<compile_context>
chip_gen: v6e
topology: v6e:2x2x1
jax: 0.10.0
libtpu: 0.0.40
codegen_flags: <defaults>
</compile_context>

<pallas_src>
import functools

import jax
import jax.numpy as jnp
from jax.experimental import pallas as pl
from jax.experimental.pallas import tpu as pltpu

IMG_SIZE = 64


# ----------------------------------------------------------------------------
# Conv2d(Cin, Cout, kernel=3, stride=2, padding=1)  -- NHWC
#
# Wrapper prep (pure data movement, done once per conv in XLA):
#   pad -> gather the three stride-2 width taps as channel blocks (3*Cin)
#   -> split padded rows into even/odd.  After that, output row `ho`, tap dy
#   needs:  dy=0 -> x_even[ho],  dy=1 -> x_odd[ho],  dy=2 -> x_even[ho+1],
#   i.e. only aligned leading-dim slices inside the kernel.
# ----------------------------------------------------------------------------
def _prep_conv_input(x):
    """x: (B, H, W, Cin) NHWC, H and W even.
    Returns (x_even, x_odd), each (B, H//2 + 1, W//2, 3*Cin) bf16 where the
    channel axis is [dx=0 | dx=1 | dx=2] tap blocks of the zero-padded input."""
    B, H, W, Cin = x.shape
    xp = jnp.pad(x.astype(jnp.bfloat16), ((0, 0), (1, 1), (1, 1), (0, 0)))
    t0 = xp[:, :, 0:W:2, :]          # padded cols 0,2,...,W-2
    t1 = xp[:, :, 1:W + 1:2, :]      # padded cols 1,3,...,W-1
    t2 = xp[:, :, 2:W + 2:2, :]      # padded cols 2,4,...,W
    xc = jnp.concatenate([t0, t1, t2], axis=-1)   # (B, H+2, W//2, 3*Cin)
    return xc[:, 0::2, :, :], xc[:, 1::2, :, :]   # even / odd padded rows


def _conv3x3_s2_kernel(xe_ref, xo_ref, w_ref, b_ref, y_ref, st_ref,
                       *, hoc, wout, cout):
    r0 = pl.multiple_of(pl.program_id(1) * hoc, hoc)
    c3 = xe_ref.shape[-1]            # 3 * Cin
    m = hoc * wout

    p0 = xe_ref[0, pl.ds(r0, hoc), :, :].reshape(m, c3)       # dy = 0
    p1 = xo_ref[0, pl.ds(r0, hoc), :, :].reshape(m, c3)       # dy = 1
    p2 = xe_ref[0, pl.ds(r0 + 1, hoc), :, :].reshape(m, c3)   # dy = 2

    acc = jnp.dot(p0, w_ref[0], preferred_element_type=jnp.float32)
    acc += jnp.dot(p1, w_ref[1], preferred_element_type=jnp.float32)
    acc += jnp.dot(p2, w_ref[2], preferred_element_type=jnp.float32)
    y = acc + b_ref[...]                                       # (m, Cout) f32

    y_ref[...] = y.reshape(1, hoc, wout, cout)
    # per-grid-step partial BatchNorm statistics (reduced in the wrapper)
    st_ref[0, 0, 0:1, :] = jnp.sum(y, axis=0, keepdims=True)
    st_ref[0, 0, 1:2, :] = jnp.sum(y * y, axis=0, keepdims=True)


def conv3x3_s2(x, w_torch, b, hoc=8):
    """x: (B, H, W, Cin) NHWC.  w_torch: (Cout, Cin, 3, 3) (PyTorch layout).
    Returns (y, stats): y (B, H/2, W/2, Cout) f32 and per-step channel
    sum/sumsq stats (B, n_chunks, 2, Cout) for downstream BatchNorm."""
    B, H, W, Cin = x.shape
    Cout = w_torch.shape[0]
    Ho, Wo = H // 2, W // 2
    hoc = min(hoc, Ho)
    assert Ho % hoc == 0
    nchunks = Ho // hoc

    xe, xo = _prep_conv_input(x)
    # (Cout,Cin,dy,dx) -> (dy, dx*Cin+ci, Cout), matching the tap channel order
    wk = w_torch.transpose(2, 3, 1, 0).reshape(3, 3 * Cin, Cout)
    wk = wk.astype(jnp.bfloat16)

    kern = functools.partial(_conv3x3_s2_kernel, hoc=hoc, wout=Wo, cout=Cout)
    y, stats = pl.pallas_call(
        kern,
        out_shape=(jax.ShapeDtypeStruct((B, Ho, Wo, Cout), jnp.float32),
                   jax.ShapeDtypeStruct((B, nchunks, 2, Cout), jnp.float32)),
        grid_spec=pltpu.PrefetchScalarGridSpec(
            num_scalar_prefetch=0,
            grid=(B, nchunks),
            in_specs=[
                pl.BlockSpec((1, Ho + 1, Wo, 3 * Cin), lambda n, r: (n, 0, 0, 0)),
                pl.BlockSpec((1, Ho + 1, Wo, 3 * Cin), lambda n, r: (n, 0, 0, 0)),
                pl.BlockSpec((3, 3 * Cin, Cout), lambda n, r: (0, 0, 0)),
                pl.BlockSpec((1, Cout), lambda n, r: (0, 0)),
            ],
            out_specs=(pl.BlockSpec((1, hoc, Wo, Cout), lambda n, r: (n, r, 0, 0)),
                       pl.BlockSpec((1, 1, 2, Cout), lambda n, r: (n, r, 0, 0))),
        ),
        compiler_params=pltpu.CompilerParams(
            dimension_semantics=("parallel", "parallel")),
    )(xe, xo, wk, b.reshape(1, Cout).astype(jnp.float32))
    return y, stats


# ----------------------------------------------------------------------------
# BatchNorm (training-mode batch stats) + LeakyReLU(0.2), tiled pointwise pass.
# scale/shift are tiny (C,) vectors computed from the conv-emitted sums.
# ----------------------------------------------------------------------------
def _bn_leaky_kernel(x_ref, sc_ref, sh_ref, o_ref):
    y = x_ref[...] * sc_ref[...] + sh_ref[...]
    o_ref[...] = jnp.where(y > 0, y, 0.2 * y).astype(o_ref.dtype)


def bn_leaky(y, stats, gamma, beta, *, eps):
    B, H, W, C = y.shape
    n = B * H * W
    tot = stats.reshape(-1, 2, C).sum(axis=0)               # (2, C), tiny
    mean = tot[0] / n
    var = jnp.maximum(tot[1] / n - mean * mean, 0.0)        # biased variance
    scale = gamma * jax.lax.rsqrt(var + eps)
    shift = beta - mean * scale

    tr = min(n, 512)
    assert n % tr == 0
    out = pl.pallas_call(
        _bn_leaky_kernel,
        out_shape=jax.ShapeDtypeStruct((n, C), jnp.bfloat16),
        grid=(n // tr,),
        in_specs=[pl.BlockSpec((tr, C), lambda i: (i, 0)),
                  pl.BlockSpec((1, C), lambda i: (0, 0)),
                  pl.BlockSpec((1, C), lambda i: (0, 0))],
        out_specs=pl.BlockSpec((tr, C), lambda i: (i, 0)),
        compiler_params=pltpu.CompilerParams(
            dimension_semantics=("parallel",)),
    )(y.reshape(n, C), scale.reshape(1, C), shift.reshape(1, C))
    return out.reshape(B, H, W, C)
    # TODO(synk): running_mean/running_var (momentum) buffer updates are not
    # modelled; only the forward normalization math is implemented.


# ----------------------------------------------------------------------------
# Linear(K -> 1) + Sigmoid.  Output lane-padded to 128 for dense stores,
# sliced back to 1 column in the wrapper.
# ----------------------------------------------------------------------------
def _linear_sigmoid_kernel(x_ref, w_ref, b_ref, o_ref):
    z = jnp.dot(x_ref[...], w_ref[...], preferred_element_type=jnp.float32)
    z = z + b_ref[...]
    o_ref[...] = 1.0 / (1.0 + jnp.exp(-z))


def linear_sigmoid(x, w, b):
    """x: (B, K).  w: (K, 1).  b: (1,).  Returns sigmoid(x @ w + b): (B, 1)."""
    B, K = x.shape
    NP = 128
    wp = jnp.pad(w.astype(jnp.bfloat16), ((0, 0), (0, NP - 1)))
    bp = jnp.pad(b.reshape(1, 1).astype(jnp.float32), ((0, 0), (0, NP - 1)))
    out = pl.pallas_call(
        _linear_sigmoid_kernel,
        out_shape=jax.ShapeDtypeStruct((B, NP), jnp.float32),
        grid=(1,),
        in_specs=[pl.BlockSpec((B, K), lambda i: (0, 0)),
                  pl.BlockSpec((K, NP), lambda i: (0, 0)),
                  pl.BlockSpec((1, NP), lambda i: (0, 0))],
        out_specs=pl.BlockSpec((B, NP), lambda i: (0, 0)),
    )(x.astype(jnp.bfloat16), wp, bp)
    return out[:, :1]


# ----------------------------------------------------------------------------
# Discriminator forward (matches the PyTorch module order)
# ----------------------------------------------------------------------------
def discriminator_forward(img, c, params):
    B = img.shape[0]
    img_n = img.transpose(0, 2, 3, 1)          # NCHW -> NHWC
    c_n = c.transpose(0, 2, 3, 1)

    # conv_img / conv_c (no BN), then channel concat (== torch.cat dim=1)
    y_img, _ = conv3x3_s2(img_n, params["w_img"], params["b_img"])  # (B,32,32,32)
    y_c, _ = conv3x3_s2(c_n, params["w_c"], params["b_c"])          # (B,32,32,32)
    x = jnp.concatenate([y_img, y_c], axis=-1)                      # (B,32,32,64)

    # conv_block(64, 128): Conv s2 + BN(eps=0.8) + LeakyReLU(0.2) + Dropout
    y1, st1 = conv3x3_s2(x, params["w1"], params["b1"])             # (B,16,16,128)
    x = bn_leaky(y1, st1, params["bn1_g"], params["bn1_b"], eps=0.8)
    # TODO(synk): Dropout(0.25) applied as identity (eval semantics); a
    # train-mode stochastic mask would need pltpu.prng_random_bits.

    # conv_block(128, 256)
    y2, st2 = conv3x3_s2(x, params["w2"], params["b2"])             # (B,8,8,256)
    x = bn_leaky(y2, st2, params["bn2_g"], params["bn2_b"], eps=0.8)

    # conv_block(256, 512)
    y3, st3 = conv3x3_s2(x, params["w3"], params["b3"])             # (B,4,4,512)
    x = bn_leaky(y3, st3, params["bn3_g"], params["bn3_b"], eps=0.8)

    # Flatten (PyTorch NCHW order) -> Linear -> Sigmoid
    feat = x.transpose(0, 3, 1, 2).reshape(B, -1)                   # (B, 8192)
    return linear_sigmoid(feat, params["wl"].T, params["bl"])       # (B, 1)


# ----------------------------------------------------------------------------
# Deterministic synthetic parameters (shapes from __init__, PyTorch-style init)
# ----------------------------------------------------------------------------
def init_params(key):
    ks = jax.random.split(key, 12)

    def u(k, shape, fan_in):
        bound = 1.0 / jnp.sqrt(jnp.float32(fan_in))
        return jax.random.uniform(k, shape, jnp.float32, -bound, bound)

    feat = 512 * (IMG_SIZE // 16) ** 2   # 8192: actual flatten width at 64x64
    # TODO(synk): the spec declares nn.Linear(512*IMG_SIZE**2, 1), which is
    # shape-inconsistent with the conv stack for 64x64 inputs (flatten gives
    # 512*(IMG_SIZE//16)**2 = 8192); the Linear is sized to the real data flow.
    return {
        "w_img": u(ks[0], (32, 3, 3, 3), 3 * 9),
        "b_img": u(ks[1], (32,), 3 * 9),
        "w_c": u(ks[2], (32, 24, 3, 3), 24 * 9),
        "b_c": u(ks[3], (32,), 24 * 9),
        "w1": u(ks[4], (128, 64, 3, 3), 64 * 9),
        "b1": u(ks[5], (128,), 64 * 9),
        "w2": u(ks[6], (256, 128, 3, 3), 128 * 9),
        "b2": u(ks[7], (256,), 128 * 9),
        "w3": u(ks[8], (512, 256, 3, 3), 256 * 9),
        "b3": u(ks[9], (512,), 256 * 9),
        "wl": u(ks[10], (1, feat), feat),
        "bl": u(ks[11], (1,), feat),
        "bn1_g": jnp.ones((128,), jnp.float32),
        "bn1_b": jnp.zeros((128,), jnp.float32),
        "bn2_g": jnp.ones((256,), jnp.float32),
        "bn2_b": jnp.zeros((256,), jnp.float32),
        "bn3_g": jnp.ones((512,), jnp.float32),
        "bn3_b": jnp.zeros((512,), jnp.float32),
    }


if __name__ == "__main__":
    key = jax.random.PRNGKey(0)
    k_img, k_c, k_p = jax.random.split(key, 3)
    B = 2
    img = jax.random.normal(k_img, (B, 3, IMG_SIZE, IMG_SIZE), jnp.float32)
    c = jax.random.normal(k_c, (B, 24, IMG_SIZE, IMG_SIZE), jnp.float32)
    params = init_params(k_p)

    out = jax.jit(discriminator_forward)(img, c, params)
    out = jax.block_until_ready(out)

    assert out.shape == (B, 1), out.shape
    assert bool(jnp.all(jnp.isfinite(out)))
    assert bool(jnp.all((out >= 0.0) & (out <= 1.0)))   # sigmoid range
    print("KERNEL_OK")
</pallas_src>

<mosaic_0001>
module attributes {stable_mosaic.version = 11 : i64} {
  func.func @_conv3x3_s2_kernel(%arg0: i32, %arg1: i32, %arg2: memref<1x33x32x72xbf16, #tpu.memory_space<vmem>>, %arg3: memref<1x33x32x72xbf16, #tpu.memory_space<vmem>>, %arg4: memref<3x72x32xbf16, #tpu.memory_space<vmem>>, %arg5: memref<1x32xf32, #tpu.memory_space<vmem>>, %arg6: memref<1x8x32x32xf32, #tpu.memory_space<vmem>>, %arg7: memref<1x1x2x32xf32, #tpu.memory_space<vmem>>) attributes {dimension_semantics = [#tpu.dimension_semantics<parallel>, #tpu.dimension_semantics<parallel>], iteration_bounds = array<i64: 2, 4>, scalar_prefetch = 0 : i64, scratch_operands = 0 : i64, tpu.core_type = #tpu.core_type<tc>, window_params = [{transform_indices = @transform_0, window_bounds = array<i64: 1, 33, 32, 72>}, {transform_indices = @transform_1, window_bounds = array<i64: 1, 33, 32, 72>}, {pipeline_mode = #tpu.pipeline_mode<synchronous>, transform_indices = @transform_2, window_bounds = array<i64: 3, 72, 32>}, {pipeline_mode = #tpu.pipeline_mode<synchronous>, transform_indices = @transform_3, window_bounds = array<i64: 1, 32>}, {transform_indices = @transform_4, window_bounds = array<i64: 1, 8, 32, 32>}, {transform_indices = @transform_5, window_bounds = array<i64: 1, 1, 2, 32>}]} {
    %c8_i32 = arith.constant 8 : i32
    %0 = arith.muli %arg1, %c8_i32 : i32
    %1 = tpu.assume_multiple %0, 8 : i32
    %c0 = arith.constant 0 : index
    %2 = arith.index_cast %1 : i32 to index
    %c0_0 = arith.constant 0 : index
    %c0_1 = arith.constant 0 : index
    %3 = vector.load %arg2[%c0, %2, %c0_0, %c0_1] : memref<1x33x32x72xbf16, #tpu.memory_space<vmem>>, vector<1x8x32x72xbf16>
    %4 = vector.shape_cast %3 : vector<1x8x32x72xbf16> to vector<8x32x72xbf16>
    %5 = vector.shape_cast %4 : vector<8x32x72xbf16> to vector<256x72xbf16>
    %c0_2 = arith.constant 0 : index
    %6 = arith.index_cast %1 : i32 to index
    %c0_3 = arith.constant 0 : index
    %c0_4 = arith.constant 0 : index
    %7 = vector.load %arg3[%c0_2, %6, %c0_3, %c0_4] : memref<1x33x32x72xbf16, #tpu.memory_space<vmem>>, vector<1x8x32x72xbf16>
    %8 = vector.shape_cast %7 : vector<1x8x32x72xbf16> to vector<8x32x72xbf16>
    %9 = vector.shape_cast %8 : vector<8x32x72xbf16> to vector<256x72xbf16>
    %c1_i32 = arith.constant 1 : i32
    %10 = arith.addi %1, %c1_i32 : i32
    %c0_5 = arith.constant 0 : index
    %11 = arith.index_cast %10 : i32 to index
    %c0_6 = arith.constant 0 : index
    %c0_7 = arith.constant 0 : index
    %12 = vector.load %arg2[%c0_5, %11, %c0_6, %c0_7] : memref<1x33x32x72xbf16, #tpu.memory_space<vmem>>, vector<1x8x32x72xbf16>
    %13 = vector.shape_cast %12 : vector<1x8x32x72xbf16> to vector<8x32x72xbf16>
    %14 = vector.shape_cast %13 : vector<8x32x72xbf16> to vector<256x72xbf16>
    %c0_8 = arith.constant 0 : index
    %c0_9 = arith.constant 0 : index
    %c0_10 = arith.constant 0 : index
    %15 = vector.load %arg4[%c0_8, %c0_9, %c0_10] : memref<3x72x32xbf16, #tpu.memory_space<vmem>>, vector<1x72x32xbf16>
    %16 = vector.shape_cast %15 : vector<1x72x32xbf16> to vector<72x32xbf16>
    %cst = arith.constant dense<0.000000e+00> : vector<256x32xf32>
    %17 = tpu.matmul %5, %16, %cst {dimension_numbers = #tpu.dot_dimension_numbers<[1], [0], [0], [1], [0, 0, 1, 1], [], []>} : vector<256x72xbf16>, vector<72x32xbf16>, vector<256x32xf32> -> vector<256x32xf32>
    %c1 = arith.constant 1 : index
    %c0_11 = arith.constant 0 : index
    %c0_12 = arith.constant 0 : index
    %18 = vector.load %arg4[%c1, %c0_11, %c0_12] : memref<3x72x32xbf16, #tpu.memory_space<vmem>>, vector<1x72x32xbf16>
    %19 = vector.shape_cast %18 : vector<1x72x32xbf16> to vector<72x32xbf16>
    %cst_13 = arith.constant dense<0.000000e+00> : vector<256x32xf32>
    %20 = tpu.matmul %9, %19, %cst_13 {dimension_numbers = #tpu.dot_dimension_numbers<[1], [0], [0], [1], [0, 0, 1, 1], [], []>} : vector<256x72xbf16>, vector<72x32xbf16>, vector<256x32xf32> -> vector<256x32xf32>
    %21 = arith.addf %17, %20 : vector<256x32xf32>
    %c2 = arith.constant 2 : index
    %c0_14 = arith.constant 0 : index
    %c0_15 = arith.constant 0 : index
    %22 = vector.load %arg4[%c2, %c0_14, %c0_15] : memref<3x72x32xbf16, #tpu.memory_space<vmem>>, vector<1x72x32xbf16>
    %23 = vector.shape_cast %22 : vector<1x72x32xbf16> to vector<72x32xbf16>
    %cst_16 = arith.constant dense<0.000000e+00> : vector<256x32xf32>
    %24 = tpu.matmul %14, %23, %cst_16 {dimension_numbers = #tpu.dot_dimension_numbers<[1], [0], [0], [1], [0, 0, 1, 1], [], []>} : vector<256x72xbf16>, vector<72x32xbf16>, vector<256x32xf32> -> vector<256x32xf32>
    %25 = arith.addf %21, %24 : vector<256x32xf32>
    %c0_17 = arith.constant 0 : index
    %c0_18 = arith.constant 0 : index
    %26 = vector.load %arg5[%c0_17, %c0_18] : memref<1x32xf32, #tpu.memory_space<vmem>>, vector<1x32xf32>
    %27 = vector.broadcast %26 : vector<1x32xf32> to vector<256x32xf32>
    %28 = arith.addf %25, %27 : vector<256x32xf32>
    %29 = vector.shape_cast %28 : vector<256x32xf32> to vector<1x8x32x32xf32>
    %c0_19 = arith.constant 0 : index
    %c0_20 = arith.constant 0 : index
    %c0_21 = arith.constant 0 : index
    %c0_22 = arith.constant 0 : index
    %30 = vector.load %arg6[%c0_19, %c0_20, %c0_21, %c0_22] : memref<1x8x32x32xf32, #tpu.memory_space<vmem>>, vector<1x8x32x32xf32>
    tpu.vector_store %arg6[%c0_19, %c0_20, %c0_21, %c0_22], %29 {strides = array<i32>} : memref<1x8x32x32xf32, #tpu.memory_space<vmem>>, vector<1x8x32x32xf32>,
    %cst_23 = arith.constant dense<0.000000e+00> : vector<32xf32>
    %31 = vector.multi_reduction <add>, %28, %cst_23 [0] : vector<256x32xf32> to vector<32xf32>
    %32 = vector.shape_cast %31 : vector<32xf32> to vector<1x32xf32>
    %c0_24 = arith.constant 0 : index
    %c0_25 = arith.constant 0 : index
    %c0_26 = arith.constant 0 : index
    %c0_27 = arith.constant 0 : index
    %33 = vector.load %arg7[%c0_24, %c0_25, %c0_26, %c0_27] : memref<1x1x2x32xf32, #tpu.memory_space<vmem>>, vector<1x1x1x32xf32>
    %34 = vector.shape_cast %33 : vector<1x1x1x32xf32> to vector<1x32xf32>
    %35 = vector.shape_cast %32 : vector<1x32xf32> to vector<1x1x1x32xf32>
    tpu.vector_store %arg7[%c0_24, %c0_25, %c0_26, %c0_27], %35 {strides = array<i32>} : memref<1x1x2x32xf32, #tpu.memory_space<vmem>>, vector<1x1x1x32xf32>,
    %36 = arith.mulf %28, %28 : vector<256x32xf32>
    %cst_28 = arith.constant dense<0.000000e+00> : vector<32xf32>
    %37 = vector.multi_reduction <add>, %36, %cst_28 [0] : vector<256x32xf32> to vector<32xf32>
    %38 = vector.shape_cast %37 : vector<32xf32> to vector<1x32xf32>
    %c0_29 = arith.constant 0 : index
    %c0_30 = arith.constant 0 : index
    %c1_31 = arith.constant 1 : index
    %c0_32 = arith.constant 0 : index
    %39 = vector.load %arg7[%c0_29, %c0_30, %c1_31, %c0_32] : memref<1x1x2x32xf32, #tpu.memory_space<vmem>>, vector<1x1x1x32xf32>
    %40 = vector.shape_cast %39 : vector<1x1x1x32xf32> to vector<1x32xf32>
    %41 = vector.shape_cast %38 : vector<1x32xf32> to vector<1x1x1x32xf32>
    tpu.vector_store %arg7[%c0_29, %c0_30, %c1_31, %c0_32], %41 {strides = array<i32>} : memref<1x1x2x32xf32, #tpu.memory_space<vmem>>, vector<1x1x1x32xf32>,
    return
  }
  func.func @transform_0(%arg0: i32, %arg1: i32) -> (i32, i32, i32, i32) {
    %c0_i32 = arith.constant 0 : i32
    %c0_i32_0 = arith.constant 0 : i32
    %c0_i32_1 = arith.constant 0 : i32
    %c0_i32_2 = arith.constant 0 : i32
    return %arg0, %c0_i32, %c0_i32_0, %c0_i32_1 : i32, i32, i32, i32
  }
  func.func @transform_1(%arg0: i32, %arg1: i32) -> (i32, i32, i32, i32) {
    %c0_i32 = arith.constant 0 : i32
    %c0_i32_0 = arith.constant 0 : i32
    %c0_i32_1 = arith.constant 0 : i32
    %c0_i32_2 = arith.constant 0 : i32
    return %arg0, %c0_i32, %c0_i32_0, %c0_i32_1 : i32, i32, i32, i32
  }
  func.func @transform_2(%arg0: i32, %arg1: i32) -> (i32, i32, i32) {
    %c0_i32 = arith.constant 0 : i32
    %c0_i32_0 = arith.constant 0 : i32
    %c0_i32_1 = arith.constant 0 : i32
    %c0_i32_2 = arith.constant 0 : i32
    return %c0_i32, %c0_i32_0, %c0_i32_1 : i32, i32, i32
  }
  func.func @transform_3(%arg0: i32, %arg1: i32) -> (i32, i32) {
    %c0_i32 = arith.constant 0 : i32
    %c0_i32_0 = arith.constant 0 : i32
    %c0_i32_1 = arith.constant 0 : i32
    return %c0_i32, %c0_i32_0 : i32, i32
  }
  func.func @transform_4(%arg0: i32, %arg1: i32) -> (i32, i32, i32, i32) {
    %c0_i32 = arith.constant 0 : i32
    %c0_i32_0 = arith.constant 0 : i32
    %c0_i32_1 = arith.constant 0 : i32
    return %arg0, %arg1, %c0_i32, %c0_i32_0 : i32, i32, i32, i32
  }
  func.func @transform_5(%arg0: i32, %arg1: i32) -> (i32, i32, i32, i32) {
    %c0_i32 = arith.constant 0 : i32
    %c0_i32_0 = arith.constant 0 : i32
    %c0_i32_1 = arith.constant 0 : i32
    return %arg0, %arg1, %c0_i32, %c0_i32_0 : i32, i32, i32, i32
  }
}

module attributes {stable_mosaic.version = 11 : i64} {
  func.func @_conv3x3_s2_kernel(%arg0: i32, %arg1: i32, %arg2: memref<1x33x32x9xbf16, #tpu.memory_space<vmem>>, %arg3: memref<1x33x32x9xbf16, #tpu.memory_space<vmem>>, %arg4: memref<3x9x32xbf16, #tpu.memory_space<vmem>>, %arg5: memref<1x32xf32, #tpu.memory_space<vmem>>, %arg6: memref<1x8x32x32xf32, #tpu.memory_space<vmem>>, %arg7: memref<1x1x2x32xf32, #tpu.memory_space<vmem>>) attributes {dimension_semantics = [#tpu.dimension_semantics<parallel>, #tpu.dimension_semantics<parallel>], iteration_bounds = array<i64: 2, 4>, scalar_prefetch = 0 : i64, scratch_operands = 0 : i64, tpu.core_type = #tpu.core_type<tc>, window_params = [{transform_indices = @transform_0, window_bounds = array<i64: 1, 33, 32, 9>}, {transform_indices = @transform_1, window_bounds = array<i64: 1, 33, 32, 9>}, {pipeline_mode = #tpu.pipeline_mode<synchronous>, transform_indices = @transform_2, window_bounds = array<i64: 3, 9, 32>}, {pipeline_mode = #tpu.pipeline_mode<synchronous>, transform_indices = @transform_3, window_bounds = array<i64: 1, 32>}, {transform_indices = @transform_4, window_bounds = array<i64: 1, 8, 32, 32>}, {transform_indices = @transform_5, window_bounds = array<i64: 1, 1, 2, 32>}]} {
    %c8_i32 = arith.constant 8 : i32
    %0 = arith.muli %arg1, %c8_i32 : i32
    %1 = tpu.assume_multiple %0, 8 : i32
    %c0 = arith.constant 0 : index
    %2 = arith.index_cast %1 : i32 to index
    %c0_0 = arith.constant 0 : index
    %c0_1 = arith.constant 0 : index
    %3 = vector.load %arg2[%c0, %2, %c0_0, %c0_1] : memref<1x33x32x9xbf16, #tpu.memory_space<vmem>>, vector<1x8x32x9xbf16>
    %4 = vector.shape_cast %3 : vector<1x8x32x9xbf16> to vector<8x32x9xbf16>
    %5 = vector.shape_cast %4 : vector<8x32x9xbf16> to vector<256x9xbf16>
    %c0_2 = arith.constant 0 : index
    %6 = arith.index_cast %1 : i32 to index
    %c0_3 = arith.constant 0 : index
    %c0_4 = arith.constant 0 : index
    %7 = vector.load %arg3[%c0_2, %6, %c0_3, %c0_4] : memref<1x33x32x9xbf16, #tpu.memory_space<vmem>>, vector<1x8x32x9xbf16>
    %8 = vector.shape_cast %7 : vector<1x8x32x9xbf16> to vector<8x32x9xbf16>
    %9 = vector.shape_cast %8 : vector<8x32x9xbf16> to vector<256x9xbf16>
    %c1_i32 = arith.constant 1 : i32
    %10 = arith.addi %1, %c1_i32 : i32
    %c0_5 = arith.constant 0 : index
    %11 = arith.index_cast %10 : i32 to index
    %c0_6 = arith.constant 0 : index
    %c0_7 = arith.constant 0 : index
    %12 = vector.load %arg2[%c0_5, %11, %c0_6, %c0_7] : memref<1x33x32x9xbf16, #tpu.memory_space<vmem>>, vector<1x8x32x9xbf16>
    %13 = vector.shape_cast %12 : vector<1x8x32x9xbf16> to vector<8x32x9xbf16>
    %14 = vector.shape_cast %13 : vector<8x32x9xbf16> to vector<256x9xbf16>
    %c0_8 = arith.constant 0 : index
    %c0_9 = arith.constant 0 : index
    %c0_10 = arith.constant 0 : index
    %15 = vector.load %arg4[%c0_8, %c0_9, %c0_10] : memref<3x9x32xbf16, #tpu.memory_space<vmem>>, vector<1x9x32xbf16>
    %16 = vector.shape_cast %15 : vector<1x9x32xbf16> to vector<9x32xbf16>
    %cst = arith.constant dense<0.000000e+00> : vector<256x32xf32>
    %17 = tpu.matmul %5, %16, %cst {dimension_numbers = #tpu.dot_dimension_numbers<[1], [0], [0], [1], [0, 0, 1, 1], [], []>} : vector<256x9xbf16>, vector<9x32xbf16>, vector<256x32xf32> -> vector<256x32xf32>
    %c1 = arith.constant 1 : index
    %c0_11 = arith.constant 0 : index
    %c0_12 = arith.constant 0 : index
    %18 = vector.load %arg4[%c1, %c0_11, %c0_12] : memref<3x9x32xbf16, #tpu.memory_space<vmem>>, vector<1x9x32xbf16>
    %19 = vector.shape_cast %18 : vector<1x9x32xbf16> to vector<9x32xbf16>
    %cst_13 = arith.constant dense<0.000000e+00> : vector<256x32xf32>
    %20 = tpu.matmul %9, %19, %cst_13 {dimension_numbers = #tpu.dot_dimension_numbers<[1], [0], [0], [1], [0, 0, 1, 1], [], []>} : vector<256x9xbf16>, vector<9x32xbf16>, vector<256x32xf32> -> vector<256x32xf32>
    %21 = arith.addf %17, %20 : vector<256x32xf32>
    %c2 = arith.constant 2 : index
    %c0_14 = arith.constant 0 : index
    %c0_15 = arith.constant 0 : index
    %22 = vector.load %arg4[%c2, %c0_14, %c0_15] : memref<3x9x32xbf16, #tpu.memory_space<vmem>>, vector<1x9x32xbf16>
    %23 = vector.shape_cast %22 : vector<1x9x32xbf16> to vector<9x32xbf16>
    %cst_16 = arith.constant dense<0.000000e+00> : vector<256x32xf32>
    %24 = tpu.matmul %14, %23, %cst_16 {dimension_numbers = #tpu.dot_dimension_numbers<[1], [0], [0], [1], [0, 0, 1, 1], [], []>} : vector<256x9xbf16>, vector<9x32xbf16>, vector<256x32xf32> -> vector<256x32xf32>
    %25 = arith.addf %21, %24 : vector<256x32xf32>
    %c0_17 = arith.constant 0 : index
    %c0_18 = arith.constant 0 : index
    %26 = vector.load %arg5[%c0_17, %c0_18] : memref<1x32xf32, #tpu.memory_space<vmem>>, vector<1x32xf32>
    %27 = vector.broadcast %26 : vector<1x32xf32> to vector<256x32xf32>
    %28 = arith.addf %25, %27 : vector<256x32xf32>
    %29 = vector.shape_cast %28 : vector<256x32xf32> to vector<1x8x32x32xf32>
    %c0_19 = arith.constant 0 : index
    %c0_20 = arith.constant 0 : index
    %c0_21 = arith.constant 0 : index
    %c0_22 = arith.constant 0 : index
    %30 = vector.load %arg6[%c0_19, %c0_20, %c0_21, %c0_22] : memref<1x8x32x32xf32, #tpu.memory_space<vmem>>, vector<1x8x32x32xf32>
    tpu.vector_store %arg6[%c0_19, %c0_20, %c0_21, %c0_22], %29 {strides = array<i32>} : memref<1x8x32x32xf32, #tpu.memory_space<vmem>>, vector<1x8x32x32xf32>,
    %cst_23 = arith.constant dense<0.000000e+00> : vector<32xf32>
    %31 = vector.multi_reduction <add>, %28, %cst_23 [0] : vector<256x32xf32> to vector<32xf32>
    %32 = vector.shape_cast %31 : vector<32xf32> to vector<1x32xf32>
    %c0_24 = arith.constant 0 : index
    %c0_25 = arith.constant 0 : index
    %c0_26 = arith.constant 0 : index
    %c0_27 = arith.constant 0 : index
    %33 = vector.load %arg7[%c0_24, %c0_25, %c0_26, %c0_27] : memref<1x1x2x32xf32, #tpu.memory_space<vmem>>, vector<1x1x1x32xf32>
    %34 = vector.shape_cast %33 : vector<1x1x1x32xf32> to vector<1x32xf32>
    %35 = vector.shape_cast %32 : vector<1x32xf32> to vector<1x1x1x32xf32>
    tpu.vector_store %arg7[%c0_24, %c0_25, %c0_26, %c0_27], %35 {strides = array<i32>} : memref<1x1x2x32xf32, #tpu.memory_space<vmem>>, vector<1x1x1x32xf32>,
    %36 = arith.mulf %28, %28 : vector<256x32xf32>
    %cst_28 = arith.constant dense<0.000000e+00> : vector<32xf32>
    %37 = vector.multi_reduction <add>, %36, %cst_28 [0] : vector<256x32xf32> to vector<32xf32>
    %38 = vector.shape_cast %37 : vector<32xf32> to vector<1x32xf32>
    %c0_29 = arith.constant 0 : index
    %c0_30 = arith.constant 0 : index
    %c1_31 = arith.constant 1 : index
    %c0_32 = arith.constant 0 : index
    %39 = vector.load %arg7[%c0_29, %c0_30, %c1_31, %c0_32] : memref<1x1x2x32xf32, #tpu.memory_space<vmem>>, vector<1x1x1x32xf32>
    %40 = vector.shape_cast %39 : vector<1x1x1x32xf32> to vector<1x32xf32>
    %41 = vector.shape_cast %38 : vector<1x32xf32> to vector<1x1x1x32xf32>
    tpu.vector_store %arg7[%c0_29, %c0_30, %c1_31, %c0_32], %41 {strides = array<i32>} : memref<1x1x2x32xf32, #tpu.memory_space<vmem>>, vector<1x1x1x32xf32>,
    return
  }
  func.func @transform_0(%arg0: i32, %arg1: i32) -> (i32, i32, i32, i32) {
    %c0_i32 = arith.constant 0 : i32
    %c0_i32_0 = arith.constant 0 : i32
    %c0_i32_1 = arith.constant 0 : i32
    %c0_i32_2 = arith.constant 0 : i32
    return %arg0, %c0_i32, %c0_i32_0, %c0_i32_1 : i32, i32, i32, i32
  }
  func.func @transform_1(%arg0: i32, %arg1: i32) -> (i32, i32, i32, i32) {
    %c0_i32 = arith.constant 0 : i32
    %c0_i32_0 = arith.constant 0 : i32
    %c0_i32_1 = arith.constant 0 : i32
    %c0_i32_2 = arith.constant 0 : i32
    return %arg0, %c0_i32, %c0_i32_0, %c0_i32_1 : i32, i32, i32, i32
  }
  func.func @transform_2(%arg0: i32, %arg1: i32) -> (i32, i32, i32) {
    %c0_i32 = arith.constant 0 : i32
    %c0_i32_0 = arith.constant 0 : i32
    %c0_i32_1 = arith.constant 0 : i32
    %c0_i32_2 = arith.constant 0 : i32
    return %c0_i32, %c0_i32_0, %c0_i32_1 : i32, i32, i32
  }
  func.func @transform_3(%arg0: i32, %arg1: i32) -> (i32, i32) {
    %c0_i32 = arith.constant 0 : i32
    %c0_i32_0 = arith.constant 0 : i32
    %c0_i32_1 = arith.constant 0 : i32
    return %c0_i32, %c0_i32_0 : i32, i32
  }
  func.func @transform_4(%arg0: i32, %arg1: i32) -> (i32, i32, i32, i32) {
    %c0_i32 = arith.constant 0 : i32
    %c0_i32_0 = arith.constant 0 : i32
    %c0_i32_1 = arith.constant 0 : i32
    return %arg0, %arg1, %c0_i32, %c0_i32_0 : i32, i32, i32, i32
  }
  func.func @transform_5(%arg0: i32, %arg1: i32) -> (i32, i32, i32, i32) {
    %c0_i32 = arith.constant 0 : i32
    %c0_i32_0 = arith.constant 0 : i32
    %c0_i32_1 = arith.constant 0 : i32
    return %arg0, %arg1, %c0_i32, %c0_i32_0 : i32, i32, i32, i32
  }
}

module attributes {stable_mosaic.version = 11 : i64} {
  func.func @_conv3x3_s2_kernel(%arg0: i32, %arg1: i32, %arg2: memref<1x17x16x192xbf16, #tpu.memory_space<vmem>>, %arg3: memref<1x17x16x192xbf16, #tpu.memory_space<vmem>>, %arg4: memref<3x192x128xbf16, #tpu.memory_space<vmem>>, %arg5: memref<1x128xf32, #tpu.memory_space<vmem>>, %arg6: memref<1x8x16x128xf32, #tpu.memory_space<vmem>>, %arg7: memref<1x1x2x128xf32, #tpu.memory_space<vmem>>) attributes {dimension_semantics = [#tpu.dimension_semantics<parallel>, #tpu.dimension_semantics<parallel>], iteration_bounds = array<i64: 2, 2>, scalar_prefetch = 0 : i64, scratch_operands = 0 : i64, tpu.core_type = #tpu.core_type<tc>, window_params = [{transform_indices = @transform_0, window_bounds = array<i64: 1, 17, 16, 192>}, {transform_indices = @transform_1, window_bounds = array<i64: 1, 17, 16, 192>}, {pipeline_mode = #tpu.pipeline_mode<synchronous>, transform_indices = @transform_2, window_bounds = array<i64: 3, 192, 128>}, {pipeline_mode = #tpu.pipeline_mode<synchronous>, transform_indices = @transform_3, window_bounds = array<i64: 1, 128>}, {transform_indices = @transform_4, window_bounds = array<i64: 1, 8, 16, 128>}, {transform_indices = @transform_5, window_bounds = array<i64: 1, 1, 2, 128>}]} {
    %c8_i32 = arith.constant 8 : i32
    %0 = arith.muli %arg1, %c8_i32 : i32
    %1 = tpu.assume_multiple %0, 8 : i32
    %c0 = arith.constant 0 : index
    %2 = arith.index_cast %1 : i32 to index
    %c0_0 = arith.constant 0 : index
    %c0_1 = arith.constant 0 : index
    %3 = vector.load %arg2[%c0, %2, %c0_0, %c0_1] : memref<1x17x16x192xbf16, #tpu.memory_space<vmem>>, vector<1x8x16x192xbf16>
    %4 = vector.shape_cast %3 : vector<1x8x16x192xbf16> to vector<8x16x192xbf16>
    %5 = vector.shape_cast %4 : vector<8x16x192xbf16> to vector<128x192xbf16>
    %c0_2 = arith.constant 0 : index
    %6 = arith.index_cast %1 : i32 to index
    %c0_3 = arith.constant 0 : index
    %c0_4 = arith.constant 0 : index
    %7 = vector.load %arg3[%c0_2, %6, %c0_3, %c0_4] : memref<1x17x16x192xbf16, #tpu.memory_space<vmem>>, vector<1x8x16x192xbf16>
    %8 = vector.shape_cast %7 : vector<1x8x16x192xbf16> to vector<8x16x192xbf16>
    %9 = vector.shape_cast %8 : vector<8x16x192xbf16> to vector<128x192xbf16>
    %c1_i32 = arith.constant 1 : i32
    %10 = arith.addi %1, %c1_i32 : i32
    %c0_5 = arith.constant 0 : index
    %11 = arith.index_cast %10 : i32 to index
    %c0_6 = arith.constant 0 : index
    %c0_7 = arith.constant 0 : index
    %12 = vector.load %arg2[%c0_5, %11, %c0_6, %c0_7] : memref<1x17x16x192xbf16, #tpu.memory_space<vmem>>, vector<1x8x16x192xbf16>
    %13 = vector.shape_cast %12 : vector<1x8x16x192xbf16> to vector<8x16x192xbf16>
    %14 = vector.shape_cast %13 : vector<8x16x192xbf16> to vector<128x192xbf16>
    %c0_8 = arith.constant 0 : index
    %c0_9 = arith.constant 0 : index
    %c0_10 = arith.constant 0 : index
    %15 = vector.load %arg4[%c0_8, %c0_9, %c0_10] : memref<3x192x128xbf16, #tpu.memory_space<vmem>>, vector<1x192x128xbf16>
    %16 = vector.shape_cast %15 : vector<1x192x128xbf16> to vector<192x128xbf16>
    %cst = arith.constant dense<0.000000e+00> : vector<128x128xf32>
    %17 = tpu.matmul %5, %16, %cst {dimension_numbers = #tpu.dot_dimension_numbers<[1], [0], [0], [1], [0, 0, 1, 1], [], []>} : vector<128x192xbf16>, vector<192x128xbf16>, vector<128x128xf32> -> vector<128x128xf32>
    %c1 = arith.constant 1 : index
    %c0_11 = arith.constant 0 : index
    %c0_12 = arith.constant 0 : index
    %18 = vector.load %arg4[%c1, %c0_11, %c0_12] : memref<3x192x128xbf16, #tpu.memory_space<vmem>>, vector<1x192x128xbf16>
    %19 = vector.shape_cast %18 : vector<1x192x128xbf16> to vector<192x128xbf16>
    %cst_13 = arith.constant dense<0.000000e+00> : vector<128x128xf32>
    %20 = tpu.matmul %9, %19, %cst_13 {dimension_numbers = #tpu.dot_dimension_numbers<[1], [0], [0], [1], [0, 0, 1, 1], [], []>} : vector<128x192xbf16>, vector<192x128xbf16>, vector<128x128xf32> -> vector<128x128xf32>
    %21 = arith.addf %17, %20 : vector<128x128xf32>
    %c2 = arith.constant 2 : index
    %c0_14 = arith.constant 0 : index
    %c0_15 = arith.constant 0 : index
    %22 = vector.load %arg4[%c2, %c0_14, %c0_15] : memref<3x192x128xbf16, #tpu.memory_space<vmem>>, vector<1x192x128xbf16>
    %23 = vector.shape_cast %22 : vector<1x192x128xbf16> to vector<192x128xbf16>
    %cst_16 = arith.constant dense<0.000000e+00> : vector<128x128xf32>
    %24 = tpu.matmul %14, %23, %cst_16 {dimension_numbers = #tpu.dot_dimension_numbers<[1], [0], [0], [1], [0, 0, 1, 1], [], []>} : vector<128x192xbf16>, vector<192x128xbf16>, vector<128x128xf32> -> vector<128x128xf32>
    %25 = arith.addf %21, %24 : vector<128x128xf32>
    %c0_17 = arith.constant 0 : index
    %c0_18 = arith.constant 0 : index
    %26 = vector.load %arg5[%c0_17, %c0_18] : memref<1x128xf32, #tpu.memory_space<vmem>>, vector<1x128xf32>
    %27 = vector.broadcast %26 : vector<1x128xf32> to vector<128x128xf32>
    %28 = arith.addf %25, %27 : vector<128x128xf32>
    %29 = vector.shape_cast %28 : vector<128x128xf32> to vector<1x8x16x128xf32>
    %c0_19 = arith.constant 0 : index
    %c0_20 = arith.constant 0 : index
    %c0_21 = arith.constant 0 : index
    %c0_22 = arith.constant 0 : index
    %30 = vector.load %arg6[%c0_19, %c0_20, %c0_21, %c0_22] : memref<1x8x16x128xf32, #tpu.memory_space<vmem>>, vector<1x8x16x128xf32>
    tpu.vector_store %arg6[%c0_19, %c0_20, %c0_21, %c0_22], %29 {strides = array<i32>} : memref<1x8x16x128xf32, #tpu.memory_space<vmem>>, vector<1x8x16x128xf32>,
    %cst_23 = arith.constant dense<0.000000e+00> : vector<128xf32>
    %31 = vector.multi_reduction <add>, %28, %cst_23 [0] : vector<128x128xf32> to vector<128xf32>
    %32 = vector.shape_cast %31 : vector<128xf32> to vector<1x128xf32>
    %c0_24 = arith.constant 0 : index
    %c0_25 = arith.constant 0 : index
    %c0_26 = arith.constant 0 : index
    %c0_27 = arith.constant 0 : index
    %33 = vector.load %arg7[%c0_24, %c0_25, %c0_26, %c0_27] : memref<1x1x2x128xf32, #tpu.memory_space<vmem>>, vector<1x1x1x128xf32>
    %34 = vector.shape_cast %33 : vector<1x1x1x128xf32> to vector<1x128xf32>
    %35 = vector.shape_cast %32 : vector<1x128xf32> to vector<1x1x1x128xf32>
    tpu.vector_store %arg7[%c0_24, %c0_25, %c0_26, %c0_27], %35 {strides = array<i32>} : memref<1x1x2x128xf32, #tpu.memory_space<vmem>>, vector<1x1x1x128xf32>,
    %36 = arith.mulf %28, %28 : vector<128x128xf32>
    %cst_28 = arith.constant dense<0.000000e+00> : vector<128xf32>
    %37 = vector.multi_reduction <add>, %36, %cst_28 [0] : vector<128x128xf32> to vector<128xf32>
    %38 = vector.shape_cast %37 : vector<128xf32> to vector<1x128xf32>
    %c0_29 = arith.constant 0 : index
    %c0_30 = arith.constant 0 : index
    %c1_31 = arith.constant 1 : index
    %c0_32 = arith.constant 0 : index
    %39 = vector.load %arg7[%c0_29, %c0_30, %c1_31, %c0_32] : memref<1x1x2x128xf32, #tpu.memory_space<vmem>>, vector<1x1x1x128xf32>
    %40 = vector.shape_cast %39 : vector<1x1x1x128xf32> to vector<1x128xf32>
    %41 = vector.shape_cast %38 : vector<1x128xf32> to vector<1x1x1x128xf32>
    tpu.vector_store %arg7[%c0_29, %c0_30, %c1_31, %c0_32], %41 {strides = array<i32>} : memref<1x1x2x128xf32, #tpu.memory_space<vmem>>, vector<1x1x1x128xf32>,
    return
  }
  func.func @transform_0(%arg0: i32, %arg1: i32) -> (i32, i32, i32, i32) {
    %c0_i32 = arith.constant 0 : i32
    %c0_i32_0 = arith.constant 0 : i32
    %c0_i32_1 = arith.constant 0 : i32
    %c0_i32_2 = arith.constant 0 : i32
    return %arg0, %c0_i32, %c0_i32_0, %c0_i32_1 : i32, i32, i32, i32
  }
  func.func @transform_1(%arg0: i32, %arg1: i32) -> (i32, i32, i32, i32) {
    %c0_i32 = arith.constant 0 : i32
    %c0_i32_0 = arith.constant 0 : i32
    %c0_i32_1 = arith.constant 0 : i32
    %c0_i32_2 = arith.constant 0 : i32
    return %arg0, %c0_i32, %c0_i32_0, %c0_i32_1 : i32, i32, i32, i32
  }
  func.func @transform_2(%arg0: i32, %arg1: i32) -> (i32, i32, i32) {
    %c0_i32 = arith.constant 0 : i32
    %c0_i32_0 = arith.constant 0 : i32
    %c0_i32_1 = arith.constant 0 : i32
    %c0_i32_2 = arith.constant 0 : i32
    return %c0_i32, %c0_i32_0, %c0_i32_1 : i32, i32, i32
  }
  func.func @transform_3(%arg0: i32, %arg1: i32) -> (i32, i32) {
    %c0_i32 = arith.constant 0 : i32
    %c0_i32_0 = arith.constant 0 : i32
    %c0_i32_1 = arith.constant 0 : i32
    return %c0_i32, %c0_i32_0 : i32, i32
  }
  func.func @transform_4(%arg0: i32, %arg1: i32) -> (i32, i32, i32, i32) {
    %c0_i32 = arith.constant 0 : i32
    %c0_i32_0 = arith.constant 0 : i32
    %c0_i32_1 = arith.constant 0 : i32
    return %arg0, %arg1, %c0_i32, %c0_i32_0 : i32, i32, i32, i32
  }
  func.func @transform_5(%arg0: i32, %arg1: i32) -> (i32, i32, i32, i32) {
    %c0_i32 = arith.constant 0 : i32
    %c0_i32_0 = arith.constant 0 : i32
    %c0_i32_1 = arith.constant 0 : i32
    return %arg0, %arg1, %c0_i32, %c0_i32_0 : i32, i32, i32, i32
  }
}

module attributes {stable_mosaic.version = 11 : i64} {
  func.func @_bn_leaky_kernel(%arg0: i32, %arg1: memref<512x128xf32, #tpu.memory_space<vmem>>, %arg2: memref<1x128xf32, #tpu.memory_space<vmem>>, %arg3: memref<1x128xf32, #tpu.memory_space<vmem>>, %arg4: memref<512x128xbf16, #tpu.memory_space<vmem>>) attributes {dimension_semantics = [#tpu.dimension_semantics<parallel>], iteration_bounds = array<i64: 1>, scalar_prefetch = 0 : i64, scratch_operands = 0 : i64, tpu.core_type = #tpu.core_type<tc>, window_params = [{transform_indices = @transform_0, window_bounds = array<i64: 512, 128>}, {pipeline_mode = #tpu.pipeline_mode<synchronous>, transform_indices = @transform_1, window_bounds = array<i64: 1, 128>}, {pipeline_mode = #tpu.pipeline_mode<synchronous>, transform_indices = @transform_2, window_bounds = array<i64: 1, 128>}, {transform_indices = @transform_3, window_bounds = array<i64: 512, 128>}]} {
    %c0 = arith.constant 0 : index
    %c0_0 = arith.constant 0 : index
    %0 = vector.load %arg1[%c0, %c0_0] : memref<512x128xf32, #tpu.memory_space<vmem>>, vector<512x128xf32>
    %c0_1 = arith.constant 0 : index
    %c0_2 = arith.constant 0 : index
    %1 = vector.load %arg2[%c0_1, %c0_2] : memref<1x128xf32, #tpu.memory_space<vmem>>, vector<1x128xf32>
    %2 = vector.broadcast %1 : vector<1x128xf32> to vector<512x128xf32>
    %3 = arith.mulf %0, %2 : vector<512x128xf32>
    %c0_3 = arith.constant 0 : index
    %c0_4 = arith.constant 0 : index
    %4 = vector.load %arg3[%c0_3, %c0_4] : memref<1x128xf32, #tpu.memory_space<vmem>>, vector<1x128xf32>
    %5 = vector.broadcast %4 : vector<1x128xf32> to vector<512x128xf32>
    %6 = arith.addf %3, %5 : vector<512x128xf32>
    %cst = arith.constant 0.000000e+00 : f32
    %7 = vector.broadcast %cst : f32 to vector<512x128xf32>
    %8 = arith.cmpf ogt, %6, %7 : vector<512x128xf32>
    %cst_5 = arith.constant 2.000000e-01 : f32
    %9 = vector.broadcast %cst_5 : f32 to vector<512x128xf32>
    %10 = arith.mulf %9, %6 : vector<512x128xf32>
    %11 = arith.select %8, %6, %10 : vector<512x128xi1>, vector<512x128xf32>
    %12 = arith.truncf %11 : vector<512x128xf32> to vector<512x128xbf16>
    %c0_6 = arith.constant 0 : index
    %c0_7 = arith.constant 0 : index
    %13 = vector.load %arg4[%c0_6, %c0_7] : memref<512x128xbf16, #tpu.memory_space<vmem>>, vector<512x128xbf16>
    tpu.vector_store %arg4[%c0_6, %c0_7], %12 {strides = array<i32>} : memref<512x128xbf16, #tpu.memory_space<vmem>>, vector<512x128xbf16>,
    return
  }
  func.func @transform_0(%arg0: i32) -> (i32, i32) {
    %c0_i32 = arith.constant 0 : i32
    %c0_i32_0 = arith.constant 0 : i32
    return %arg0, %c0_i32 : i32, i32
  }
  func.func @transform_1(%arg0: i32) -> (i32, i32) {
    %c0_i32 = arith.constant 0 : i32
    %c0_i32_0 = arith.constant 0 : i32
    %c0_i32_1 = arith.constant 0 : i32
    return %c0_i32, %c0_i32_0 : i32, i32
  }
  func.func @transform_2(%arg0: i32) -> (i32, i32) {
    %c0_i32 = arith.constant 0 : i32
    %c0_i32_0 = arith.constant 0 : i32
    %c0_i32_1 = arith.constant 0 : i32
    return %c0_i32, %c0_i32_0 : i32, i32
  }
  func.func @transform_3(%arg0: i32) -> (i32, i32) {
    %c0_i32 = arith.constant 0 : i32
    %c0_i32_0 = arith.constant 0 : i32
    return %arg0, %c0_i32 : i32, i32
  }
}

module attributes {stable_mosaic.version = 11 : i64} {
  func.func @_conv3x3_s2_kernel(%arg0: i32, %arg1: i32, %arg2: memref<1x9x8x384xbf16, #tpu.memory_space<vmem>>, %arg3: memref<1x9x8x384xbf16, #tpu.memory_space<vmem>>, %arg4: memref<3x384x256xbf16, #tpu.memory_space<vmem>>, %arg5: memref<1x256xf32, #tpu.memory_space<vmem>>, %arg6: memref<1x8x8x256xf32, #tpu.memory_space<vmem>>, %arg7: memref<1x1x2x256xf32, #tpu.memory_space<vmem>>) attributes {dimension_semantics = [#tpu.dimension_semantics<parallel>, #tpu.dimension_semantics<parallel>], iteration_bounds = array<i64: 2, 1>, scalar_prefetch = 0 : i64, scratch_operands = 0 : i64, tpu.core_type = #tpu.core_type<tc>, window_params = [{transform_indices = @transform_0, window_bounds = array<i64: 1, 9, 8, 384>}, {transform_indices = @transform_1, window_bounds = array<i64: 1, 9, 8, 384>}, {pipeline_mode = #tpu.pipeline_mode<synchronous>, transform_indices = @transform_2, window_bounds = array<i64: 3, 384, 256>}, {pipeline_mode = #tpu.pipeline_mode<synchronous>, transform_indices = @transform_3, window_bounds = array<i64: 1, 256>}, {transform_indices = @transform_4, window_bounds = array<i64: 1, 8, 8, 256>}, {transform_indices = @transform_5, window_bounds = array<i64: 1, 1, 2, 256>}]} {
    %c8_i32 = arith.constant 8 : i32
    %0 = arith.muli %arg1, %c8_i32 : i32
    %1 = tpu.assume_multiple %0, 8 : i32
    %c0 = arith.constant 0 : index
    %2 = arith.index_cast %1 : i32 to index
    %c0_0 = arith.constant 0 : index
    %c0_1 = arith.constant 0 : index
    %3 = vector.load %arg2[%c0, %2, %c0_0, %c0_1] : memref<1x9x8x384xbf16, #tpu.memory_space<vmem>>, vector<1x8x8x384xbf16>
    %4 = vector.shape_cast %3 : vector<1x8x8x384xbf16> to vector<8x8x384xbf16>
    %5 = vector.shape_cast %4 : vector<8x8x384xbf16> to vector<64x384xbf16>
    %c0_2 = arith.constant 0 : index
    %6 = arith.index_cast %1 : i32 to index
    %c0_3 = arith.constant 0 : index
    %c0_4 = arith.constant 0 : index
    %7 = vector.load %arg3[%c0_2, %6, %c0_3, %c0_4] : memref<1x9x8x384xbf16, #tpu.memory_space<vmem>>, vector<1x8x8x384xbf16>
    %8 = vector.shape_cast %7 : vector<1x8x8x384xbf16> to vector<8x8x384xbf16>
    %9 = vector.shape_cast %8 : vector<8x8x384xbf16> to vector<64x384xbf16>
    %c1_i32 = arith.constant 1 : i32
    %10 = arith.addi %1, %c1_i32 : i32
    %c0_5 = arith.constant 0 : index
    %11 = arith.index_cast %10 : i32 to index
    %c0_6 = arith.constant 0 : index
    %c0_7 = arith.constant 0 : index
    %12 = vector.load %arg2[%c0_5, %11, %c0_6, %c0_7] : memref<1x9x8x384xbf16, #tpu.memory_space<vmem>>, vector<1x8x8x384xbf16>
    %13 = vector.shape_cast %12 : vector<1x8x8x384xbf16> to vector<8x8x384xbf16>
    %14 = vector.shape_cast %13 : vector<8x8x384xbf16> to vector<64x384xbf16>
    %c0_8 = arith.constant 0 : index
    %c0_9 = arith.constant 0 : index
    %c0_10 = arith.constant 0 : index
    %15 = vector.load %arg4[%c0_8, %c0_9, %c0_10] : memref<3x384x256xbf16, #tpu.memory_space<vmem>>, vector<1x384x256xbf16>
    %16 = vector.shape_cast %15 : vector<1x384x256xbf16> to vector<384x256xbf16>
    %cst = arith.constant dense<0.000000e+00> : vector<64x256xf32>
    %17 = tpu.matmul %5, %16, %cst {dimension_numbers = #tpu.dot_dimension_numbers<[1], [0], [0], [1], [0, 0, 1, 1], [], []>} : vector<64x384xbf16>, vector<384x256xbf16>, vector<64x256xf32> -> vector<64x256xf32>
    %c1 = arith.constant 1 : index
    %c0_11 = arith.constant 0 : index
    %c0_12 = arith.constant 0 : index
    %18 = vector.load %arg4[%c1, %c0_11, %c0_12] : memref<3x384x256xbf16, #tpu.memory_space<vmem>>, vector<1x384x256xbf16>
    %19 = vector.shape_cast %18 : vector<1x384x256xbf16> to vector<384x256xbf16>
    %cst_13 = arith.constant dense<0.000000e+00> : vector<64x256xf32>
    %20 = tpu.matmul %9, %19, %cst_13 {dimension_numbers = #tpu.dot_dimension_numbers<[1], [0], [0], [1], [0, 0, 1, 1], [], []>} : vector<64x384xbf16>, vector<384x256xbf16>, vector<64x256xf32> -> vector<64x256xf32>
    %21 = arith.addf %17, %20 : vector<64x256xf32>
    %c2 = arith.constant 2 : index
    %c0_14 = arith.constant 0 : index
    %c0_15 = arith.constant 0 : index
    %22 = vector.load %arg4[%c2, %c0_14, %c0_15] : memref<3x384x256xbf16, #tpu.memory_space<vmem>>, vector<1x384x256xbf16>
    %23 = vector.shape_cast %22 : vector<1x384x256xbf16> to vector<384x256xbf16>
    %cst_16 = arith.constant dense<0.000000e+00> : vector<64x256xf32>
    %24 = tpu.matmul %14, %23, %cst_16 {dimension_numbers = #tpu.dot_dimension_numbers<[1], [0], [0], [1], [0, 0, 1, 1], [], []>} : vector<64x384xbf16>, vector<384x256xbf16>, vector<64x256xf32> -> vector<64x256xf32>
    %25 = arith.addf %21, %24 : vector<64x256xf32>
    %c0_17 = arith.constant 0 : index
    %c0_18 = arith.constant 0 : index
    %26 = vector.load %arg5[%c0_17, %c0_18] : memref<1x256xf32, #tpu.memory_space<vmem>>, vector<1x256xf32>
    %27 = vector.broadcast %26 : vector<1x256xf32> to vector<64x256xf32>
    %28 = arith.addf %25, %27 : vector<64x256xf32>
    %29 = vector.shape_cast %28 : vector<64x256xf32> to vector<1x8x8x256xf32>
    %c0_19 = arith.constant 0 : index
    %c0_20 = arith.constant 0 : index
    %c0_21 = arith.constant 0 : index
    %c0_22 = arith.constant 0 : index
    %30 = vector.load %arg6[%c0_19, %c0_20, %c0_21, %c0_22] : memref<1x8x8x256xf32, #tpu.memory_space<vmem>>, vector<1x8x8x256xf32>
    tpu.vector_store %arg6[%c0_19, %c0_20, %c0_21, %c0_22], %29 {strides = array<i32>} : memref<1x8x8x256xf32, #tpu.memory_space<vmem>>, vector<1x8x8x256xf32>,
    %cst_23 = arith.constant dense<0.000000e+00> : vector<256xf32>
    %31 = vector.multi_reduction <add>, %28, %cst_23 [0] : vector<64x256xf32> to vector<256xf32>
    %32 = vector.shape_cast %31 : vector<256xf32> to vector<1x256xf32>
    %c0_24 = arith.constant 0 : index
    %c0_25 = arith.constant 0 : index
    %c0_26 = arith.constant 0 : index
    %c0_27 = arith.constant 0 : index
    %33 = vector.load %arg7[%c0_24, %c0_25, %c0_26, %c0_27] : memref<1x1x2x256xf32, #tpu.memory_space<vmem>>, vector<1x1x1x256xf32>
    %34 = vector.shape_cast %33 : vector<1x1x1x256xf32> to vector<1x256xf32>
    %35 = vector.shape_cast %32 : vector<1x256xf32> to vector<1x1x1x256xf32>
    tpu.vector_store %arg7[%c0_24, %c0_25, %c0_26, %c0_27], %35 {strides = array<i32>} : memref<1x1x2x256xf32, #tpu.memory_space<vmem>>, vector<1x1x1x256xf32>,
    %36 = arith.mulf %28, %28 : vector<64x256xf32>
    %cst_28 = arith.constant dense<0.000000e+00> : vector<256xf32>
    %37 = vector.multi_reduction <add>, %36, %cst_28 [0] : vector<64x256xf32> to vector<256xf32>
    %38 = vector.shape_cast %37 : vector<256xf32> to vector<1x256xf32>
    %c0_29 = arith.constant 0 : index
    %c0_30 = arith.constant 0 : index
    %c1_31 = arith.constant 1 : index
    %c0_32 = arith.constant 0 : index
    %39 = vector.load %arg7[%c0_29, %c0_30, %c1_31, %c0_32] : memref<1x1x2x256xf32, #tpu.memory_space<vmem>>, vector<1x1x1x256xf32>
    %40 = vector.shape_cast %39 : vector<1x1x1x256xf32> to vector<1x256xf32>
    %41 = vector.shape_cast %38 : vector<1x256xf32> to vector<1x1x1x256xf32>
    tpu.vector_store %arg7[%c0_29, %c0_30, %c1_31, %c0_32], %41 {strides = array<i32>} : memref<1x1x2x256xf32, #tpu.memory_space<vmem>>, vector<1x1x1x256xf32>,
    return
  }
  func.func @transform_0(%arg0: i32, %arg1: i32) -> (i32, i32, i32, i32) {
    %c0_i32 = arith.constant 0 : i32
    %c0_i32_0 = arith.constant 0 : i32
    %c0_i32_1 = arith.constant 0 : i32
    %c0_i32_2 = arith.constant 0 : i32
    return %arg0, %c0_i32, %c0_i32_0, %c0_i32_1 : i32, i32, i32, i32
  }
  func.func @transform_1(%arg0: i32, %arg1: i32) -> (i32, i32, i32, i32) {
    %c0_i32 = arith.constant 0 : i32
    %c0_i32_0 = arith.constant 0 : i32
    %c0_i32_1 = arith.constant 0 : i32
    %c0_i32_2 = arith.constant 0 : i32
    return %arg0, %c0_i32, %c0_i32_0, %c0_i32_1 : i32, i32, i32, i32
  }
  func.func @transform_2(%arg0: i32, %arg1: i32) -> (i32, i32, i32) {
    %c0_i32 = arith.constant 0 : i32
    %c0_i32_0 = arith.constant 0 : i32
    %c0_i32_1 = arith.constant 0 : i32
    %c0_i32_2 = arith.constant 0 : i32
    return %c0_i32, %c0_i32_0, %c0_i32_1 : i32, i32, i32
  }
  func.func @transform_3(%arg0: i32, %arg1: i32) -> (i32, i32) {
    %c0_i32 = arith.constant 0 : i32
    %c0_i32_0 = arith.constant 0 : i32
    %c0_i32_1 = arith.constant 0 : i32
    return %c0_i32, %c0_i32_0 : i32, i32
  }
  func.func @transform_4(%arg0: i32, %arg1: i32) -> (i32, i32, i32, i32) {
    %c0_i32 = arith.constant 0 : i32
    %c0_i32_0 = arith.constant 0 : i32
    %c0_i32_1 = arith.constant 0 : i32
    return %arg0, %arg1, %c0_i32, %c0_i32_0 : i32, i32, i32, i32
  }
  func.func @transform_5(%arg0: i32, %arg1: i32) -> (i32, i32, i32, i32) {
    %c0_i32 = arith.constant 0 : i32
    %c0_i32_0 = arith.constant 0 : i32
    %c0_i32_1 = arith.constant 0 : i32
    return %arg0, %arg1, %c0_i32, %c0_i32_0 : i32, i32, i32, i32
  }
}

module attributes {stable_mosaic.version = 11 : i64} {
  func.func @_bn_leaky_kernel(%arg0: i32, %arg1: memref<128x256xf32, #tpu.memory_space<vmem>>, %arg2: memref<1x256xf32, #tpu.memory_space<vmem>>, %arg3: memref<1x256xf32, #tpu.memory_space<vmem>>, %arg4: memref<128x256xbf16, #tpu.memory_space<vmem>>) attributes {dimension_semantics = [#tpu.dimension_semantics<parallel>], iteration_bounds = array<i64: 1>, scalar_prefetch = 0 : i64, scratch_operands = 0 : i64, tpu.core_type = #tpu.core_type<tc>, window_params = [{transform_indices = @transform_0, window_bounds = array<i64: 128, 256>}, {pipeline_mode = #tpu.pipeline_mode<synchronous>, transform_indices = @transform_1, window_bounds = array<i64: 1, 256>}, {pipeline_mode = #tpu.pipeline_mode<synchronous>, transform_indices = @transform_2, window_bounds = array<i64: 1, 256>}, {transform_indices = @transform_3, window_bounds = array<i64: 128, 256>}]} {
    %c0 = arith.constant 0 : index
    %c0_0 = arith.constant 0 : index
    %0 = vector.load %arg1[%c0, %c0_0] : memref<128x256xf32, #tpu.memory_space<vmem>>, vector<128x256xf32>
    %c0_1 = arith.constant 0 : index
    %c0_2 = arith.constant 0 : index
    %1 = vector.load %arg2[%c0_1, %c0_2] : memref<1x256xf32, #tpu.memory_space<vmem>>, vector<1x256xf32>
    %2 = vector.broadcast %1 : vector<1x256xf32> to vector<128x256xf32>
    %3 = arith.mulf %0, %2 : vector<128x256xf32>
    %c0_3 = arith.constant 0 : index
    %c0_4 = arith.constant 0 : index
    %4 = vector.load %arg3[%c0_3, %c0_4] : memref<1x256xf32, #tpu.memory_space<vmem>>, vector<1x256xf32>
    %5 = vector.broadcast %4 : vector<1x256xf32> to vector<128x256xf32>
    %6 = arith.addf %3, %5 : vector<128x256xf32>
    %cst = arith.constant 0.000000e+00 : f32
    %7 = vector.broadcast %cst : f32 to vector<128x256xf32>
    %8 = arith.cmpf ogt, %6, %7 : vector<128x256xf32>
    %cst_5 = arith.constant 2.000000e-01 : f32
    %9 = vector.broadcast %cst_5 : f32 to vector<128x256xf32>
    %10 = arith.mulf %9, %6 : vector<128x256xf32>
    %11 = arith.select %8, %6, %10 : vector<128x256xi1>, vector<128x256xf32>
    %12 = arith.truncf %11 : vector<128x256xf32> to vector<128x256xbf16>
    %c0_6 = arith.constant 0 : index
    %c0_7 = arith.constant 0 : index
    %13 = vector.load %arg4[%c0_6, %c0_7] : memref<128x256xbf16, #tpu.memory_space<vmem>>, vector<128x256xbf16>
    tpu.vector_store %arg4[%c0_6, %c0_7], %12 {strides = array<i32>} : memref<128x256xbf16, #tpu.memory_space<vmem>>, vector<128x256xbf16>,
    return
  }
  func.func @transform_0(%arg0: i32) -> (i32, i32) {
    %c0_i32 = arith.constant 0 : i32
    %c0_i32_0 = arith.constant 0 : i32
    return %arg0, %c0_i32 : i32, i32
  }
  func.func @transform_1(%arg0: i32) -> (i32, i32) {
    %c0_i32 = arith.constant 0 : i32
    %c0_i32_0 = arith.constant 0 : i32
    %c0_i32_1 = arith.constant 0 : i32
    return %c0_i32, %c0_i32_0 : i32, i32
  }
  func.func @transform_2(%arg0: i32) -> (i32, i32) {
    %c0_i32 = arith.constant 0 : i32
    %c0_i32_0 = arith.constant 0 : i32
    %c0_i32_1 = arith.constant 0 : i32
    return %c0_i32, %c0_i32_0 : i32, i32
  }
  func.func @transform_3(%arg0: i32) -> (i32, i32) {
    %c0_i32 = arith.constant 0 : i32
    %c0_i32_0 = arith.constant 0 : i32
    return %arg0, %c0_i32 : i32, i32
  }
}

module attributes {stable_mosaic.version = 11 : i64} {
  func.func @_conv3x3_s2_kernel(%arg0: i32, %arg1: i32, %arg2: memref<1x5x4x768xbf16, #tpu.memory_space<vmem>>, %arg3: memref<1x5x4x768xbf16, #tpu.memory_space<vmem>>, %arg4: memref<3x768x512xbf16, #tpu.memory_space<vmem>>, %arg5: memref<1x512xf32, #tpu.memory_space<vmem>>, %arg6: memref<1x4x4x512xf32, #tpu.memory_space<vmem>>, %arg7: memref<1x1x2x512xf32, #tpu.memory_space<vmem>>) attributes {dimension_semantics = [#tpu.dimension_semantics<parallel>, #tpu.dimension_semantics<parallel>], iteration_bounds = array<i64: 2, 1>, scalar_prefetch = 0 : i64, scratch_operands = 0 : i64, tpu.core_type = #tpu.core_type<tc>, window_params = [{transform_indices = @transform_0, window_bounds = array<i64: 1, 5, 4, 768>}, {transform_indices = @transform_1, window_bounds = array<i64: 1, 5, 4, 768>}, {pipeline_mode = #tpu.pipeline_mode<synchronous>, transform_indices = @transform_2, window_bounds = array<i64: 3, 768, 512>}, {pipeline_mode = #tpu.pipeline_mode<synchronous>, transform_indices = @transform_3, window_bounds = array<i64: 1, 512>}, {transform_indices = @transform_4, window_bounds = array<i64: 1, 4, 4, 512>}, {transform_indices = @transform_5, window_bounds = array<i64: 1, 1, 2, 512>}]} {
    %c4_i32 = arith.constant 4 : i32
    %0 = arith.muli %arg1, %c4_i32 : i32
    %1 = tpu.assume_multiple %0, 4 : i32
    %c0 = arith.constant 0 : index
    %2 = arith.index_cast %1 : i32 to index
    %c0_0 = arith.constant 0 : index
    %c0_1 = arith.constant 0 : index
    %3 = vector.load %arg2[%c0, %2, %c0_0, %c0_1] : memref<1x5x4x768xbf16, #tpu.memory_space<vmem>>, vector<1x4x4x768xbf16>
    %4 = vector.shape_cast %3 : vector<1x4x4x768xbf16> to vector<4x4x768xbf16>
    %5 = vector.shape_cast %4 : vector<4x4x768xbf16> to vector<16x768xbf16>
    %c0_2 = arith.constant 0 : index
    %6 = arith.index_cast %1 : i32 to index
    %c0_3 = arith.constant 0 : index
    %c0_4 = arith.constant 0 : index
    %7 = vector.load %arg3[%c0_2, %6, %c0_3, %c0_4] : memref<1x5x4x768xbf16, #tpu.memory_space<vmem>>, vector<1x4x4x768xbf16>
    %8 = vector.shape_cast %7 : vector<1x4x4x768xbf16> to vector<4x4x768xbf16>
    %9 = vector.shape_cast %8 : vector<4x4x768xbf16> to vector<16x768xbf16>
    %c1_i32 = arith.constant 1 : i32
    %10 = arith.addi %1, %c1_i32 : i32
    %c0_5 = arith.constant 0 : index
    %11 = arith.index_cast %10 : i32 to index
    %c0_6 = arith.constant 0 : index
    %c0_7 = arith.constant 0 : index
    %12 = vector.load %arg2[%c0_5, %11, %c0_6, %c0_7] : memref<1x5x4x768xbf16, #tpu.memory_space<vmem>>, vector<1x4x4x768xbf16>
    %13 = vector.shape_cast %12 : vector<1x4x4x768xbf16> to vector<4x4x768xbf16>
    %14 = vector.shape_cast %13 : vector<4x4x768xbf16> to vector<16x768xbf16>
    %c0_8 = arith.constant 0 : index
    %c0_9 = arith.constant 0 : index
    %c0_10 = arith.constant 0 : index
    %15 = vector.load %arg4[%c0_8, %c0_9, %c0_10] : memref<3x768x512xbf16, #tpu.memory_space<vmem>>, vector<1x768x512xbf16>
    %16 = vector.shape_cast %15 : vector<1x768x512xbf16> to vector<768x512xbf16>
    %cst = arith.constant dense<0.000000e+00> : vector<16x512xf32>
    %17 = tpu.matmul %5, %16, %cst {dimension_numbers = #tpu.dot_dimension_numbers<[1], [0], [0], [1], [0, 0, 1, 1], [], []>} : vector<16x768xbf16>, vector<768x512xbf16>, vector<16x512xf32> -> vector<16x512xf32>
    %c1 = arith.constant 1 : index
    %c0_11 = arith.constant 0 : index
    %c0_12 = arith.constant 0 : index
    %18 = vector.load %arg4[%c1, %c0_11, %c0_12] : memref<3x768x512xbf16, #tpu.memory_space<vmem>>, vector<1x768x512xbf16>
    %19 = vector.shape_cast %18 : vector<1x768x512xbf16> to vector<768x512xbf16>
    %cst_13 = arith.constant dense<0.000000e+00> : vector<16x512xf32>
    %20 = tpu.matmul %9, %19, %cst_13 {dimension_numbers = #tpu.dot_dimension_numbers<[1], [0], [0], [1], [0, 0, 1, 1], [], []>} : vector<16x768xbf16>, vector<768x512xbf16>, vector<16x512xf32> -> vector<16x512xf32>
    %21 = arith.addf %17, %20 : vector<16x512xf32>
    %c2 = arith.constant 2 : index
    %c0_14 = arith.constant 0 : index
    %c0_15 = arith.constant 0 : index
    %22 = vector.load %arg4[%c2, %c0_14, %c0_15] : memref<3x768x512xbf16, #tpu.memory_space<vmem>>, vector<1x768x512xbf16>
    %23 = vector.shape_cast %22 : vector<1x768x512xbf16> to vector<768x512xbf16>
    %cst_16 = arith.constant dense<0.000000e+00> : vector<16x512xf32>
    %24 = tpu.matmul %14, %23, %cst_16 {dimension_numbers = #tpu.dot_dimension_numbers<[1], [0], [0], [1], [0, 0, 1, 1], [], []>} : vector<16x768xbf16>, vector<768x512xbf16>, vector<16x512xf32> -> vector<16x512xf32>
    %25 = arith.addf %21, %24 : vector<16x512xf32>
    %c0_17 = arith.constant 0 : index
    %c0_18 = arith.constant 0 : index
    %26 = vector.load %arg5[%c0_17, %c0_18] : memref<1x512xf32, #tpu.memory_space<vmem>>, vector<1x512xf32>
    %27 = vector.broadcast %26 : vector<1x512xf32> to vector<16x512xf32>
    %28 = arith.addf %25, %27 : vector<16x512xf32>
    %29 = vector.shape_cast %28 : vector<16x512xf32> to vector<1x4x4x512xf32>
    %c0_19 = arith.constant 0 : index
    %c0_20 = arith.constant 0 : index
    %c0_21 = arith.constant 0 : index
    %c0_22 = arith.constant 0 : index
    %30 = vector.load %arg6[%c0_19, %c0_20, %c0_21, %c0_22] : memref<1x4x4x512xf32, #tpu.memory_space<vmem>>, vector<1x4x4x512xf32>
    tpu.vector_store %arg6[%c0_19, %c0_20, %c0_21, %c0_22], %29 {strides = array<i32>} : memref<1x4x4x512xf32, #tpu.memory_space<vmem>>, vector<1x4x4x512xf32>,
    %cst_23 = arith.constant dense<0.000000e+00> : vector<512xf32>
    %31 = vector.multi_reduction <add>, %28, %cst_23 [0] : vector<16x512xf32> to vector<512xf32>
    %32 = vector.shape_cast %31 : vector<512xf32> to vector<1x512xf32>
    %c0_24 = arith.constant 0 : index
    %c0_25 = arith.constant 0 : index
    %c0_26 = arith.constant 0 : index
    %c0_27 = arith.constant 0 : index
    %33 = vector.load %arg7[%c0_24, %c0_25, %c0_26, %c0_27] : memref<1x1x2x512xf32, #tpu.memory_space<vmem>>, vector<1x1x1x512xf32>
    %34 = vector.shape_cast %33 : vector<1x1x1x512xf32> to vector<1x512xf32>
    %35 = vector.shape_cast %32 : vector<1x512xf32> to vector<1x1x1x512xf32>
    tpu.vector_store %arg7[%c0_24, %c0_25, %c0_26, %c0_27], %35 {strides = array<i32>} : memref<1x1x2x512xf32, #tpu.memory_space<vmem>>, vector<1x1x1x512xf32>,
    %36 = arith.mulf %28, %28 : vector<16x512xf32>
    %cst_28 = arith.constant dense<0.000000e+00> : vector<512xf32>
    %37 = vector.multi_reduction <add>, %36, %cst_28 [0] : vector<16x512xf32> to vector<512xf32>
    %38 = vector.shape_cast %37 : vector<512xf32> to vector<1x512xf32>
    %c0_29 = arith.constant 0 : index
    %c0_30 = arith.constant 0 : index
    %c1_31 = arith.constant 1 : index
    %c0_32 = arith.constant 0 : index
    %39 = vector.load %arg7[%c0_29, %c0_30, %c1_31, %c0_32] : memref<1x1x2x512xf32, #tpu.memory_space<vmem>>, vector<1x1x1x512xf32>
    %40 = vector.shape_cast %39 : vector<1x1x1x512xf32> to vector<1x512xf32>
    %41 = vector.shape_cast %38 : vector<1x512xf32> to vector<1x1x1x512xf32>
    tpu.vector_store %arg7[%c0_29, %c0_30, %c1_31, %c0_32], %41 {strides = array<i32>} : memref<1x1x2x512xf32, #tpu.memory_space<vmem>>, vector<1x1x1x512xf32>,
    return
  }
  func.func @transform_0(%arg0: i32, %arg1: i32) -> (i32, i32, i32, i32) {
    %c0_i32 = arith.constant 0 : i32
    %c0_i32_0 = arith.constant 0 : i32
    %c0_i32_1 = arith.constant 0 : i32
    %c0_i32_2 = arith.constant 0 : i32
    return %arg0, %c0_i32, %c0_i32_0, %c0_i32_1 : i32, i32, i32, i32
  }
  func.func @transform_1(%arg0: i32, %arg1: i32) -> (i32, i32, i32, i32) {
    %c0_i32 = arith.constant 0 : i32
    %c0_i32_0 = arith.constant 0 : i32
    %c0_i32_1 = arith.constant 0 : i32
    %c0_i32_2 = arith.constant 0 : i32
    return %arg0, %c0_i32, %c0_i32_0, %c0_i32_1 : i32, i32, i32, i32
  }
  func.func @transform_2(%arg0: i32, %arg1: i32) -> (i32, i32, i32) {
    %c0_i32 = arith.constant 0 : i32
    %c0_i32_0 = arith.constant 0 : i32
    %c0_i32_1 = arith.constant 0 : i32
    %c0_i32_2 = arith.constant 0 : i32
    return %c0_i32, %c0_i32_0, %c0_i32_1 : i32, i32, i32
  }
  func.func @transform_3(%arg0: i32, %arg1: i32) -> (i32, i32) {
    %c0_i32 = arith.constant 0 : i32
    %c0_i32_0 = arith.constant 0 : i32
    %c0_i32_1 = arith.constant 0 : i32
    return %c0_i32, %c0_i32_0 : i32, i32
  }
  func.func @transform_4(%arg0: i32, %arg1: i32) -> (i32, i32, i32, i32) {
    %c0_i32 = arith.constant 0 : i32
    %c0_i32_0 = arith.constant 0 : i32
    %c0_i32_1 = arith.constant 0 : i32
    return %arg0, %arg1, %c0_i32, %c0_i32_0 : i32, i32, i32, i32
  }
  func.func @transform_5(%arg0: i32, %arg1: i32) -> (i32, i32, i32, i32) {
    %c0_i32 = arith.constant 0 : i32
    %c0_i32_0 = arith.constant 0 : i32
    %c0_i32_1 = arith.constant 0 : i32
    return %arg0, %arg1, %c0_i32, %c0_i32_0 : i32, i32, i32, i32
  }
}

module attributes {stable_mosaic.version = 11 : i64} {
  func.func @_bn_leaky_kernel(%arg0: i32, %arg1: memref<32x512xf32, #tpu.memory_space<vmem>>, %arg2: memref<1x512xf32, #tpu.memory_space<vmem>>, %arg3: memref<1x512xf32, #tpu.memory_space<vmem>>, %arg4: memref<32x512xbf16, #tpu.memory_space<vmem>>) attributes {dimension_semantics = [#tpu.dimension_semantics<parallel>], iteration_bounds = array<i64: 1>, scalar_prefetch = 0 : i64, scratch_operands = 0 : i64, tpu.core_type = #tpu.core_type<tc>, window_params = [{transform_indices = @transform_0, window_bounds = array<i64: 32, 512>}, {pipeline_mode = #tpu.pipeline_mode<synchronous>, transform_indices = @transform_1, window_bounds = array<i64: 1, 512>}, {pipeline_mode = #tpu.pipeline_mode<synchronous>, transform_indices = @transform_2, window_bounds = array<i64: 1, 512>}, {transform_indices = @transform_3, window_bounds = array<i64: 32, 512>}]} {
    %c0 = arith.constant 0 : index
    %c0_0 = arith.constant 0 : index
    %0 = vector.load %arg1[%c0, %c0_0] : memref<32x512xf32, #tpu.memory_space<vmem>>, vector<32x512xf32>
    %c0_1 = arith.constant 0 : index
    %c0_2 = arith.constant 0 : index
    %1 = vector.load %arg2[%c0_1, %c0_2] : memref<1x512xf32, #tpu.memory_space<vmem>>, vector<1x512xf32>
    %2 = vector.broadcast %1 : vector<1x512xf32> to vector<32x512xf32>
    %3 = arith.mulf %0, %2 : vector<32x512xf32>
    %c0_3 = arith.constant 0 : index
    %c0_4 = arith.constant 0 : index
    %4 = vector.load %arg3[%c0_3, %c0_4] : memref<1x512xf32, #tpu.memory_space<vmem>>, vector<1x512xf32>
    %5 = vector.broadcast %4 : vector<1x512xf32> to vector<32x512xf32>
    %6 = arith.addf %3, %5 : vector<32x512xf32>
    %cst = arith.constant 0.000000e+00 : f32
    %7 = vector.broadcast %cst : f32 to vector<32x512xf32>
    %8 = arith.cmpf ogt, %6, %7 : vector<32x512xf32>
    %cst_5 = arith.constant 2.000000e-01 : f32
    %9 = vector.broadcast %cst_5 : f32 to vector<32x512xf32>
    %10 = arith.mulf %9, %6 : vector<32x512xf32>
    %11 = arith.select %8, %6, %10 : vector<32x512xi1>, vector<32x512xf32>
    %12 = arith.truncf %11 : vector<32x512xf32> to vector<32x512xbf16>
    %c0_6 = arith.constant 0 : index
    %c0_7 = arith.constant 0 : index
    %13 = vector.load %arg4[%c0_6, %c0_7] : memref<32x512xbf16, #tpu.memory_space<vmem>>, vector<32x512xbf16>
    tpu.vector_store %arg4[%c0_6, %c0_7], %12 {strides = array<i32>} : memref<32x512xbf16, #tpu.memory_space<vmem>>, vector<32x512xbf16>,
    return
  }
  func.func @transform_0(%arg0: i32) -> (i32, i32) {
    %c0_i32 = arith.constant 0 : i32
    %c0_i32_0 = arith.constant 0 : i32
    return %arg0, %c0_i32 : i32, i32
  }
  func.func @transform_1(%arg0: i32) -> (i32, i32) {
    %c0_i32 = arith.constant 0 : i32
    %c0_i32_0 = arith.constant 0 : i32
    %c0_i32_1 = arith.constant 0 : i32
    return %c0_i32, %c0_i32_0 : i32, i32
  }
  func.func @transform_2(%arg0: i32) -> (i32, i32) {
    %c0_i32 = arith.constant 0 : i32
    %c0_i32_0 = arith.constant 0 : i32
    %c0_i32_1 = arith.constant 0 : i32
    return %c0_i32, %c0_i32_0 : i32, i32
  }
  func.func @transform_3(%arg0: i32) -> (i32, i32) {
    %c0_i32 = arith.constant 0 : i32
    %c0_i32_0 = arith.constant 0 : i32
    return %arg0, %c0_i32 : i32, i32
  }
}

module attributes {stable_mosaic.version = 11 : i64} {
  func.func @_linear_sigmoid_kernel(%arg0: i32, %arg1: memref<2x8192xbf16, #tpu.memory_space<vmem>>, %arg2: memref<8192x128xbf16, #tpu.memory_space<vmem>>, %arg3: memref<1x128xf32, #tpu.memory_space<vmem>>, %arg4: memref<2x128xf32, #tpu.memory_space<vmem>>) attributes {dimension_semantics = [#tpu.dimension_semantics<arbitrary>], iteration_bounds = array<i64: 1>, scalar_prefetch = 0 : i64, scratch_operands = 0 : i64, tpu.core_type = #tpu.core_type<tc>, window_params = [{pipeline_mode = #tpu.pipeline_mode<synchronous>, transform_indices = @transform_0, window_bounds = array<i64: 2, 8192>}, {pipeline_mode = #tpu.pipeline_mode<synchronous>, transform_indices = @transform_1, window_bounds = array<i64: 8192, 128>}, {pipeline_mode = #tpu.pipeline_mode<synchronous>, transform_indices = @transform_2, window_bounds = array<i64: 1, 128>}, {pipeline_mode = #tpu.pipeline_mode<synchronous>, transform_indices = @transform_3, window_bounds = array<i64: 2, 128>}]} {
    %c0 = arith.constant 0 : index
    %c0_0 = arith.constant 0 : index
    %0 = vector.load %arg1[%c0, %c0_0] : memref<2x8192xbf16, #tpu.memory_space<vmem>>, vector<2x8192xbf16>
    %c0_1 = arith.constant 0 : index
    %c0_2 = arith.constant 0 : index
    %1 = vector.load %arg2[%c0_1, %c0_2] : memref<8192x128xbf16, #tpu.memory_space<vmem>>, vector<8192x128xbf16>
    %cst = arith.constant dense<0.000000e+00> : vector<2x128xf32>
    %2 = tpu.matmul %0, %1, %cst {dimension_numbers = #tpu.dot_dimension_numbers<[1], [0], [0], [1], [0, 0, 1, 1], [], []>} : vector<2x8192xbf16>, vector<8192x128xbf16>, vector<2x128xf32> -> vector<2x128xf32>
    %c0_3 = arith.constant 0 : index
    %c0_4 = arith.constant 0 : index
    %3 = vector.load %arg3[%c0_3, %c0_4] : memref<1x128xf32, #tpu.memory_space<vmem>>, vector<1x128xf32>
    %4 = vector.broadcast %3 : vector<1x128xf32> to vector<2x128xf32>
    %5 = arith.addf %2, %4 : vector<2x128xf32>
    %cst_5 = arith.constant 0.000000e+00 : f32
    %6 = vector.broadcast %cst_5 : f32 to vector<2x128xf32>
    %7 = arith.subf %6, %5 : vector<2x128xf32>
    %8 = math.exp %7 : vector<2x128xf32>
    %cst_6 = arith.constant 1.000000e+00 : f32
    %9 = vector.broadcast %cst_6 : f32 to vector<2x128xf32>
    %10 = arith.addf %9, %8 : vector<2x128xf32>
    %cst_7 = arith.constant 1.000000e+00 : f32
    %11 = vector.broadcast %cst_7 : f32 to vector<2x128xf32>
    %12 = arith.divf %11, %10 : vector<2x128xf32>
    %c0_8 = arith.constant 0 : index
    %c0_9 = arith.constant 0 : index
    %13 = vector.load %arg4[%c0_8, %c0_9] : memref<2x128xf32, #tpu.memory_space<vmem>>, vector<2x128xf32>
    tpu.vector_store %arg4[%c0_8, %c0_9], %12 {strides = array<i32>} : memref<2x128xf32, #tpu.memory_space<vmem>>, vector<2x128xf32>,
    return
  }
  func.func @transform_0(%arg0: i32) -> (i32, i32) {
    %c0_i32 = arith.constant 0 : i32
    %c0_i32_0 = arith.constant 0 : i32
    %c0_i32_1 = arith.constant 0 : i32
    return %c0_i32, %c0_i32_0 : i32, i32
  }
  func.func @transform_1(%arg0: i32) -> (i32, i32) {
    %c0_i32 = arith.constant 0 : i32
    %c0_i32_0 = arith.constant 0 : i32
    %c0_i32_1 = arith.constant 0 : i32
    return %c0_i32, %c0_i32_0 : i32, i32
  }
  func.func @transform_2(%arg0: i32) -> (i32, i32) {
    %c0_i32 = arith.constant 0 : i32
    %c0_i32_0 = arith.constant 0 : i32
    %c0_i32_1 = arith.constant 0 : i32
    return %c0_i32, %c0_i32_0 : i32, i32
  }
  func.func @transform_3(%arg0: i32) -> (i32, i32) {
    %c0_i32 = arith.constant 0 : i32
    %c0_i32_0 = arith.constant 0 : i32
    %c0_i32_1 = arith.constant 0 : i32
    return %c0_i32, %c0_i32_0 : i32, i32
  }
}

</mosaic_0001>

<bundles_post_ra>
// kernel: discriminator_forward.10
= control target key start
LH: loop header
LB: loop body
LE: loop exit
PB: predicated region body
PF: predicated region fallthrough
CT: control target
= control target key end

     0   :  { %11 = vsyncpa [#allocation3], 0  ;;  %s3010_s0 = inlined_call_operand.vmem [shape: bf16[2,33,32,72], index: 0, kind: input, shape index: {}]   ;;  %s3011_s1 = inlined_call_operand.vmem [shape: bf16[2,33,32,72], index: 1, kind: input, shape index: {}]   ;;  %s3012_s2 = inlined_call_operand.vmem [shape: bf16[3,72,32], index: 2, kind: input, shape index: {}]   ;;  %s3013_s3 = inlined_call_operand.vmem [shape: f32[1,32], index: 3, kind: input, shape index: {}]   ;;  %s3014_s4 = inlined_call_operand.vmem [shape: f32[2,32,32,32], index: 4, kind: output, shape index: {0}]   ;;  %s3015_s5 = inlined_call_operand.hbm [shape: f32[2,4,2,32], index: 5, kind: output, shape index: {1}]  }
   0x1   :  { %13 = vsyncpa [#allocation3 + $0x1], 0  ;;  %s2471_s18 = smov 0   ;;  %s2473_s19 = smov 0  }
   0x2   :  { %s2475_s20 = smov 0   ;;  %s2477_s21 = smov 0  }
   0x3   :  { %s2479_s22 = smov 0   ;;  %s2481_s23 = smov 0  }
   0x4   :  { %s2483_s24 = smov 0   ;;  %s2485_s25 = smov 0  }
   0x5 LB: > { %s1819_s26 = sadd.s32 4294967295, %s2438_s25   ;;  %s1820_s27 = sadd.s32 4294967294, %s2438_s25   ;;  %s2438_s25 = sphi %s2485_s25, %s19_s25   ;;  %s2434_s24 = sphi %s2483_s24, %s3024_s24   ;;  %s2430_s23 = sphi %s2481_s23, %s3023_s23   ;;  %s2426_s22 = sphi %s2479_s22, %s3022_s22   ;;  %s2422_s21 = sphi %s2477_s21, %s3021_s21   ;;  %s2418_s20 = sphi %s2475_s20, %s3020_s20   ;;  %s2414_s19 = sphi %s2473_s19, %s3019_s19   ;;  %s2410_s18 = sphi %s2471_s18, %s3018_s18  }
   0x6   : > { %s28_s28 = sadd.s32 1, %s2430_s23  ;;  %s31_s29 = sadd.s32 1, %s2434_s24 }
   0x7   : > { %p29_p0 = scmp.ge.s32.totalorder %s28_s28, 4  ;;  %p172_p1 = scmp.ne.s32.totalorder %s2418_s20, %s2414_s19 }
   0x8   : > { %p173_p2 = scmp.eq.s32.totalorder %s1819_s26, 7  ;;  %p178_p5 = scmp.ne.s32.totalorder %s2414_s19, %s2410_s18 }
   0x9   : > { %s3026_s28 = smov (%p29_p0, %s28_s28), 0  ;;  %s3028_s29 = smov (!%p29_p0, %s31_s29), %s2434_s24 }
   0xa   : > { %s158_s30 = ssub.s32 %s2430_s23, %s3026_s28  ;;  %p2522_p3 = por %p173_p2, %p172_p1 }
   0xb   : > { %p33_p4 = scmp.ge.s32.totalorder %s3028_s29, 2  ;;  %p179_p6 = scmp.eq.s32.totalorder %s1820_s27, 7 }
   0xc   : > { %p1823_p7 = scmp.ge.s32.totalorder %s2438_s25, 1  ;;  %p219_p9 = scmp.lt.s32.totalorder %s2438_s25, 9 }
   0xd   : > { %s3030_s29 = smov (%p33_p4, %s3028_s29), 0  ;;  %p2531_p8 = por %p179_p6, %p178_p5 }
   0xe   : > { %s157_s8 = ssub.s32 %s2434_s24, %s3030_s29  ;;  %s162_s9 = sadd.s32 1, %s2418_s20 }
   0xf   : > { %s159_s10 = sor.u32 %s158_s30, %s157_s8  ;;  %p220_p10 = pnand %p1823_p7, %p219_p9 }
  0x10   : > { %p160_p11 = scmp.eq.s32.totalorder %s159_s10, 0  ;;  %p262_p12 = scmp.lt.s32.totalorder (!%p220_p10), %s2426_s22, 1 }
  0x11   : > { %223 = sbr.rel (%p220_p10) target bundleno = 370 (0x172), region = 36  ;;  %s2005_s30 = sshll.u32 (!%p220_p10), %s2422_s21, 7 }
  0x12   : > { %s2540_s11 = scalar_select %p160_p11, %s2418_s20, %s162_s9  }
  0x13   : > { %s259_s12 = sand.u32 (!%p220_p10), 1, %s2414_s19  }
  0x16   : > { %v2283_v0 = vld [vmem:[%s3012_s2 + $0x44] ss:$0 sps:$4 sm:$0xff]   ;;  %vm565_vm0 = vcmask 1043456   ;;  %v2284_v1 = vld [vmem:[%s3012_s2 + $0x3c] sm:$0xff]   ;;  %v2285_v3 = vld [vmem:[%s3012_s2 + $0x34] sm:$0xff]   ;;  %s2556_s26 = scalar_select %p262_p12, %s2426_s22, 1 }
  0x17   : > { %2207 = vmatprep.subr.msk.bf16.mxu0 %vm565_vm0, %v2283_v0  ;;  %2208 = vmatprep.subr.msk.bf16.mxu1 %vm565_vm0, %v2283_v0  ;;  %v567_v2 = vsel %vm565_vm0, %v2283_v0, 0  ;;  %v2286_v4 = vld [vmem:[%s3012_s2 + $0x2c] sm:$0xff]   ;;  %v2287_v5 = vld [vmem:[%s3012_s2 + $0x24] sm:$0xff]   ;;  %vm516_vm1 = vcmask 588800   ;;  %v2292_v8 = vld [vmem:[%s3012_s2 + $0x20] ss:$0 sps:$4 sm:$0xff]  }
  0x18   : > { %2072 = vmatpush3.bf16.msra.mxu0 %v567_v2  ;;  %2202 = vmatpush3.bf16.msra.mxu1 %v567_v2  ;;  %s2211_s27 = smul.u32 528, %s2556_s26  ;;  %v2293_v9 = vld [vmem:[%s3012_s2 + $0x68] ss:$0 sps:$4 sm:$0xff]   ;;  %v886_v12 = vsel %vm565_vm0, %v2292_v8, 0  ;;  %v2296_v14 = vld [vmem:[%s3012_s2 + $0x18] sm:$0xff]   ;;  %v2299_v17 = vld [vmem:[%s3012_s2 + $0x60] sm:$0xff]  }
  0x19   : > { %2073 = vmatprep.subr.bf16.mxu0 %v2284_v1  ;;  %2198 = vmatprep.subr.bf16.mxu1 %v2284_v1  ;;  %v1215_v15 = vsel %vm565_vm0, %v2293_v9, 0  ;;  %v2300_v18 = vld [vmem:[%s3012_s2 + $0x10] sm:$0xff]   ;;  %v2303_v19 = vld [vmem:[%s3012_s2 + $0x58] sm:$0xff]   ;;  %v2306_v24 = vld [vmem:[%s3012_s2 + $0x8] sm:$0xff]   ;;  %s1829_s15 = sshll.u32 %s2556_s26, 7  ;;  %vm1449_vm2 = vcmask 261120  }
  0x1a   : > { %s271_s13 = scalar_lea.vmem %s3011_s1, %s2211_s27  ;;  %s266_s14 = scalar_lea.vmem %s3010_s0, %s2211_s27  ;;  %v2307_v25 = vld [vmem:[%s3012_s2 + $0x50] sm:$0xff]   ;;  %v2312_v28 = vld [vmem:[%s3012_s2] sm:$0xff]   ;;  %v2313_v29 = vld [vmem:[%s3012_s2 + $0x48] sm:$0xff]   ;;  %vm1551_vm3 = vcmask 253952  }
  0x1b   : > { %s2573_s16 = scalar_lea.vmem %s271_s13, %s2005_s30  ;;  %s2623_s8 = scalar_lea.vmem %s266_s14, %s2005_s30 }
  0x1c   : > { %2074 = vmatpush3.bf16.msra.mxu0 %v2284_v1  ;;  %2203 = vmatpush3.bf16.msra.mxu1 %v2284_v1  ;;  %v2288_v6 = vld [vmem:[%s2573_s16] sm:$0xff]   ;;  %v2290_v10 = vld [vmem:[%s2573_s16 + $0x8] sm:$0xff]   ;;  %v2294_v13 = vld [vmem:[%s2573_s16 + $0x10] sm:$0xff]   ;;  %s1824_s13 = sshll.u32 %s259_s12, 1  ;;  %s1666_s26 = scalar_lea.sflag [#allocation3], %s259_s12 }
  0x1d   : > { %2075 = vmatprep.subr.bf16.mxu0 %v2285_v3  ;;  %2199 = vmatprep.subr.bf16.mxu1 %v2285_v3  ;;  %v2289_v7 = vld [vmem:[%s2573_s16 + $0x40] sm:$0xff]   ;;  %v2291_v11 = vld [vmem:[%s2573_s16 + $0x48] sm:$0xff]   ;;  %v2295_v16 = vld [vmem:[%s2573_s16 + $0x50] sm:$0xff]  }
  0x1e   : > { %2081 = vmatprep.mubr.msk.bf16.mxu0 %vm516_vm1, %v2288_v6  ;;  %2097 = vmatprep.mubr.msk.bf16.mxu1 %vm516_vm1, %v2289_v7  ;;  %v2297_v20 = vld [vmem:[%s2573_s16 + $0x18] sm:$0xff]   ;;  %v2301_v22 = vld [vmem:[%s2573_s16 + $0x20] sm:$0xff]   ;;  %v2304_v26 = vld [vmem:[%s2573_s16 + $0x28] sm:$0xff]  }
  0x1f   : > { %v2298_v21 = vld [vmem:[%s2573_s16 + $0x58] sm:$0xff]   ;;  %v2302_v23 = vld [vmem:[%s2573_s16 + $0x60] sm:$0xff]   ;;  %v2305_v27 = vld [vmem:[%s2573_s16 + $0x68] sm:$0xff]  }
  0x20   : > { %2076 = vmatpush3.bf16.msra.mxu0 %v2285_v3  ;;  %2204 = vmatpush3.bf16.msra.mxu1 %v2285_v3  ;;  %v2308_v30 = vld [vmem:[%s2573_s16 + $0x30] sm:$0xff]   ;;  %v2310_v32 = vld [vmem:[%s2573_s16 + $0x38] sm:$0xff]   ;;  %v2314_v34 = vld [vmem:[%s2623_s8] sm:$0xff]  }
  0x21   : > { %2077 = vmatprep.subr.bf16.mxu0 %v2286_v4  ;;  %2200 = vmatprep.subr.bf16.mxu1 %v2286_v4  ;;  %v2309_v31 = vld [vmem:[%s2573_s16 + $0x70] sm:$0xff]   ;;  %v2311_v33 = vld [vmem:[%s2573_s16 + $0x78] sm:$0xff]   ;;  %v2316_v36 = vld [vmem:[%s2623_s8 + $0x8] sm:$0xff]   ;;  %s1827_s16 = sshll.u32 %s2422_s21, 3 }
  0x22   : > { %v2315_v35 = vld [vmem:[%s2623_s8 + $0x10] sm:$0xff]   ;;  %v2317_v37 = vld [vmem:[%s2623_s8 + $0x18] sm:$0xff]   ;;  %v2319_v39 = vld [vmem:[%s2623_s8 + $0x20] sm:$0xff]   ;;  %p275_p13 = scmp.lt.s32.totalorder %s1827_s16, 31 }
  0x23   : > { %v2318_v38 = vld [vmem:[%s2623_s8 + $0x10] sm:$0xff]   ;;  %v2320_v40 = vld [vmem:[%s2623_s8 + $0x18] sm:$0xff]   ;;  %v2321_v41 = vld [vmem:[%s2623_s8 + $0x28] sm:$0xff]  }
  0x24   : > { %2078 = vmatpush3.bf16.msra.mxu0 %v2286_v4  ;;  %2205 = vmatpush3.bf16.msra.mxu1 %v2286_v4  ;;  %v2322_v42 = vld [vmem:[%s2623_s8 + $0x20] sm:$0xff]   ;;  %v2323_v43 = vld [vmem:[%s2623_s8 + $0x30] sm:$0xff]   ;;  %v2324_v44 = vld [vmem:[%s2623_s8 + $0x28] sm:$0xff]   ;;  %s3032_s16 = smov (!%p275_p13, %s1827_s16), 31 }
  0x25   : > { %2079 = vmatprep.subr.bf16.mxu0 %v2287_v5  ;;  %2201 = vmatprep.subr.bf16.mxu1 %v2287_v5  ;;  %v2325_v45 = vld [vmem:[%s2623_s8 + $0x38] sm:$0xff]   ;;  %v2326_v46 = vld [vmem:[%s2623_s8 + $0x30] sm:$0xff]   ;;  %v2327_v47 = vld [vmem:[%s2623_s8 + $0x40] sm:$0xff]   ;;  %s1828_s14 = sshll.u32 %s3032_s16, 2  ;;  %s2000_s16 = sshll.u32 %s2426_s22, 2 }
  0x26   : > { %v2328_v48 = vld [vmem:[%s2623_s8 + $0x38] sm:$0xff]   ;;  %v2329_v49 = vld [vmem:[%s2623_s8 + $0x48] sm:$0xff]   ;;  %v2330_v50 = vld [vmem:[%s2623_s8 + $0x40] sm:$0xff]   ;;  %s279_s17 = sadd.s32 %s1829_s15, %s1828_s14  ;;  %s1681_s14 = sadd.s32 %s2422_s21, %s2000_s16 }
  0x27   : > { %v2331_v51 = vld [vmem:[%s2623_s8 + $0x50] sm:$0xff]   ;;  %v2332_v52 = vld [vmem:[%s2623_s8 + $0x48] sm:$0xff]   ;;  %v2333_v53 = vld [vmem:[%s2623_s8 + $0x58] sm:$0xff]   ;;  %s2001_s15 = sshll.u32 %s1681_s14, 5  ;;  %s2440_s21 = smov [#allocation2]  }
  0x28   : > { %2080 = vmatpush3.bf16.msra.mxu0 %v2287_v5  ;;  %2206 = vmatpush3.bf16.msra.mxu1 %v2287_v5  ;;  %v2334_v54 = vld [vmem:[%s2623_s8 + $0x50] sm:$0xff]   ;;  %v2335_v55 = vld [vmem:[%s2623_s8 + $0x60] sm:$0xff]   ;;  %v2336_v56 = vld [vmem:[%s2623_s8 + $0x58] sm:$0xff]   ;;  %s1683_s22 = scalar_lea.hbm %s3015_s5, %s2001_s15 }
  0x29   : > { %2209 = vmatprep.subr.msk.bf16.mxu1 %vm565_vm0, %v2292_v8  ;;  %2210 = vmatprep.subr.msk.bf16.mxu0 %vm565_vm0, %v2293_v9  ;;  %v2337_v57 = vld [vmem:[%s2623_s8 + $0x68] sm:$0xff]   ;;  %v2338_v58 = vld [vmem:[%s2623_s8 + $0x60] sm:$0xff]   ;;  %v2339_v59 = vld [vmem:[%s2623_s8 + $0x70] sm:$0xff]  }
  0x2a   : > { %v2340_v60 = vld [vmem:[%s2623_s8 + $0x68] sm:$0xff]   ;;  %v2341_v61 = vld [vmem:[%s2623_s8 + $0x78] sm:$0xff]   ;;  %v2342_v62 = vld [vmem:[%s2623_s8 + $0x70] sm:$0xff]  }
  0x2b   : > { %2082 = vmatmul.mubr.msk.bf16.vlgmr.msra.gmra.mxu0 %vm516_vm1, %v2290_v10  ;;  %2098 = vmatmul.mubr.msk.bf16.vlgmr.msra.gmra.mxu1 %vm516_vm1, %v2291_v11  ;;  %v2343_v63 = vld [vmem:[%s2623_s8 + $0x80] sm:$0xff]   ;;  %v2344_v0 = vld [vmem:[%s2623_s8 + $0x78] sm:$0xff]   ;;  %v2345_v1 = vld [vmem:[%s2623_s8 + $0x88] sm:$0xff]   ;;  %s1830_s8 = sshll.u32 %s279_s17, 3  ;;  %s261_s17 = scalar_lea.vmem [#allocation2], %s1824_s13 }
  0x2c   : > { %2114 = vmatpush3.bf16.msra.mxu1 %v886_v12  ;;  %2156 = vmatpush3.bf16.msra.mxu0 %v1215_v15  ;;  %s2776_s30 = scalar_lea.vmem %s3014_s4, %s1830_s8  ;;  %s1685_s8 = sshll.u32 %s261_s17, 4  ;;  %s1686_s8 = int_to_ptr.vmem [resolvable:$true] %s1685_s8 }
  0x2d   : > { %2085 = vmatprep.mubr.msk.bf16.mxu0 %vm516_vm1, %v2294_v13  ;;  %2101 = vmatprep.mubr.msk.bf16.mxu1 %vm516_vm1, %v2295_v16  ;;  %s2346_s27 = scalar_lea.vmem %s1686_s8, 32 }
  0x2e   : > { %2115 = vmatprep.subr.bf16.mxu1 %v2296_v14  ;;  %2157 = vmatprep.subr.bf16.mxu0 %v2299_v17  ;;  %p2347_p0 = scmp.ne.s32.totalorder %s1686_s8, %s2346_s27 }
  0x30   : > { %2116 = vmatpush3.bf16.msra.mxu1 %v2296_v14  ;;  %2158 = vmatpush3.bf16.msra.mxu0 %v2299_v17  ;;  %p2348_p1 = pnand %p2347_p0, %p2522_p3 }
  0x31   : > { %2117 = vmatprep.subr.bf16.mxu1 %v2300_v18  ;;  %2159 = vmatprep.subr.bf16.mxu0 %v2303_v19 }
  0x32   : > { %p2349_p2 = pneg %p2348_p1 }
  0x33   : > { %2086 = vmatmul.mubr.msk.bf16.gmra.mxu0 %vm516_vm1, %v2297_v20  ;;  %2102 = vmatmul.mubr.msk.bf16.gmra.mxu1 %vm516_vm1, %v2298_v21 }
  0x34   : > { %2118 = vmatpush3.bf16.msra.mxu1 %v2300_v18  ;;  %2089 = vmatprep.mubr.msk.bf16.mxu0 %vm516_vm1, %v2301_v22 }
  0x35   : > { %2105 = vmatprep.mubr.msk.bf16.mxu1 %vm516_vm1, %v2302_v23  ;;  %2160 = vmatpush3.bf16.msra.mxu0 %v2303_v19 }
  0x36   : > { %2119 = vmatprep.subr.bf16.mxu1 %v2306_v24  ;;  %2161 = vmatprep.subr.bf16.mxu0 %v2307_v25 }
  0x38   : > { %2120 = vmatpush3.bf16.msra.mxu1 %v2306_v24 }
  0x39   : > { %2162 = vmatpush3.bf16.msra.mxu0 %v2307_v25  ;;  %2121 = vmatprep.subr.bf16.mxu1 %v2312_v28 }
  0x3a   : > { %2163 = vmatprep.subr.bf16.mxu0 %v2313_v29 }
  0x3b   : > { %2090 = vmatmul.mubr.msk.bf16.gmra.mxu0 %vm516_vm1, %v2304_v26  ;;  %2106 = vmatmul.mubr.msk.bf16.gmra.mxu1 %vm516_vm1, %v2305_v27 }
  0x3c   : > { %2093 = vmatprep.mubr.msk.bf16.mxu0 %vm516_vm1, %v2308_v30  ;;  %2109 = vmatprep.mubr.msk.bf16.mxu1 %vm516_vm1, %v2309_v31 }
  0x3d   : > { %2122 = vmatpush3.bf16.msra.mxu1 %v2312_v28  ;;  %2164 = vmatpush3.bf16.msra.mxu0 %v2313_v29 }
  0x43   : > { %2094 = vmatmul.mubr.msk.bf16.gmra.mxu0 %vm516_vm1, %v2310_v32  ;;  %2110 = vmatmul.mubr.msk.bf16.gmra.mxu1 %vm516_vm1, %v2311_v33 }
  0x44   : > { %2123 = vmatprep.mubr.msk.bf16.mxu1 %vm516_vm1, %v2314_v34  ;;  %2165 = vmatprep.mubr.msk.bf16.mxu0 %vm516_vm1, %v2315_v35 }
  0x4b   : > { %2124 = vmatmul.mubr.msk.bf16.vlgmr.msra.gmra.mxu1 %vm516_vm1, %v2316_v36  ;;  %2166 = vmatmul.mubr.msk.bf16.vlgmr.msra.gmra.mxu0 %vm516_vm1, %v2317_v37  ;;  %v2771_v37 = vld [vmem:[%s3013_s3] ss:$0 sm:$0xff] }
  0x4c   : > { %2127 = vmatprep.mubr.msk.bf16.mxu1 %vm516_vm1, %v2318_v38  ;;  %2169 = vmatprep.mubr.msk.bf16.mxu0 %vm516_vm1, %v2319_v39 }
  0x53   : > { %2128 = vmatmul.mubr.msk.bf16.gmra.mxu1 %vm516_vm1, %v2320_v40  ;;  %2170 = vmatmul.mubr.msk.bf16.gmra.mxu0 %vm516_vm1, %v2321_v41 }
  0x54   : > { %2131 = vmatprep.mubr.msk.bf16.mxu1 %vm516_vm1, %v2322_v42  ;;  %2173 = vmatprep.mubr.msk.bf16.mxu0 %vm516_vm1, %v2323_v43 }
  0x5b   : > { %2132 = vmatmul.mubr.msk.bf16.gmra.mxu1 %vm516_vm1, %v2324_v44  ;;  %2174 = vmatmul.mubr.msk.bf16.gmra.mxu0 %vm516_vm1, %v2325_v45 }
  0x5c   : > { %2135 = vmatprep.mubr.msk.bf16.mxu1 %vm516_vm1, %v2326_v46  ;;  %2177 = vmatprep.mubr.msk.bf16.mxu0 %vm516_vm1, %v2327_v47 }
  0x63   : > { %2136 = vmatmul.mubr.msk.bf16.gmra.mxu1 %vm516_vm1, %v2328_v48  ;;  %2178 = vmatmul.mubr.msk.bf16.gmra.mxu0 %vm516_vm1, %v2329_v49 }
  0x64   : > { %2139 = vmatprep.mubr.msk.bf16.mxu1 %vm516_vm1, %v2330_v50  ;;  %2181 = vmatprep.mubr.msk.bf16.mxu0 %vm516_vm1, %v2331_v51 }
  0x6b   : > { %2140 = vmatmul.mubr.msk.bf16.gmra.mxu1 %vm516_vm1, %v2332_v52  ;;  %2182 = vmatmul.mubr.msk.bf16.gmra.mxu0 %vm516_vm1, %v2333_v53 }
  0x6c   : > { %2143 = vmatprep.mubr.msk.bf16.mxu1 %vm516_vm1, %v2334_v54  ;;  %2185 = vmatprep.mubr.msk.bf16.mxu0 %vm516_vm1, %v2335_v55 }
  0x73   : > { %2144 = vmatmul.mubr.msk.bf16.gmra.mxu1 %vm516_vm1, %v2336_v56  ;;  %2186 = vmatmul.mubr.msk.bf16.gmra.mxu0 %vm516_vm1, %v2337_v57 }
  0x74   : > { %2147 = vmatprep.mubr.msk.bf16.mxu1 %vm516_vm1, %v2338_v58  ;;  %2189 = vmatprep.mubr.msk.bf16.mxu0 %vm516_vm1, %v2339_v59 }
  0x7b   : > { %2148 = vmatmul.mubr.msk.bf16.gmra.mxu1 %vm516_vm1, %v2340_v60  ;;  %2190 = vmatmul.mubr.msk.bf16.gmra.mxu0 %vm516_vm1, %v2341_v61 }
  0x7c   : > { %2151 = vmatprep.mubr.msk.bf16.mxu1 %vm516_vm1, %v2342_v62  ;;  %2193 = vmatprep.mubr.msk.bf16.mxu0 %vm516_vm1, %v2343_v63 }
  0x83   : > { %2152 = vmatmul.mubr.msk.bf16.gmra.mxu1 %vm516_vm1, %v2344_v0  ;;  %2194 = vmatmul.mubr.msk.bf16.gmra.mxu0 %vm516_vm1, %v2345_v1 }
  0xeb   : > { %v2083_v2 = vpop.f32.mrf.mxu0  ;;  %v2714_v3 = vpop.f32.mrf.mxu1 }
  0xed   : > { %v603_v4 = vpop.f32.mrf.mxu0  ;;  %v2716_v5 = vpop.f32.mrf.mxu1 }
  0xef   : > { %v2084_v6 = vpop.f32.mrf.mxu0  ;;  %v2718_v7 = vpop.f32.mrf.mxu1 }
  0xf1   : > { %v606_v8 = vpop.f32.mrf.mxu0  ;;  %v2720_v9 = vpop.f32.mrf.mxu1 }
  0xf3   : > { %v2087_v10 = vpop.f32.mrf.mxu0  ;;  %v2722_v11 = vpop.f32.mrf.mxu1 }
  0xf5   : > { %v619_v12 = vpop.f32.mrf.mxu0  ;;  %v2724_v13 = vpop.f32.mrf.mxu1 }
  0xf7   : > { %v2726_v14 = vpop.f32.mrf.mxu0  ;;  %v2728_v15 = vpop.f32.mrf.mxu1 }
  0xf9   : > { %v2730_v16 = vpop.f32.mrf.mxu0  ;;  %v2732_v17 = vpop.f32.mrf.mxu1 }
  0xfb   : > { %v2734_v18 = vpop.f32.mrf.mxu0  ;;  %v2736_v19 = vpop.f32.mrf.mxu1 }
  0xfd   : > { %v2739_v20 = vpop.f32.mrf.mxu0  ;;  %v2741_v21 = vpop.f32.mrf.mxu1 }
  0xff   : > { %v2743_v22 = vpop.f32.mrf.mxu0  ;;  %v2745_v23 = vpop.f32.mrf.mxu1 }
 0x101   : > { %v2747_v24 = vpop.f32.mrf.mxu0  ;;  %v2749_v25 = vpop.f32.mrf.mxu1 }
 0x103   : > { %v2751_v26 = vpop.f32.mrf.mxu0  ;;  %v2753_v27 = vpop.f32.mrf.mxu1 }
 0x105   : > { %v2755_v28 = vpop.f32.mrf.mxu0  ;;  %v2757_v29 = vpop.f32.mrf.mxu1 }
 0x107   : > { %v2760_v30 = vpop.f32.mrf.mxu0  ;;  %v2762_v31 = vpop.f32.mrf.mxu1 }
 0x109   : > { %v2764_v32 = vpop.f32.mrf.mxu0  ;;  %v2766_v33 = vpop.f32.mrf.mxu1 }
 0x10b   : > { %v2125_v34 = vpop.f32.mrf.mxu1  ;;  %v2167_v35 = vpop.f32.mrf.mxu0 }
 0x10c   : > { %v931_v36 = vadd.f32 %v2125_v34, %v2083_v2 }
 0x10d   : > { %v922_v38 = vpop.f32.mrf.mxu1  ;;  %v1251_v39 = vpop.f32.mrf.mxu0 }
 0x10e   : > { %v1380_v40 = vadd.f32 %v2167_v35, %v931_v36  ;;  %v923_v41 = vadd.f32 %v922_v38, %v603_v4 }
 0x10f   : > { %v2126_v42 = vpop.f32.mrf.mxu1  ;;  %v2168_v43 = vpop.f32.mrf.mxu0 }
 0x110   : > { %v1419_v44 = vadd.f32 %v2771_v37, %v1380_v40  ;;  %v1378_v45 = vadd.f32 %v1251_v39, %v923_v41  ;;  %v934_v46 = vadd.f32 %v2126_v42, %v2084_v6 }
 0x111   : > { %v925_v47 = vpop.f32.mrf.mxu1  ;;  %v1254_v48 = vpop.f32.mrf.mxu0 }
 0x112   : > { %1452 = vst.msk [vmem:[%s2776_s30 + $0x10] sm:$0xff] %vm1449_vm2, %v1419_v44  ;;  %v1417_v49 = vadd.f32 %v2771_v37, %v1378_v45  ;;  %v1381_v50 = vadd.f32 %v2168_v43, %v934_v46  ;;  %v926_v51 = vadd.f32 %v925_v47, %v606_v8  ;;  %v1555_v60 = vmul.f32 %v1419_v44, %v1419_v44 }
 0x113   : > { %v2129_v52 = vpop.f32.mrf.mxu1  ;;  %v2171_v53 = vpop.f32.mrf.mxu0 }
 0x114   : > { %1450 = vst.msk [vmem:[%s2776_s30] sm:$0xff] %vm1449_vm2, %v1417_v49  ;;  %v1420_v54 = vadd.f32 %v2771_v37, %v1381_v50  ;;  %v1379_v55 = vadd.f32 %v1254_v48, %v926_v51  ;;  %v947_v56 = vadd.f32 %v2129_v52, %v2087_v10  ;;  %v1553_v61 = vmul.f32 %v1417_v49, %v1417_v49 }
 0x115   : > { %v938_v57 = vpop.f32.mrf.mxu1  ;;  %v1267_v58 = vpop.f32.mrf.mxu0  ;;  %v1482_v2 = vsel %vm1449_vm2, %v1417_v49, 0.0  ;;  %v1588_v42 = vsel %vm1449_vm2, %v1555_v60, 0.0 }
 0x116   : > { %1453 = vst.msk [vmem:[%s2776_s30 + $0x18] sm:$0xff] %vm1449_vm2, %v1420_v54  ;;  %v939_v59 = vadd.f32 %v938_v57, %v619_v12  ;;  %v1418_v62 = vadd.f32 %v2771_v37, %v1379_v55  ;;  %v1384_v63 = vadd.f32 %v2171_v53, %v947_v56  ;;  %v1556_v8 = vmul.f32 %v1420_v54, %v1420_v54 }
 0x117   : > { %v2130_v0 = vpop.f32.mrf.mxu1  ;;  %v2172_v1 = vpop.f32.mrf.mxu0  ;;  %v1585_v43 = vsel %vm1449_vm2, %v1553_v61, 0.0  ;;  %v1487_v48 = vsel %vm1449_vm2, %v1420_v54, 0.0 }
 0x118   : > { %v1382_v4 = vadd.f32 %v1267_v58, %v939_v59  ;;  %v950_v6 = vadd.f32 %v2130_v0, %v2726_v14  ;;  %1451 = vst.msk [vmem:[%s2776_s30 + $0x8] sm:$0xff] %vm1449_vm2, %v1418_v62  ;;  %v1483_v10 = vsel %vm1449_vm2, %v1418_v62, 0.0  ;;  %v1554_v34 = vmul.f32 %v1418_v62, %v1418_v62 }
 0x119   : > { %v1423_v12 = vadd.f32 %v2771_v37, %v1384_v63  ;;  %v941_v35 = vpop.f32.mrf.mxu1  ;;  %v1270_v36 = vpop.f32.mrf.mxu0  ;;  %v1484_v38 = vadd.f32 %v1483_v10, %v1482_v2  ;;  %v1485_v14 = vsel %vm1449_vm2, %v1419_v44, 0.0  ;;  %v1590_v44 = vsel %vm1449_vm2, %v1556_v8, 0.0 }
 0x11a   : > { %v1421_v39 = vadd.f32 %v2771_v37, %v1382_v4  ;;  %v1385_v40 = vadd.f32 %v2172_v1, %v950_v6  ;;  %v942_v41 = vadd.f32 %v941_v35, %v2730_v16  ;;  %v1586_v45 = vsel %vm1449_vm2, %v1554_v34, 0.0 }
 0x11b   : > { %1456 = vst.msk [vmem:[%s2776_s30 + $0x30] sm:$0xff] %vm1449_vm2, %v1423_v12  ;;  %v2133_v46 = vpop.f32.mrf.mxu1  ;;  %v2175_v47 = vpop.f32.mrf.mxu0  ;;  %v1486_v49 = vadd.f32 %v1485_v14, %v1484_v38  ;;  %v1587_v50 = vadd.f32 %v1586_v45, %v1585_v43  ;;  %v1559_v58 = vmul.f32 %v1423_v12, %v1423_v12  ;;  %v1493_v14 = vsel %vm1449_vm2, %v1423_v12, 0.0 }
 0x11c   : > { %1454 = vst.msk [vmem:[%s2776_s30 + $0x20] sm:$0xff] %vm1449_vm2, %v1421_v39  ;;  %v1557_v16 = vmul.f32 %v1421_v39, %v1421_v39  ;;  %v1424_v51 = vadd.f32 %v2771_v37, %v1385_v40  ;;  %v1383_v52 = vadd.f32 %v1270_v36, %v942_v41  ;;  %v963_v53 = vadd.f32 %v2133_v46, %v2734_v18 }
 0x11d   : > { %v954_v55 = vpop.f32.mrf.mxu1  ;;  %v1283_v56 = vpop.f32.mrf.mxu0  ;;  %v1589_v57 = vadd.f32 %v1588_v42, %v1587_v50  ;;  %v1488_v59 = vadd.f32 %v1487_v48, %v1486_v49  ;;  %v1489_v60 = vsel %vm1449_vm2, %v1421_v39, 0.0 }
 0x11e   : > { %v955_v54 = vadd.f32 %v954_v55, %v2739_v20  ;;  %v1592_v61 = vsel %vm1449_vm2, %v1557_v16, 0.0  ;;  %1457 = vst.msk [vmem:[%s2776_s30 + $0x38] sm:$0xff] %vm1449_vm2, %v1424_v51  ;;  %v1422_v62 = vadd.f32 %v2771_v37, %v1383_v52  ;;  %v1388_v63 = vadd.f32 %v2175_v47, %v963_v53 }
 0x11f   : > { %v2134_v0 = vpop.f32.mrf.mxu1  ;;  %v2176_v1 = vpop.f32.mrf.mxu0  ;;  %v1490_v18 = vadd.f32 %v1489_v60, %v1488_v59  ;;  %v1591_v2 = vadd.f32 %v1590_v44, %v1589_v57  ;;  %v1560_v8 = vmul.f32 %v1424_v51, %v1424_v51  ;;  %v1495_v47 = vsel %vm1449_vm2, %v1424_v51, 0.0 }
 0x120   : > { %v1386_v4 = vadd.f32 %v1283_v56, %v955_v54  ;;  %v966_v6 = vadd.f32 %v2134_v0, %v2743_v22  ;;  %1455 = vst.msk [vmem:[%s2776_s30 + $0x28] sm:$0xff] %vm1449_vm2, %v1422_v62  ;;  %v1491_v20 = vsel %vm1449_vm2, %v1422_v62, 0.0  ;;  %v1558_v10 = vmul.f32 %v1422_v62, %v1422_v62 }
 0x121   : > { %v1427_v34 = vadd.f32 %v2771_v37, %v1388_v63  ;;  %v957_v35 = vpop.f32.mrf.mxu1  ;;  %v1286_v36 = vpop.f32.mrf.mxu0  ;;  %v1593_v38 = vadd.f32 %v1592_v61, %v1591_v2  ;;  %v1492_v39 = vadd.f32 %v1491_v20, %v1490_v18  ;;  %v1596_v22 = vsel %vm1449_vm2, %v1559_v58, 0.0 }
 0x122   : > { %v1425_v40 = vadd.f32 %v2771_v37, %v1386_v4  ;;  %v1389_v41 = vadd.f32 %v2176_v1, %v966_v6  ;;  %v1594_v42 = vsel %vm1449_vm2, %v1558_v10, 0.0  ;;  %v958_v43 = vadd.f32 %v957_v35, %v2747_v24 }
 0x123   : > { %1460 = vst.msk [vmem:[%s2776_s30 + $0x50] sm:$0xff] %vm1449_vm2, %v1427_v34  ;;  %v2137_v45 = vpop.f32.mrf.mxu1  ;;  %v2179_v46 = vpop.f32.mrf.mxu0  ;;  %v1494_v48 = vadd.f32 %v1493_v14, %v1492_v39  ;;  %v1595_v49 = vadd.f32 %v1594_v42, %v1593_v38  ;;  %v1598_v12 = vsel %vm1449_vm2, %v1560_v8, 0.0  ;;  %v1563_v56 = vmul.f32 %v1427_v34, %v1427_v34 }
 0x124   : > { %1458 = vst.msk [vmem:[%s2776_s30 + $0x40] sm:$0xff] %vm1449_vm2, %v1425_v40  ;;  %v1561_v50 = vmul.f32 %v1425_v40, %v1425_v40  ;;  %v1428_v16 = vadd.f32 %v2771_v37, %v1389_v41  ;;  %v1387_v44 = vadd.f32 %v1286_v36, %v958_v43  ;;  %v979_v52 = vadd.f32 %v2137_v45, %v2751_v26 }
 0x125   : > { %v970_v53 = vpop.f32.mrf.mxu1  ;;  %v1299_v55 = vpop.f32.mrf.mxu0  ;;  %v1597_v24 = vadd.f32 %v1596_v22, %v1595_v49  ;;  %v1496_v57 = vadd.f32 %v1495_v47, %v1494_v48  ;;  %v1497_v58 = vsel %vm1449_vm2, %v1425_v40, 0.0  ;;  %v1501_v38 = vsel %vm1449_vm2, %v1427_v34, 0.0 }
 0x126   : > { %v971_v51 = vadd.f32 %v970_v53, %v2755_v28  ;;  %v1600_v59 = vsel %vm1449_vm2, %v1561_v50, 0.0  ;;  %1461 = vst.msk [vmem:[%s2776_s30 + $0x58] sm:$0xff] %vm1449_vm2, %v1428_v16  ;;  %v1426_v54 = vadd.f32 %v2771_v37, %v1387_v44  ;;  %v1392_v60 = vadd.f32 %v2179_v46, %v979_v52 }
 0x127   : > { %v2138_v61 = vpop.f32.mrf.mxu1  ;;  %v2180_v62 = vpop.f32.mrf.mxu0  ;;  %v1498_v26 = vadd.f32 %v1497_v58, %v1496_v57  ;;  %v1599_v63 = vadd.f32 %v1598_v12, %v1597_v24  ;;  %v1564_v18 = vmul.f32 %v1428_v16, %v1428_v16  ;;  %v1503_v22 = vsel %vm1449_vm2, %v1428_v16, 0.0 }
 0x128   : > { %v1390_v0 = vadd.f32 %v1299_v55, %v971_v51  ;;  %v982_v1 = vadd.f32 %v2138_v61, %v2760_v30  ;;  %1459 = vst.msk [vmem:[%s2776_s30 + $0x48] sm:$0xff] %vm1449_vm2, %v1426_v54  ;;  %v1499_v28 = vsel %vm1449_vm2, %v1426_v54, 0.0  ;;  %v1562_v2 = vmul.f32 %v1426_v54, %v1426_v54 }
 0x129   : > { %v1431_v4 = vadd.f32 %v2771_v37, %v1392_v60  ;;  %v973_v6 = vpop.f32.mrf.mxu1  ;;  %v1302_v8 = vpop.f32.mrf.mxu0  ;;  %v1601_v20 = vadd.f32 %v1600_v59, %v1599_v63  ;;  %v1500_v10 = vadd.f32 %v1499_v28, %v1498_v26  ;;  %v1604_v30 = vsel %vm1449_vm2, %v1563_v56, 0.0 }
 0x12a   : > { %v1429_v35 = vadd.f32 %v2771_v37, %v1390_v0  ;;  %v1393_v36 = vadd.f32 %v2180_v62, %v982_v1  ;;  %v1602_v39 = vsel %vm1449_vm2, %v1562_v2, 0.0  ;;  %v974_v40 = vadd.f32 %v973_v6, %v2764_v32 }
 0x12b   : > { %1464 = vst.msk [vmem:[%s2776_s30 + $0x70] sm:$0xff] %vm1449_vm2, %v1431_v4  ;;  %v2141_v41 = vpop.f32.mrf.mxu1  ;;  %v2183_v14 = vpop.f32.mrf.mxu0  ;;  %v1502_v42 = vadd.f32 %v1501_v38, %v1500_v10  ;;  %v1603_v43 = vadd.f32 %v1602_v39, %v1601_v20  ;;  %v1606_v34 = vsel %vm1449_vm2, %v1564_v18, 0.0  ;;  %v1567_v12 = vmul.f32 %v1431_v4, %v1431_v4 }
 0x12c   : > { %1462 = vst.msk [vmem:[%s2776_s30 + $0x60] sm:$0xff] %vm1449_vm2, %v1429_v35  ;;  %v1565_v45 = vmul.f32 %v1429_v35, %v1429_v35  ;;  %v1432_v46 = vadd.f32 %v2771_v37, %v1393_v36  ;;  %v1391_v47 = vadd.f32 %v1302_v8, %v974_v40  ;;  %v995_v48 = vadd.f32 %v2141_v41, %v2714_v3 }
 0x12d   : > { %v986_v49 = vpop.f32.mrf.mxu1  ;;  %v1315_v50 = vpop.f32.mrf.mxu0  ;;  %v1605_v32 = vadd.f32 %v1604_v30, %v1603_v43  ;;  %v1504_v44 = vadd.f32 %v1503_v22, %v1502_v42  ;;  %v1505_v52 = vsel %vm1449_vm2, %v1429_v35, 0.0  ;;  %v1509_v28 = vsel %vm1449_vm2, %v1431_v4, 0.0 }
 0x12e   : > { %v987_v16 = vadd.f32 %v986_v49, %v2716_v5  ;;  %v1608_v53 = vsel %vm1449_vm2, %v1565_v45, 0.0  ;;  %1465 = vst.msk [vmem:[%s2776_s30 + $0x78] sm:$0xff] %vm1449_vm2, %v1432_v46  ;;  %v1430_v55 = vadd.f32 %v2771_v37, %v1391_v47  ;;  %v1396_v24 = vadd.f32 %v2183_v14, %v995_v48 }
 0x12f   : > { %v2142_v56 = vpop.f32.mrf.mxu1  ;;  %v2184_v57 = vpop.f32.mrf.mxu0  ;;  %v1506_v3 = vadd.f32 %v1505_v52, %v1504_v44  ;;  %v1607_v51 = vadd.f32 %v1606_v34, %v1605_v32  ;;  %v1568_v54 = vmul.f32 %v1432_v46, %v1432_v46  ;;  %v1511_v10 = vsel %vm1449_vm2, %v1432_v46, 0.0 }
 0x130   : > { %v1394_v58 = vadd.f32 %v1315_v50, %v987_v16  ;;  %v998_v59 = vadd.f32 %v2142_v56, %v2718_v7  ;;  %1463 = vst.msk [vmem:[%s2776_s30 + $0x68] sm:$0xff] %vm1449_vm2, %v1430_v55  ;;  %v1507_v5 = vsel %vm1449_vm2, %v1430_v55, 0.0  ;;  %v1566_v60 = vmul.f32 %v1430_v55, %v1430_v55 }
 0x131   : > { %v1435_v61 = vadd.f32 %v2771_v37, %v1396_v24  ;;  %v989_v62 = vpop.f32.mrf.mxu1  ;;  %v1318_v26 = vpop.f32.mrf.mxu0  ;;  %v1609_v63 = vadd.f32 %v1608_v53, %v1607_v51  ;;  %v1508_v0 = vadd.f32 %v1507_v5, %v1506_v3  ;;  %v1612_v7 = vsel %vm1449_vm2, %v1567_v12, 0.0 }
 0x132   : > { %v1433_v1 = vadd.f32 %v2771_v37, %v1394_v58  ;;  %v1397_v18 = vadd.f32 %v2184_v57, %v998_v59  ;;  %v1610_v2 = vsel %vm1449_vm2, %v1566_v60, 0.0  ;;  %v990_v6 = vadd.f32 %v989_v62, %v2720_v9 }
 0x133   : > { %1468 = vst.msk [vmem:[%s2776_s30 + $0x90] sm:$0xff] %vm1449_vm2, %v1435_v61  ;;  %v2145_v8 = vpop.f32.mrf.mxu1  ;;  %v2187_v20 = vpop.f32.mrf.mxu0  ;;  %v1510_v35 = vadd.f32 %v1509_v28, %v1508_v0  ;;  %v1611_v36 = vadd.f32 %v1610_v2, %v1609_v63  ;;  %v1614_v4 = vsel %vm1449_vm2, %v1568_v54, 0.0  ;;  %v1571_v22 = vmul.f32 %v1435_v61, %v1435_v61 }
 0x134   : > { %1466 = vst.msk [vmem:[%s2776_s30 + $0x80] sm:$0xff] %vm1449_vm2, %v1433_v1  ;;  %v1569_v38 = vmul.f32 %v1433_v1, %v1433_v1  ;;  %v1436_v30 = vadd.f32 %v2771_v37, %v1397_v18  ;;  %v1395_v39 = vadd.f32 %v1318_v26, %v990_v6  ;;  %v1011_v40 = vadd.f32 %v2145_v8, %v2722_v11 }
 0x135   : > { %v1002_v41 = vpop.f32.mrf.mxu1  ;;  %v1331_v14 = vpop.f32.mrf.mxu0  ;;  %v1613_v9 = vadd.f32 %v1612_v7, %v1611_v36  ;;  %v1512_v42 = vadd.f32 %v1511_v10, %v1510_v35  ;;  %v1513_v45 = vsel %vm1449_vm2, %v1433_v1, 0.0  ;;  %v1517_v51 = vsel %vm1449_vm2, %v1435_v61, 0.0 }
 0x136   : > { %v1003_v43 = vadd.f32 %v1002_v41, %v2724_v13  ;;  %v1616_v34 = vsel %vm1449_vm2, %v1569_v38, 0.0  ;;  %1469 = vst.msk [vmem:[%s2776_s30 + $0x98] sm:$0xff] %vm1449_vm2, %v1436_v30  ;;  %v1434_v46 = vadd.f32 %v2771_v37, %v1395_v39  ;;  %v1400_v47 = vadd.f32 %v2187_v20, %v1011_v40 }
 0x137   : > { %v2146_v48 = vpop.f32.mrf.mxu1  ;;  %v2188_v49 = vpop.f32.mrf.mxu0  ;;  %v1514_v11 = vadd.f32 %v1513_v45, %v1512_v42  ;;  %v1615_v50 = vadd.f32 %v1614_v4, %v1613_v9  ;;  %v1572_v44 = vmul.f32 %v1436_v30, %v1436_v30  ;;  %v1519_v60 = vsel %vm1449_vm2, %v1436_v30, 0.0 }
 0x138   : > { %v1398_v32 = vadd.f32 %v1331_v14, %v1003_v43  ;;  %v1014_v12 = vadd.f32 %v2146_v48, %v2728_v15  ;;  %1467 = vst.msk [vmem:[%s2776_s30 + $0x88] sm:$0xff] %vm1449_vm2, %v1434_v46  ;;  %v1515_v13 = vsel %vm1449_vm2, %v1434_v46, 0.0  ;;  %v1570_v16 = vmul.f32 %v1434_v46, %v1434_v46 }
 0x139   : > { %v1439_v52 = vadd.f32 %v2771_v37, %v1400_v47  ;;  %v1005_v53 = vpop.f32.mrf.mxu1  ;;  %v1334_v55 = vpop.f32.mrf.mxu0  ;;  %v1617_v24 = vadd.f32 %v1616_v34, %v1615_v50  ;;  %v1516_v56 = vadd.f32 %v1515_v13, %v1514_v11  ;;  %v1620_v15 = vsel %vm1449_vm2, %v1571_v22, 0.0 }
 0x13a   : > { %v1437_v57 = vadd.f32 %v2771_v37, %v1398_v32  ;;  %v1401_v3 = vadd.f32 %v2188_v49, %v1014_v12  ;;  %v1618_v58 = vsel %vm1449_vm2, %v1570_v16, 0.0  ;;  %v1006_v59 = vadd.f32 %v1005_v53, %v2732_v17 }
 0x13b   : > { %1472 = vst.msk [vmem:[%s2776_s30 + $0xb0] sm:$0xff] %vm1449_vm2, %v1439_v52  ;;  %v2149_v54 = vpop.f32.mrf.mxu1  ;;  %v2191_v5 = vpop.f32.mrf.mxu0  ;;  %v1518_v62 = vadd.f32 %v1517_v51, %v1516_v56  ;;  %v1619_v26 = vadd.f32 %v1618_v58, %v1617_v24  ;;  %v1622_v61 = vsel %vm1449_vm2, %v1572_v44, 0.0  ;;  %v1575_v2 = vmul.f32 %v1439_v52, %v1439_v52 }
 0x13c   : > { %1470 = vst.msk [vmem:[%s2776_s30 + $0xa0] sm:$0xff] %vm1449_vm2, %v1437_v57  ;;  %v1573_v63 = vmul.f32 %v1437_v57, %v1437_v57  ;;  %v1440_v0 = vadd.f32 %v2771_v37, %v1401_v3  ;;  %v1399_v1 = vadd.f32 %v1334_v55, %v1006_v59  ;;  %v1027_v18 = vadd.f32 %v2149_v54, %v2736_v19 }
 0x13d   : > { %v1018_v28 = vpop.f32.mrf.mxu1  ;;  %v1347_v7 = vpop.f32.mrf.mxu0  ;;  %v1621_v17 = vadd.f32 %v1620_v15, %v1619_v26  ;;  %v1520_v6 = vadd.f32 %v1519_v60, %v1518_v62  ;;  %v1521_v20 = vsel %vm1449_vm2, %v1437_v57, 0.0  ;;  %v1525_v47 = vsel %vm1449_vm2, %v1439_v52, 0.0 }
 0x13e   : > { %v1019_v8 = vadd.f32 %v1018_v28, %v2741_v21  ;;  %v1624_v10 = vsel %vm1449_vm2, %v1573_v63, 0.0  ;;  %1473 = vst.msk [vmem:[%s2776_s30 + $0xb8] sm:$0xff] %vm1449_vm2, %v1440_v0  ;;  %v1438_v35 = vadd.f32 %v2771_v37, %v1399_v1  ;;  %v1404_v36 = vadd.f32 %v2191_v5, %v1027_v18 }
 0x13f   : > { %v2150_v38 = vpop.f32.mrf.mxu1  ;;  %v2192_v4 = vpop.f32.mrf.mxu0  ;;  %v1522_v19 = vadd.f32 %v1521_v20, %v1520_v6  ;;  %v1623_v30 = vadd.f32 %v1622_v61, %v1621_v17  ;;  %v1576_v41 = vmul.f32 %v1440_v0, %v1440_v0  ;;  %v1628_v50 = vsel %vm1449_vm2, %v1575_v2, 0.0 }
 0x140   : > { %v1402_v39 = vadd.f32 %v1347_v7, %v1019_v8  ;;  %v1030_v40 = vadd.f32 %v2150_v38, %v2745_v23  ;;  %1471 = vst.msk [vmem:[%s2776_s30 + $0xa8] sm:$0xff] %vm1449_vm2, %v1438_v35  ;;  %v1523_v21 = vsel %vm1449_vm2, %v1438_v35, 0.0  ;;  %v1574_v14 = vmul.f32 %v1438_v35, %v1438_v35 }
 0x141   : > { %v1443_v9 = vadd.f32 %v2771_v37, %v1404_v36  ;;  %v1021_v22 = vpop.f32.mrf.mxu1  ;;  %v1350_v42 = vpop.f32.mrf.mxu0  ;;  %v1625_v43 = vadd.f32 %v1624_v10, %v1623_v30  ;;  %v1524_v45 = vadd.f32 %v1523_v21, %v1522_v19  ;;  %v1527_v32 = vsel %vm1449_vm2, %v1440_v0, 0.0 }
 0x142   : > { %v1441_v34 = vadd.f32 %v2771_v37, %v1402_v39  ;;  %v1405_v46 = vadd.f32 %v2192_v4, %v1030_v40  ;;  %v1626_v23 = vsel %vm1449_vm2, %v1574_v14, 0.0  ;;  %v1022_v48 = vadd.f32 %v1021_v22, %v2749_v25 }
 0x143   : > { %1476 = vst.msk [vmem:[%s2776_s30 + $0xd0] sm:$0xff] %vm1449_vm2, %v1443_v9  ;;  %v2153_v49 = vpop.f32.mrf.mxu1  ;;  %v2195_v11 = vpop.f32.mrf.mxu0  ;;  %v1526_v12 = vadd.f32 %v1525_v47, %v1524_v45  ;;  %v1627_v44 = vadd.f32 %v1626_v23, %v1625_v43  ;;  %v1630_v25 = vsel %vm1449_vm2, %v1576_v41, 0.0  ;;  %v1579_v51 = vmul.f32 %v1443_v9, %v1443_v9 }
 0x144   : > { %1474 = vst.msk [vmem:[%s2776_s30 + $0xc0] sm:$0xff] %vm1449_vm2, %v1441_v34  ;;  %v1577_v13 = vmul.f32 %v1441_v34, %v1441_v34  ;;  %v1444_v16 = vadd.f32 %v2771_v37, %v1405_v46  ;;  %v1403_v52 = vadd.f32 %v1350_v42, %v1022_v48  ;;  %v1043_v53 = vadd.f32 %v2153_v49, %v2753_v27 }
 0x145   : > { %v1034_v55 = vpop.f32.mrf.mxu1  ;;  %v1363_v24 = vpop.f32.mrf.mxu0  ;;  %v1629_v56 = vadd.f32 %v1628_v50, %v1627_v44  ;;  %v1528_v57 = vadd.f32 %v1527_v32, %v1526_v12  ;;  %v1529_v15 = vsel %vm1449_vm2, %v1441_v34, 0.0  ;;  %v1533_v2 = vsel %vm1449_vm2, %v1443_v9, 0.0 }
 0x146   : > { %v1035_v3 = vadd.f32 %v1034_v55, %v2757_v29  ;;  %1477 = vst.msk [vmem:[%s2776_s30 + $0xd8] sm:$0xff] %vm1449_vm2, %v1444_v16  ;;  %v1442_v58 = vadd.f32 %v2771_v37, %v1403_v52  ;;  %v1408_v59 = vadd.f32 %v2195_v11, %v1043_v53  ;;  %v1632_v63 = vsel %vm1449_vm2, %v1577_v13, 0.0 }
 0x147   : > { %v2154_v54 = vpop.f32.mrf.mxu1  ;;  %v1530_v5 = vadd.f32 %v1529_v15, %v1528_v57  ;;  %v1631_v27 = vadd.f32 %v1630_v25, %v1629_v56  ;;  %v2196_v26 = vpop.f32.mrf.mxu0  ;;  %v1636_v20 = vsel %vm1449_vm2, %v1579_v51, 0.0  ;;  %v1535_v38 = vsel %vm1449_vm2, %v1444_v16, 0.0 }
 0x148   : > { %v1406_v60 = vadd.f32 %v1363_v24, %v1035_v3  ;;  %v1046_v62 = vadd.f32 %v2154_v54, %v2762_v31  ;;  %1475 = vst.msk [vmem:[%s2776_s30 + $0xc8] sm:$0xff] %vm1449_vm2, %v1442_v58  ;;  %v1531_v29 = vsel %vm1449_vm2, %v1442_v58, 0.0  ;;  %v1578_v61 = vmul.f32 %v1442_v58, %v1442_v58 }
 0x149   : > { %v1447_v0 = vadd.f32 %v2771_v37, %v1408_v59  ;;  %v1037_v1 = vpop.f32.mrf.mxu1  ;;  %v1633_v18 = vadd.f32 %v1632_v63, %v1631_v27  ;;  %v1532_v28 = vadd.f32 %v1531_v29, %v1530_v5  ;;  %v1580_v31 = vmul.f32 %v1444_v16, %v1444_v16  ;;  %v1366_v36 = vpop.f32.mrf.mxu0 }
 0x14a   : > { %v1445_v7 = vadd.f32 %v2771_v37, %v1406_v60  ;;  %v1409_v17 = vadd.f32 %v2196_v26, %v1046_v62  ;;  %v1634_v6 = vsel %vm1449_vm2, %v1578_v61, 0.0  ;;  %v1038_v8 = vadd.f32 %v1037_v1, %v2766_v33 }
 0x14b   : > { %1480 = vst.msk [vmem:[%s2776_s30 + $0xf0] sm:$0xff] %vm1449_vm2, %v1447_v0  ;;  %v1534_v10 = vadd.f32 %v1533_v2, %v1532_v28  ;;  %v1635_v35 = vadd.f32 %v1634_v6, %v1633_v18  ;;  %v1638_v41 = vsel %vm1449_vm2, %v1580_v31, 0.0  ;;  %v1583_v22 = vmul.f32 %v1447_v0, %v1447_v0 }
 0x14c   : > { %1478 = vst.msk [vmem:[%s2776_s30 + $0xe0] sm:$0xff] %vm1449_vm2, %v1445_v7  ;;  %v1581_v4 = vmul.f32 %v1445_v7, %v1445_v7  ;;  %v1448_v19 = vadd.f32 %v2771_v37, %v1409_v17  ;;  %v1407_v30 = vadd.f32 %v1366_v36, %v1038_v8  ;;  %v1537_v33 = vsel %vm1449_vm2, %v1445_v7, 0.0 }
 0x14d   : > { %v1637_v39 = vadd.f32 %v1636_v20, %v1635_v35  ;;  %v1536_v40 = vadd.f32 %v1535_v38, %v1534_v10  ;;  %v1541_v47 = vsel %vm1449_vm2, %v1447_v0, 0.0  ;;  %v1644_v11 = vsel %vm1449_vm2, %v1583_v22, 0.0 }
 0x14e   : > { %1481 = vst.msk [vmem:[%s2776_s30 + $0xf8] sm:$0xff] %vm1449_vm2, %v1448_v19  ;;  %v1446_v21 = vadd.f32 %v2771_v37, %v1407_v30  ;;  %v1640_v42 = vsel %vm1449_vm2, %v1581_v4, 0.0  ;;  %v1584_v23 = vmul.f32 %v1448_v19, %v1448_v19  ;;  %v1543_v50 = vsel %vm1449_vm2, %v1448_v19, 0.0 }
 0x14f   : > { %v1538_v14 = vadd.f32 %v1537_v33, %v1536_v40  ;;  %v1639_v9 = vadd.f32 %v1638_v41, %v1637_v39 }
 0x150   : > { %1479 = vst.msk [vmem:[%s2776_s30 + $0xe8] sm:$0xff] %vm1449_vm2, %v1446_v21  ;;  %v1539_v43 = vsel %vm1449_vm2, %v1446_v21, 0.0  ;;  %v1582_v45 = vmul.f32 %v1446_v21, %v1446_v21  ;;  %v1646_v44 = vsel %vm1449_vm2, %v1584_v23, 0.0  ;;  %s2350_s30 = sshll.u32 %s2440_s21, 4  ;;  %s2351_s30 = int_to_ptr.vmem [resolvable:$false] %s2350_s30 }
 0x151   : > { %v1641_v34 = vadd.f32 %v1640_v42, %v1639_v9  ;;  %v1540_v46 = vadd.f32 %v1539_v43, %v1538_v14  ;;  %s2352_s13 = scalar_lea.vmem %s2351_s30, 64  ;;  %p2353_p4 = scmp.lt.s32.totalorder %s1686_s8, %s2351_s30 }
 0x152   : > { %v1642_v48 = vsel %vm1449_vm2, %v1582_v45, 0.0  ;;  %p2354_p5 = scmp.lt.s32.totalorder %s2352_s13, %s2346_s27 }
 0x153   : > { %v1542_v37 = vadd.f32 %v1541_v47, %v1540_v46  ;;  %v1643_v49 = vadd.f32 %v1642_v48, %v1641_v34 }
 0x154   : > { %p2355_p6 = por %p2354_p5, %p2353_p4 }
 0x155   : > { %v1544_v32 = vadd.f32 %v1543_v50, %v1542_v37  ;;  %v1645_v12 = vadd.f32 %v1644_v11, %v1643_v49 }
 0x156   : > { %p2356_p7 = pnand %p2355_p6, %p2349_p2 }
 0x157   : > { %v1545_v13 = vrot.slane %v1544_v32, 4  ;;  %v1647_v16 = vadd.f32 %v1646_v44, %v1645_v12 }
 0x159   : > { %v1546_v52 = vadd.f32 %v1545_v13, %v1544_v32  ;;  %v1648_v53 = vrot.slane %v1647_v16, 4 }
 0x15b   : > { %v1547_v55 = vrot.slane %v1546_v52, 2  ;;  %v1649_v24 = vadd.f32 %v1648_v53, %v1647_v16 }
 0x15d   : > { %v1548_v25 = vadd.f32 %v1547_v55, %v1546_v52  ;;  %v1650_v56 = vrot.slane %v1649_v24, 2 }
 0x15f   : > { %v1549_v57 = vrot.slane %v1548_v25, 1  ;;  %v1651_v3 = vadd.f32 %v1650_v56, %v1649_v24 }
 0x161   : > { %v1550_v51 = vadd.f32 %v1549_v57, %v1548_v25  ;;  %v1652_v15 = vrot.slane %v1651_v3, 1 }
 0x163   : > { %1552 = vst.msk [vmem:[%s261_s17] sm:$0x1] %vm1551_vm3, %v1550_v51  ;;  %v1653_v58 = vadd.f32 %v1652_v15, %v1651_v3 }
 0x165   : > { %1654 = vst.msk [vmem:[%s261_s17 + $0x1] sm:$0x1] %vm1551_vm3, %v1653_v58 }
 0x166   : > { %2359 = shalt.err (!%p2356_p7)
}
 0x167   : > { %s2360_s16 = scalar_lea.hbm %s1683_s22, 32  ;;  %s2364_s15 = scalar_lea.hbm %s3015_s5, 256 }
 0x168   : > { %p2361_p9 = scmp.ne.s32.totalorder %s1683_s22, %s2360_s16  ;;  %p2365_p12 = scmp.lt.s32.totalorder %s1683_s22, %s3015_s5 }
 0x169   : > { %p2366_p13 = scmp.lt.s32.totalorder %s2364_s15, %s2360_s16 }
 0x16a   : > { %p2362_p10 = pnand %p2361_p9, %p2522_p3 }
 0x16b   : > { %p2367_p0 = por %p2366_p13, %p2365_p12 }
 0x16c   : > { %p2363_p11 = pneg %p2362_p10 }
 0x16e   : > { %p2368_p1 = pnand %p2367_p0, %p2363_p11 }
 0x170   : > { %2371 = shalt.err (!%p2368_p1)
}
 0x171   : > { %2212 = dma.vmem_to_hbm [thread:$0]  (%p2522_p3), %s1686_s8, 32, %s1683_s22, %s1666_s26  }
 0x172 PF: > { %p2218_p2 = scmp.ge.s32.totalorder %s2438_s25, 2  ;;  %s1710_s10 = sand.u32 1, %s2410_s18  }
 0x173   : > { %s1711_s27 = scalar_lea.sflag [#allocation3], %s1710_s10 }
 0x174   : > { %p2215_p4 = pnand %p2218_p2, %p2531_p8 }
 0x176   : > { %p2216_p5 = pneg %p2215_p4 }
 0x178   : > { %2405 = dma.done.wait (%p2216_p5), %s1711_s27, 32  }
 0x179   : > { %2407 = vsyncadd (%p2216_p5), %s1711_s27, 4294967264  ;;  %s19_s25 = sadd.s32 1, %s2438_s25   ;;  %s3018_s18 = smov %s2414_s19 }
 0x17a   : > { %p16_p6 = scmp.ge.s32.totalorder %s19_s25, 10   ;;  %s3019_s19 = smov %s2418_s20 }
 0x17b   : > { %s3020_s20 = smov %s2540_s11  ;;  %s3021_s21 = smov %s2430_s23 }
 0x17c   : > { %s3022_s22 = smov %s2434_s24  ;;  %s3023_s23 = smov %s3026_s28 }
 0x17d   : > { %s3024_s24 = smov %s3030_s29  ;;  %18 = sbr.rel (!%p16_p6) target bundleno = 5 (0x5), region = 91 }
 0x182   :  { %1716 = vsyncpa [#allocation3], 1 }
 0x183   :  { %1718 = vsyncpa [#allocation3 + $0x1], 1 }

// kernel: discriminator_forward.9
= control target key start
LH: loop header
LB: loop body
LE: loop exit
PB: predicated region body
PF: predicated region fallthrough
CT: control target
= control target key end

     0   :  { %11 = vsyncpa [#allocation3], 0  ;;  %s2799_s0 = inlined_call_operand.vmem [shape: bf16[2,33,32,9], index: 0, kind: input, shape index: {}]   ;;  %s2800_s1 = inlined_call_operand.vmem [shape: bf16[2,33,32,9], index: 1, kind: input, shape index: {}]   ;;  %s2801_s2 = inlined_call_operand.vmem [shape: bf16[3,9,32], index: 2, kind: input, shape index: {}]   ;;  %s2802_s3 = inlined_call_operand.vmem [shape: f32[1,32], index: 3, kind: input, shape index: {}]   ;;  %s2803_s4 = inlined_call_operand.vmem [shape: f32[2,32,32,32], index: 4, kind: output, shape index: {0}]   ;;  %s2804_s5 = inlined_call_operand.hbm [shape: f32[2,4,2,32], index: 5, kind: output, shape index: {1}]  }
   0x1   :  { %13 = vsyncpa [#allocation3 + $0x1], 0  ;;  %s2303_s18 = smov 0   ;;  %s2305_s19 = smov 0  }
   0x2   :  { %s2307_s20 = smov 0   ;;  %s2309_s21 = smov 0  }
   0x3   :  { %s2311_s22 = smov 0   ;;  %s2313_s23 = smov 0  }
   0x4   :  { %s2315_s24 = smov 0   ;;  %s2317_s25 = smov 0  }
   0x5 LB: > { %s1735_s26 = sadd.s32 4294967295, %s2269_s25   ;;  %s1736_s27 = sadd.s32 4294967294, %s2269_s25   ;;  %s2269_s25 = sphi %s2317_s25, %s19_s25   ;;  %s2265_s24 = sphi %s2315_s24, %s2813_s24   ;;  %s2261_s23 = sphi %s2313_s23, %s2812_s23   ;;  %s2257_s22 = sphi %s2311_s22, %s2811_s22   ;;  %s2253_s21 = sphi %s2309_s21, %s2810_s21   ;;  %s2249_s20 = sphi %s2307_s20, %s2809_s20   ;;  %s2245_s19 = sphi %s2305_s19, %s2808_s19   ;;  %s2241_s18 = sphi %s2303_s18, %s2807_s18  }
   0x6   : > { %s28_s28 = sadd.s32 1, %s2261_s23  ;;  %s31_s29 = sadd.s32 1, %s2265_s24 }
   0x7   : > { %p29_p0 = scmp.ge.s32.totalorder %s28_s28, 4  ;;  %p172_p1 = scmp.ne.s32.totalorder %s2249_s20, %s2245_s19 }
   0x8   : > { %p173_p2 = scmp.eq.s32.totalorder %s1735_s26, 7  ;;  %p178_p5 = scmp.ne.s32.totalorder %s2245_s19, %s2241_s18 }
   0x9   : > { %s2815_s28 = smov (%p29_p0, %s28_s28), 0  ;;  %s2817_s29 = smov (!%p29_p0, %s31_s29), %s2265_s24 }
   0xa   : > { %s158_s30 = ssub.s32 %s2261_s23, %s2815_s28  ;;  %p2354_p3 = por %p173_p2, %p172_p1 }
   0xb   : > { %p33_p4 = scmp.ge.s32.totalorder %s2817_s29, 2  ;;  %p179_p6 = scmp.eq.s32.totalorder %s1736_s27, 7 }
   0xc   : > { %p1739_p7 = scmp.ge.s32.totalorder %s2269_s25, 1  ;;  %p219_p9 = scmp.lt.s32.totalorder %s2269_s25, 9 }
   0xd   : > { %s2819_s29 = smov (%p33_p4, %s2817_s29), 0  ;;  %p2363_p8 = por %p179_p6, %p178_p5 }
   0xe   : > { %s157_s8 = ssub.s32 %s2265_s24, %s2819_s29  ;;  %s162_s9 = sadd.s32 1, %s2249_s20 }
   0xf   : > { %s159_s10 = sor.u32 %s158_s30, %s157_s8  ;;  %p220_p10 = pnand %p1739_p7, %p219_p9 }
  0x10   : > { %p160_p11 = scmp.eq.s32.totalorder %s159_s10, 0  ;;  %p262_p12 = scmp.lt.s32.totalorder (!%p220_p10), %s2257_s22, 1 }
  0x11   : > { %223 = sbr.rel (%p220_p10) target bundleno = 358 (0x166), region = 36  ;;  %s1895_s30 = sshll.u32 (!%p220_p10), %s2253_s21, 7 }
  0x12   : > { %s2372_s11 = scalar_select %p160_p11, %s2249_s20, %s162_s9  }
  0x13   : > { %s1743_s26 = sshll.u32 (!%p220_p10), %s2253_s21, 3 }
  0x14   : > { %p275_p13 = scmp.lt.s32.totalorder (!%p220_p10), %s1743_s26, 31 }
  0x16   : > { %v2126_v0 = vld [vmem:[%s2801_s2 + $0x8] sm:$0x1f]   ;;  %vm529_vm0 = vcmask 1043456   ;;  %vm530_vm1 = vcmask 1044480   ;;  %v2271_v1 = vmov 65535   ;;  %s2379_s14 = scalar_select %p262_p12, %s2257_s22, 1 }
  0x17   : > { %v531_v2 = vsel %vm529_vm0, 4294967295, %v2271_v1  ;;  %v2129_v4 = vld [vmem:[%s2801_s2] sm:$0x1f]   ;;  %v2132_v6 = vld [vmem:[%s2801_s2 + $0x10] sm:$0x1f]   ;;  %vm480_vm2 = vcmask 72704  }
  0x18   : > { %v532_v3 = vsel %vm530_vm1, %v531_v2, 0  ;;  %s2053_s27 = smul.u32 528, %s2379_s14  ;;  %s2821_s26 = smov (!%p275_p13, %s1743_s26), 31  ;;  %vm1365_vm3 = vcmask 261120   ;;  %vm1467_vm4 = vcmask 253952  }
  0x19   : > { %v534_v5 = vand.u32 %v2126_v0, %v532_v3  ;;  %v831_v7 = vand.u32 %v2129_v4, %v532_v3  ;;  %v1131_v8 = vand.u32 %v2132_v6, %v532_v3 }
  0x1a   : > { %s271_s10 = scalar_lea.vmem %s2800_s1, %s2053_s27  ;;  %s266_s16 = scalar_lea.vmem %s2799_s0, %s2053_s27 }
  0x1b   : > { %2051 = vmatprep.subr.bf16.mxu1 %v534_v5  ;;  %1949 = vmatprep.subr.bf16.mxu0 %v534_v5  ;;  %s2396_s12 = scalar_lea.vmem %s271_s10, %s1895_s30  ;;  %s2425_s17 = scalar_lea.vmem %s266_s16, %s1895_s30 }
  0x1c   : > { %2052 = vmatpush3.bf16.msra.mxu1 %v534_v5  ;;  %1950 = vmatpush3.bf16.msra.mxu0 %v534_v5  ;;  %v2127_v9 = vld [vmem:[%s2396_s12] sm:$0xff]   ;;  %v2130_v11 = vld [vmem:[%s2396_s12 + $0x8] sm:$0xff]   ;;  %v2133_v13 = vld [vmem:[%s2396_s12 + $0x10] sm:$0xff]   ;;  %s1744_s27 = sshll.u32 %s2821_s26, 2  ;;  %s1745_s30 = sshll.u32 %s2379_s14, 7 }
  0x1d   : > { %1983 = vmatprep.subr.bf16.mxu1 %v831_v7  ;;  %2017 = vmatprep.subr.bf16.mxu0 %v1131_v8  ;;  %v2128_v10 = vld [vmem:[%s2396_s12 + $0x40] sm:$0xff]   ;;  %v2131_v12 = vld [vmem:[%s2396_s12 + $0x48] sm:$0xff]   ;;  %v2134_v14 = vld [vmem:[%s2396_s12 + $0x50] sm:$0xff]   ;;  %s279_s8 = sadd.s32 %s1745_s30, %s1744_s27  ;;  %s259_s16 = sand.u32 1, %s2245_s19  }
  0x1e   : > { %1951 = vmatprep.mubr.msk.bf16.mxu0 %vm480_vm2, %v2127_v9  ;;  %1967 = vmatprep.mubr.msk.bf16.mxu1 %vm480_vm2, %v2128_v10  ;;  %v2135_v15 = vld [vmem:[%s2396_s12 + $0x18] sm:$0xff]   ;;  %v2137_v17 = vld [vmem:[%s2396_s12 + $0x20] sm:$0xff]   ;;  %v2139_v19 = vld [vmem:[%s2396_s12 + $0x28] sm:$0xff]   ;;  %s1746_s9 = sshll.u32 %s279_s8, 3  ;;  %s1890_s26 = sshll.u32 %s2257_s22, 2 }
  0x1f   : > { %1952 = vmatmul.mubr.msk.bf16.vlgmr.msra.gmra.mxu0 %vm480_vm2, %v2130_v11  ;;  %1968 = vmatmul.mubr.msk.bf16.vlgmr.msra.gmra.mxu1 %vm480_vm2, %v2131_v12  ;;  %v2136_v16 = vld [vmem:[%s2396_s12 + $0x58] sm:$0xff]   ;;  %v2138_v18 = vld [vmem:[%s2396_s12 + $0x60] sm:$0xff]   ;;  %v2140_v20 = vld [vmem:[%s2396_s12 + $0x68] sm:$0xff]   ;;  %s2565_s15 = scalar_lea.vmem %s2803_s4, %s1746_s9  ;;  %s1597_s27 = sadd.s32 %s2253_s21, %s1890_s26 }
  0x20   : > { %2018 = vmatpush3.bf16.msra.mxu0 %v1131_v8  ;;  %1984 = vmatpush3.bf16.msra.mxu1 %v831_v7  ;;  %v2141_v21 = vld [vmem:[%s2396_s12 + $0x30] sm:$0xff]   ;;  %v2143_v23 = vld [vmem:[%s2396_s12 + $0x38] sm:$0xff]   ;;  %v2145_v26 = vld [vmem:[%s2425_s17] sm:$0xff]   ;;  %s1891_s30 = sshll.u32 %s1597_s27, 5  ;;  %s1582_s14 = scalar_lea.sflag [#allocation3], %s259_s16 }
  0x21   : > { %1955 = vmatprep.mubr.msk.bf16.mxu0 %vm480_vm2, %v2133_v13  ;;  %1971 = vmatprep.mubr.msk.bf16.mxu1 %vm480_vm2, %v2134_v14  ;;  %v2142_v22 = vld [vmem:[%s2396_s12 + $0x70] sm:$0xff]   ;;  %v2144_v24 = vld [vmem:[%s2396_s12 + $0x78] sm:$0xff]   ;;  %v2147_v27 = vld [vmem:[%s2425_s17 + $0x8] sm:$0xff]   ;;  %s1599_s22 = scalar_lea.hbm %s2804_s5, %s1891_s30  ;;  %s2272_s21 = smov [#allocation2]  }
  0x22   : > { %v2146_v25 = vld [vmem:[%s2425_s17 + $0x10] sm:$0xff]   ;;  %v2148_v28 = vld [vmem:[%s2425_s17 + $0x18] sm:$0xff]   ;;  %v2150_v29 = vld [vmem:[%s2425_s17 + $0x20] sm:$0xff]  }
  0x23   : > { %v2149_v30 = vld [vmem:[%s2425_s17 + $0x10] sm:$0xff]   ;;  %v2151_v31 = vld [vmem:[%s2425_s17 + $0x18] sm:$0xff]   ;;  %v2152_v32 = vld [vmem:[%s2425_s17 + $0x28] sm:$0xff]  }
  0x24   : > { %v2154_v33 = vld [vmem:[%s2425_s17 + $0x30] sm:$0xff]   ;;  %v2153_v34 = vld [vmem:[%s2425_s17 + $0x20] sm:$0xff]   ;;  %v2156_v35 = vld [vmem:[%s2425_s17 + $0x38] sm:$0xff]  }
  0x25   : > { %v2155_v36 = vld [vmem:[%s2425_s17 + $0x28] sm:$0xff]   ;;  %v2158_v37 = vld [vmem:[%s2425_s17 + $0x40] sm:$0xff]   ;;  %v2157_v38 = vld [vmem:[%s2425_s17 + $0x30] sm:$0xff]  }
  0x26   : > { %v2160_v39 = vld [vmem:[%s2425_s17 + $0x48] sm:$0xff]   ;;  %v2159_v40 = vld [vmem:[%s2425_s17 + $0x38] sm:$0xff]   ;;  %v2162_v41 = vld [vmem:[%s2425_s17 + $0x50] sm:$0xff]  }
  0x27   : > { %1956 = vmatmul.mubr.msk.bf16.gmra.mxu0 %vm480_vm2, %v2135_v15  ;;  %1972 = vmatmul.mubr.msk.bf16.gmra.mxu1 %vm480_vm2, %v2136_v16  ;;  %v2161_v42 = vld [vmem:[%s2425_s17 + $0x40] sm:$0xff]   ;;  %v2164_v43 = vld [vmem:[%s2425_s17 + $0x58] sm:$0xff]   ;;  %v2163_v44 = vld [vmem:[%s2425_s17 + $0x48] sm:$0xff]  }
  0x28   : > { %1959 = vmatprep.mubr.msk.bf16.mxu0 %vm480_vm2, %v2137_v17  ;;  %1975 = vmatprep.mubr.msk.bf16.mxu1 %vm480_vm2, %v2138_v18  ;;  %v2166_v45 = vld [vmem:[%s2425_s17 + $0x60] sm:$0xff]   ;;  %v2165_v46 = vld [vmem:[%s2425_s17 + $0x50] sm:$0xff]   ;;  %v2168_v47 = vld [vmem:[%s2425_s17 + $0x68] sm:$0xff]  }
  0x29   : > { %v2167_v48 = vld [vmem:[%s2425_s17 + $0x58] sm:$0xff]   ;;  %v2170_v49 = vld [vmem:[%s2425_s17 + $0x70] sm:$0xff]   ;;  %v2169_v50 = vld [vmem:[%s2425_s17 + $0x60] sm:$0xff]  }
  0x2a   : > { %v2172_v51 = vld [vmem:[%s2425_s17 + $0x78] sm:$0xff]   ;;  %v2171_v52 = vld [vmem:[%s2425_s17 + $0x68] sm:$0xff]   ;;  %v2174_v53 = vld [vmem:[%s2425_s17 + $0x80] sm:$0xff]  }
  0x2b   : > { %v2173_v54 = vld [vmem:[%s2425_s17 + $0x70] sm:$0xff]   ;;  %v2176_v55 = vld [vmem:[%s2425_s17 + $0x88] sm:$0xff]   ;;  %v2175_v56 = vld [vmem:[%s2425_s17 + $0x78] sm:$0xff]   ;;  %s1740_s17 = sshll.u32 %s259_s16, 1 }
  0x2c   : > { %s261_s8 = scalar_lea.vmem [#allocation2], %s1740_s17 }
  0x2d   : > { %s1601_s9 = sshll.u32 %s261_s8, 4  ;;  %s1602_s9 = int_to_ptr.vmem [resolvable:$true] %s1601_s9 }
  0x2e   : > { %s2177_s13 = scalar_lea.vmem %s1602_s9, 32 }
  0x2f   : > { %1960 = vmatmul.mubr.msk.bf16.gmra.mxu0 %vm480_vm2, %v2139_v19  ;;  %1976 = vmatmul.mubr.msk.bf16.gmra.mxu1 %vm480_vm2, %v2140_v20  ;;  %p2178_p0 = scmp.ne.s32.totalorder %s1602_s9, %s2177_s13 }
  0x30   : > { %1963 = vmatprep.mubr.msk.bf16.mxu0 %vm480_vm2, %v2141_v21  ;;  %1979 = vmatprep.mubr.msk.bf16.mxu1 %vm480_vm2, %v2142_v22 }
  0x31   : > { %p2179_p1 = pnand %p2178_p0, %p2354_p3 }
  0x33   : > { %p2180_p2 = pneg %p2179_p1 }
  0x37   : > { %1964 = vmatmul.mubr.msk.bf16.gmra.mxu0 %vm480_vm2, %v2143_v23  ;;  %1980 = vmatmul.mubr.msk.bf16.gmra.mxu1 %vm480_vm2, %v2144_v24 }
  0x38   : > { %2019 = vmatprep.mubr.msk.bf16.mxu0 %vm480_vm2, %v2146_v25  ;;  %1985 = vmatprep.mubr.msk.bf16.mxu1 %vm480_vm2, %v2145_v26 }
  0x3f   : > { %2020 = vmatmul.mubr.msk.bf16.vlgmr.msra.gmra.mxu0 %vm480_vm2, %v2148_v28  ;;  %1986 = vmatmul.mubr.msk.bf16.vlgmr.msra.gmra.mxu1 %vm480_vm2, %v2147_v27 }
  0x40   : > { %2023 = vmatprep.mubr.msk.bf16.mxu0 %vm480_vm2, %v2150_v29  ;;  %1989 = vmatprep.mubr.msk.bf16.mxu1 %vm480_vm2, %v2149_v30  ;;  %v2560_v29 = vld [vmem:[%s2802_s3] ss:$0 sm:$0xff] }
  0x47   : > { %2024 = vmatmul.mubr.msk.bf16.gmra.mxu0 %vm480_vm2, %v2152_v32  ;;  %1990 = vmatmul.mubr.msk.bf16.gmra.mxu1 %vm480_vm2, %v2151_v31 }
  0x48   : > { %2027 = vmatprep.mubr.msk.bf16.mxu0 %vm480_vm2, %v2154_v33  ;;  %1993 = vmatprep.mubr.msk.bf16.mxu1 %vm480_vm2, %v2153_v34 }
  0x4f   : > { %2028 = vmatmul.mubr.msk.bf16.gmra.mxu0 %vm480_vm2, %v2156_v35  ;;  %1994 = vmatmul.mubr.msk.bf16.gmra.mxu1 %vm480_vm2, %v2155_v36 }
  0x50   : > { %2031 = vmatprep.mubr.msk.bf16.mxu0 %vm480_vm2, %v2158_v37  ;;  %1997 = vmatprep.mubr.msk.bf16.mxu1 %vm480_vm2, %v2157_v38 }
  0x57   : > { %2032 = vmatmul.mubr.msk.bf16.gmra.mxu0 %vm480_vm2, %v2160_v39  ;;  %1998 = vmatmul.mubr.msk.bf16.gmra.mxu1 %vm480_vm2, %v2159_v40 }
  0x58   : > { %2035 = vmatprep.mubr.msk.bf16.mxu0 %vm480_vm2, %v2162_v41  ;;  %2001 = vmatprep.mubr.msk.bf16.mxu1 %vm480_vm2, %v2161_v42 }
  0x5f   : > { %2036 = vmatmul.mubr.msk.bf16.gmra.mxu0 %vm480_vm2, %v2164_v43  ;;  %2002 = vmatmul.mubr.msk.bf16.gmra.mxu1 %vm480_vm2, %v2163_v44 }
  0x60   : > { %2039 = vmatprep.mubr.msk.bf16.mxu0 %vm480_vm2, %v2166_v45  ;;  %2005 = vmatprep.mubr.msk.bf16.mxu1 %vm480_vm2, %v2165_v46 }
  0x67   : > { %2040 = vmatmul.mubr.msk.bf16.gmra.mxu0 %vm480_vm2, %v2168_v47  ;;  %2006 = vmatmul.mubr.msk.bf16.gmra.mxu1 %vm480_vm2, %v2167_v48 }
  0x68   : > { %2043 = vmatprep.mubr.msk.bf16.mxu0 %vm480_vm2, %v2170_v49  ;;  %2009 = vmatprep.mubr.msk.bf16.mxu1 %vm480_vm2, %v2169_v50 }
  0x6f   : > { %2044 = vmatmul.mubr.msk.bf16.gmra.mxu0 %vm480_vm2, %v2172_v51  ;;  %2010 = vmatmul.mubr.msk.bf16.gmra.mxu1 %vm480_vm2, %v2171_v52 }
  0x70   : > { %2047 = vmatprep.mubr.msk.bf16.mxu0 %vm480_vm2, %v2174_v53  ;;  %2013 = vmatprep.mubr.msk.bf16.mxu1 %vm480_vm2, %v2173_v54 }
  0x77   : > { %2048 = vmatmul.mubr.msk.bf16.gmra.mxu0 %vm480_vm2, %v2176_v55  ;;  %2014 = vmatmul.mubr.msk.bf16.gmra.mxu1 %vm480_vm2, %v2175_v56 }
  0xdf   : > { %v1953_v57 = vpop.f32.mrf.mxu0  ;;  %v2503_v58 = vpop.f32.mrf.mxu1 }
  0xe1   : > { %v570_v59 = vpop.f32.mrf.mxu0  ;;  %v2505_v60 = vpop.f32.mrf.mxu1 }
  0xe3   : > { %v1954_v61 = vpop.f32.mrf.mxu0  ;;  %v2507_v62 = vpop.f32.mrf.mxu1 }
  0xe5   : > { %v573_v63 = vpop.f32.mrf.mxu0  ;;  %v2509_v0 = vpop.f32.mrf.mxu1 }
  0xe7   : > { %v1957_v1 = vpop.f32.mrf.mxu0  ;;  %v2511_v2 = vpop.f32.mrf.mxu1 }
  0xe9   : > { %v586_v3 = vpop.f32.mrf.mxu0  ;;  %v2513_v4 = vpop.f32.mrf.mxu1 }
  0xeb   : > { %v2515_v5 = vpop.f32.mrf.mxu0  ;;  %v2517_v6 = vpop.f32.mrf.mxu1 }
  0xed   : > { %v2519_v7 = vpop.f32.mrf.mxu0  ;;  %v2521_v8 = vpop.f32.mrf.mxu1 }
  0xef   : > { %v2523_v9 = vpop.f32.mrf.mxu0  ;;  %v2525_v10 = vpop.f32.mrf.mxu1 }
  0xf1   : > { %v2528_v11 = vpop.f32.mrf.mxu0  ;;  %v2530_v12 = vpop.f32.mrf.mxu1 }
  0xf3   : > { %v2532_v13 = vpop.f32.mrf.mxu0  ;;  %v2534_v14 = vpop.f32.mrf.mxu1 }
  0xf5   : > { %v2536_v15 = vpop.f32.mrf.mxu0  ;;  %v2538_v16 = vpop.f32.mrf.mxu1 }
  0xf7   : > { %v2540_v17 = vpop.f32.mrf.mxu0  ;;  %v2542_v18 = vpop.f32.mrf.mxu1 }
  0xf9   : > { %v2544_v19 = vpop.f32.mrf.mxu0  ;;  %v2546_v20 = vpop.f32.mrf.mxu1 }
  0xfb   : > { %v2548_v21 = vpop.f32.mrf.mxu0  ;;  %v2551_v22 = vpop.f32.mrf.mxu1 }
  0xfd   : > { %v2553_v23 = vpop.f32.mrf.mxu0  ;;  %v2555_v24 = vpop.f32.mrf.mxu1 }
  0xff   : > { %v2021_v25 = vpop.f32.mrf.mxu0  ;;  %v1987_v26 = vpop.f32.mrf.mxu1 }
 0x100   : > { %v876_v27 = vadd.f32 %v1987_v26, %v1953_v57 }
 0x101   : > { %v1167_v28 = vpop.f32.mrf.mxu0  ;;  %v867_v30 = vpop.f32.mrf.mxu1 }
 0x102   : > { %v1296_v31 = vadd.f32 %v2021_v25, %v876_v27  ;;  %v868_v32 = vadd.f32 %v867_v30, %v570_v59 }
 0x103   : > { %v2022_v33 = vpop.f32.mrf.mxu0  ;;  %v1988_v34 = vpop.f32.mrf.mxu1 }
 0x104   : > { %v1335_v35 = vadd.f32 %v2560_v29, %v1296_v31  ;;  %v1294_v36 = vadd.f32 %v1167_v28, %v868_v32  ;;  %v879_v37 = vadd.f32 %v1988_v34, %v1954_v61 }
 0x105   : > { %v1170_v38 = vpop.f32.mrf.mxu0  ;;  %v870_v39 = vpop.f32.mrf.mxu1 }
 0x106   : > { %1368 = vst.msk [vmem:[%s2565_s15 + $0x10] sm:$0xff] %vm1365_vm3, %v1335_v35  ;;  %v1333_v40 = vadd.f32 %v2560_v29, %v1294_v36  ;;  %v1297_v41 = vadd.f32 %v2022_v33, %v879_v37  ;;  %v871_v43 = vadd.f32 %v870_v39, %v573_v63  ;;  %v1471_v52 = vmul.f32 %v1335_v35, %v1335_v35 }
 0x107   : > { %v2025_v42 = vpop.f32.mrf.mxu0  ;;  %v1991_v44 = vpop.f32.mrf.mxu1 }
 0x108   : > { %1366 = vst.msk [vmem:[%s2565_s15] sm:$0xff] %vm1365_vm3, %v1333_v40  ;;  %v1336_v45 = vadd.f32 %v2560_v29, %v1297_v41  ;;  %v1295_v47 = vadd.f32 %v1170_v38, %v871_v43  ;;  %v892_v48 = vadd.f32 %v1991_v44, %v1957_v1  ;;  %v1469_v53 = vmul.f32 %v1333_v40, %v1333_v40 }
 0x109   : > { %v1183_v46 = vpop.f32.mrf.mxu0  ;;  %v883_v49 = vpop.f32.mrf.mxu1  ;;  %v1398_v57 = vsel %vm1365_vm3, %v1333_v40, 0.0  ;;  %v1504_v34 = vsel %vm1365_vm3, %v1471_v52, 0.0 }
 0x10a   : > { %1369 = vst.msk [vmem:[%s2565_s15 + $0x18] sm:$0xff] %vm1365_vm3, %v1336_v45  ;;  %v884_v50 = vadd.f32 %v883_v49, %v586_v3  ;;  %v1334_v54 = vadd.f32 %v2560_v29, %v1295_v47  ;;  %v1300_v55 = vadd.f32 %v2025_v42, %v892_v48  ;;  %v1472_v25 = vmul.f32 %v1336_v45, %v1336_v45 }
 0x10b   : > { %v2026_v51 = vpop.f32.mrf.mxu0  ;;  %v1992_v56 = vpop.f32.mrf.mxu1  ;;  %v1501_v36 = vsel %vm1365_vm3, %v1469_v53, 0.0  ;;  %v1403_v39 = vsel %vm1365_vm3, %v1336_v45, 0.0 }
 0x10c   : > { %v1298_v59 = vadd.f32 %v1183_v46, %v884_v50  ;;  %v895_v61 = vadd.f32 %v1992_v56, %v2515_v5  ;;  %1367 = vst.msk [vmem:[%s2565_s15 + $0x8] sm:$0xff] %vm1365_vm3, %v1334_v54  ;;  %v1399_v1 = vsel %vm1365_vm3, %v1334_v54, 0.0  ;;  %v1470_v3 = vmul.f32 %v1334_v54, %v1334_v54 }
 0x10d   : > { %v1186_v63 = vpop.f32.mrf.mxu0  ;;  %v1339_v26 = vadd.f32 %v2560_v29, %v1300_v55  ;;  %v886_v27 = vpop.f32.mrf.mxu1  ;;  %v1400_v28 = vadd.f32 %v1399_v1, %v1398_v57  ;;  %v1401_v5 = vsel %vm1365_vm3, %v1335_v35, 0.0  ;;  %v1506_v35 = vsel %vm1365_vm3, %v1472_v25, 0.0 }
 0x10e   : > { %v1337_v30 = vadd.f32 %v2560_v29, %v1298_v59  ;;  %v1301_v31 = vadd.f32 %v2026_v51, %v895_v61  ;;  %v887_v32 = vadd.f32 %v886_v27, %v2519_v7  ;;  %v1502_v37 = vsel %vm1365_vm3, %v1470_v3, 0.0 }
 0x10f   : > { %v2029_v33 = vpop.f32.mrf.mxu0  ;;  %1372 = vst.msk [vmem:[%s2565_s15 + $0x30] sm:$0xff] %vm1365_vm3, %v1339_v26  ;;  %v1995_v38 = vpop.f32.mrf.mxu1  ;;  %v1402_v40 = vadd.f32 %v1401_v5, %v1400_v28  ;;  %v1503_v41 = vadd.f32 %v1502_v37, %v1501_v36  ;;  %v1475_v49 = vmul.f32 %v1339_v26, %v1339_v26 }
 0x110   : > { %1370 = vst.msk [vmem:[%s2565_s15 + $0x20] sm:$0xff] %vm1365_vm3, %v1337_v30  ;;  %v1473_v7 = vmul.f32 %v1337_v30, %v1337_v30  ;;  %v1340_v43 = vadd.f32 %v2560_v29, %v1301_v31  ;;  %v1299_v44 = vadd.f32 %v1186_v63, %v887_v32  ;;  %v908_v46 = vadd.f32 %v1995_v38, %v2523_v9 }
 0x111   : > { %v1199_v42 = vpop.f32.mrf.mxu0  ;;  %v899_v47 = vpop.f32.mrf.mxu1  ;;  %v1505_v48 = vadd.f32 %v1504_v34, %v1503_v41  ;;  %v1404_v50 = vadd.f32 %v1403_v39, %v1402_v40  ;;  %v1405_v52 = vsel %vm1365_vm3, %v1337_v30, 0.0  ;;  %v1512_v5 = vsel %vm1365_vm3, %v1475_v49, 0.0 }
 0x112   : > { %v900_v45 = vadd.f32 %v899_v47, %v2528_v11  ;;  %v1508_v53 = vsel %vm1365_vm3, %v1473_v7, 0.0  ;;  %1373 = vst.msk [vmem:[%s2565_s15 + $0x38] sm:$0xff] %vm1365_vm3, %v1340_v43  ;;  %v1338_v54 = vadd.f32 %v2560_v29, %v1299_v44  ;;  %v1304_v55 = vadd.f32 %v2029_v33, %v908_v46 }
 0x113   : > { %v2030_v51 = vpop.f32.mrf.mxu0  ;;  %v1996_v56 = vpop.f32.mrf.mxu1  ;;  %v1406_v57 = vadd.f32 %v1405_v52, %v1404_v50  ;;  %v1507_v9 = vadd.f32 %v1506_v35, %v1505_v48  ;;  %v1476_v25 = vmul.f32 %v1340_v43, %v1340_v43  ;;  %v1411_v38 = vsel %vm1365_vm3, %v1340_v43, 0.0 }
 0x114   : > { %v1302_v59 = vadd.f32 %v1199_v42, %v900_v45  ;;  %v911_v61 = vadd.f32 %v1996_v56, %v2532_v13  ;;  %1371 = vst.msk [vmem:[%s2565_s15 + $0x28] sm:$0xff] %vm1365_vm3, %v1338_v54  ;;  %v1407_v11 = vsel %vm1365_vm3, %v1338_v54, 0.0  ;;  %v1474_v1 = vmul.f32 %v1338_v54, %v1338_v54 }
 0x115   : > { %v1202_v63 = vpop.f32.mrf.mxu0  ;;  %v1343_v3 = vadd.f32 %v2560_v29, %v1304_v55  ;;  %v902_v27 = vpop.f32.mrf.mxu1  ;;  %v1509_v28 = vadd.f32 %v1508_v53, %v1507_v9  ;;  %v1408_v30 = vadd.f32 %v1407_v11, %v1406_v57  ;;  %v1409_v13 = vsel %vm1365_vm3, %v1339_v26, 0.0 }
 0x116   : > { %v1341_v31 = vadd.f32 %v2560_v29, %v1302_v59  ;;  %v1305_v32 = vadd.f32 %v2030_v51, %v911_v61  ;;  %v1510_v34 = vsel %vm1365_vm3, %v1474_v1, 0.0  ;;  %v903_v36 = vadd.f32 %v902_v27, %v2536_v15 }
 0x117   : > { %v2033_v33 = vpop.f32.mrf.mxu0  ;;  %1376 = vst.msk [vmem:[%s2565_s15 + $0x50] sm:$0xff] %vm1365_vm3, %v1343_v3  ;;  %v1999_v37 = vpop.f32.mrf.mxu1  ;;  %v1410_v39 = vadd.f32 %v1409_v13, %v1408_v30  ;;  %v1511_v40 = vadd.f32 %v1510_v34, %v1509_v28  ;;  %v1514_v26 = vsel %vm1365_vm3, %v1476_v25, 0.0  ;;  %v1479_v15 = vmul.f32 %v1343_v3, %v1343_v3 }
 0x118   : > { %1374 = vst.msk [vmem:[%s2565_s15 + $0x40] sm:$0xff] %vm1365_vm3, %v1341_v31  ;;  %v1477_v41 = vmul.f32 %v1341_v31, %v1341_v31  ;;  %v1344_v42 = vadd.f32 %v2560_v29, %v1305_v32  ;;  %v1303_v35 = vadd.f32 %v1202_v63, %v903_v36  ;;  %v924_v44 = vadd.f32 %v1999_v37, %v2540_v17 }
 0x119   : > { %v1215_v7 = vpop.f32.mrf.mxu0  ;;  %v915_v46 = vpop.f32.mrf.mxu1  ;;  %v1513_v47 = vadd.f32 %v1512_v5, %v1511_v40  ;;  %v1412_v48 = vadd.f32 %v1411_v38, %v1410_v39  ;;  %v1413_v50 = vsel %vm1365_vm3, %v1341_v31, 0.0  ;;  %v1520_v30 = vsel %vm1365_vm3, %v1479_v15, 0.0 }
 0x11a   : > { %v916_v43 = vadd.f32 %v915_v46, %v2544_v19  ;;  %v1516_v45 = vsel %vm1365_vm3, %v1477_v41, 0.0  ;;  %1377 = vst.msk [vmem:[%s2565_s15 + $0x58] sm:$0xff] %vm1365_vm3, %v1344_v42  ;;  %v1342_v51 = vadd.f32 %v2560_v29, %v1303_v35  ;;  %v1308_v52 = vadd.f32 %v2033_v33, %v924_v44 }
 0x11b   : > { %v2034_v49 = vpop.f32.mrf.mxu0  ;;  %v2000_v53 = vpop.f32.mrf.mxu1  ;;  %v1414_v54 = vadd.f32 %v1413_v50, %v1412_v48  ;;  %v1515_v17 = vadd.f32 %v1514_v26, %v1513_v47  ;;  %v1480_v9 = vmul.f32 %v1344_v42, %v1344_v42  ;;  %v1419_v13 = vsel %vm1365_vm3, %v1344_v42, 0.0 }
 0x11c   : > { %v1306_v55 = vadd.f32 %v1215_v7, %v916_v43  ;;  %v927_v56 = vadd.f32 %v2000_v53, %v2548_v21  ;;  %1375 = vst.msk [vmem:[%s2565_s15 + $0x48] sm:$0xff] %vm1365_vm3, %v1342_v51  ;;  %v1415_v19 = vsel %vm1365_vm3, %v1342_v51, 0.0  ;;  %v1478_v59 = vmul.f32 %v1342_v51, %v1342_v51 }
 0x11d   : > { %v1218_v57 = vpop.f32.mrf.mxu0  ;;  %v1347_v61 = vadd.f32 %v2560_v29, %v1308_v52  ;;  %v918_v63 = vpop.f32.mrf.mxu1  ;;  %v1517_v25 = vadd.f32 %v1516_v45, %v1515_v17  ;;  %v1416_v11 = vadd.f32 %v1415_v19, %v1414_v54  ;;  %v1417_v21 = vsel %vm1365_vm3, %v1343_v3, 0.0 }
 0x11e   : > { %v1345_v1 = vadd.f32 %v2560_v29, %v1306_v55  ;;  %v1309_v27 = vadd.f32 %v2034_v49, %v927_v56  ;;  %v1518_v31 = vsel %vm1365_vm3, %v1478_v59, 0.0  ;;  %v919_v32 = vadd.f32 %v918_v63, %v2553_v23 }
 0x11f   : > { %v2037_v28 = vpop.f32.mrf.mxu0  ;;  %1380 = vst.msk [vmem:[%s2565_s15 + $0x70] sm:$0xff] %vm1365_vm3, %v1347_v61  ;;  %v2003_v33 = vpop.f32.mrf.mxu1  ;;  %v1418_v5 = vadd.f32 %v1417_v21, %v1416_v11  ;;  %v1519_v34 = vadd.f32 %v1518_v31, %v1517_v25  ;;  %v1522_v3 = vsel %vm1365_vm3, %v1480_v9, 0.0  ;;  %v1483_v23 = vmul.f32 %v1347_v61, %v1347_v61 }
 0x120   : > { %1378 = vst.msk [vmem:[%s2565_s15 + $0x60] sm:$0xff] %vm1365_vm3, %v1345_v1  ;;  %v1481_v36 = vmul.f32 %v1345_v1, %v1345_v1  ;;  %v1348_v38 = vadd.f32 %v2560_v29, %v1309_v27  ;;  %v1307_v39 = vadd.f32 %v1218_v57, %v919_v32  ;;  %v940_v40 = vadd.f32 %v2003_v33, %v2503_v58 }
 0x121   : > { %v1231_v37 = vpop.f32.mrf.mxu0  ;;  %v931_v41 = vpop.f32.mrf.mxu1  ;;  %v1521_v7 = vadd.f32 %v1520_v30, %v1519_v34  ;;  %v1420_v26 = vadd.f32 %v1419_v13, %v1418_v5  ;;  %v1421_v44 = vsel %vm1365_vm3, %v1345_v1, 0.0  ;;  %v1528_v19 = vsel %vm1365_vm3, %v1483_v23, 0.0 }
 0x122   : > { %v932_v42 = vadd.f32 %v931_v41, %v2505_v60  ;;  %v1524_v46 = vsel %vm1365_vm3, %v1481_v36, 0.0  ;;  %1381 = vst.msk [vmem:[%s2565_s15 + $0x78] sm:$0xff] %vm1365_vm3, %v1348_v38  ;;  %v1346_v47 = vadd.f32 %v2560_v29, %v1307_v39  ;;  %v1312_v15 = vadd.f32 %v2037_v28, %v940_v40 }
 0x123   : > { %v2038_v35 = vpop.f32.mrf.mxu0  ;;  %v2004_v48 = vpop.f32.mrf.mxu1  ;;  %v1422_v43 = vadd.f32 %v1421_v44, %v1420_v26  ;;  %v1523_v58 = vadd.f32 %v1522_v3, %v1521_v7  ;;  %v1484_v51 = vmul.f32 %v1348_v38, %v1348_v38  ;;  %v1427_v11 = vsel %vm1365_vm3, %v1348_v38, 0.0 }
 0x124   : > { %v1310_v49 = vadd.f32 %v1231_v37, %v932_v42  ;;  %v943_v50 = vadd.f32 %v2004_v48, %v2507_v62  ;;  %1379 = vst.msk [vmem:[%s2565_s15 + $0x68] sm:$0xff] %vm1365_vm3, %v1346_v47  ;;  %v1423_v60 = vsel %vm1365_vm3, %v1346_v47, 0.0  ;;  %v1482_v52 = vmul.f32 %v1346_v47, %v1346_v47 }
 0x125   : > { %v1234_v45 = vpop.f32.mrf.mxu0  ;;  %v1351_v53 = vadd.f32 %v2560_v29, %v1312_v15  ;;  %v934_v54 = vpop.f32.mrf.mxu1  ;;  %v1525_v17 = vadd.f32 %v1524_v46, %v1523_v58  ;;  %v1424_v55 = vadd.f32 %v1423_v60, %v1422_v43  ;;  %v1425_v62 = vsel %vm1365_vm3, %v1347_v61, 0.0 }
 0x126   : > { %v1349_v56 = vadd.f32 %v2560_v29, %v1310_v49  ;;  %v1313_v57 = vadd.f32 %v2038_v35, %v943_v50  ;;  %v1526_v59 = vsel %vm1365_vm3, %v1482_v52, 0.0  ;;  %v935_v63 = vadd.f32 %v934_v54, %v2509_v0 }
 0x127   : > { %v2041_v9 = vpop.f32.mrf.mxu0  ;;  %1384 = vst.msk [vmem:[%s2565_s15 + $0x90] sm:$0xff] %vm1365_vm3, %v1351_v53  ;;  %v2007_v25 = vpop.f32.mrf.mxu1  ;;  %v1426_v1 = vadd.f32 %v1425_v62, %v1424_v55  ;;  %v1527_v27 = vadd.f32 %v1526_v59, %v1525_v17  ;;  %v1530_v61 = vsel %vm1365_vm3, %v1484_v51, 0.0  ;;  %v1487_v0 = vmul.f32 %v1351_v53, %v1351_v53 }
 0x128   : > { %1382 = vst.msk [vmem:[%s2565_s15 + $0x80] sm:$0xff] %vm1365_vm3, %v1349_v56  ;;  %v1485_v28 = vmul.f32 %v1349_v56, %v1349_v56  ;;  %v1352_v30 = vadd.f32 %v2560_v29, %v1313_v57  ;;  %v1311_v31 = vadd.f32 %v1234_v45, %v935_v63  ;;  %v956_v32 = vadd.f32 %v2007_v25, %v2511_v2 }
 0x129   : > { %v1247_v21 = vpop.f32.mrf.mxu0  ;;  %v947_v33 = vpop.f32.mrf.mxu1  ;;  %v1529_v13 = vadd.f32 %v1528_v19, %v1527_v27  ;;  %v1428_v5 = vadd.f32 %v1427_v11, %v1426_v1  ;;  %v1429_v37 = vsel %vm1365_vm3, %v1349_v56, 0.0  ;;  %v1536_v49 = vsel %vm1365_vm3, %v1487_v0, 0.0 }
 0x12a   : > { %v948_v34 = vadd.f32 %v947_v33, %v2513_v4  ;;  %v1532_v3 = vsel %vm1365_vm3, %v1485_v28, 0.0  ;;  %1385 = vst.msk [vmem:[%s2565_s15 + $0x98] sm:$0xff] %vm1365_vm3, %v1352_v30  ;;  %v1350_v38 = vadd.f32 %v2560_v29, %v1311_v31  ;;  %v1316_v39 = vadd.f32 %v2041_v9, %v956_v32 }
 0x12b   : > { %v2042_v36 = vpop.f32.mrf.mxu0  ;;  %v2008_v40 = vpop.f32.mrf.mxu1  ;;  %v1430_v41 = vadd.f32 %v1429_v37, %v1428_v5  ;;  %v1531_v2 = vadd.f32 %v1530_v61, %v1529_v13  ;;  %v1488_v42 = vmul.f32 %v1352_v30, %v1352_v30  ;;  %v1435_v60 = vsel %vm1365_vm3, %v1352_v30, 0.0 }
 0x12c   : > { %v1314_v7 = vadd.f32 %v1247_v21, %v948_v34  ;;  %v959_v23 = vadd.f32 %v2008_v40, %v2517_v6  ;;  %1383 = vst.msk [vmem:[%s2565_s15 + $0x88] sm:$0xff] %vm1365_vm3, %v1350_v38  ;;  %v1431_v4 = vsel %vm1365_vm3, %v1350_v38, 0.0  ;;  %v1486_v35 = vmul.f32 %v1350_v38, %v1350_v38 }
 0x12d   : > { %v1250_v26 = vpop.f32.mrf.mxu0  ;;  %v1355_v44 = vadd.f32 %v2560_v29, %v1316_v39  ;;  %v950_v46 = vpop.f32.mrf.mxu1  ;;  %v1533_v47 = vadd.f32 %v1532_v3, %v1531_v2  ;;  %v1432_v15 = vadd.f32 %v1431_v4, %v1430_v41  ;;  %v1433_v6 = vsel %vm1365_vm3, %v1351_v53, 0.0 }
 0x12e   : > { %v1353_v48 = vadd.f32 %v2560_v29, %v1314_v7  ;;  %v1317_v43 = vadd.f32 %v2042_v36, %v959_v23  ;;  %v1534_v50 = vsel %vm1365_vm3, %v1486_v35, 0.0  ;;  %v951_v45 = vadd.f32 %v950_v46, %v2521_v8 }
 0x12f   : > { %v2045_v58 = vpop.f32.mrf.mxu0  ;;  %1388 = vst.msk [vmem:[%s2565_s15 + $0xb0] sm:$0xff] %vm1365_vm3, %v1355_v44  ;;  %v2011_v51 = vpop.f32.mrf.mxu1  ;;  %v1434_v52 = vadd.f32 %v1433_v6, %v1432_v15  ;;  %v1535_v54 = vadd.f32 %v1534_v50, %v1533_v47  ;;  %v1538_v53 = vsel %vm1365_vm3, %v1488_v42, 0.0  ;;  %v1491_v8 = vmul.f32 %v1355_v44, %v1355_v44 }
 0x130   : > { %1386 = vst.msk [vmem:[%s2565_s15 + $0xa0] sm:$0xff] %vm1365_vm3, %v1353_v48  ;;  %v1489_v17 = vmul.f32 %v1353_v48, %v1353_v48  ;;  %v1356_v56 = vadd.f32 %v2560_v29, %v1317_v43  ;;  %v1315_v57 = vadd.f32 %v1250_v26, %v951_v45  ;;  %v972_v9 = vadd.f32 %v2011_v51, %v2525_v10 }
 0x131   : > { %v1263_v55 = vpop.f32.mrf.mxu0  ;;  %v963_v62 = vpop.f32.mrf.mxu1  ;;  %v1537_v19 = vadd.f32 %v1536_v49, %v1535_v54  ;;  %v1436_v59 = vadd.f32 %v1435_v60, %v1434_v52  ;;  %v1437_v11 = vsel %vm1365_vm3, %v1353_v48, 0.0  ;;  %v1441_v39 = vsel %vm1365_vm3, %v1355_v44, 0.0 }
 0x132   : > { %v964_v63 = vadd.f32 %v963_v62, %v2530_v12  ;;  %v1540_v1 = vsel %vm1365_vm3, %v1489_v17, 0.0  ;;  %1389 = vst.msk [vmem:[%s2565_s15 + $0xb8] sm:$0xff] %vm1365_vm3, %v1356_v56  ;;  %v1354_v27 = vadd.f32 %v2560_v29, %v1315_v57  ;;  %v1320_v28 = vadd.f32 %v2045_v58, %v972_v9 }
 0x133   : > { %v2046_v25 = vpop.f32.mrf.mxu0  ;;  %v2012_v21 = vpop.f32.mrf.mxu1  ;;  %v1438_v61 = vadd.f32 %v1437_v11, %v1436_v59  ;;  %v1539_v10 = vadd.f32 %v1538_v53, %v1537_v19  ;;  %v1492_v33 = vmul.f32 %v1356_v56, %v1356_v56  ;;  %v1544_v2 = vsel %vm1365_vm3, %v1491_v8, 0.0 }
 0x134   : > { %v1318_v30 = vadd.f32 %v1263_v55, %v964_v63  ;;  %v975_v31 = vadd.f32 %v2012_v21, %v2534_v14  ;;  %1387 = vst.msk [vmem:[%s2565_s15 + $0xa8] sm:$0xff] %vm1365_vm3, %v1354_v27  ;;  %v1439_v12 = vsel %vm1365_vm3, %v1354_v27, 0.0  ;;  %v1490_v13 = vmul.f32 %v1354_v27, %v1354_v27 }
 0x135   : > { %v1266_v32 = vpop.f32.mrf.mxu0  ;;  %v1359_v0 = vadd.f32 %v2560_v29, %v1320_v28  ;;  %v966_v5 = vpop.f32.mrf.mxu1  ;;  %v1541_v34 = vadd.f32 %v1540_v1, %v1539_v10  ;;  %v1440_v36 = vadd.f32 %v1439_v12, %v1438_v61  ;;  %v1443_v7 = vsel %vm1365_vm3, %v1356_v56, 0.0 }
 0x136   : > { %v1357_v37 = vadd.f32 %v2560_v29, %v1318_v30  ;;  %v1321_v3 = vadd.f32 %v2046_v25, %v975_v31  ;;  %v1542_v14 = vsel %vm1365_vm3, %v1490_v13, 0.0  ;;  %v967_v40 = vadd.f32 %v966_v5, %v2538_v16 }
 0x137   : > { %v2049_v38 = vpop.f32.mrf.mxu0  ;;  %1392 = vst.msk [vmem:[%s2565_s15 + $0xd0] sm:$0xff] %vm1365_vm3, %v1359_v0  ;;  %v2015_v41 = vpop.f32.mrf.mxu1  ;;  %v1442_v23 = vadd.f32 %v1441_v39, %v1440_v36  ;;  %v1543_v26 = vadd.f32 %v1542_v14, %v1541_v34  ;;  %v1546_v16 = vsel %vm1365_vm3, %v1492_v33, 0.0  ;;  %v1495_v58 = vmul.f32 %v1359_v0, %v1359_v0 }
 0x138   : > { %1390 = vst.msk [vmem:[%s2565_s15 + $0xc0] sm:$0xff] %vm1365_vm3, %v1357_v37  ;;  %v1493_v4 = vmul.f32 %v1357_v37, %v1357_v37  ;;  %v1360_v35 = vadd.f32 %v2560_v29, %v1321_v3  ;;  %v1319_v44 = vadd.f32 %v1266_v32, %v967_v40  ;;  %v988_v46 = vadd.f32 %v2015_v41, %v2542_v18 }
 0x139   : > { %v1279_v42 = vpop.f32.mrf.mxu0  ;;  %v979_v47 = vpop.f32.mrf.mxu1  ;;  %v1545_v15 = vadd.f32 %v1544_v2, %v1543_v26  ;;  %v1444_v48 = vadd.f32 %v1443_v7, %v1442_v23  ;;  %v1445_v6 = vsel %vm1365_vm3, %v1357_v37, 0.0  ;;  %v1449_v8 = vsel %vm1365_vm3, %v1359_v0, 0.0 }
 0x13a   : > { %v980_v43 = vadd.f32 %v979_v47, %v2546_v20  ;;  %1393 = vst.msk [vmem:[%s2565_s15 + $0xd8] sm:$0xff] %vm1365_vm3, %v1360_v35  ;;  %v1358_v49 = vadd.f32 %v2560_v29, %v1319_v44  ;;  %v1324_v50 = vadd.f32 %v2049_v38, %v988_v46  ;;  %v1548_v17 = vsel %vm1365_vm3, %v1493_v4, 0.0 }
 0x13b   : > { %v2016_v45 = vpop.f32.mrf.mxu1  ;;  %v1446_v51 = vadd.f32 %v1445_v6, %v1444_v48  ;;  %v1547_v60 = vadd.f32 %v1546_v16, %v1545_v15  ;;  %v2050_v54 = vpop.f32.mrf.mxu0  ;;  %v1552_v25 = vsel %vm1365_vm3, %v1495_v58, 0.0  ;;  %v1451_v28 = vsel %vm1365_vm3, %v1360_v35, 0.0 }
 0x13c   : > { %v1322_v18 = vadd.f32 %v1279_v42, %v980_v43  ;;  %v991_v52 = vadd.f32 %v2016_v45, %v2551_v22  ;;  %1391 = vst.msk [vmem:[%s2565_s15 + $0xc8] sm:$0xff] %vm1365_vm3, %v1358_v49  ;;  %v1447_v20 = vsel %vm1365_vm3, %v1358_v49, 0.0  ;;  %v1494_v55 = vmul.f32 %v1358_v49, %v1358_v49 }
 0x13d   : > { %v1363_v53 = vadd.f32 %v2560_v29, %v1324_v50  ;;  %v982_v56 = vpop.f32.mrf.mxu1  ;;  %v1549_v57 = vadd.f32 %v1548_v17, %v1547_v60  ;;  %v1448_v9 = vadd.f32 %v1447_v20, %v1446_v51  ;;  %v1496_v22 = vmul.f32 %v1360_v35, %v1360_v35  ;;  %v1282_v27 = vpop.f32.mrf.mxu0 }
 0x13e   : > { %v1361_v62 = vadd.f32 %v2560_v29, %v1322_v18  ;;  %v1325_v19 = vadd.f32 %v2050_v54, %v991_v52  ;;  %v1550_v59 = vsel %vm1365_vm3, %v1494_v55, 0.0  ;;  %v983_v63 = vadd.f32 %v982_v56, %v2555_v24 }
 0x13f   : > { %1396 = vst.msk [vmem:[%s2565_s15 + $0xf0] sm:$0xff] %vm1365_vm3, %v1363_v53  ;;  %v1450_v11 = vadd.f32 %v1449_v8, %v1448_v9  ;;  %v1551_v1 = vadd.f32 %v1550_v59, %v1549_v57  ;;  %v1554_v32 = vsel %vm1365_vm3, %v1496_v22, 0.0  ;;  %v1499_v0 = vmul.f32 %v1363_v53, %v1363_v53 }
 0x140   : > { %1394 = vst.msk [vmem:[%s2565_s15 + $0xe0] sm:$0xff] %vm1365_vm3, %v1361_v62  ;;  %v1497_v21 = vmul.f32 %v1361_v62, %v1361_v62  ;;  %v1364_v61 = vadd.f32 %v2560_v29, %v1325_v19  ;;  %v1323_v10 = vadd.f32 %v1282_v27, %v983_v63  ;;  %v1453_v24 = vsel %vm1365_vm3, %v1361_v62, 0.0 }
 0x141   : > { %v1553_v30 = vadd.f32 %v1552_v25, %v1551_v1  ;;  %v1452_v31 = vadd.f32 %v1451_v28, %v1450_v11  ;;  %v1457_v38 = vsel %vm1365_vm3, %v1363_v53, 0.0  ;;  %v1560_v41 = vsel %vm1365_vm3, %v1499_v0, 0.0 }
 0x142   : > { %1397 = vst.msk [vmem:[%s2565_s15 + $0xf8] sm:$0xff] %vm1365_vm3, %v1364_v61  ;;  %v1362_v33 = vadd.f32 %v2560_v29, %v1323_v10  ;;  %v1556_v5 = vsel %vm1365_vm3, %v1497_v21, 0.0  ;;  %v1500_v39 = vmul.f32 %v1364_v61, %v1364_v61  ;;  %v1459_v2 = vsel %vm1365_vm3, %v1364_v61, 0.0 }
 0x143   : > { %v1454_v12 = vadd.f32 %v1453_v24, %v1452_v31  ;;  %v1555_v13 = vadd.f32 %v1554_v32, %v1553_v30 }
 0x144   : > { %1395 = vst.msk [vmem:[%s2565_s15 + $0xe8] sm:$0xff] %vm1365_vm3, %v1362_v33  ;;  %v1455_v34 = vsel %vm1365_vm3, %v1362_v33, 0.0  ;;  %v1498_v36 = vmul.f32 %v1362_v33, %v1362_v33  ;;  %v1562_v26 = vsel %vm1365_vm3, %v1500_v39, 0.0  ;;  %s2181_s15 = sshll.u32 %s2272_s21, 4  ;;  %s2182_s15 = int_to_ptr.vmem [resolvable:$false] %s2181_s15 }
 0x145   : > { %v1557_v37 = vadd.f32 %v1556_v5, %v1555_v13  ;;  %v1456_v3 = vadd.f32 %v1455_v34, %v1454_v12  ;;  %s2183_s17 = scalar_lea.vmem %s2182_s15, 64  ;;  %p2184_p4 = scmp.lt.s32.totalorder %s1602_s9, %s2182_s15 }
 0x146   : > { %v1558_v14 = vsel %vm1365_vm3, %v1498_v36, 0.0  ;;  %p2185_p5 = scmp.lt.s32.totalorder %s2183_s17, %s2177_s13 }
 0x147   : > { %v1458_v29 = vadd.f32 %v1457_v38, %v1456_v3  ;;  %v1559_v40 = vadd.f32 %v1558_v14, %v1557_v37 }
 0x148   : > { %p2186_p6 = por %p2185_p5, %p2184_p4 }
 0x149   : > { %v1460_v7 = vadd.f32 %v1459_v2, %v1458_v29  ;;  %v1561_v23 = vadd.f32 %v1560_v41, %v1559_v40 }
 0x14a   : > { %p2187_p7 = pnand %p2186_p6, %p2180_p2 }
 0x14b   : > { %v1461_v42 = vrot.slane %v1460_v7, 4  ;;  %v1563_v4 = vadd.f32 %v1562_v26, %v1561_v23 }
 0x14d   : > { %v1462_v35 = vadd.f32 %v1461_v42, %v1460_v7  ;;  %v1564_v44 = vrot.slane %v1563_v4, 4 }
 0x14f   : > { %v1463_v46 = vrot.slane %v1462_v35, 2  ;;  %v1565_v47 = vadd.f32 %v1564_v44, %v1563_v4 }
 0x151   : > { %v1464_v16 = vadd.f32 %v1463_v46, %v1462_v35  ;;  %v1566_v15 = vrot.slane %v1565_v47, 2 }
 0x153   : > { %v1465_v48 = vrot.slane %v1464_v16, 1  ;;  %v1567_v43 = vadd.f32 %v1566_v15, %v1565_v47 }
 0x155   : > { %v1466_v58 = vadd.f32 %v1465_v48, %v1464_v16  ;;  %v1568_v6 = vrot.slane %v1567_v43, 1 }
 0x157   : > { %1468 = vst.msk [vmem:[%s261_s8] sm:$0x1] %vm1467_vm4, %v1466_v58  ;;  %v1569_v49 = vadd.f32 %v1568_v6, %v1567_v43 }
 0x159   : > { %1570 = vst.msk [vmem:[%s261_s8 + $0x1] sm:$0x1] %vm1467_vm4, %v1569_v49 }
 0x15a   : > { %2190 = shalt.err (!%p2187_p7)
}
 0x15b   : > { %s2191_s26 = scalar_lea.hbm %s1599_s22, 32  ;;  %s2195_s30 = scalar_lea.hbm %s2804_s5, 256 }
 0x15c   : > { %p2192_p9 = scmp.ne.s32.totalorder %s1599_s22, %s2191_s26  ;;  %p2196_p12 = scmp.lt.s32.totalorder %s1599_s22, %s2804_s5 }
 0x15d   : > { %p2197_p13 = scmp.lt.s32.totalorder %s2195_s30, %s2191_s26 }
 0x15e   : > { %p2193_p10 = pnand %p2192_p9, %p2354_p3 }
 0x15f   : > { %p2198_p0 = por %p2197_p13, %p2196_p12 }
 0x160   : > { %p2194_p11 = pneg %p2193_p10 }
 0x162   : > { %p2199_p1 = pnand %p2198_p0, %p2194_p11 }
 0x164   : > { %2202 = shalt.err (!%p2199_p1)
}
 0x165   : > { %2054 = dma.vmem_to_hbm [thread:$0]  (%p2354_p3), %s1602_s9, 32, %s1599_s22, %s1582_s14  }
 0x166 PF: > { %p2060_p2 = scmp.ge.s32.totalorder %s2269_s25, 2  ;;  %s1626_s12 = sand.u32 1, %s2241_s18  }
 0x167   : > { %s1627_s13 = scalar_lea.sflag [#allocation3], %s1626_s12 }
 0x168   : > { %p2057_p4 = pnand %p2060_p2, %p2363_p8 }
 0x16a   : > { %p2058_p5 = pneg %p2057_p4 }
 0x16c   : > { %2236 = dma.done.wait (%p2058_p5), %s1627_s13, 32  }
 0x16d   : > { %2238 = vsyncadd (%p2058_p5), %s1627_s13, 4294967264  ;;  %s19_s25 = sadd.s32 1, %s2269_s25   ;;  %s2807_s18 = smov %s2245_s19 }
 0x16e   : > { %p16_p6 = scmp.ge.s32.totalorder %s19_s25, 10   ;;  %s2808_s19 = smov %s2249_s20 }
 0x16f   : > { %s2809_s20 = smov %s2372_s11  ;;  %s2810_s21 = smov %s2261_s23 }
 0x170   : > { %s2811_s22 = smov %s2265_s24  ;;  %s2812_s23 = smov %s2815_s28 }
 0x171   : > { %s2813_s24 = smov %s2819_s29  ;;  %18 = sbr.rel (!%p16_p6) target bundleno = 5 (0x5), region = 91 }
 0x176   :  { %1632 = vsyncpa [#allocation3], 1 }
 0x177   :  { %1634 = vsyncpa [#allocation3 + $0x1], 1 }

// kernel: discriminator_forward.11
= control target key start
LH: loop header
LB: loop body
LE: loop exit
PB: predicated region body
PF: predicated region fallthrough
CT: control target
= control target key end

     0   :  { %s1914_s18 = smov 0   ;;  %s1916_s19 = smov 0   ;;  %s2380_s0 = inlined_call_operand.vmem [shape: bf16[2,17,16,192], index: 0, kind: input, shape index: {}]   ;;  %s2381_s1 = inlined_call_operand.vmem [shape: bf16[2,17,16,192], index: 1, kind: input, shape index: {}]   ;;  %s2382_s2 = inlined_call_operand.vmem [shape: bf16[3,192,128], index: 2, kind: input, shape index: {}]   ;;  %s2383_s3 = inlined_call_operand.vmem [shape: f32[1,128], index: 3, kind: input, shape index: {}]   ;;  %s2384_s4 = inlined_call_operand.vmem [shape: f32[2,16,16,128], index: 4, kind: output, shape index: {0}]   ;;  %s2385_s5 = inlined_call_operand.vmem [shape: f32[2,2,2,128], index: 5, kind: output, shape index: {1}]  }
   0x1   :  { %s1918_s20 = smov 0   ;;  %s1920_s21 = smov 0  }
   0x2   :  { %s1922_s22 = smov 0  }
   0x3 LB: > { %s25_s23 = sadd.s32 1, %s1873_s20  ;;  %s28_s24 = sadd.s32 1, %s1877_s21  ;;  %s1881_s22 = sphi %s1922_s22, %s16_s22   ;;  %s1877_s21 = sphi %s1920_s21, %s2389_s21   ;;  %s1873_s20 = sphi %s1918_s20, %s2388_s20   ;;  %s1869_s19 = sphi %s1916_s19, %s2387_s19   ;;  %s1865_s18 = sphi %s1914_s18, %s2386_s18  }
   0x4   : > { %p26_p0 = scmp.ge.s32.totalorder %s25_s23, 2  ;;  %p1496_p1 = scmp.ge.s32.totalorder %s1881_s22, 1 }
   0x5   : > { %p216_p2 = scmp.lt.s32.totalorder %s1881_s22, 5 }
   0x6   : > { %s2391_s23 = smov (%p26_p0, %s25_s23), 0  ;;  %s2393_s24 = smov (!%p26_p0, %s28_s24), %s1877_s21 }
   0x7   : > { %p217_p3 = pnand %p1496_p1, %p216_p2  ;;  %p30_p4 = scmp.ge.s32.totalorder %s2393_s24, 2 }
   0x8   : > { %p262_p5 = scmp.lt.s32.totalorder (!%p217_p3), %s1869_s19, 1  ;;  %s1687_s10 = sshll.u32 (!%p217_p3), %s1865_s18, 7 }
   0x9   : > { %s2395_s24 = smov (%p30_p4, %s2393_s24), 0  ;;  %220 = sbr.rel (%p217_p3) target bundleno = 385 (0x181), region = 36 }
   0xa   : > { %p285_p7 = scmp.lt.s32.totalorder (!%p217_p3), %s1865_s18, 1 }
   0xe   : > { %v1756_v0 = vld [vmem:[%s2382_s2 + $0x98] sm:$0xff]   ;;  %v1883_v1 = vmov 0   ;;  %v1758_v3 = vld [vmem:[%s2382_s2 + $0x90] sm:$0xff]   ;;  %v1760_v5 = vld [vmem:[%s2382_s2 + $0x88] sm:$0xff]   ;;  %s2397_s19 = smov (!%p262_p5, %s1869_s19), 1  ;;  %vm543_vm0 = vcmask 523264  }
   0xf   : > { %568 = vmatprep.subr.bf16.mxu0 %v1883_v1  ;;  %833 = vmatprep.subr.bf16.mxu1 %v1883_v1  ;;  %v1757_v2 = vld [vmem:[%s2382_s2 + $0x38] sm:$0xff]   ;;  %v1759_v4 = vld [vmem:[%s2382_s2 + $0x30] sm:$0xff]   ;;  %v1761_v6 = vld [vmem:[%s2382_s2 + $0x28] sm:$0xff]   ;;  %s1714_s27 = smul.u32 272, %s2397_s19  ;;  %s1501_s14 = sshll.u32 %s2397_s19, 5 }
  0x10   : > { %569 = vmatpush1.bf16.msra.mxu0 %v1756_v0  ;;  %834 = vmatpush1.bf16.msra.mxu1 %v1757_v2  ;;  %v1762_v7 = vld [vmem:[%s2382_s2 + $0x80] sm:$0xff]   ;;  %v1764_v9 = vld [vmem:[%s2382_s2 + $0x78] sm:$0xff]   ;;  %v1766_v11 = vld [vmem:[%s2382_s2 + $0x70] sm:$0xff]   ;;  %s1503_s6 = sshll.u32 %s2397_s19, 1 }
  0x11   : > { %570 = vmatprep.subr.bf16.mxu0 %v1883_v1  ;;  %835 = vmatprep.subr.bf16.mxu1 %v1883_v1  ;;  %v1763_v8 = vld [vmem:[%s2382_s2 + $0x20] sm:$0xff]   ;;  %v1765_v10 = vld [vmem:[%s2382_s2 + $0x18] sm:$0xff]   ;;  %v1767_v12 = vld [vmem:[%s2382_s2 + $0x10] sm:$0xff]   ;;  %s271_s9 = scalar_lea.vmem %s2381_s1, %s1714_s27  ;;  %s266_s13 = scalar_lea.vmem %s2380_s0, %s1714_s27 }
  0x12   : > { %v1768_v13 = vld [vmem:[%s2382_s2 + $0x68] sm:$0xff]   ;;  %s2011_s16 = scalar_lea.vmem %s271_s9, %s1687_s10  ;;  %s2017_s26 = scalar_lea.vmem %s266_s13, %s1687_s10  ;;  %v1770_v16 = vld [vmem:[%s2382_s2 + $0x60] sm:$0xff]   ;;  %v1772_v19 = vld [vmem:[%s2382_s2 + $0xb8] sm:$0xff]  }
  0x13   : > { %v1769_v14 = vld [vmem:[%s2382_s2 + $0x8] sm:$0xff]   ;;  %v1771_v18 = vld [vmem:[%s2382_s2] sm:$0xff]   ;;  %v1773_v20 = vld [vmem:[%s2382_s2 + $0x58] sm:$0xff]  }
  0x14   : > { %571 = vmatpush1.bf16.msra.mxu0 %v1758_v3  ;;  %836 = vmatpush1.bf16.msra.mxu1 %v1759_v4  ;;  %v1782_v15 = vld [vmem:[%s2011_s16 + $0x4] ss:$8 sps:$4 sm:$0xff]   ;;  %v1774_v21 = vld [vmem:[%s2382_s2 + $0xb0] sm:$0xff]   ;;  %v1780_v27 = vld [vmem:[%s2011_s16] ss:$8 sps:$4 sm:$0xff]  }
  0x15   : > { %572 = vmatprep.subr.bf16.mxu0 %v1883_v1  ;;  %837 = vmatprep.subr.bf16.mxu1 %v1883_v1  ;;  %v1785_v17 = vld [vmem:[%s2017_s26 + $0x4] ss:$8 sps:$4 sm:$0xff]   ;;  %v1775_v22 = vld [vmem:[%s2382_s2 + $0x50] sm:$0xff]   ;;  %v1783_v28 = vld [vmem:[%s2017_s26] ss:$8 sps:$4 sm:$0xff]  }
  0x16   : > { %1579 = vmatprep.mubr.msk.bf16.mxu0 %vm543_vm0, %v1782_v15  ;;  %1615 = vmatprep.mubr.msk.bf16.mxu1 %vm543_vm0, %v1785_v17  ;;  %v1776_v23 = vld [vmem:[%s2382_s2 + $0xa8] sm:$0xff]   ;;  %v1778_v25 = vld [vmem:[%s2382_s2 + $0xa0] sm:$0xff]   ;;  %v1786_v29 = vld [vmem:[%s2382_s2 + $0xf8] sm:$0xff]  }
  0x17   : > { %v1777_v24 = vld [vmem:[%s2382_s2 + $0x48] sm:$0xff]   ;;  %v1779_v26 = vld [vmem:[%s2382_s2 + $0x40] sm:$0xff]   ;;  %v1787_v30 = vld [vmem:[%s2011_s16 + $0x14] ss:$8 sps:$4 sm:$0xff]  }
  0x18   : > { %573 = vmatpush1.bf16.msra.mxu0 %v1760_v5  ;;  %838 = vmatpush1.bf16.msra.mxu1 %v1761_v6  ;;  %v2072_v31 = vld [vmem:[%s2017_s26 + $0x14] ss:$8 sps:$4 sm:$0xff]   ;;  %v1792_v33 = vld [vmem:[%s2011_s16 + $0x10] ss:$8 sps:$4 sm:$0xff]   ;;  %v1794_v35 = vld [vmem:[%s2382_s2 + $0xe8] sm:$0xff]  }
  0x19   : > { %574 = vmatprep.subr.bf16.mxu0 %v1883_v1  ;;  %839 = vmatprep.subr.bf16.mxu1 %v1883_v1  ;;  %v1791_v32 = vld [vmem:[%s2382_s2 + $0xf0] sm:$0xff]   ;;  %v1795_v36 = vld [vmem:[%s2011_s16 + $0x24] ss:$8 sps:$4 sm:$0xff]   ;;  %v1799_v39 = vld [vmem:[%s2011_s16 + $0x20] ss:$8 sps:$4 sm:$0xff]  }
  0x1a   : > { %v2084_v34 = vld [vmem:[%s2017_s26 + $0x10] ss:$8 sps:$4 sm:$0xff]   ;;  %v2093_v37 = vld [vmem:[%s2017_s26 + $0x24] ss:$8 sps:$4 sm:$0xff]   ;;  %v2107_v40 = vld [vmem:[%s2017_s26 + $0x20] ss:$8 sps:$4 sm:$0xff]  }
  0x1b   : > { %v1801_v38 = vld [vmem:[%s2382_s2 + $0xe0] sm:$0xff]   ;;  %v1802_v41 = vld [vmem:[%s2011_s16 + $0x34] ss:$8 sps:$4 sm:$0xff]   ;;  %v1807_v45 = vld [vmem:[%s2011_s16 + $0x30] ss:$8 sps:$4 sm:$0xff]  }
  0x1c   : > { %575 = vmatpush1.bf16.msra.mxu0 %v1762_v7  ;;  %840 = vmatpush1.bf16.msra.mxu1 %v1763_v8  ;;  %v2112_v42 = vld [vmem:[%s2017_s26 + $0x34] ss:$8 sps:$4 sm:$0xff]   ;;  %v2129_v46 = vld [vmem:[%s2017_s26 + $0x30] ss:$8 sps:$4 sm:$0xff]   ;;  %v1810_v47 = vld [vmem:[%s2011_s16 + $0x44] ss:$8 sps:$4 sm:$0xff]  }
  0x1d   : > { %576 = vmatprep.subr.bf16.mxu0 %v1883_v1  ;;  %841 = vmatprep.subr.bf16.mxu1 %v1883_v1  ;;  %v1806_v43 = vld [vmem:[%s2382_s2 + $0xd8] sm:$0xff]   ;;  %v1809_v44 = vld [vmem:[%s2382_s2 + $0xd0] sm:$0xff]   ;;  %v2133_v48 = vld [vmem:[%s2017_s26 + $0x44] ss:$8 sps:$4 sm:$0xff]  }
  0x1e   : > { %v1816_v49 = vld [vmem:[%s2382_s2 + $0xc8] sm:$0xff]   ;;  %v1821_v50 = vld [vmem:[%s2382_s2 + $0xc0] sm:$0xff]   ;;  %v1817_v53 = vld [vmem:[%s2011_s16 + $0x54] ss:$8 sps:$4 sm:$0xff]  }
  0x1f   : > { %v1814_v51 = vld [vmem:[%s2011_s16 + $0x40] ss:$8 sps:$4 sm:$0xff]   ;;  %v1819_v54 = vld [vmem:[%s2017_s26 + $0x54] ss:$8 sps:$4 sm:$0xff]   ;;  %v1822_v57 = vld [vmem:[%s2011_s16 + $0x50] ss:$8 sps:$4 sm:$0xff]  }
  0x20   : > { %577 = vmatpush1.bf16.msra.mxu0 %v1764_v9  ;;  %842 = vmatpush1.bf16.msra.mxu1 %v1765_v10  ;;  %v2151_v52 = vld [vmem:[%s2017_s26 + $0x40] ss:$8 sps:$4 sm:$0xff]   ;;  %v1824_v55 = vld [vmem:[%s2382_s2 + $0x118] sm:$0xff]   ;;  %v1831_v56 = vld [vmem:[%s2382_s2 + $0x110] sm:$0xff]  }
  0x21   : > { %578 = vmatprep.subr.bf16.mxu0 %v1883_v1  ;;  %843 = vmatprep.subr.bf16.mxu1 %v1883_v1  ;;  %v1823_v58 = vld [vmem:[%s2017_s26 + $0x50] ss:$8 sps:$4 sm:$0xff]   ;;  %v1825_v59 = vld [vmem:[%s2011_s16 + $0x64] ss:$8 sps:$4 sm:$0xff]   ;;  %v1829_v63 = vld [vmem:[%s2011_s16 + $0x60] ss:$8 sps:$4 sm:$0xff]  }
  0x22   : > { %v1827_v60 = vld [vmem:[%s2017_s26 + $0x64] ss:$8 sps:$4 sm:$0xff]   ;;  %v1830_v0 = vld [vmem:[%s2017_s26 + $0x60] ss:$8 sps:$4 sm:$0xff]   ;;  %v1832_v2 = vld [vmem:[%s2011_s16 + $0x74] ss:$8 sps:$4 sm:$0xff]  }
  0x23   : > { %v1836_v61 = vld [vmem:[%s2382_s2 + $0x108] sm:$0xff]   ;;  %v1839_v62 = vld [vmem:[%s2382_s2 + $0x100] sm:$0xff]   ;;  %v1834_v3 = vld [vmem:[%s2017_s26 + $0x74] ss:$8 sps:$4 sm:$0xff]  }
  0x24   : > { %579 = vmatpush1.bf16.msra.mxu0 %v1766_v11  ;;  %844 = vmatpush1.bf16.msra.mxu1 %v1767_v12  ;;  %v1837_v4 = vld [vmem:[%s2011_s16 + $0x70] ss:$8 sps:$4 sm:$0xff]   ;;  %v1842_v6 = vld [vmem:[%s2017_s26 + $0x80] ss:$8 sps:$4 sm:$0xff]   ;;  %s1499_s16 = sshll.u32 %s1865_s18, 3  ;;  %s2401_s18 = smov (!%p285_p7, %s1865_s18), 1 }
  0x25   : > { %580 = vmatprep.subr.bf16.mxu0 %v1883_v1  ;;  %845 = vmatprep.subr.bf16.mxu1 %v1883_v1  ;;  %v1838_v5 = vld [vmem:[%s2017_s26 + $0x70] ss:$8 sps:$4 sm:$0xff]   ;;  %p275_p6 = scmp.lt.s32.totalorder %s1499_s16, 15  ;;  %s288_s7 = sadd.s32 %s1503_s6, %s2401_s18 }
  0x26   : > { %s1504_s8 = sshll.u32 %s288_s7, 1 }
  0x27   : > { %s2399_s16 = smov (!%p275_p6, %s1499_s16), 15  ;;  %s290_s11 = scalar_lea.vmem %s2385_s5, %s1504_s8 }
  0x28   : > { %581 = vmatpush1.bf16.msra.mxu0 %v1768_v13  ;;  %846 = vmatpush1.bf16.msra.mxu1 %v1769_v14 }
  0x29   : > { %582 = vmatprep.subr.bf16.mxu0 %v1883_v1  ;;  %847 = vmatprep.subr.bf16.mxu1 %v1883_v1 }
  0x2c   : > { %583 = vmatpush1.bf16.msra.mxu0 %v1770_v16  ;;  %848 = vmatpush1.bf16.msra.mxu1 %v1771_v18 }
  0x2d   : > { %592 = vmatprep.subr.bf16.mxu0 %v1883_v1  ;;  %857 = vmatprep.subr.bf16.mxu1 %v1883_v1 }
  0x30   : > { %593 = vmatpush2.bf16.msra.mxu0 %v1772_v19  ;;  %858 = vmatpush2.bf16.msra.mxu1 %v1773_v20 }
  0x31   : > { %594 = vmatprep.subr.bf16.mxu0 %v1883_v1  ;;  %859 = vmatprep.subr.bf16.mxu1 %v1883_v1 }
  0x34   : > { %595 = vmatpush2.bf16.msra.mxu0 %v1774_v21  ;;  %860 = vmatpush2.bf16.msra.mxu1 %v1775_v22 }
  0x35   : > { %596 = vmatprep.subr.bf16.mxu0 %v1883_v1  ;;  %861 = vmatprep.subr.bf16.mxu1 %v1883_v1 }
  0x38   : > { %597 = vmatpush2.bf16.msra.mxu0 %v1776_v23  ;;  %862 = vmatpush2.bf16.msra.mxu1 %v1777_v24 }
  0x39   : > { %598 = vmatprep.subr.bf16.mxu0 %v1883_v1  ;;  %863 = vmatprep.subr.bf16.mxu1 %v1883_v1 }
  0x3c   : > { %599 = vmatpush2.bf16.msra.mxu0 %v1778_v25  ;;  %864 = vmatpush2.bf16.msra.mxu1 %v1779_v26 }
  0x3d   : > { %1123 = vmatprep.subr.bf16.mxu0 %v1883_v1  ;;  %1690 = vmatprep.subr.bf16.mxu1 %v1883_v1 }
  0x3f   : > { %601 = vmatmul.mubr.bf16.vlgmr.msra.gmra.mxu0 %v1780_v27  ;;  %866 = vmatmul.mubr.bf16.vlgmr.msra.gmra.mxu1 %v1783_v28 }
  0x40   : > { %1124 = vmatpush1.bf16.msra.mxu0 %v1786_v29  ;;  %1580 = vmatprep.mubr.msk.bf16.mxu0 %vm543_vm0, %v1787_v30 }
  0x41   : > { %1125 = vmatprep.subr.bf16.mxu0 %v1883_v1  ;;  %1616 = vmatprep.mubr.msk.bf16.mxu1 %vm543_vm0, %v2072_v31 }
  0x42   : > { %1702 = vmatpush1.bf16.msra.mxu1 %v1786_v29 }
  0x43   : > { %1691 = vmatprep.subr.bf16.mxu1 %v1883_v1 }
  0x44   : > { %1126 = vmatpush1.bf16.msra.mxu0 %v1791_v32 }
  0x45   : > { %1127 = vmatprep.subr.bf16.mxu0 %v1883_v1 }
  0x46   : > { %1703 = vmatpush1.bf16.msra.mxu1 %v1791_v32 }
  0x47   : > { %609 = vmatmul.mubr.bf16.gmra.mxu0 %v1792_v33  ;;  %1692 = vmatprep.subr.bf16.mxu1 %v1883_v1 }
  0x48   : > { %874 = vmatmul.mubr.bf16.gmra.mxu1 %v2084_v34  ;;  %1128 = vmatpush1.bf16.msra.mxu0 %v1794_v35 }
  0x49   : > { %1581 = vmatprep.mubr.msk.bf16.mxu0 %vm543_vm0, %v1795_v36  ;;  %1617 = vmatprep.mubr.msk.bf16.mxu1 %vm543_vm0, %v2093_v37 }
  0x4a   : > { %1129 = vmatprep.subr.bf16.mxu0 %v1883_v1  ;;  %1704 = vmatpush1.bf16.msra.mxu1 %v1794_v35 }
  0x4b   : > { %1693 = vmatprep.subr.bf16.mxu1 %v1883_v1 }
  0x4c   : > { %1130 = vmatpush1.bf16.msra.mxu0 %v1801_v38 }
  0x4d   : > { %1131 = vmatprep.subr.bf16.mxu0 %v1883_v1 }
  0x4e   : > { %1705 = vmatpush1.bf16.msra.mxu1 %v1801_v38 }
  0x4f   : > { %617 = vmatmul.mubr.bf16.gmra.mxu0 %v1799_v39  ;;  %1694 = vmatprep.subr.bf16.mxu1 %v1883_v1 }
  0x50   : > { %882 = vmatmul.mubr.bf16.gmra.mxu1 %v2107_v40  ;;  %1582 = vmatprep.mubr.msk.bf16.mxu0 %vm543_vm0, %v1802_v41 }
  0x51   : > { %1618 = vmatprep.mubr.msk.bf16.mxu1 %vm543_vm0, %v2112_v42  ;;  %1132 = vmatpush1.bf16.msra.mxu0 %v1806_v43 }
  0x52   : > { %1133 = vmatprep.subr.bf16.mxu0 %v1883_v1  ;;  %1706 = vmatpush1.bf16.msra.mxu1 %v1806_v43 }
  0x53   : > { %1695 = vmatprep.subr.bf16.mxu1 %v1883_v1 }
  0x55   : > { %1134 = vmatpush1.bf16.msra.mxu0 %v1809_v44 }
  0x56   : > { %1135 = vmatprep.subr.bf16.mxu0 %v1883_v1  ;;  %1707 = vmatpush1.bf16.msra.mxu1 %v1809_v44 }
  0x57   : > { %625 = vmatmul.mubr.bf16.gmra.mxu0 %v1807_v45  ;;  %1696 = vmatprep.subr.bf16.mxu1 %v1883_v1 }
  0x58   : > { %890 = vmatmul.mubr.bf16.gmra.mxu1 %v2129_v46  ;;  %1583 = vmatprep.mubr.msk.bf16.mxu0 %vm543_vm0, %v1810_v47 }
  0x59   : > { %1619 = vmatprep.mubr.msk.bf16.mxu1 %vm543_vm0, %v2133_v48  ;;  %1136 = vmatpush1.bf16.msra.mxu0 %v1816_v49 }
  0x5a   : > { %1137 = vmatprep.subr.bf16.mxu0 %v1883_v1  ;;  %1708 = vmatpush1.bf16.msra.mxu1 %v1816_v49 }
  0x5b   : > { %1697 = vmatprep.subr.bf16.mxu1 %v1883_v1 }
  0x5d   : > { %1138 = vmatpush1.bf16.msra.mxu0 %v1821_v50 }
  0x5e   : > { %1147 = vmatprep.subr.bf16.mxu0 %v1883_v1  ;;  %1709 = vmatpush1.bf16.msra.mxu1 %v1821_v50 }
  0x5f   : > { %633 = vmatmul.mubr.bf16.gmra.mxu0 %v1814_v51  ;;  %1698 = vmatprep.subr.bf16.mxu1 %v1883_v1 }
  0x60   : > { %898 = vmatmul.mubr.bf16.gmra.mxu1 %v2151_v52  ;;  %1584 = vmatprep.mubr.msk.bf16.mxu0 %vm543_vm0, %v1817_v53 }
  0x61   : > { %1620 = vmatprep.mubr.msk.bf16.mxu1 %vm543_vm0, %v1819_v54  ;;  %1148 = vmatpush2.bf16.msra.mxu0 %v1824_v55 }
  0x62   : > { %1149 = vmatprep.subr.bf16.mxu0 %v1883_v1  ;;  %1710 = vmatpush2.bf16.msra.mxu1 %v1824_v55 }
  0x63   : > { %1699 = vmatprep.subr.bf16.mxu1 %v1883_v1 }
  0x65   : > { %1150 = vmatpush2.bf16.msra.mxu0 %v1831_v56 }
  0x66   : > { %1711 = vmatpush2.bf16.msra.mxu1 %v1831_v56  ;;  %1151 = vmatprep.subr.bf16.mxu0 %v1883_v1 }
  0x67   : > { %641 = vmatmul.mubr.bf16.gmra.mxu0 %v1822_v57  ;;  %1700 = vmatprep.subr.bf16.mxu1 %v1883_v1 }
  0x68   : > { %906 = vmatmul.mubr.bf16.gmra.mxu1 %v1823_v58  ;;  %1585 = vmatprep.mubr.msk.bf16.mxu0 %vm543_vm0, %v1825_v59 }
  0x69   : > { %1621 = vmatprep.mubr.msk.bf16.mxu1 %vm543_vm0, %v1827_v60  ;;  %1152 = vmatpush2.bf16.msra.mxu0 %v1836_v61 }
  0x6a   : > { %1712 = vmatpush2.bf16.msra.mxu1 %v1836_v61  ;;  %1153 = vmatprep.subr.bf16.mxu0 %v1883_v1 }
  0x6b   : > { %1701 = vmatprep.subr.bf16.mxu1 %v1883_v1  ;;  %v1840_v1 = vld [vmem:[%s2017_s26 + $0x84] ss:$8 sps:$4 sm:$0xff]   ;;  %s1500_s26 = sshll.u32 %s2399_s16, 1 }
  0x6c   : > { %s279_s15 = sadd.s32 %s1501_s14, %s1500_s26 }
  0x6d   : > { %1154 = vmatpush2.bf16.msra.mxu0 %v1839_v62  ;;  %s1502_s17 = sshll.u32 %s279_s15, 3 }
  0x6e   : > { %1713 = vmatpush2.bf16.msra.mxu1 %v1839_v62  ;;  %s2272_s30 = scalar_lea.vmem %s2384_s4, %s1502_s17 }
  0x6f   : > { %649 = vmatmul.mubr.bf16.gmra.mxu0 %v1829_v63 }
  0x70   : > { %914 = vmatmul.mubr.bf16.gmra.mxu1 %v1830_v0  ;;  %1586 = vmatprep.mubr.msk.bf16.mxu0 %vm543_vm0, %v1832_v2 }
  0x71   : > { %1622 = vmatprep.mubr.msk.bf16.mxu1 %vm543_vm0, %v1834_v3 }
  0x77   : > { %657 = vmatmul.mubr.bf16.gmra.mxu0 %v1837_v4 }
  0x78   : > { %922 = vmatmul.mubr.bf16.gmra.mxu1 %v1838_v5  ;;  %1675 = vmatprep.mubr.msk.bf16.mxu0 %vm543_vm0, %v2072_v31 }
  0x79   : > { %1679 = vmatprep.mubr.msk.bf16.mxu1 %vm543_vm0, %v1819_v54 }
  0x7f   : > { %1156 = vmatmul.mubr.bf16.vlgmr.msra.gmra.mxu0 %v2084_v34 }
  0x80   : > { %1188 = vmatmul.mubr.bf16.vlgmr.msra.gmra.mxu1 %v1823_v58  ;;  %1676 = vmatprep.mubr.msk.bf16.mxu0 %vm543_vm0, %v2093_v37 }
  0x81   : > { %1680 = vmatprep.mubr.msk.bf16.mxu1 %vm543_vm0, %v1827_v60 }
  0x87   : > { %1164 = vmatmul.mubr.bf16.gmra.mxu0 %v2107_v40 }
  0x88   : > { %1196 = vmatmul.mubr.bf16.gmra.mxu1 %v1830_v0  ;;  %1677 = vmatprep.mubr.msk.bf16.mxu0 %vm543_vm0, %v2112_v42 }
  0x89   : > { %1681 = vmatprep.mubr.msk.bf16.mxu1 %vm543_vm0, %v1834_v3 }
  0x8f   : > { %1172 = vmatmul.mubr.bf16.gmra.mxu0 %v2129_v46 }
  0x90   : > { %1204 = vmatmul.mubr.bf16.gmra.mxu1 %v1838_v5  ;;  %1678 = vmatprep.mubr.msk.bf16.mxu0 %vm543_vm0, %v2133_v48 }
  0x91   : > { %1682 = vmatprep.mubr.msk.bf16.mxu1 %vm543_vm0, %v1840_v1 }
  0x97   : > { %1180 = vmatmul.mubr.bf16.gmra.mxu0 %v2151_v52 }
  0x98   : > { %1212 = vmatmul.mubr.bf16.gmra.mxu1 %v1842_v6 }
  0xff   : > { %v2210_v7 = vpop.f32.mrf.mxu0  ;;  %v2212_v8 = vpop.f32.mrf.mxu1 }
 0x100   : > { %v868_v6 = vadd.f32 %v2212_v8, %v2210_v7 }
 0x101   : > { %v604_v9 = vpop.f32.mrf.mxu0  ;;  %v869_v10 = vpop.f32.mrf.mxu1 }
 0x103   : > { %v2214_v11 = vpop.f32.mrf.mxu0  ;;  %v2216_v12 = vpop.f32.mrf.mxu1 }
 0x104   : > { %v871_v8 = vadd.f32 %v2216_v12, %v2214_v11 }
 0x105   : > { %v607_v13 = vpop.f32.mrf.mxu0  ;;  %v872_v14 = vpop.f32.mrf.mxu1 }
 0x106   : > { %v2267_v14 = vld [vmem:[%s2383_s3] ss:$0 sm:$0xff] }
 0x107   : > { %v2218_v15 = vpop.f32.mrf.mxu0 }
 0x108   : > { %v2220_v16 = vpop.f32.mrf.mxu1 }
 0x109   : > { %v612_v17 = vpop.f32.mrf.mxu0  ;;  %v876_v11 = vadd.f32 %v2220_v16, %v2218_v15 }
 0x10a   : > { %v877_v18 = vpop.f32.mrf.mxu1 }
 0x10b   : > { %v2222_v19 = vpop.f32.mrf.mxu0 }
 0x10c   : > { %v2224_v20 = vpop.f32.mrf.mxu1 }
 0x10d   : > { %v615_v21 = vpop.f32.mrf.mxu0  ;;  %v879_v15 = vadd.f32 %v2224_v20, %v2222_v19 }
 0x10e   : > { %v880_v22 = vpop.f32.mrf.mxu1 }
 0x10f   : > { %v2226_v23 = vpop.f32.mrf.mxu0 }
 0x110   : > { %v2228_v24 = vpop.f32.mrf.mxu1 }
 0x111   : > { %v620_v25 = vpop.f32.mrf.mxu0  ;;  %v884_v19 = vadd.f32 %v2228_v24, %v2226_v23 }
 0x112   : > { %v885_v26 = vpop.f32.mrf.mxu1 }
 0x113   : > { %v2230_v27 = vpop.f32.mrf.mxu0 }
 0x114   : > { %v2232_v28 = vpop.f32.mrf.mxu1 }
 0x115   : > { %v623_v29 = vpop.f32.mrf.mxu0  ;;  %v887_v23 = vadd.f32 %v2232_v28, %v2230_v27 }
 0x116   : > { %v888_v30 = vpop.f32.mrf.mxu1 }
 0x117   : > { %v2234_v31 = vpop.f32.mrf.mxu0 }
 0x118   : > { %v2236_v32 = vpop.f32.mrf.mxu1 }
 0x119   : > { %v628_v33 = vpop.f32.mrf.mxu0  ;;  %v892_v27 = vadd.f32 %v2236_v32, %v2234_v31 }
 0x11a   : > { %v893_v34 = vpop.f32.mrf.mxu1 }
 0x11b   : > { %v2238_v35 = vpop.f32.mrf.mxu0 }
 0x11c   : > { %v2240_v36 = vpop.f32.mrf.mxu1 }
 0x11d   : > { %v631_v37 = vpop.f32.mrf.mxu0 }
 0x11e   : > { %v896_v38 = vpop.f32.mrf.mxu1 }
 0x11f   : > { %v634_v39 = vpop.f32.mrf.mxu0 }
 0x120   : > { %v899_v40 = vpop.f32.mrf.mxu1 }
 0x121   : > { %v636_v41 = vpop.f32.mrf.mxu0  ;;  %v900_v10 = vadd.f32 %v899_v40, %v634_v39 }
 0x122   : > { %v901_v42 = vpop.f32.mrf.mxu1 }
 0x123   : > { %v637_v43 = vpop.f32.mrf.mxu0 }
 0x124   : > { %v902_v44 = vpop.f32.mrf.mxu1 }
 0x125   : > { %v639_v45 = vpop.f32.mrf.mxu0  ;;  %v903_v26 = vadd.f32 %v902_v44, %v637_v43 }
 0x126   : > { %v904_v46 = vpop.f32.mrf.mxu1 }
 0x127   : > { %v642_v47 = vpop.f32.mrf.mxu0 }
 0x128   : > { %v907_v48 = vpop.f32.mrf.mxu1 }
 0x129   : > { %v644_v49 = vpop.f32.mrf.mxu0  ;;  %v908_v40 = vadd.f32 %v907_v48, %v642_v47 }
 0x12a   : > { %v909_v50 = vpop.f32.mrf.mxu1 }
 0x12b   : > { %v2242_v51 = vpop.f32.mrf.mxu0 }
 0x12c   : > { %v910_v52 = vpop.f32.mrf.mxu1 }
 0x12d   : > { %v647_v53 = vpop.f32.mrf.mxu0  ;;  %v911_v47 = vadd.f32 %v910_v52, %v2242_v51 }
 0x12e   : > { %v912_v54 = vpop.f32.mrf.mxu1 }
 0x12f   : > { %v2245_v55 = vpop.f32.mrf.mxu0 }
 0x130   : > { %v2247_v56 = vpop.f32.mrf.mxu1 }
 0x131   : > { %v652_v57 = vpop.f32.mrf.mxu0  ;;  %v916_v51 = vadd.f32 %v2247_v56, %v2245_v55 }
 0x132   : > { %v917_v58 = vpop.f32.mrf.mxu1 }
 0x133   : > { %v2249_v59 = vpop.f32.mrf.mxu0 }
 0x134   : > { %v2251_v60 = vpop.f32.mrf.mxu1 }
 0x135   : > { %v655_v61 = vpop.f32.mrf.mxu0  ;;  %v919_v56 = vadd.f32 %v2251_v60, %v2249_v59 }
 0x136   : > { %v920_v62 = vpop.f32.mrf.mxu1 }
 0x137   : > { %v2253_v63 = vpop.f32.mrf.mxu0 }
 0x138   : > { %v2255_v0 = vpop.f32.mrf.mxu1 }
 0x139   : > { %v660_v2 = vpop.f32.mrf.mxu0 }
 0x13a   : > { %v925_v3 = vpop.f32.mrf.mxu1 }
 0x13b   : > { %v2258_v4 = vpop.f32.mrf.mxu0 }
 0x13c   : > { %v2260_v5 = vpop.f32.mrf.mxu1 }
 0x13d   : > { %v663_v1 = vpop.f32.mrf.mxu0 }
 0x13e   : > { %v928_v9 = vpop.f32.mrf.mxu1 }
 0x13f   : > { %v1157_v13 = vpop.f32.mrf.mxu0 }
 0x140   : > { %v1220_v17 = vadd.f32 %v1157_v13, %v868_v6  ;;  %v1189_v18 = vpop.f32.mrf.mxu1 }
 0x141   : > { %v1228_v21 = vadd.f32 %v1189_v18, %v900_v10  ;;  %v1159_v7 = vpop.f32.mrf.mxu0 }
 0x142   : > { %v1243_v22 = vadd.f32 %v2267_v14, %v1220_v17  ;;  %v1191_v25 = vpop.f32.mrf.mxu1 }
 0x143   : > { %v2278_v29 = vadd.f32 %v2267_v14, %v1228_v21  ;;  %v1160_v30 = vpop.f32.mrf.mxu0 }
 0x144   : > { %1259 = vst [vmem:[%s2272_s30] sm:$0xff] %v1243_v22  ;;  %v1221_v33 = vadd.f32 %v1160_v30, %v871_v8  ;;  %v1192_v34 = vpop.f32.mrf.mxu1  ;;  %v1297_v17 = vmul.f32 %v1243_v22, %v1243_v22 }
 0x145   : > { %1267 = vst [vmem:[%s2272_s30 + $0x40] sm:$0xff] %v2278_v29  ;;  %v1229_v37 = vadd.f32 %v1192_v34, %v903_v26  ;;  %v1162_v38 = vpop.f32.mrf.mxu0 }
 0x146   : > { %v1244_v12 = vadd.f32 %v2267_v14, %v1221_v33  ;;  %v1194_v39 = vpop.f32.mrf.mxu1 }
 0x147   : > { %v2287_v41 = vadd.f32 %v2267_v14, %v1229_v37  ;;  %v1165_v42 = vpop.f32.mrf.mxu0  ;;  %v895_v39 = vadd.f32 %v2240_v36, %v2238_v35 }
 0x148   : > { %1260 = vst [vmem:[%s2272_s30 + $0x8] sm:$0xff] %v1244_v12  ;;  %v1222_v43 = vadd.f32 %v1165_v42, %v876_v11  ;;  %v1197_v44 = vpop.f32.mrf.mxu1  ;;  %v1298_v24 = vmul.f32 %v1244_v12, %v1244_v12  ;;  %v1275_v18 = vadd.f32 %v1244_v12, %v1243_v22  ;;  %v924_v22 = vadd.f32 %v2255_v0, %v2253_v63 }
 0x149   : > { %1268 = vst [vmem:[%s2272_s30 + $0x48] sm:$0xff] %v2287_v41  ;;  %v1230_v45 = vadd.f32 %v1197_v44, %v908_v40  ;;  %v1167_v46 = vpop.f32.mrf.mxu0 }
 0x14a   : > { %v1245_v16 = vadd.f32 %v2267_v14, %v1222_v43  ;;  %v1199_v49 = vpop.f32.mrf.mxu1  ;;  %v1313_v59 = vadd.f32 %v1298_v24, %v1297_v17  ;;  %v927_v46 = vadd.f32 %v2260_v5, %v2258_v4 }
 0x14b   : > { %v2297_v48 = vadd.f32 %v2267_v14, %v1230_v45  ;;  %v1168_v50 = vpop.f32.mrf.mxu0 }
 0x14c   : > { %1261 = vst [vmem:[%s2272_s30 + $0x10] sm:$0xff] %v1245_v16  ;;  %v1223_v53 = vadd.f32 %v1168_v50, %v879_v15  ;;  %v1200_v54 = vpop.f32.mrf.mxu1  ;;  %v1299_v21 = vmul.f32 %v1245_v16, %v1245_v16  ;;  %v1276_v60 = vadd.f32 %v1275_v18, %v1245_v16 }
 0x14d   : > { %1269 = vst [vmem:[%s2272_s30 + $0x50] sm:$0xff] %v2297_v48  ;;  %v1231_v57 = vadd.f32 %v1200_v54, %v911_v47  ;;  %v1170_v58 = vpop.f32.mrf.mxu0 }
 0x14e   : > { %v1246_v20 = vadd.f32 %v2267_v14, %v1223_v53  ;;  %v1202_v61 = vpop.f32.mrf.mxu1  ;;  %v1314_v38 = vadd.f32 %v1313_v59, %v1299_v21 }
 0x14f   : > { %v2308_v52 = vadd.f32 %v2267_v14, %v1231_v57  ;;  %v1173_v62 = vpop.f32.mrf.mxu0 }
 0x150   : > { %1262 = vst [vmem:[%s2272_s30 + $0x18] sm:$0xff] %v1246_v20  ;;  %v1224_v2 = vadd.f32 %v1173_v62, %v884_v19  ;;  %v1205_v3 = vpop.f32.mrf.mxu1  ;;  %v1300_v26 = vmul.f32 %v1246_v20, %v1246_v20  ;;  %v1277_v11 = vadd.f32 %v1276_v60, %v1246_v20  ;;  %v1305_v62 = vmul.f32 %v2278_v29, %v2278_v29 }
 0x151   : > { %1270 = vst [vmem:[%s2272_s30 + $0x58] sm:$0xff] %v2308_v52  ;;  %v1232_v1 = vadd.f32 %v1205_v3, %v916_v51  ;;  %v1175_v6 = vpop.f32.mrf.mxu0 }
 0x152   : > { %v1247_v9 = vadd.f32 %v2267_v14, %v1224_v2  ;;  %v1207_v55 = vpop.f32.mrf.mxu1  ;;  %v1315_v43 = vadd.f32 %v1314_v38, %v1300_v26 }
 0x153   : > { %v2319_v10 = vadd.f32 %v2267_v14, %v1232_v1  ;;  %v1176_v13 = vpop.f32.mrf.mxu0  ;;  %v1306_v1 = vmul.f32 %v2287_v41, %v2287_v41  ;;  %v1308_v55 = vmul.f32 %v2308_v52, %v2308_v52 }
 0x154   : > { %1263 = vst [vmem:[%s2272_s30 + $0x20] sm:$0xff] %v1247_v9  ;;  %v1225_v7 = vadd.f32 %v1176_v13, %v887_v23  ;;  %v1208_v8 = vpop.f32.mrf.mxu1  ;;  %v1301_v31 = vmul.f32 %v1247_v9, %v1247_v9  ;;  %v1278_v44 = vadd.f32 %v1277_v11, %v1247_v9 }
 0x155   : > { %1271 = vst [vmem:[%s2272_s30 + $0x60] sm:$0xff] %v2319_v10  ;;  %v1233_v28 = vadd.f32 %v1208_v8, %v919_v56  ;;  %v1178_v25 = vpop.f32.mrf.mxu0  ;;  %v1309_v13 = vmul.f32 %v2319_v10, %v2319_v10 }
 0x156   : > { %v1248_v30 = vadd.f32 %v2267_v14, %v1225_v7  ;;  %v1210_v33 = vpop.f32.mrf.mxu1  ;;  %v1316_v49 = vadd.f32 %v1315_v43, %v1301_v31 }
 0x157   : > { %v1256_v34 = vadd.f32 %v2267_v14, %v1233_v28  ;;  %v1181_v37 = vpop.f32.mrf.mxu0 }
 0x158   : > { %1264 = vst [vmem:[%s2272_s30 + $0x28] sm:$0xff] %v1248_v30  ;;  %v1226_v32 = vadd.f32 %v1181_v37, %v892_v27  ;;  %v1213_v12 = vpop.f32.mrf.mxu1  ;;  %v1302_v63 = vmul.f32 %v1248_v30, %v1248_v30  ;;  %v1279_v47 = vadd.f32 %v1278_v44, %v1248_v30 }
 0x159   : > { %1272 = vst [vmem:[%s2272_s30 + $0x68] sm:$0xff] %v1256_v34  ;;  %v1234_v40 = vadd.f32 %v1213_v12, %v924_v22  ;;  %v1183_v42 = vpop.f32.mrf.mxu0  ;;  %v1310_v18 = vmul.f32 %v1256_v34, %v1256_v34 }
 0x15a   : > { %v1249_v0 = vadd.f32 %v2267_v14, %v1226_v32  ;;  %v1215_v45 = vpop.f32.mrf.mxu1  ;;  %v1317_v57 = vadd.f32 %v1316_v49, %v1302_v63 }
 0x15b   : > { %v1257_v15 = vadd.f32 %v2267_v14, %v1234_v40  ;;  %v1184_v16 = vpop.f32.mrf.mxu0 }
 0x15c   : > { %1265 = vst [vmem:[%s2272_s30 + $0x30] sm:$0xff] %v1249_v0  ;;  %v1303_v35 = vmul.f32 %v1249_v0, %v1249_v0  ;;  %v1227_v36 = vadd.f32 %v1184_v16, %v895_v39  ;;  %v1216_v50 = vpop.f32.mrf.mxu1  ;;  %v1280_v58 = vadd.f32 %v1279_v47, %v1249_v0 }
 0x15d   : > { %1273 = vst [vmem:[%s2272_s30 + $0x70] sm:$0xff] %v1257_v15  ;;  %v1235_v53 = vadd.f32 %v1216_v50, %v927_v46  ;;  %v1186_v54 = vpop.f32.mrf.mxu0 }
 0x15e   : > { %v1250_v19 = vadd.f32 %v2267_v14, %v1227_v36  ;;  %v1218_v20 = vpop.f32.mrf.mxu1  ;;  %v1318_v5 = vadd.f32 %v1317_v57, %v1303_v35 }
 0x15f   : > { %v1258_v4 = vadd.f32 %v2267_v14, %v1235_v53  ;;  %v1307_v14 = vmul.f32 %v2297_v48, %v2297_v48 }
 0x160   : > { %1266 = vst [vmem:[%s2272_s30 + $0x38] sm:$0xff] %v1250_v19  ;;  %v1281_v61 = vadd.f32 %v1280_v58, %v1250_v19  ;;  %v1304_v51 = vmul.f32 %v1250_v19, %v1250_v19 }
 0x161   : > { %1274 = vst [vmem:[%s2272_s30 + $0x78] sm:$0xff] %v1258_v4  ;;  %v1312_v25 = vmul.f32 %v1258_v4, %v1258_v4 }
 0x162   : > { %v1282_v2 = vadd.f32 %v1281_v61, %v2278_v29  ;;  %v1319_v3 = vadd.f32 %v1318_v5, %v1304_v51 }
 0x164   : > { %v1283_v6 = vadd.f32 %v1282_v2, %v2287_v41  ;;  %v1320_v23 = vadd.f32 %v1319_v3, %v1305_v62 }
 0x166   : > { %v1284_v24 = vadd.f32 %v1283_v6, %v2297_v48  ;;  %v1321_v9 = vadd.f32 %v1320_v23, %v1306_v1  ;;  %v1311_v48 = vmul.f32 %v1257_v15, %v1257_v15 }
 0x168   : > { %v1322_v56 = vadd.f32 %v1321_v9, %v1307_v14  ;;  %v1285_v29 = vadd.f32 %v1284_v24, %v2308_v52 }
 0x16a   : > { %v1286_v41 = vadd.f32 %v1285_v29, %v2319_v10  ;;  %v1323_v17 = vadd.f32 %v1322_v56, %v1308_v55 }
 0x16c   : > { %v1287_v21 = vadd.f32 %v1286_v41, %v1256_v34  ;;  %v1324_v7 = vadd.f32 %v1323_v17, %v1309_v13 }
 0x16e   : > { %v1288_v8 = vadd.f32 %v1287_v21, %v1257_v15  ;;  %v1325_v27 = vadd.f32 %v1324_v7, %v1310_v18 }
 0x170   : > { %v1289_v28 = vadd.f32 %v1288_v8, %v1258_v4  ;;  %v1326_v59 = vadd.f32 %v1325_v27, %v1311_v48 }
 0x172   : > { %v1290_v60 = vrot.slane %v1289_v28, 4  ;;  %v1327_v52 = vadd.f32 %v1326_v59, %v1312_v25 }
 0x174   : > { %v1291_v26 = vadd.f32 %v1290_v60, %v1289_v28  ;;  %v1328_v30 = vrot.slane %v1327_v52, 4 }
 0x176   : > { %v1292_v33 = vrot.slane %v1291_v26, 2  ;;  %v1329_v10 = vadd.f32 %v1328_v30, %v1327_v52 }
 0x178   : > { %v1293_v22 = vadd.f32 %v1292_v33, %v1291_v26  ;;  %v1330_v34 = vrot.slane %v1329_v10, 2 }
 0x17a   : > { %v1294_v37 = vrot.slane %v1293_v22, 1  ;;  %v1331_v38 = vadd.f32 %v1330_v34, %v1329_v10 }
 0x17c   : > { %v1295_v11 = vadd.f32 %v1294_v37, %v1293_v22  ;;  %v1332_v31 = vrot.slane %v1331_v38, 1 }
 0x17e   : > { %1296 = vst [vmem:[%s290_s11] sm:$0x1] %v1295_v11  ;;  %v1333_v32 = vadd.f32 %v1332_v31, %v1331_v38 }
 0x180   : > { %1334 = vst [vmem:[%s290_s11 + $0x1] sm:$0x1] %v1333_v32 }
 0x181 PF: > { %s16_s22 = sadd.s32 1, %s1881_s22   ;;  %s2386_s18 = smov %s1873_s20 }
 0x182   : > { %p13_p8 = scmp.ge.s32.totalorder %s16_s22, 6   ;;  %s2387_s19 = smov %s1877_s21 }
 0x183   : > { %s2388_s20 = smov %s2391_s23  ;;  %s2389_s21 = smov %s2395_s24 }
 0x184   :  { %15 = sbr.rel (!%p13_p8) target bundleno = 3 (0x3), region = 86 }

// kernel: discriminator_forward.12
= control target key start
LH: loop header
LB: loop body
LE: loop exit
PB: predicated region body
PF: predicated region fallthrough
CT: control target
= control target key end

     0   :  { %s1503_s0 = inlined_call_operand.vmem [shape: f32[512,128], index: 0, kind: input, shape index: {}]   ;;  %s1504_s1 = inlined_call_operand.vmem [shape: f32[1,128], index: 1, kind: input, shape index: {}]   ;;  %s1505_s2 = inlined_call_operand.vmem [shape: f32[1,128], index: 2, kind: input, shape index: {}]   ;;  %s1506_s3 = inlined_call_operand.vmem [shape: bf16[512,128], index: 3, kind: output, shape index: {}]  }
   0x1   :  { %v14_v0 = vld [vmem:[%s1503_s0] sm:$0xff]  ;;  %v15_v1 = vld [vmem:[%s1503_s0 + $0x8] sm:$0xff]  ;;  %v16_v6 = vld [vmem:[%s1503_s0 + $0x10] sm:$0xff] }
   0x2   :  { %v1086_v2 = vld [vmem:[%s1504_s1] ss:$0 sm:$0xff]  ;;  %v17_v7 = vld [vmem:[%s1503_s0 + $0x18] sm:$0xff]  ;;  %v19_v11 = vld [vmem:[%s1503_s0 + $0x28] sm:$0xff] }
   0x3   :  { %v85_v3 = vmul.f32 %v1086_v2, %v14_v0  ;;  %v86_v4 = vmul.f32 %v1086_v2, %v15_v1  ;;  %v1093_v5 = vld [vmem:[%s1505_s2] ss:$0 sm:$0xff]  ;;  %v87_v8 = vmul.f32 %v1086_v2, %v16_v6  ;;  %v88_v9 = vmul.f32 %v1086_v2, %v17_v7  ;;  %v20_v12 = vld [vmem:[%s1503_s0 + $0x30] sm:$0xff]  ;;  %v21_v17 = vld [vmem:[%s1503_s0 + $0x38] sm:$0xff] }
   0x4   :  { %v18_v10 = vld [vmem:[%s1503_s0 + $0x20] sm:$0xff]  ;;  %v90_v16 = vmul.f32 %v1086_v2, %v19_v11  ;;  %v91_v20 = vmul.f32 %v1086_v2, %v20_v12  ;;  %v92_v21 = vmul.f32 %v1086_v2, %v21_v17  ;;  %v23_v35 = vld [vmem:[%s1503_s0 + $0x48] sm:$0xff]  ;;  %v24_v36 = vld [vmem:[%s1503_s0 + $0x50] sm:$0xff] }
   0x5   :  { %v156_v13 = vadd.f32 %v1093_v5, %v85_v3  ;;  %v157_v14 = vadd.f32 %v1093_v5, %v86_v4  ;;  %v89_v15 = vmul.f32 %v1086_v2, %v18_v10  ;;  %v158_v18 = vadd.f32 %v1093_v5, %v87_v8  ;;  %v22_v34 = vld [vmem:[%s1503_s0 + $0x40] sm:$0xff]  ;;  %v25_v42 = vld [vmem:[%s1503_s0 + $0x58] sm:$0xff]  ;;  %v27_v48 = vld [vmem:[%s1503_s0 + $0x68] sm:$0xff] }
   0x6   :  { %v159_v19 = vadd.f32 %v1093_v5, %v88_v9  ;;  %v161_v29 = vadd.f32 %v1093_v5, %v90_v16  ;;  %v162_v33 = vadd.f32 %v1093_v5, %v91_v20  ;;  %v163_v40 = vadd.f32 %v1093_v5, %v92_v21  ;;  %v26_v47 = vld [vmem:[%s1503_s0 + $0x60] sm:$0xff]  ;;  %v28_v60 = vld [vmem:[%s1503_s0 + $0x70] sm:$0xff]  ;;  %v29_v7 = vld [vmem:[%s1503_s0 + $0x78] sm:$0xff] }
   0x7   :  { %vm220_vm0 = vcmp.gt.f32.partialorder %v156_v13, 0.0  ;;  %vm221_vm1 = vcmp.gt.f32.partialorder %v157_v14, 0.0  ;;  %v284_v22 = vmul.f32 0.2, %v156_v13  ;;  %v285_v23 = vmul.f32 0.2, %v157_v14 }
   0x8   :  { %vm222_vm2 = vcmp.gt.f32.partialorder %v158_v18, 0.0  ;;  %vm223_vm3 = vcmp.gt.f32.partialorder %v159_v19, 0.0  ;;  %v286_v24 = vmul.f32 0.2, %v158_v18  ;;  %v287_v25 = vmul.f32 0.2, %v159_v19 }
   0x9   :  { %v348_v26 = vsel %vm220_vm0, %v156_v13, %v284_v22  ;;  %v349_v27 = vsel %vm221_vm1, %v157_v14, %v285_v23  ;;  %v160_v28 = vadd.f32 %v1093_v5, %v89_v15  ;;  %vm225_vm5 = vcmp.gt.f32.partialorder %v161_v29, 0.0  ;;  %v30_v12 = vld [vmem:[%s1503_s0 + $0x80] sm:$0xff]  ;;  %v31_v13 = vld [vmem:[%s1503_s0 + $0x88] sm:$0xff]  ;;  %v32_v20 = vld [vmem:[%s1503_s0 + $0x90] sm:$0xff] }
   0xa   :  { %v869_v30 = vpack.c.bf16 %v349_v27, %v348_v26  ;;  %v350_v31 = vsel %vm222_vm2, %v158_v18, %v286_v24  ;;  %v351_v32 = vsel %vm223_vm3, %v159_v19, %v287_v25  ;;  %v289_v39 = vmul.f32 0.2, %v161_v29  ;;  %v33_v25 = vld [vmem:[%s1503_s0 + $0x98] sm:$0xff] }
   0xb   :  { %v874_v37 = vpack.c.bf16 %v351_v32, %v350_v31  ;;  %vm224_vm4 = vcmp.gt.f32.partialorder %v160_v28, 0.0  ;;  %v288_v38 = vmul.f32 0.2, %v160_v28  ;;  %vm226_vm6 = vcmp.gt.f32.partialorder %v162_v33, 0.0 }
   0xc   :  { %870 = vst [vmem:[%s1506_s3] sm:$0xff] %v869_v30   ;;  %v290_v41 = vmul.f32 0.2, %v162_v33  ;;  %v93_v44 = vmul.f32 %v1086_v2, %v22_v34  ;;  %v94_v45 = vmul.f32 %v1086_v2, %v23_v35  ;;  %v95_v46 = vmul.f32 %v1086_v2, %v24_v36 }
   0xd   :  { %1026 = vst [vmem:[%s1506_s3 + $0x8] sm:$0xff] %v874_v37   ;;  %v352_v43 = vsel %vm224_vm4, %v160_v28, %v288_v38  ;;  %v353_v49 = vsel %vm225_vm5, %v161_v29, %v289_v39  ;;  %vm227_vm7 = vcmp.gt.f32.partialorder %v163_v40, 0.0  ;;  %v291_v50 = vmul.f32 0.2, %v163_v40  ;;  %v35_v37 = vld [vmem:[%s1503_s0 + $0xa8] sm:$0xff] }
   0xe   :  { %v354_v51 = vsel %vm226_vm6, %v162_v33, %v290_v41  ;;  %v879_v52 = vpack.c.bf16 %v353_v49, %v352_v43  ;;  %v164_v53 = vadd.f32 %v1093_v5, %v93_v44  ;;  %v165_v54 = vadd.f32 %v1093_v5, %v94_v45  ;;  %v34_v33 = vld [vmem:[%s1503_s0 + $0xa0] sm:$0xff]  ;;  %v36_v44 = vld [vmem:[%s1503_s0 + $0xb0] sm:$0xff]  ;;  %v37_v49 = vld [vmem:[%s1503_s0 + $0xb8] sm:$0xff] }
   0xf   :  { %v96_v55 = vmul.f32 %v1086_v2, %v25_v42  ;;  %v355_v56 = vsel %vm227_vm7, %v163_v40, %v291_v50  ;;  %v166_v57 = vadd.f32 %v1093_v5, %v95_v46  ;;  %v97_v58 = vmul.f32 %v1086_v2, %v26_v47  ;;  %v38_v50 = vld [vmem:[%s1503_s0 + $0xc0] sm:$0xff] }
  0x10   :  { %v98_v59 = vmul.f32 %v1086_v2, %v27_v48  ;;  %1027 = vst [vmem:[%s1506_s3 + $0x10] sm:$0xff] %v879_v52   ;;  %v884_v61 = vpack.c.bf16 %v355_v56, %v354_v51  ;;  %vm228_vm8 = vcmp.gt.f32.partialorder %v164_v53, 0.0  ;;  %vm229_vm9 = vcmp.gt.f32.partialorder %v165_v54, 0.0  ;;  %v39_v51 = vld [vmem:[%s1503_s0 + $0xc8] sm:$0xff] }
  0x11   :  { %v292_v62 = vmul.f32 0.2, %v164_v53  ;;  %v293_v63 = vmul.f32 0.2, %v165_v54  ;;  %v167_v0 = vadd.f32 %v1093_v5, %v96_v55  ;;  %vm230_vm10 = vcmp.gt.f32.partialorder %v166_v57, 0.0 }
  0x12   :  { %v294_v1 = vmul.f32 0.2, %v166_v57  ;;  %1028 = vst [vmem:[%s1506_s3 + $0x18] sm:$0xff] %v884_v61   ;;  %v168_v4 = vadd.f32 %v1093_v5, %v97_v58  ;;  %v169_v6 = vadd.f32 %v1093_v5, %v98_v59  ;;  %v99_v8 = vmul.f32 %v1086_v2, %v28_v60 }
  0x13   :  { %v356_v3 = vsel %vm228_vm8, %v164_v53, %v292_v62  ;;  %v357_v9 = vsel %vm229_vm9, %v165_v54, %v293_v63  ;;  %vm231_vm11 = vcmp.gt.f32.partialorder %v167_v0, 0.0  ;;  %v295_v10 = vmul.f32 0.2, %v167_v0  ;;  %v40_v62 = vld [vmem:[%s1503_s0 + $0xd0] sm:$0xff] }
  0x14   :  { %v358_v11 = vsel %vm230_vm10, %v166_v57, %v294_v1  ;;  %v889_v14 = vpack.c.bf16 %v357_v9, %v356_v3  ;;  %vm232_vm12 = vcmp.gt.f32.partialorder %v168_v4, 0.0  ;;  %vm233_vm13 = vcmp.gt.f32.partialorder %v169_v6, 0.0 }
  0x15   :  { %v296_v15 = vmul.f32 0.2, %v168_v4  ;;  %v359_v16 = vsel %vm231_vm11, %v167_v0, %v295_v10  ;;  %v297_v17 = vmul.f32 0.2, %v169_v6  ;;  %v100_v18 = vmul.f32 %v1086_v2, %v29_v7  ;;  %v41_v10 = vld [vmem:[%s1503_s0 + $0xd8] sm:$0xff] }
  0x16   :  { %v170_v19 = vadd.f32 %v1093_v5, %v99_v8  ;;  %1029 = vst [vmem:[%s1506_s3 + $0x20] sm:$0xff] %v889_v14   ;;  %v894_v21 = vpack.c.bf16 %v359_v16, %v358_v11  ;;  %v101_v23 = vmul.f32 %v1086_v2, %v30_v12  ;;  %v102_v24 = vmul.f32 %v1086_v2, %v31_v13  ;;  %v42_v14 = vld [vmem:[%s1503_s0 + $0xe0] sm:$0xff] }
  0x17   :  { %v360_v22 = vsel %vm232_vm12, %v168_v4, %v296_v15  ;;  %v361_v26 = vsel %vm233_vm13, %v169_v6, %v297_v17  ;;  %v171_v27 = vadd.f32 %v1093_v5, %v100_v18  ;;  %v103_v32 = vmul.f32 %v1086_v2, %v32_v20  ;;  %v43_v15 = vld [vmem:[%s1503_s0 + $0xe8] sm:$0xff] }
  0x18   :  { %vm234_vm14 = vcmp.gt.f32.partialorder %v170_v19, 0.0  ;;  %v298_v28 = vmul.f32 0.2, %v170_v19  ;;  %1030 = vst [vmem:[%s1506_s3 + $0x28] sm:$0xff] %v894_v21   ;;  %v899_v29 = vpack.c.bf16 %v361_v26, %v360_v22  ;;  %v172_v30 = vadd.f32 %v1093_v5, %v101_v23  ;;  %v44_v26 = vld [vmem:[%s1503_s0 + $0xf0] sm:$0xff] }
  0x19   :  { %v173_v31 = vadd.f32 %v1093_v5, %v102_v24  ;;  %vm235_vm15 = vcmp.gt.f32.partialorder %v171_v27, 0.0  ;;  %v299_v34 = vmul.f32 0.2, %v171_v27  ;;  %v104_v36 = vmul.f32 %v1086_v2, %v33_v25 }
  0x1a   :  { %v362_v35 = vsel %vm234_vm14, %v170_v19, %v298_v28  ;;  %1031 = vst [vmem:[%s1506_s3 + $0x30] sm:$0xff] %v899_v29   ;;  %vm236_vm0 = vcmp.gt.f32.partialorder %v172_v30, 0.0  ;;  %v300_v38 = vmul.f32 0.2, %v172_v30  ;;  %v174_v41 = vadd.f32 %v1093_v5, %v103_v32 }
  0x1b   :  { %vm237_vm1 = vcmp.gt.f32.partialorder %v173_v31, 0.0  ;;  %v301_v39 = vmul.f32 0.2, %v173_v31  ;;  %v363_v40 = vsel %vm235_vm15, %v171_v27, %v299_v34  ;;  %v175_v42 = vadd.f32 %v1093_v5, %v104_v36 }
  0x1c   :  { %v105_v43 = vmul.f32 %v1086_v2, %v34_v33  ;;  %v904_v45 = vpack.c.bf16 %v363_v40, %v362_v35  ;;  %v364_v46 = vsel %vm236_vm0, %v172_v30, %v300_v38  ;;  %v106_v48 = vmul.f32 %v1086_v2, %v35_v37  ;;  %v46_v38 = vld [vmem:[%s1503_s0 + $0x100] sm:$0xff] }
  0x1d   :  { %v365_v47 = vsel %vm237_vm1, %v173_v31, %v301_v39  ;;  %vm238_vm2 = vcmp.gt.f32.partialorder %v174_v41, 0.0  ;;  %vm239_vm3 = vcmp.gt.f32.partialorder %v175_v42, 0.0  ;;  %v302_v53 = vmul.f32 0.2, %v174_v41  ;;  %v45_v31 = vld [vmem:[%s1503_s0 + $0xf8] sm:$0xff] }
  0x1e   :  { %v909_v52 = vpack.c.bf16 %v365_v47, %v364_v46  ;;  %1032 = vst [vmem:[%s1506_s3 + $0x38] sm:$0xff] %v904_v45   ;;  %v303_v54 = vmul.f32 0.2, %v175_v42  ;;  %v176_v55 = vadd.f32 %v1093_v5, %v105_v43  ;;  %v177_v56 = vadd.f32 %v1093_v5, %v106_v48 }
  0x1f   :  { %v107_v57 = vmul.f32 %v1086_v2, %v36_v44  ;;  %v366_v58 = vsel %vm238_vm2, %v174_v41, %v302_v53  ;;  %v108_v59 = vmul.f32 %v1086_v2, %v37_v49  ;;  %v109_v60 = vmul.f32 %v1086_v2, %v38_v50  ;;  %v48_v50 = vld [vmem:[%s1503_s0 + $0x110] sm:$0xff] }
  0x20   :  { %1033 = vst [vmem:[%s1506_s3 + $0x40] sm:$0xff] %v909_v52   ;;  %v110_v61 = vmul.f32 %v1086_v2, %v39_v51  ;;  %v367_v63 = vsel %vm239_vm3, %v175_v42, %v303_v54  ;;  %vm240_vm4 = vcmp.gt.f32.partialorder %v176_v55, 0.0  ;;  %vm241_vm5 = vcmp.gt.f32.partialorder %v177_v56, 0.0  ;;  %v47_v42 = vld [vmem:[%s1503_s0 + $0x108] sm:$0xff]  ;;  %v49_v51 = vld [vmem:[%s1503_s0 + $0x118] sm:$0xff] }
  0x21   :  { %v304_v0 = vmul.f32 0.2, %v176_v55  ;;  %v914_v1 = vpack.c.bf16 %v367_v63, %v366_v58  ;;  %v305_v3 = vmul.f32 0.2, %v177_v56  ;;  %v178_v4 = vadd.f32 %v1093_v5, %v107_v57  ;;  %v51_v63 = vld [vmem:[%s1503_s0 + $0x128] sm:$0xff] }
  0x22   :  { %v179_v6 = vadd.f32 %v1093_v5, %v108_v59  ;;  %v180_v8 = vadd.f32 %v1093_v5, %v109_v60  ;;  %v181_v9 = vadd.f32 %v1093_v5, %v110_v61  ;;  %v111_v11 = vmul.f32 %v1086_v2, %v40_v62 }
  0x23   :  { %v368_v7 = vsel %vm240_vm4, %v176_v55, %v304_v0  ;;  %1034 = vst [vmem:[%s1506_s3 + $0x48] sm:$0xff] %v914_v1   ;;  %v369_v12 = vsel %vm241_vm5, %v177_v56, %v305_v3  ;;  %vm242_vm6 = vcmp.gt.f32.partialorder %v178_v4, 0.0  ;;  %v306_v13 = vmul.f32 0.2, %v178_v4  ;;  %v50_v55 = vld [vmem:[%s1503_s0 + $0x120] sm:$0xff] }
  0x24   :  { %vm243_vm7 = vcmp.gt.f32.partialorder %v179_v6, 0.0  ;;  %v919_v16 = vpack.c.bf16 %v369_v12, %v368_v7  ;;  %v307_v17 = vmul.f32 0.2, %v179_v6  ;;  %vm244_vm8 = vcmp.gt.f32.partialorder %v180_v8, 0.0 }
  0x25   :  { %vm245_vm9 = vcmp.gt.f32.partialorder %v181_v9, 0.0  ;;  %v370_v18 = vsel %vm242_vm6, %v178_v4, %v306_v13  ;;  %v308_v19 = vmul.f32 0.2, %v180_v8  ;;  %v309_v20 = vmul.f32 0.2, %v181_v9  ;;  %v52_v4 = vld [vmem:[%s1503_s0 + $0x130] sm:$0xff] }
  0x26   :  { %v112_v21 = vmul.f32 %v1086_v2, %v41_v10  ;;  %1035 = vst [vmem:[%s1506_s3 + $0x50] sm:$0xff] %v919_v16   ;;  %v371_v22 = vsel %vm243_vm7, %v179_v6, %v307_v17  ;;  %v182_v23 = vadd.f32 %v1093_v5, %v111_v11  ;;  %v113_v24 = vmul.f32 %v1086_v2, %v42_v14  ;;  %v53_v13 = vld [vmem:[%s1503_s0 + $0x138] sm:$0xff] }
  0x27   :  { %v114_v25 = vmul.f32 %v1086_v2, %v43_v15  ;;  %v924_v27 = vpack.c.bf16 %v371_v22, %v370_v18  ;;  %v372_v28 = vsel %vm244_vm8, %v180_v8, %v308_v19  ;;  %v373_v29 = vsel %vm245_vm9, %v181_v9, %v309_v20  ;;  %v54_v20 = vld [vmem:[%s1503_s0 + $0x140] sm:$0xff] }
  0x28   :  { %v183_v30 = vadd.f32 %v1093_v5, %v112_v21  ;;  %v929_v32 = vpack.c.bf16 %v373_v29, %v372_v28  ;;  %vm246_vm10 = vcmp.gt.f32.partialorder %v182_v23, 0.0  ;;  %v310_v33 = vmul.f32 0.2, %v182_v23 }
  0x29   :  { %v184_v34 = vadd.f32 %v1093_v5, %v113_v24  ;;  %1036 = vst [vmem:[%s1506_s3 + $0x58] sm:$0xff] %v924_v27   ;;  %v185_v36 = vadd.f32 %v1093_v5, %v114_v25  ;;  %v115_v37 = vmul.f32 %v1086_v2, %v44_v26  ;;  %v116_v41 = vmul.f32 %v1086_v2, %v45_v31  ;;  %v55_v24 = vld [vmem:[%s1503_s0 + $0x148] sm:$0xff] }
  0x2a   :  { %vm247_vm11 = vcmp.gt.f32.partialorder %v183_v30, 0.0  ;;  %v311_v35 = vmul.f32 0.2, %v183_v30  ;;  %1037 = vst [vmem:[%s1506_s3 + $0x60] sm:$0xff] %v929_v32   ;;  %v374_v39 = vsel %vm246_vm10, %v182_v23, %v310_v33  ;;  %v117_v49 = vmul.f32 %v1086_v2, %v46_v38  ;;  %v56_v32 = vld [vmem:[%s1503_s0 + $0x150] sm:$0xff]  ;;  %v57_v33 = vld [vmem:[%s1503_s0 + $0x158] sm:$0xff] }
  0x2b   :  { %vm248_vm12 = vcmp.gt.f32.partialorder %v184_v34, 0.0  ;;  %v312_v40 = vmul.f32 0.2, %v184_v34  ;;  %vm249_vm13 = vcmp.gt.f32.partialorder %v185_v36, 0.0  ;;  %v313_v44 = vmul.f32 0.2, %v185_v36 }
  0x2c   :  { %v375_v43 = vsel %vm247_vm11, %v183_v30, %v311_v35  ;;  %v186_v45 = vadd.f32 %v1093_v5, %v115_v37  ;;  %v187_v48 = vadd.f32 %v1093_v5, %v116_v41  ;;  %v118_v54 = vmul.f32 %v1086_v2, %v47_v42  ;;  %v58_v37 = vld [vmem:[%s1503_s0 + $0x160] sm:$0xff] }
  0x2d   :  { %v934_v46 = vpack.c.bf16 %v375_v43, %v374_v39  ;;  %v376_v47 = vsel %vm248_vm12, %v184_v34, %v312_v40  ;;  %v377_v52 = vsel %vm249_vm13, %v185_v36, %v313_v44  ;;  %v188_v58 = vadd.f32 %v1093_v5, %v117_v49  ;;  %v60_v49 = vld [vmem:[%s1503_s0 + $0x170] sm:$0xff] }
  0x2e   :  { %vm250_vm14 = vcmp.gt.f32.partialorder %v186_v45, 0.0  ;;  %v314_v53 = vmul.f32 0.2, %v186_v45  ;;  %v939_v56 = vpack.c.bf16 %v377_v52, %v376_v47  ;;  %vm251_vm15 = vcmp.gt.f32.partialorder %v187_v48, 0.0 }
  0x2f   :  { %1038 = vst [vmem:[%s1506_s3 + $0x68] sm:$0xff] %v934_v46   ;;  %v315_v57 = vmul.f32 0.2, %v187_v48  ;;  %v189_v60 = vadd.f32 %v1093_v5, %v118_v54  ;;  %v119_v61 = vmul.f32 %v1086_v2, %v48_v50  ;;  %v120_v62 = vmul.f32 %v1086_v2, %v49_v51 }
  0x30   :  { %v378_v59 = vsel %vm250_vm14, %v186_v45, %v314_v53  ;;  %1039 = vst [vmem:[%s1506_s3 + $0x70] sm:$0xff] %v939_v56   ;;  %vm252_vm0 = vcmp.gt.f32.partialorder %v188_v58, 0.0  ;;  %v316_v1 = vmul.f32 0.2, %v188_v58  ;;  %v121_v3 = vmul.f32 %v1086_v2, %v50_v55  ;;  %v59_v45 = vld [vmem:[%s1503_s0 + $0x168] sm:$0xff] }
  0x31   :  { %v379_v0 = vsel %vm251_vm15, %v187_v48, %v315_v57  ;;  %vm253_vm1 = vcmp.gt.f32.partialorder %v189_v60, 0.0  ;;  %v317_v7 = vmul.f32 0.2, %v189_v60  ;;  %v190_v8 = vadd.f32 %v1093_v5, %v119_v61  ;;  %v61_v57 = vld [vmem:[%s1503_s0 + $0x178] sm:$0xff] }
  0x32   :  { %v944_v6 = vpack.c.bf16 %v379_v0, %v378_v59  ;;  %v380_v9 = vsel %vm252_vm0, %v188_v58, %v316_v1  ;;  %v191_v10 = vadd.f32 %v1093_v5, %v120_v62  ;;  %v122_v11 = vmul.f32 %v1086_v2, %v51_v63  ;;  %v62_v0 = vld [vmem:[%s1503_s0 + $0x180] sm:$0xff] }
  0x33   :  { %v192_v12 = vadd.f32 %v1093_v5, %v121_v3  ;;  %v381_v14 = vsel %vm253_vm1, %v189_v60, %v317_v7  ;;  %vm254_vm2 = vcmp.gt.f32.partialorder %v190_v8, 0.0  ;;  %v318_v15 = vmul.f32 0.2, %v190_v8 }
  0x34   :  { %1040 = vst [vmem:[%s1506_s3 + $0x78] sm:$0xff] %v944_v6   ;;  %v123_v16 = vmul.f32 %v1086_v2, %v52_v4  ;;  %v949_v17 = vpack.c.bf16 %v381_v14, %v380_v9  ;;  %vm255_vm3 = vcmp.gt.f32.partialorder %v191_v10, 0.0  ;;  %v319_v18 = vmul.f32 0.2, %v191_v10  ;;  %v63_v6 = vld [vmem:[%s1503_s0 + $0x188] sm:$0xff]  ;;  %v64_v14 = vld [vmem:[%s1503_s0 + $0x190] sm:$0xff] }
  0x35   :  { %v193_v19 = vadd.f32 %v1093_v5, %v122_v11  ;;  %v382_v21 = vsel %vm254_vm2, %v190_v8, %v318_v15  ;;  %vm256_vm4 = vcmp.gt.f32.partialorder %v192_v12, 0.0  ;;  %v320_v22 = vmul.f32 0.2, %v192_v12  ;;  %v65_v15 = vld [vmem:[%s1503_s0 + $0x198] sm:$0xff] }
  0x36   :  { %v124_v23 = vmul.f32 %v1086_v2, %v53_v13  ;;  %1041 = vst [vmem:[%s1506_s3 + $0x80] sm:$0xff] %v949_v17   ;;  %v383_v25 = vsel %vm255_vm3, %v191_v10, %v319_v18  ;;  %v194_v27 = vadd.f32 %v1093_v5, %v123_v16  ;;  %v125_v31 = vmul.f32 %v1086_v2, %v54_v20 }
  0x37   :  { %vm257_vm5 = vcmp.gt.f32.partialorder %v193_v19, 0.0  ;;  %v321_v26 = vmul.f32 0.2, %v193_v19  ;;  %v954_v28 = vpack.c.bf16 %v383_v25, %v382_v21  ;;  %v384_v29 = vsel %vm256_vm4, %v192_v12, %v320_v22 }
  0x38   :  { %v195_v30 = vadd.f32 %v1093_v5, %v124_v23  ;;  %vm258_vm6 = vcmp.gt.f32.partialorder %v194_v27, 0.0  ;;  %v322_v35 = vmul.f32 0.2, %v194_v27  ;;  %v126_v36 = vmul.f32 %v1086_v2, %v55_v24 }
  0x39   :  { %v385_v34 = vsel %vm257_vm5, %v193_v19, %v321_v26  ;;  %1042 = vst [vmem:[%s1506_s3 + $0x88] sm:$0xff] %v954_v28   ;;  %v196_v40 = vadd.f32 %v1093_v5, %v125_v31  ;;  %v127_v43 = vmul.f32 %v1086_v2, %v56_v32  ;;  %v128_v44 = vmul.f32 %v1086_v2, %v57_v33  ;;  %v66_v19 = vld [vmem:[%s1503_s0 + $0x1a0] sm:$0xff]  ;;  %v68_v31 = vld [vmem:[%s1503_s0 + $0x1b0] sm:$0xff] }
  0x3a   :  { %v959_v38 = vpack.c.bf16 %v385_v34, %v384_v29  ;;  %vm259_vm7 = vcmp.gt.f32.partialorder %v195_v30, 0.0  ;;  %v323_v39 = vmul.f32 0.2, %v195_v30  ;;  %v386_v41 = vsel %vm258_vm6, %v194_v27, %v322_v35  ;;  %v67_v27 = vld [vmem:[%s1503_s0 + $0x1a8] sm:$0xff] }
  0x3b   :  { %v197_v42 = vadd.f32 %v1093_v5, %v126_v36  ;;  %vm260_vm8 = vcmp.gt.f32.partialorder %v196_v40, 0.0  ;;  %v324_v47 = vmul.f32 0.2, %v196_v40  ;;  %v129_v48 = vmul.f32 %v1086_v2, %v58_v37 }
  0x3c   :  { %1043 = vst [vmem:[%s1506_s3 + $0x90] sm:$0xff] %v959_v38   ;;  %v387_v46 = vsel %vm259_vm7, %v195_v30, %v323_v39  ;;  %v198_v52 = vadd.f32 %v1093_v5, %v127_v43  ;;  %v199_v54 = vadd.f32 %v1093_v5, %v128_v44  ;;  %v130_v55 = vmul.f32 %v1086_v2, %v59_v45  ;;  %v69_v39 = vld [vmem:[%s1503_s0 + $0x1b8] sm:$0xff] }
  0x3d   :  { %v964_v50 = vpack.c.bf16 %v387_v46, %v386_v41  ;;  %vm261_vm9 = vcmp.gt.f32.partialorder %v197_v42, 0.0  ;;  %v325_v51 = vmul.f32 0.2, %v197_v42  ;;  %v388_v53 = vsel %vm260_vm8, %v196_v40, %v324_v47  ;;  %v70_v46 = vld [vmem:[%s1503_s0 + $0x1c0] sm:$0xff] }
  0x3e   :  { %v200_v56 = vadd.f32 %v1093_v5, %v129_v48  ;;  %vm262_vm10 = vcmp.gt.f32.partialorder %v198_v52, 0.0  ;;  %v326_v59 = vmul.f32 0.2, %v198_v52  ;;  %v131_v60 = vmul.f32 %v1086_v2, %v60_v49 }
  0x3f   :  { %1044 = vst [vmem:[%s1506_s3 + $0x98] sm:$0xff] %v964_v50   ;;  %v389_v58 = vsel %vm261_vm9, %v197_v42, %v325_v51  ;;  %vm263_vm11 = vcmp.gt.f32.partialorder %v199_v54, 0.0  ;;  %v327_v62 = vmul.f32 0.2, %v199_v54  ;;  %v201_v63 = vadd.f32 %v1093_v5, %v130_v55  ;;  %v71_v50 = vld [vmem:[%s1503_s0 + $0x1c8] sm:$0xff] }
  0x40   :  { %v969_v61 = vpack.c.bf16 %v389_v58, %v388_v53  ;;  %v390_v1 = vsel %vm262_vm10, %v198_v52, %v326_v59  ;;  %vm264_vm12 = vcmp.gt.f32.partialorder %v200_v56, 0.0  ;;  %v328_v3 = vmul.f32 0.2, %v200_v56  ;;  %v72_v58 = vld [vmem:[%s1503_s0 + $0x1d0] sm:$0xff]  ;;  %v73_v59 = vld [vmem:[%s1503_s0 + $0x1d8] sm:$0xff] }
  0x41   :  { %v132_v4 = vmul.f32 %v1086_v2, %v61_v57  ;;  %v391_v7 = vsel %vm263_vm11, %v199_v54, %v327_v62  ;;  %vm265_vm13 = vcmp.gt.f32.partialorder %v201_v63, 0.0  ;;  %v329_v8 = vmul.f32 0.2, %v201_v63 }
  0x42   :  { %1045 = vst [vmem:[%s1506_s3 + $0xa0] sm:$0xff] %v969_v61   ;;  %v202_v9 = vadd.f32 %v1093_v5, %v131_v60  ;;  %v974_v10 = vpack.c.bf16 %v391_v7, %v390_v1  ;;  %v392_v11 = vsel %vm264_vm12, %v200_v56, %v328_v3  ;;  %v133_v13 = vmul.f32 %v1086_v2, %v62_v0 }
  0x43   :  { %v203_v12 = vadd.f32 %v1093_v5, %v132_v4  ;;  %v393_v16 = vsel %vm265_vm13, %v201_v63, %v329_v8  ;;  %v134_v18 = vmul.f32 %v1086_v2, %v63_v6  ;;  %v135_v25 = vmul.f32 %v1086_v2, %v64_v14  ;;  %v74_v63 = vld [vmem:[%s1503_s0 + $0x1e0] sm:$0xff] }
  0x44   :  { %vm266_vm14 = vcmp.gt.f32.partialorder %v202_v9, 0.0  ;;  %v330_v17 = vmul.f32 0.2, %v202_v9  ;;  %1046 = vst [vmem:[%s1506_s3 + $0xa8] sm:$0xff] %v974_v10   ;;  %v979_v20 = vpack.c.bf16 %v393_v16, %v392_v11  ;;  %v204_v22 = vadd.f32 %v1093_v5, %v133_v13  ;;  %v76_v13 = vld [vmem:[%s1503_s0 + $0x1f0] sm:$0xff] }
  0x45   :  { %vm267_vm15 = vcmp.gt.f32.partialorder %v203_v12, 0.0  ;;  %v331_v21 = vmul.f32 0.2, %v203_v12  ;;  %v205_v24 = vadd.f32 %v1093_v5, %v134_v18  ;;  %v136_v26 = vmul.f32 %v1086_v2, %v65_v15 }
  0x46   :  { %v394_v23 = vsel %vm266_vm14, %v202_v9, %v330_v17  ;;  %1047 = vst [vmem:[%s1506_s3 + $0xb0] sm:$0xff] %v979_v20   ;;  %vm268_vm0 = vcmp.gt.f32.partialorder %v204_v22, 0.0  ;;  %v332_v29 = vmul.f32 0.2, %v204_v22  ;;  %v137_v30 = vmul.f32 %v1086_v2, %v66_v19  ;;  %v75_v9 = vld [vmem:[%s1503_s0 + $0x1e8] sm:$0xff] }
  0x47   :  { %v395_v28 = vsel %vm267_vm15, %v203_v12, %v331_v21  ;;  %vm269_vm1 = vcmp.gt.f32.partialorder %v205_v24, 0.0  ;;  %v333_v33 = vmul.f32 0.2, %v205_v24  ;;  %v206_v34 = vadd.f32 %v1093_v5, %v135_v25  ;;  %v77_v21 = vld [vmem:[%s1503_s0 + $0x1f8] sm:$0xff] }
  0x48   :  { %v984_v32 = vpack.c.bf16 %v395_v28, %v394_v23  ;;  %v396_v35 = vsel %vm268_vm0, %v204_v22, %v332_v29  ;;  %v207_v36 = vadd.f32 %v1093_v5, %v136_v26  ;;  %v138_v37 = vmul.f32 %v1086_v2, %v67_v27 }
  0x49   :  { %v208_v38 = vadd.f32 %v1093_v5, %v137_v30  ;;  %v397_v40 = vsel %vm269_vm1, %v205_v24, %v333_v33  ;;  %vm270_vm2 = vcmp.gt.f32.partialorder %v206_v34, 0.0  ;;  %v334_v41 = vmul.f32 0.2, %v206_v34 }
  0x4a   :  { %1048 = vst [vmem:[%s1506_s3 + $0xb8] sm:$0xff] %v984_v32   ;;  %v139_v42 = vmul.f32 %v1086_v2, %v68_v31  ;;  %v989_v43 = vpack.c.bf16 %v397_v40, %v396_v35  ;;  %vm271_vm3 = vcmp.gt.f32.partialorder %v207_v36, 0.0  ;;  %v335_v44 = vmul.f32 0.2, %v207_v36 }
  0x4b   :  { %v209_v45 = vadd.f32 %v1093_v5, %v138_v37  ;;  %v398_v47 = vsel %vm270_vm2, %v206_v34, %v334_v41  ;;  %vm272_vm4 = vcmp.gt.f32.partialorder %v208_v38, 0.0  ;;  %v336_v48 = vmul.f32 0.2, %v208_v38 }
  0x4c   :  { %v140_v49 = vmul.f32 %v1086_v2, %v69_v39  ;;  %1049 = vst [vmem:[%s1506_s3 + $0xc0] sm:$0xff] %v989_v43   ;;  %v399_v51 = vsel %vm271_vm3, %v207_v36, %v335_v44  ;;  %v210_v53 = vadd.f32 %v1093_v5, %v139_v42  ;;  %v141_v57 = vmul.f32 %v1086_v2, %v70_v46 }
  0x4d   :  { %vm273_vm5 = vcmp.gt.f32.partialorder %v209_v45, 0.0  ;;  %v337_v52 = vmul.f32 0.2, %v209_v45  ;;  %v994_v54 = vpack.c.bf16 %v399_v51, %v398_v47  ;;  %v400_v55 = vsel %vm272_vm4, %v208_v38, %v336_v48 }
  0x4e   :  { %v211_v56 = vadd.f32 %v1093_v5, %v140_v49  ;;  %vm274_vm6 = vcmp.gt.f32.partialorder %v210_v53, 0.0  ;;  %v338_v61 = vmul.f32 0.2, %v210_v53  ;;  %v142_v62 = vmul.f32 %v1086_v2, %v71_v50 }
  0x4f   :  { %v401_v60 = vsel %vm273_vm5, %v209_v45, %v337_v52  ;;  %1050 = vst [vmem:[%s1506_s3 + $0xc8] sm:$0xff] %v994_v54   ;;  %v212_v3 = vadd.f32 %v1093_v5, %v141_v57  ;;  %v143_v7 = vmul.f32 %v1086_v2, %v72_v58  ;;  %v144_v8 = vmul.f32 %v1086_v2, %v73_v59 }
  0x50   :  { %v999_v0 = vpack.c.bf16 %v401_v60, %v400_v55  ;;  %vm275_vm7 = vcmp.gt.f32.partialorder %v211_v56, 0.0  ;;  %v339_v1 = vmul.f32 0.2, %v211_v56  ;;  %v402_v4 = vsel %vm274_vm6, %v210_v53, %v338_v61 }
  0x51   :  { %v213_v6 = vadd.f32 %v1093_v5, %v142_v62  ;;  %vm276_vm8 = vcmp.gt.f32.partialorder %v212_v3, 0.0  ;;  %v340_v11 = vmul.f32 0.2, %v212_v3  ;;  %v145_v12 = vmul.f32 %v1086_v2, %v74_v63 }
  0x52   :  { %1051 = vst [vmem:[%s1506_s3 + $0xd0] sm:$0xff] %v999_v0   ;;  %v403_v10 = vsel %vm275_vm7, %v211_v56, %v339_v1  ;;  %v214_v16 = vadd.f32 %v1093_v5, %v143_v7  ;;  %v215_v18 = vadd.f32 %v1093_v5, %v144_v8  ;;  %v146_v19 = vmul.f32 %v1086_v2, %v75_v9 }
  0x53   :  { %v1004_v14 = vpack.c.bf16 %v403_v10, %v402_v4  ;;  %vm277_vm9 = vcmp.gt.f32.partialorder %v213_v6, 0.0  ;;  %v341_v15 = vmul.f32 0.2, %v213_v6  ;;  %v404_v17 = vsel %vm276_vm8, %v212_v3, %v340_v11 }
  0x54   :  { %v216_v20 = vadd.f32 %v1093_v5, %v145_v12  ;;  %vm278_vm10 = vcmp.gt.f32.partialorder %v214_v16, 0.0  ;;  %v342_v23 = vmul.f32 0.2, %v214_v16  ;;  %v147_v24 = vmul.f32 %v1086_v2, %v76_v13 }
  0x55   :  { %1052 = vst [vmem:[%s1506_s3 + $0xd8] sm:$0xff] %v1004_v14   ;;  %v405_v22 = vsel %vm277_vm9, %v213_v6, %v341_v15  ;;  %vm279_vm11 = vcmp.gt.f32.partialorder %v215_v18, 0.0  ;;  %v343_v26 = vmul.f32 0.2, %v215_v18  ;;  %v217_v27 = vadd.f32 %v1093_v5, %v146_v19 }
  0x56   :  { %v1009_v25 = vpack.c.bf16 %v405_v22, %v404_v17  ;;  %v406_v28 = vsel %vm278_vm10, %v214_v16, %v342_v23  ;;  %vm280_vm12 = vcmp.gt.f32.partialorder %v216_v20, 0.0  ;;  %v344_v29 = vmul.f32 0.2, %v216_v20 }
  0x57   :  { %v148_v30 = vmul.f32 %v1086_v2, %v77_v21  ;;  %v407_v31 = vsel %vm279_vm11, %v215_v18, %v343_v26  ;;  %vm281_vm13 = vcmp.gt.f32.partialorder %v217_v27, 0.0  ;;  %v345_v32 = vmul.f32 0.2, %v217_v27 }
  0x58   :  { %1053 = vst [vmem:[%s1506_s3 + $0xe0] sm:$0xff] %v1009_v25   ;;  %v218_v33 = vadd.f32 %v1093_v5, %v147_v24  ;;  %v1014_v34 = vpack.c.bf16 %v407_v31, %v406_v28  ;;  %v408_v35 = vsel %vm280_vm12, %v216_v20, %v344_v29 }
  0x59   :  { %v219_v36 = vadd.f32 %v1093_v5, %v148_v30  ;;  %v409_v37 = vsel %vm281_vm13, %v217_v27, %v345_v32 }
  0x5a   :  { %vm282_vm14 = vcmp.gt.f32.partialorder %v218_v33, 0.0  ;;  %v346_v38 = vmul.f32 0.2, %v218_v33  ;;  %1054 = vst [vmem:[%s1506_s3 + $0xe8] sm:$0xff] %v1014_v34   ;;  %v1019_v2 = vpack.c.bf16 %v409_v37, %v408_v35 }
  0x5b   :  { %vm283_vm15 = vcmp.gt.f32.partialorder %v219_v36, 0.0  ;;  %v347_v39 = vmul.f32 0.2, %v219_v36 }
  0x5c   :  { %v410_v40 = vsel %vm282_vm14, %v218_v33, %v346_v38  ;;  %1055 = vst [vmem:[%s1506_s3 + $0xf0] sm:$0xff] %v1019_v2  }
  0x5d   :  { %v411_v41 = vsel %vm283_vm15, %v219_v36, %v347_v39 }
  0x5e   :  { %v1024_v42 = vpack.c.bf16 %v411_v41, %v410_v40 }
  0x60   :  { %1056 = vst [vmem:[%s1506_s3 + $0xf8] sm:$0xff] %v1024_v42  }

// kernel: discriminator_forward.13
= control target key start
LH: loop header
LB: loop body
LE: loop exit
PB: predicated region body
PF: predicated region fallthrough
CT: control target
= control target key end

     0   :  { %s2826_s18 = smov 0   ;;  %s2828_s19 = smov 0   ;;  %s3666_s0 = inlined_call_operand.vmem [shape: bf16[2,9,8,384], index: 0, kind: input, shape index: {}]   ;;  %s3667_s1 = inlined_call_operand.vmem [shape: bf16[2,9,8,384], index: 1, kind: input, shape index: {}]   ;;  %s3668_s2 = inlined_call_operand.vmem [shape: bf16[3,384,256], index: 2, kind: input, shape index: {}]   ;;  %s3669_s3 = inlined_call_operand.vmem [shape: f32[1,256], index: 3, kind: input, shape index: {}]   ;;  %s3670_s4 = inlined_call_operand.vmem [shape: f32[2,8,8,256], index: 4, kind: output, shape index: {0}]   ;;  %s3671_s5 = inlined_call_operand.vmem [shape: f32[2,1,2,256], index: 5, kind: output, shape index: {1}]  }
   0x1   :  { %s2830_s20 = smov 0  }
   0x2 LB: > { %s28_s21 = sadd.s32 1, %s2788_s19  ;;  %p2183_p0 = scmp.ge.s32.totalorder %s2792_s20, 1  ;;  %s2792_s20 = sphi %s2830_s20, %s16_s20   ;;  %s2788_s19 = sphi %s2828_s19, %s3716_s19   ;;  %s2784_s18 = sphi %s2826_s18, %s3715_s18  }
   0x3   : > { %p30_p1 = scmp.ge.s32.totalorder %s28_s21, 2  ;;  %p216_p2 = scmp.lt.s32.totalorder %s2792_s20, 3 }
   0x5   : > { %s3718_s21 = smov (%p30_p1, %s28_s21), 0  ;;  %p217_p3 = pnand %p2183_p0, %p216_p2 }
   0x7   : > { %220 = sbr.rel (%p217_p3) target bundleno = 425 (0x1a9), region = 36 }
   0xc   : > { %v2514_v0 = vld [vmem:[%s3668_s2 + $0x1f4] ss:$8 sps:$4 sm:$0xff]   ;;  %v2794_v2 = vmov 0   ;;  %v2518_v3 = vld [vmem:[%s3668_s2 + $0x1f0] ss:$8 sps:$4 sm:$0xff]   ;;  %p263_p4 = scmp.lt.s32.totalorder %s2784_s18, 1 }
   0xd   : > { %v2516_v1 = vld [vmem:[%s3668_s2 + $0x2f4] ss:$8 sps:$4 sm:$0xff]   ;;  %858 = vmatprep.mubr.bf16.mxu1 %v2794_v2  ;;  %753 = vmatprep.subr.bf16.mxu0 %v2514_v0  ;;  %v2519_v4 = vld [vmem:[%s3668_s2 + $0x2f0] ss:$8 sps:$4 sm:$0xff]   ;;  %v2520_v5 = vld [vmem:[%s3668_s2 + $0x1e4] ss:$8 sps:$4 sm:$0xff]  }
   0xe   : > { %826 = vmatprep.subr.bf16.mxu1 %v2516_v1  ;;  %754 = vmatpush1.bf16.msra.mxu0 %v2518_v3  ;;  %v2522_v6 = vld [vmem:[%s3668_s2 + $0x2e4] ss:$8 sps:$4 sm:$0xff]   ;;  %v2524_v7 = vld [vmem:[%s3668_s2 + $0x1e0] ss:$8 sps:$4 sm:$0xff]   ;;  %v2526_v9 = vld [vmem:[%s3668_s2 + $0x1d4] ss:$8 sps:$4 sm:$0xff]  }
   0xf   : > { %827 = vmatpush1.bf16.msra.mxu1 %v2519_v4  ;;  %755 = vmatprep.subr.bf16.mxu0 %v2520_v5  ;;  %v2525_v8 = vld [vmem:[%s3668_s2 + $0x2e0] ss:$8 sps:$4 sm:$0xff]   ;;  %v2528_v10 = vld [vmem:[%s3668_s2 + $0x2d4] ss:$8 sps:$4 sm:$0xff]   ;;  %v2530_v11 = vld [vmem:[%s3668_s2 + $0x1d0] ss:$8 sps:$4 sm:$0xff]  }
  0x10   : > { %828 = vmatprep.subr.bf16.mxu1 %v2522_v6  ;;  %v2531_v12 = vld [vmem:[%s3668_s2 + $0x2d0] ss:$8 sps:$4 sm:$0xff]   ;;  %v2532_v13 = vld [vmem:[%s3668_s2 + $0x1c4] ss:$8 sps:$4 sm:$0xff]   ;;  %v2536_v15 = vld [vmem:[%s3668_s2 + $0x1c0] ss:$8 sps:$4 sm:$0xff]  }
  0x11   : > { %v2534_v14 = vld [vmem:[%s3668_s2 + $0x2c4] ss:$8 sps:$4 sm:$0xff]   ;;  %v2537_v16 = vld [vmem:[%s3668_s2 + $0x2c0] ss:$8 sps:$4 sm:$0xff]   ;;  %v2538_v17 = vld [vmem:[%s3668_s2 + $0x1b4] ss:$8 sps:$4 sm:$0xff]  }
  0x12   : > { %756 = vmatpush1.bf16.msra.mxu0 %v2524_v7  ;;  %v2540_v18 = vld [vmem:[%s3668_s2 + $0x2b4] ss:$8 sps:$4 sm:$0xff]   ;;  %v2542_v19 = vld [vmem:[%s3668_s2 + $0x1b0] ss:$8 sps:$4 sm:$0xff]   ;;  %s3720_s18 = smov (!%p263_p4, %s2784_s18), 1 }
  0x13   : > { %829 = vmatpush1.bf16.msra.mxu1 %v2525_v8  ;;  %757 = vmatprep.subr.bf16.mxu0 %v2526_v9  ;;  %v2543_v20 = vld [vmem:[%s3668_s2 + $0x2b0] ss:$8 sps:$4 sm:$0xff]   ;;  %v2544_v21 = vld [vmem:[%s3668_s2 + $0x1a4] ss:$8 sps:$4 sm:$0xff]   ;;  %v2548_v23 = vld [vmem:[%s3668_s2 + $0x1a0] ss:$8 sps:$4 sm:$0xff]  }
  0x14   : > { %830 = vmatprep.subr.bf16.mxu1 %v2528_v10  ;;  %v2546_v22 = vld [vmem:[%s3668_s2 + $0x2a4] ss:$8 sps:$4 sm:$0xff]   ;;  %s2487_s26 = smul.u32 108, %s3720_s18  ;;  %v2549_v24 = vld [vmem:[%s3668_s2 + $0x2a0] ss:$8 sps:$4 sm:$0xff]   ;;  %s2485_s17 = sshll.u32 %s3720_s18, 7 }
  0x15   : > { %v2550_v25 = vld [vmem:[%s3668_s2 + $0x194] ss:$8 sps:$4 sm:$0xff]   ;;  %v2554_v27 = vld [vmem:[%s3668_s2 + $0x190] ss:$8 sps:$4 sm:$0xff]   ;;  %v2556_v29 = vld [vmem:[%s3668_s2 + $0x184] ss:$8 sps:$4 sm:$0xff]   ;;  %s3540_s24 = scalar_lea.vmem %s3670_s4, %s2485_s17 }
  0x16   : > { %758 = vmatpush1.bf16.msra.mxu0 %v2530_v11  ;;  %v2552_v26 = vld [vmem:[%s3668_s2 + $0x294] ss:$8 sps:$4 sm:$0xff]   ;;  %v2555_v28 = vld [vmem:[%s3668_s2 + $0x290] ss:$8 sps:$4 sm:$0xff]   ;;  %s2941_s14 = scalar_lea.vmem %s3667_s1, %s2487_s26  ;;  %v2558_v30 = vld [vmem:[%s3668_s2 + $0x284] ss:$8 sps:$4 sm:$0xff]   ;;  %s3096_s13 = scalar_lea.vmem %s3666_s0, %s2487_s26 }
  0x17   : > { %831 = vmatpush1.bf16.msra.mxu1 %v2531_v12  ;;  %759 = vmatprep.subr.bf16.mxu0 %v2532_v13  ;;  %v2560_v31 = vld [vmem:[%s3668_s2 + $0x180] ss:$8 sps:$4 sm:$0xff]   ;;  %v2562_v33 = vld [vmem:[%s3668_s2 + $0x274] ss:$8 sps:$4 sm:$0xff]   ;;  %v2564_v36 = vld [vmem:[%s3668_s2 + $0x70] ss:$8 sps:$4 sm:$0xff]  }
  0x18   : > { %832 = vmatprep.subr.bf16.mxu1 %v2534_v14  ;;  %v2561_v32 = vld [vmem:[%s3668_s2 + $0x280] ss:$8 sps:$4 sm:$0xff]   ;;  %v2566_v34 = vld [vmem:[%s3668_s2 + $0x74] ss:$8 sps:$4 sm:$0xff]   ;;  %v2567_v37 = vld [vmem:[%s3668_s2 + $0x270] ss:$8 sps:$4 sm:$0xff]  }
  0x19   : > { %v2568_v35 = vld [vmem:[%s2941_s14 + $0x8] ss:$12 sps:$4 sm:$0xff]   ;;  %v2569_v38 = vld [vmem:[%s3668_s2 + $0x264] ss:$8 sps:$4 sm:$0xff]   ;;  %v2577_v44 = vld [vmem:[%s3668_s2 + $0x50] ss:$8 sps:$4 sm:$0xff]  }
  0x1a   : > { %760 = vmatpush1.bf16.msra.mxu0 %v2536_v15  ;;  %v2573_v39 = vld [vmem:[%s3668_s2 + $0x64] ss:$8 sps:$4 sm:$0xff]   ;;  %v2571_v40 = vld [vmem:[%s3668_s2 + $0x60] ss:$8 sps:$4 sm:$0xff]   ;;  %v2575_v42 = vld [vmem:[%s3668_s2 + $0x254] ss:$8 sps:$4 sm:$0xff]  }
  0x1b   : > { %833 = vmatpush1.bf16.msra.mxu1 %v2537_v16  ;;  %761 = vmatprep.subr.bf16.mxu0 %v2538_v17  ;;  %v2574_v41 = vld [vmem:[%s3668_s2 + $0x260] ss:$8 sps:$4 sm:$0xff]   ;;  %v2579_v43 = vld [vmem:[%s3668_s2 + $0x54] ss:$8 sps:$4 sm:$0xff]   ;;  %v2580_v45 = vld [vmem:[%s3668_s2 + $0x250] ss:$8 sps:$4 sm:$0xff]  }
  0x1c   : > { %834 = vmatprep.subr.bf16.mxu1 %v2540_v18  ;;  %v2581_v46 = vld [vmem:[%s3668_s2 + $0x244] ss:$8 sps:$4 sm:$0xff]   ;;  %v2583_v48 = vld [vmem:[%s3668_s2 + $0x40] ss:$8 sps:$4 sm:$0xff]   ;;  %v2587_v50 = vld [vmem:[%s3668_s2 + $0x234] ss:$8 sps:$4 sm:$0xff]  }
  0x1d   : > { %v2585_v47 = vld [vmem:[%s3668_s2 + $0x44] ss:$8 sps:$4 sm:$0xff]   ;;  %v2586_v49 = vld [vmem:[%s3668_s2 + $0x240] ss:$8 sps:$4 sm:$0xff]   ;;  %v2591_v52 = vld [vmem:[%s3668_s2 + $0x34] ss:$8 sps:$4 sm:$0xff]  }
  0x1e   : > { %762 = vmatpush1.bf16.msra.mxu0 %v2542_v19  ;;  %v2613_v51 = vld [vmem:[%s2941_s14 + $0x4] ss:$12 sps:$4 sm:$0xff]   ;;  %v2595_v57 = vld [vmem:[%s3668_s2 + $0x20] ss:$8 sps:$4 sm:$0xff]   ;;  %v2599_v60 = vld [vmem:[%s3668_s2 + $0x214] ss:$8 sps:$4 sm:$0xff]  }
  0x1f   : > { %835 = vmatpush1.bf16.msra.mxu1 %v2543_v20  ;;  %763 = vmatprep.subr.bf16.mxu0 %v2544_v21  ;;  %v2589_v53 = vld [vmem:[%s3668_s2 + $0x30] ss:$8 sps:$4 sm:$0xff]   ;;  %v2593_v55 = vld [vmem:[%s3668_s2 + $0x224] ss:$8 sps:$4 sm:$0xff]   ;;  %v2598_v58 = vld [vmem:[%s3668_s2 + $0x220] ss:$8 sps:$4 sm:$0xff]  }
  0x20   : > { %836 = vmatprep.subr.bf16.mxu1 %v2546_v22  ;;  %785 = vmatprep.mubr.bf16.mxu0 %v2613_v51  ;;  %v2592_v54 = vld [vmem:[%s3668_s2 + $0x230] ss:$8 sps:$4 sm:$0xff]   ;;  %v2597_v56 = vld [vmem:[%s3668_s2 + $0x24] ss:$8 sps:$4 sm:$0xff]   ;;  %v2603_v61 = vld [vmem:[%s3668_s2 + $0x14] ss:$8 sps:$4 sm:$0xff]  }
  0x21   : > { %v2629_v59 = vld [vmem:[%s2941_s14 + $0x20] ss:$12 sps:$4 sm:$0xff]   ;;  %v2601_v62 = vld [vmem:[%s3668_s2 + $0x10] ss:$8 sps:$4 sm:$0xff]   ;;  %v2616_v6 = vld [vmem:[%s3668_s2 + $0xf4] ss:$8 sps:$4 sm:$0xff]  }
  0x22   : > { %764 = vmatpush1.bf16.msra.mxu0 %v2548_v23  ;;  %v2604_v63 = vld [vmem:[%s3668_s2 + $0x210] ss:$8 sps:$4 sm:$0xff]   ;;  %v2605_v0 = vld [vmem:[%s3668_s2 + $0x204] ss:$8 sps:$4 sm:$0xff]   ;;  %v2607_v3 = vld [vmem:[%s3668_s2] ss:$8 sps:$4 sm:$0xff]  }
  0x23   : > { %837 = vmatpush1.bf16.msra.mxu1 %v2549_v24  ;;  %765 = vmatprep.subr.bf16.mxu0 %v2550_v25  ;;  %v2609_v1 = vld [vmem:[%s3668_s2 + $0x4] ss:$8 sps:$4 sm:$0xff]   ;;  %v2610_v4 = vld [vmem:[%s3668_s2 + $0x200] ss:$8 sps:$4 sm:$0xff]   ;;  %v2619_v7 = vld [vmem:[%s3668_s2 + $0x174] ss:$8 sps:$4 sm:$0xff]  }
  0x24   : > { %838 = vmatprep.subr.bf16.mxu1 %v2552_v26  ;;  %v2645_v5 = vld [vmem:[%s2941_s14 + $0x38] ss:$12 sps:$4 sm:$0xff]   ;;  %v2611_v8 = vld [vmem:[%s2941_s14] ss:$12 sps:$4 sm:$0xff]   ;;  %v2626_v15 = vld [vmem:[%s2941_s14 + $0x1c] ss:$12 sps:$4 sm:$0xff]  }
  0x25   : > { %v2614_v9 = vld [vmem:[%s3668_s2 + $0xf0] ss:$8 sps:$4 sm:$0xff]   ;;  %v2622_v11 = vld [vmem:[%s3668_s2 + $0xe4] ss:$8 sps:$4 sm:$0xff]   ;;  %v2620_v13 = vld [vmem:[%s3668_s2 + $0xe0] ss:$8 sps:$4 sm:$0xff]  }
  0x26   : > { %766 = vmatpush1.bf16.msra.mxu0 %v2554_v27  ;;  %v2617_v10 = vld [vmem:[%s3668_s2 + $0x170] ss:$8 sps:$4 sm:$0xff]   ;;  %v2625_v12 = vld [vmem:[%s3668_s2 + $0x164] ss:$8 sps:$4 sm:$0xff]   ;;  %v2623_v14 = vld [vmem:[%s3668_s2 + $0x160] ss:$8 sps:$4 sm:$0xff]  }
  0x27   : > { %839 = vmatpush1.bf16.msra.mxu1 %v2555_v28  ;;  %767 = vmatprep.subr.bf16.mxu0 %v2556_v29  ;;  %v2661_v16 = vld [vmem:[%s2941_s14 + $0x50] ss:$12 sps:$4 sm:$0xff]   ;;  %v2628_v19 = vld [vmem:[%s2941_s14 + $0x18] ss:$12 sps:$4 sm:$0xff]   ;;  %v2642_v26 = vld [vmem:[%s2941_s14 + $0x34] ss:$12 sps:$4 sm:$0xff]  }
  0x28   : > { %840 = vmatprep.subr.bf16.mxu1 %v2558_v30  ;;  %v2632_v17 = vld [vmem:[%s3668_s2 + $0xd4] ss:$8 sps:$4 sm:$0xff]   ;;  %v2630_v20 = vld [vmem:[%s3668_s2 + $0xd0] ss:$8 sps:$4 sm:$0xff]   ;;  %v2638_v22 = vld [vmem:[%s3668_s2 + $0xc4] ss:$8 sps:$4 sm:$0xff]  }
  0x29   : > { %v2635_v18 = vld [vmem:[%s3668_s2 + $0x154] ss:$8 sps:$4 sm:$0xff]   ;;  %v2633_v21 = vld [vmem:[%s3668_s2 + $0x150] ss:$8 sps:$4 sm:$0xff]   ;;  %v2641_v23 = vld [vmem:[%s3668_s2 + $0x144] ss:$8 sps:$4 sm:$0xff]  }
  0x2a   : > { %768 = vmatpush1.bf16.msra.mxu0 %v2560_v31  ;;  %v3112_v24 = vld [vmem:[%s3096_s13] sm:$0xff]  ;;  %v3115_v25 = vld [vmem:[%s3096_s13 + $0xc] sm:$0xff]  ;;  %v2648_v30 = vld [vmem:[%s3668_s2 + $0xb4] ss:$8 sps:$4 sm:$0xff]   ;;  %s2486_s26 = sshll.u32 %s3720_s18, 2 }
  0x2b   : > { %841 = vmatpush1.bf16.msra.mxu1 %v2561_v32  ;;  %769 = vmatprep.subr.bf16.mxu0 %v2562_v33  ;;  %v2315_v27 = vcombine.high %v3112_v24, %v3115_v25  ;;  %v2636_v28 = vld [vmem:[%s3668_s2 + $0xc0] ss:$8 sps:$4 sm:$0xff]   ;;  %v2651_v31 = vld [vmem:[%s3668_s2 + $0x134] ss:$8 sps:$4 sm:$0xff]   ;;  %v2646_v33 = vld [vmem:[%s3668_s2 + $0xb0] ss:$8 sps:$4 sm:$0xff]   ;;  %s292_s28 = scalar_lea.vmem %s3671_s5, %s2486_s26 }
  0x2c   : > { %1203 = vmatprep.subr.bf16.mxu1 %v2566_v34  ;;  %v2639_v29 = vld [vmem:[%s3668_s2 + $0x140] ss:$8 sps:$4 sm:$0xff]   ;;  %v2644_v32 = vld [vmem:[%s2941_s14 + $0x30] ss:$12 sps:$4 sm:$0xff]  }
  0x2d   : > { %v2649_v34 = vld [vmem:[%s3668_s2 + $0x130] ss:$8 sps:$4 sm:$0xff]   ;;  %v3184_v51 = vld [vmem:[%s3096_s13 + $0x24] sm:$0xff] }
  0x2e   : > { %859 = vmatmul.mubr.bf16.vlgmr.msra.gmra.mxu1 %v2568_v35  ;;  %770 = vmatpush2.bf16.msra.mxu0 %v2567_v37  ;;  %v2654_v35 = vld [vmem:[%s3668_s2 + $0xa4] ss:$8 sps:$4 sm:$0xff]  }
  0x2f   : > { %1204 = vmatpush1.bf16.msra.mxu1 %v2564_v36  ;;  %771 = vmatprep.subr.bf16.mxu0 %v2569_v38  ;;  %v2657_v36 = vld [vmem:[%s3668_s2 + $0x124] ss:$8 sps:$4 sm:$0xff]   ;;  %v2652_v38 = vld [vmem:[%s3668_s2 + $0xa0] ss:$8 sps:$4 sm:$0xff]  }
  0x30   : > { %1205 = vmatprep.subr.bf16.mxu1 %v2573_v39  ;;  %868 = vmatprep.mubr.bf16.mxu1 %v2794_v2  ;;  %v2658_v37 = vld [vmem:[%s2941_s14 + $0x4c] ss:$12 sps:$4 sm:$0xff]   ;;  %v2655_v39 = vld [vmem:[%s3668_s2 + $0x120] ss:$8 sps:$4 sm:$0xff]  }
  0x32   : > { %772 = vmatpush2.bf16.msra.mxu0 %v2574_v41  ;;  %v2667_v41 = vld [vmem:[%s3668_s2 + $0x114] ss:$8 sps:$4 sm:$0xff]  }
  0x33   : > { %1206 = vmatpush1.bf16.msra.mxu1 %v2571_v40  ;;  %773 = vmatprep.subr.bf16.mxu0 %v2575_v42  ;;  %v2664_v40 = vld [vmem:[%s3668_s2 + $0x94] ss:$8 sps:$4 sm:$0xff]  }
  0x34   : > { %1207 = vmatprep.subr.bf16.mxu1 %v2579_v43  ;;  %v2660_v42 = vld [vmem:[%s2941_s14 + $0x48] ss:$12 sps:$4 sm:$0xff]   ;;  %v2662_v43 = vld [vmem:[%s3668_s2 + $0x90] ss:$8 sps:$4 sm:$0xff]  }
  0x36   : > { %774 = vmatpush2.bf16.msra.mxu0 %v2580_v45  ;;  %869 = vmatmul.mubr.bf16.gmra.mxu1 %v2629_v59  ;;  %v2670_v45 = vld [vmem:[%s3668_s2 + $0x84] ss:$8 sps:$4 sm:$0xff]   ;;  %v2707_v59 = vld [vmem:[%s3668_s2 + $0x470] ss:$8 sps:$4 sm:$0xff]  }
  0x37   : > { %1208 = vmatpush1.bf16.msra.mxu1 %v2577_v44  ;;  %775 = vmatprep.subr.bf16.mxu0 %v2581_v46  ;;  %v2665_v44 = vld [vmem:[%s3668_s2 + $0x110] ss:$8 sps:$4 sm:$0xff]   ;;  %v2673_v46 = vld [vmem:[%s3668_s2 + $0x104] ss:$8 sps:$4 sm:$0xff]  }
  0x38   : > { %1209 = vmatprep.subr.bf16.mxu1 %v2585_v47  ;;  %878 = vmatprep.mubr.bf16.mxu1 %v2794_v2  ;;  %v2668_v47 = vld [vmem:[%s3668_s2 + $0x80] ss:$8 sps:$4 sm:$0xff]  }
  0x3a   : > { %776 = vmatpush2.bf16.msra.mxu0 %v2586_v49  ;;  %v2679_v49 = vld [vmem:[%s3668_s2 + $0x374] ss:$8 sps:$4 sm:$0xff]  }
  0x3b   : > { %1210 = vmatpush1.bf16.msra.mxu1 %v2583_v48  ;;  %777 = vmatprep.subr.bf16.mxu0 %v2587_v50  ;;  %v2671_v48 = vld [vmem:[%s3668_s2 + $0x100] ss:$8 sps:$4 sm:$0xff]   ;;  %v3181_v50 = vld [vmem:[%s3096_s13 + $0x18] sm:$0xff] }
  0x3c   : > { %1211 = vmatprep.subr.bf16.mxu1 %v2591_v52  ;;  %v2709_v52 = vld [vmem:[%s3668_s2 + $0x474] ss:$8 sps:$4 sm:$0xff]  }
  0x3e   : > { %778 = vmatpush2.bf16.msra.mxu0 %v2592_v54  ;;  %879 = vmatmul.mubr.bf16.gmra.mxu1 %v2645_v5  ;;  %v2676_v54 = vld [vmem:[%s3096_s13 + $0x8] ss:$12 sps:$4 sm:$0xff]  }
  0x3f   : > { %1212 = vmatpush1.bf16.msra.mxu1 %v2589_v53  ;;  %779 = vmatprep.subr.bf16.mxu0 %v2593_v55  ;;  %v2314_v53 = vcombine.low %v3112_v24, %v3115_v25  ;;  %v2677_v55 = vld [vmem:[%s3668_s2 + $0x370] ss:$8 sps:$4 sm:$0xff]  }
  0x40   : > { %1213 = vmatprep.subr.bf16.mxu1 %v2597_v56  ;;  %888 = vmatprep.mubr.bf16.mxu1 %v2794_v2  ;;  %v2318_v56 = vcombine.high %v3181_v50, %v3184_v51 }
  0x42   : > { %780 = vmatpush2.bf16.msra.mxu0 %v2598_v58  ;;  %v2680_v58 = vld [vmem:[%s3668_s2 + $0x360] ss:$8 sps:$4 sm:$0xff]  }
  0x43   : > { %1214 = vmatpush1.bf16.msra.mxu1 %v2595_v57  ;;  %781 = vmatprep.subr.bf16.mxu0 %v2599_v60  ;;  %v2682_v57 = vld [vmem:[%s3668_s2 + $0x364] ss:$8 sps:$4 sm:$0xff]   ;;  %v2687_v60 = vld [vmem:[%s3668_s2 + $0x354] ss:$8 sps:$4 sm:$0xff]  }
  0x44   : > { %1215 = vmatprep.subr.bf16.mxu1 %v2603_v61  ;;  %v2715_v61 = vld [vmem:[%s3668_s2 + $0x464] ss:$8 sps:$4 sm:$0xff]  }
  0x46   : > { %782 = vmatpush2.bf16.msra.mxu0 %v2604_v63  ;;  %889 = vmatmul.mubr.bf16.gmra.mxu1 %v2661_v16  ;;  %v3218_v63 = vld [vmem:[%s3096_s13 + $0x3c] sm:$0xff]  ;;  %v2694_v16 = vld [vmem:[%s3668_s2 + $0x330] ss:$8 sps:$4 sm:$0xff]  }
  0x47   : > { %1216 = vmatpush1.bf16.msra.mxu1 %v2601_v62  ;;  %783 = vmatprep.subr.bf16.mxu0 %v2605_v0  ;;  %v3214_v62 = vld [vmem:[%s3096_s13 + $0x30] sm:$0xff]  ;;  %v2713_v0 = vld [vmem:[%s3668_s2 + $0x460] ss:$8 sps:$4 sm:$0xff]  }
  0x48   : > { %1217 = vmatprep.subr.bf16.mxu1 %v2609_v1  ;;  %1235 = vmatprep.mubr.bf16.mxu1 %v2315_v27  ;;  %v2317_v1 = vcombine.low %v3181_v50, %v3184_v51  ;;  %v2321_v5 = vcombine.high %v3214_v62, %v3218_v63  ;;  %v2731_v27 = vld [vmem:[%s3668_s2 + $0x430] ss:$8 sps:$4 sm:$0xff]  }
  0x4a   : > { %784 = vmatpush2.bf16.msra.mxu0 %v2610_v4  ;;  %v2685_v4 = vld [vmem:[%s3668_s2 + $0x350] ss:$8 sps:$4 sm:$0xff]  }
  0x4b   : > { %1218 = vmatpush1.bf16.msra.mxu1 %v2607_v3  ;;  %1276 = vmatprep.subr.bf16.mxu0 %v2619_v7  ;;  %v2688_v3 = vld [vmem:[%s3096_s13 + $0x20] ss:$12 sps:$4 sm:$0xff]  }
  0x4c   : > { %1219 = vmatprep.subr.bf16.mxu1 %v2616_v6  ;;  %v2691_v6 = vld [vmem:[%s3668_s2 + $0x344] ss:$8 sps:$4 sm:$0xff]   ;;  %v2689_v7 = vld [vmem:[%s3668_s2 + $0x340] ss:$8 sps:$4 sm:$0xff]  }
  0x4d   : > { %786 = vmatmul.mubr.bf16.vlgmr.msra.gmra.mxu0 %v2611_v8  ;;  %v2721_v8 = vld [vmem:[%s3668_s2 + $0x454] ss:$8 sps:$4 sm:$0xff]  }
  0x4e   : > { %1277 = vmatpush1.bf16.msra.mxu0 %v2617_v10  ;;  %795 = vmatprep.mubr.bf16.mxu0 %v2626_v15  ;;  %v3244_v10 = vld [vmem:[%s3096_s13 + $0x48] sm:$0xff]  ;;  %v2697_v15 = vld [vmem:[%s3096_s13 + $0x38] ss:$12 sps:$4 sm:$0xff]  }
  0x4f   : > { %1220 = vmatpush2.bf16.msra.mxu1 %v2614_v9  ;;  %1278 = vmatprep.subr.bf16.mxu0 %v2625_v12  ;;  %v2696_v9 = vld [vmem:[%s3668_s2 + $0x334] ss:$8 sps:$4 sm:$0xff]   ;;  %v2727_v12 = vld [vmem:[%s3668_s2 + $0x444] ss:$8 sps:$4 sm:$0xff]  }
  0x50   : > { %1221 = vmatprep.subr.bf16.mxu1 %v2622_v11  ;;  %v2719_v11 = vld [vmem:[%s3668_s2 + $0x450] ss:$8 sps:$4 sm:$0xff]  }
  0x52   : > { %1279 = vmatpush1.bf16.msra.mxu0 %v2623_v14  ;;  %v2320_v14 = vcombine.low %v3214_v62, %v3218_v63 }
  0x53   : > { %1222 = vmatpush2.bf16.msra.mxu1 %v2620_v13  ;;  %1280 = vmatprep.subr.bf16.mxu0 %v2635_v18  ;;  %v3254_v13 = vld [vmem:[%s3096_s13 + $0x54] sm:$0xff]  ;;  %v2700_v18 = vld [vmem:[%s3668_s2 + $0x324] ss:$8 sps:$4 sm:$0xff]  }
  0x54   : > { %1223 = vmatprep.subr.bf16.mxu1 %v2632_v17  ;;  %v2324_v17 = vcombine.high %v3244_v10, %v3254_v13 }
  0x55   : > { %796 = vmatmul.mubr.bf16.gmra.mxu0 %v2628_v19  ;;  %v2725_v19 = vld [vmem:[%s3668_s2 + $0x440] ss:$8 sps:$4 sm:$0xff]  }
  0x56   : > { %1281 = vmatpush1.bf16.msra.mxu0 %v2633_v21  ;;  %805 = vmatprep.mubr.bf16.mxu0 %v2642_v26  ;;  %v2698_v21 = vld [vmem:[%s3668_s2 + $0x320] ss:$8 sps:$4 sm:$0xff]  }
  0x57   : > { %1224 = vmatpush2.bf16.msra.mxu1 %v2630_v20  ;;  %1282 = vmatprep.subr.bf16.mxu0 %v2641_v23  ;;  %v2733_v20 = vld [vmem:[%s3668_s2 + $0x434] ss:$8 sps:$4 sm:$0xff]  }
  0x58   : > { %1225 = vmatprep.subr.bf16.mxu1 %v2638_v22  ;;  %v3277_v22 = vld [vmem:[%s3096_s13 + $0x60] sm:$0xff]  ;;  %v2705_v23 = vld [vmem:[%s3668_s2 + $0x314] ss:$8 sps:$4 sm:$0xff]  }
  0x59   : > { %v2432_v24 = vcombine.high %v3254_v13, %v3277_v22  ;;  %v2431_v26 = vcombine.low %v3254_v13, %v3277_v22 }
  0x5a   : > { %1283 = vmatpush1.bf16.msra.mxu0 %v2639_v29  ;;  %v2706_v29 = vld [vmem:[%s3096_s13 + $0x50] ss:$12 sps:$4 sm:$0xff]  }
  0x5b   : > { %1226 = vmatpush2.bf16.msra.mxu1 %v2636_v28  ;;  %1284 = vmatprep.subr.bf16.mxu0 %v2651_v31  ;;  %v2323_v28 = vcombine.low %v3244_v10, %v3254_v13  ;;  %v2739_v31 = vld [vmem:[%s3668_s2 + $0x424] ss:$8 sps:$4 sm:$0xff]  }
  0x5c   : > { %1227 = vmatprep.subr.bf16.mxu1 %v2648_v30  ;;  %v2703_v30 = vld [vmem:[%s3668_s2 + $0x310] ss:$8 sps:$4 sm:$0xff]  }
  0x5d   : > { %806 = vmatmul.mubr.bf16.gmra.mxu0 %v2644_v32  ;;  %v2712_v32 = vld [vmem:[%s3668_s2 + $0x304] ss:$8 sps:$4 sm:$0xff]  }
  0x5e   : > { %1285 = vmatpush1.bf16.msra.mxu0 %v2649_v34  ;;  %815 = vmatprep.mubr.bf16.mxu0 %v2658_v37  ;;  %v2423_v34 = vcombine.high %v3115_v25, %v3181_v50  ;;  %v2718_v37 = vld [vmem:[%s3668_s2 + $0x3f4] ss:$8 sps:$4 sm:$0xff]  }
  0x5f   : > { %1228 = vmatpush2.bf16.msra.mxu1 %v2646_v33  ;;  %1286 = vmatprep.subr.bf16.mxu0 %v2657_v36  ;;  %v2737_v33 = vld [vmem:[%s3668_s2 + $0x420] ss:$8 sps:$4 sm:$0xff]  }
  0x60   : > { %1229 = vmatprep.subr.bf16.mxu1 %v2654_v35  ;;  %v2745_v35 = vld [vmem:[%s3668_s2 + $0x414] ss:$8 sps:$4 sm:$0xff]   ;;  %v2710_v36 = vld [vmem:[%s3668_s2 + $0x300] ss:$8 sps:$4 sm:$0xff]  }
  0x62   : > { %1287 = vmatpush1.bf16.msra.mxu0 %v2655_v39  ;;  %v2751_v39 = vld [vmem:[%s3668_s2 + $0x404] ss:$8 sps:$4 sm:$0xff]  }
  0x63   : > { %1230 = vmatpush2.bf16.msra.mxu1 %v2652_v38  ;;  %1288 = vmatprep.subr.bf16.mxu0 %v2667_v41  ;;  %v2743_v38 = vld [vmem:[%s3668_s2 + $0x410] ss:$8 sps:$4 sm:$0xff]   ;;  %v2724_v41 = vld [vmem:[%s3668_s2 + $0x3e4] ss:$8 sps:$4 sm:$0xff]  }
  0x64   : > { %1231 = vmatprep.subr.bf16.mxu1 %v2664_v40  ;;  %v2716_v40 = vld [vmem:[%s3668_s2 + $0x3f0] ss:$8 sps:$4 sm:$0xff]  }
  0x65   : > { %816 = vmatmul.mubr.bf16.gmra.mxu0 %v2660_v42  ;;  %v2749_v42 = vld [vmem:[%s3668_s2 + $0x400] ss:$8 sps:$4 sm:$0xff]  }
  0x66   : > { %1289 = vmatpush1.bf16.msra.mxu0 %v2665_v44  ;;  %1308 = vmatprep.mubr.bf16.mxu0 %v2794_v2  ;;  %v2730_v44 = vld [vmem:[%s3668_s2 + $0x3d4] ss:$8 sps:$4 sm:$0xff]  }
  0x67   : > { %1232 = vmatpush2.bf16.msra.mxu1 %v2662_v43  ;;  %1290 = vmatprep.subr.bf16.mxu0 %v2673_v46  ;;  %v2722_v43 = vld [vmem:[%s3668_s2 + $0x3e0] ss:$8 sps:$4 sm:$0xff]   ;;  %v2728_v46 = vld [vmem:[%s3668_s2 + $0x3d0] ss:$8 sps:$4 sm:$0xff]  }
  0x68   : > { %1233 = vmatprep.subr.bf16.mxu1 %v2670_v45  ;;  %v2755_v45 = vld [vmem:[%s3096_s13 + $0x14] ss:$12 sps:$4 sm:$0xff]  }
  0x6a   : > { %1291 = vmatpush1.bf16.msra.mxu0 %v2671_v48  ;;  %v2734_v48 = vld [vmem:[%s3668_s2 + $0x3c0] ss:$8 sps:$4 sm:$0xff]  }
  0x6b   : > { %1234 = vmatpush2.bf16.msra.mxu1 %v2668_v47  ;;  %1702 = vmatprep.subr.bf16.mxu0 %v2679_v49  ;;  %v2736_v47 = vld [vmem:[%s3668_s2 + $0x3c4] ss:$8 sps:$4 sm:$0xff]   ;;  %v2742_v49 = vld [vmem:[%s3668_s2 + $0x3b4] ss:$8 sps:$4 sm:$0xff]  }
  0x6c   : > { %1775 = vmatprep.subr.bf16.mxu1 %v2709_v52  ;;  %v2761_v52 = vld [vmem:[%s3096_s13 + $0x2c] ss:$12 sps:$4 sm:$0xff]  }
  0x6d   : > { %1309 = vmatmul.mubr.bf16.vlgmr.msra.gmra.mxu0 %v2676_v54  ;;  %v2748_v54 = vld [vmem:[%s3668_s2 + $0x3a4] ss:$8 sps:$4 sm:$0xff]  }
  0x6e   : > { %1236 = vmatmul.mubr.bf16.vlgmr.msra.gmra.mxu1 %v2314_v53  ;;  %1703 = vmatpush1.bf16.msra.mxu0 %v2677_v55  ;;  %v2740_v53 = vld [vmem:[%s3668_s2 + $0x3b0] ss:$8 sps:$4 sm:$0xff]   ;;  %v2746_v55 = vld [vmem:[%s3668_s2 + $0x3a0] ss:$8 sps:$4 sm:$0xff]  }
  0x6f   : > { %1245 = vmatprep.mubr.bf16.mxu1 %v2318_v56  ;;  %1704 = vmatprep.subr.bf16.mxu0 %v2682_v57  ;;  %v2754_v56 = vld [vmem:[%s3668_s2 + $0x394] ss:$8 sps:$4 sm:$0xff]   ;;  %v2764_v57 = vld [vmem:[%s3096_s13 + $0x44] ss:$12 sps:$4 sm:$0xff]  }
  0x70   : > { %1318 = vmatprep.mubr.bf16.mxu0 %v2794_v2  ;;  %1776 = vmatpush1.bf16.msra.mxu1 %v2707_v59  ;;  %v2758_v59 = vld [vmem:[%s3668_s2 + $0x384] ss:$8 sps:$4 sm:$0xff]  }
  0x71   : > { %1777 = vmatprep.subr.bf16.mxu1 %v2715_v61  ;;  %v2767_v61 = vld [vmem:[%s3096_s13 + $0x5c] ss:$12 sps:$4 sm:$0xff]  }
  0x72   : > { %1705 = vmatpush1.bf16.msra.mxu0 %v2680_v58  ;;  %v2752_v58 = vld [vmem:[%s3668_s2 + $0x390] ss:$8 sps:$4 sm:$0xff]  }
  0x73   : > { %1706 = vmatprep.subr.bf16.mxu0 %v2687_v60  ;;  %v2756_v60 = vld [vmem:[%s3668_s2 + $0x380] ss:$8 sps:$4 sm:$0xff]  }
  0x74   : > { %1778 = vmatpush1.bf16.msra.mxu1 %v2713_v0  ;;  %v2422_v0 = vcombine.low %v3115_v25, %v3181_v50 }
  0x75   : > { %1319 = vmatmul.mubr.bf16.gmra.mxu0 %v2688_v3  ;;  %1779 = vmatprep.subr.bf16.mxu1 %v2721_v8  ;;  %v2429_v3 = vcombine.high %v3218_v63, %v3244_v10 }
  0x76   : > { %1246 = vmatmul.mubr.bf16.gmra.mxu1 %v2317_v1  ;;  %1707 = vmatpush1.bf16.msra.mxu0 %v2685_v4  ;;  %v2426_v1 = vcombine.high %v3184_v51, %v3214_v62  ;;  %v2428_v4 = vcombine.low %v3218_v63, %v3244_v10 }
  0x77   : > { %1255 = vmatprep.mubr.bf16.mxu1 %v2321_v5  ;;  %1708 = vmatprep.subr.bf16.mxu0 %v2691_v6 }
  0x78   : > { %1328 = vmatprep.mubr.bf16.mxu0 %v2794_v2  ;;  %1780 = vmatpush1.bf16.msra.mxu1 %v2719_v11 }
  0x79   : > { %1781 = vmatprep.subr.bf16.mxu1 %v2727_v12 }
  0x7a   : > { %1709 = vmatpush1.bf16.msra.mxu0 %v2689_v7 }
  0x7b   : > { %1710 = vmatprep.subr.bf16.mxu0 %v2696_v9 }
  0x7c   : > { %1782 = vmatpush1.bf16.msra.mxu1 %v2725_v19 }
  0x7d   : > { %1329 = vmatmul.mubr.bf16.gmra.mxu0 %v2697_v15  ;;  %1783 = vmatprep.subr.bf16.mxu1 %v2733_v20 }
  0x7e   : > { %1256 = vmatmul.mubr.bf16.gmra.mxu1 %v2320_v14  ;;  %1711 = vmatpush1.bf16.msra.mxu0 %v2694_v16 }
  0x7f   : > { %1265 = vmatprep.mubr.bf16.mxu1 %v2324_v17  ;;  %1712 = vmatprep.subr.bf16.mxu0 %v2700_v18 }
  0x80   : > { %1338 = vmatprep.mubr.bf16.mxu0 %v2794_v2  ;;  %1784 = vmatpush1.bf16.msra.mxu1 %v2731_v27 }
  0x81   : > { %1785 = vmatprep.subr.bf16.mxu1 %v2739_v31 }
  0x82   : > { %1713 = vmatpush1.bf16.msra.mxu0 %v2698_v21 }
  0x83   : > { %1714 = vmatprep.subr.bf16.mxu0 %v2705_v23 }
  0x84   : > { %1786 = vmatpush1.bf16.msra.mxu1 %v2737_v33 }
  0x85   : > { %1339 = vmatmul.mubr.bf16.gmra.mxu0 %v2706_v29  ;;  %1787 = vmatprep.subr.bf16.mxu1 %v2745_v35 }
  0x86   : > { %1266 = vmatmul.mubr.bf16.gmra.mxu1 %v2323_v28  ;;  %1715 = vmatpush1.bf16.msra.mxu0 %v2703_v30 }
  0x87   : > { %1716 = vmatprep.subr.bf16.mxu0 %v2712_v32  ;;  %1807 = vmatprep.mubr.bf16.mxu1 %v2794_v2 }
  0x88   : > { %1734 = vmatprep.mubr.bf16.mxu0 %v2423_v34  ;;  %1788 = vmatpush1.bf16.msra.mxu1 %v2743_v38 }
  0x89   : > { %1789 = vmatprep.subr.bf16.mxu1 %v2751_v39 }
  0x8a   : > { %1717 = vmatpush1.bf16.msra.mxu0 %v2710_v36 }
  0x8b   : > { %1718 = vmatprep.subr.bf16.mxu0 %v2718_v37 }
  0x8c   : > { %1790 = vmatpush1.bf16.msra.mxu1 %v2749_v42 }
  0x8e   : > { %1719 = vmatpush2.bf16.msra.mxu0 %v2716_v40 }
  0x8f   : > { %1720 = vmatprep.subr.bf16.mxu0 %v2724_v41  ;;  %1808 = vmatmul.mubr.bf16.vlgmr.msra.gmra.mxu1 %v2755_v45 }
  0x90   : > { %1817 = vmatprep.mubr.bf16.mxu1 %v2794_v2 }
  0x92   : > { %1721 = vmatpush2.bf16.msra.mxu0 %v2722_v43 }
  0x93   : > { %1722 = vmatprep.subr.bf16.mxu0 %v2730_v44 }
  0x96   : > { %1723 = vmatpush2.bf16.msra.mxu0 %v2728_v46 }
  0x97   : > { %1724 = vmatprep.subr.bf16.mxu0 %v2736_v47  ;;  %1818 = vmatmul.mubr.bf16.gmra.mxu1 %v2761_v52 }
  0x98   : > { %1827 = vmatprep.mubr.bf16.mxu1 %v2794_v2 }
  0x9a   : > { %1725 = vmatpush2.bf16.msra.mxu0 %v2734_v48 }
  0x9b   : > { %1726 = vmatprep.subr.bf16.mxu0 %v2742_v49 }
  0x9e   : > { %1727 = vmatpush2.bf16.msra.mxu0 %v2740_v53 }
  0x9f   : > { %1728 = vmatprep.subr.bf16.mxu0 %v2748_v54  ;;  %1828 = vmatmul.mubr.bf16.gmra.mxu1 %v2764_v57 }
  0xa0   : > { %1837 = vmatprep.mubr.bf16.mxu1 %v2794_v2  ;;  %v2425_v2 = vcombine.low %v3184_v51, %v3214_v62 }
  0xa2   : > { %1729 = vmatpush2.bf16.msra.mxu0 %v2746_v55 }
  0xa3   : > { %1730 = vmatprep.subr.bf16.mxu0 %v2754_v56 }
  0xa6   : > { %1731 = vmatpush2.bf16.msra.mxu0 %v2752_v58 }
  0xa7   : > { %1732 = vmatprep.subr.bf16.mxu0 %v2758_v59  ;;  %1838 = vmatmul.mubr.bf16.gmra.mxu1 %v2767_v61 }
  0xaa   : > { %1733 = vmatpush2.bf16.msra.mxu0 %v2756_v60 }
  0xad   : > { %1735 = vmatmul.mubr.bf16.vlgmr.msra.gmra.mxu0 %v2422_v0 }
  0xae   : > { %1744 = vmatprep.mubr.bf16.mxu0 %v2426_v1 }
  0xb5   : > { %1745 = vmatmul.mubr.bf16.gmra.mxu0 %v2425_v2 }
  0xb6   : > { %1754 = vmatprep.mubr.bf16.mxu0 %v2429_v3 }
  0xbd   : > { %1755 = vmatmul.mubr.bf16.gmra.mxu0 %v2428_v4 }
  0xbe   : > { %1764 = vmatprep.mubr.bf16.mxu0 %v2432_v24 }
  0xc5   : > { %1765 = vmatmul.mubr.bf16.gmra.mxu0 %v2431_v26 }
  0xee   : > { %v3394_v25 = vpop.f32.mrf.mxu1 }
  0xf0   : > { %v3396_v50 = vpop.f32.mrf.mxu1 }
  0xf2   : > { %v3398_v51 = vpop.f32.mrf.mxu1 }
  0xf4   : > { %v3400_v62 = vpop.f32.mrf.mxu1 }
  0xf6   : > { %v3402_v5 = vpop.f32.mrf.mxu1 }
  0xf8   : > { %v3404_v63 = vpop.f32.mrf.mxu1 }
  0xfa   : > { %v3406_v6 = vpop.f32.mrf.mxu1 }
  0xfc   : > { %v3408_v7 = vpop.f32.mrf.mxu1 }
  0xfe   : > { %v3412_v9 = vpop.f32.mrf.mxu1 }
 0x100   : > { %v3418_v12 = vpop.f32.mrf.mxu1 }
 0x102   : > { %v3424_v15 = vpop.f32.mrf.mxu1 }
 0x104   : > { %v3430_v18 = vpop.f32.mrf.mxu1 }
 0x106   : > { %v3436_v21 = vpop.f32.mrf.mxu1 }
 0x108   : > { %v3442_v24 = vpop.f32.mrf.mxu1 }
 0x10a   : > { %v3448_v28 = vpop.f32.mrf.mxu1 }
 0x10c   : > { %v3454_v31 = vpop.f32.mrf.mxu1 }
 0x10d   : > { %v3410_v8 = vpop.f32.mrf.mxu0 }
 0x10f   : > { %v3414_v10 = vpop.f32.mrf.mxu0 }
 0x111   : > { %v3416_v11 = vpop.f32.mrf.mxu0 }
 0x113   : > { %v3420_v13 = vpop.f32.mrf.mxu0 }
 0x115   : > { %v3422_v14 = vpop.f32.mrf.mxu0 }
 0x117   : > { %v3426_v16 = vpop.f32.mrf.mxu0 }
 0x119   : > { %v3428_v17 = vpop.f32.mrf.mxu0 }
 0x11b   : > { %v3432_v19 = vpop.f32.mrf.mxu0 }
 0x11d   : > { %v3434_v20 = vpop.f32.mrf.mxu0 }
 0x11f   : > { %v3438_v22 = vpop.f32.mrf.mxu0 }
 0x121   : > { %v3440_v23 = vpop.f32.mrf.mxu0 }
 0x123   : > { %v3444_v26 = vpop.f32.mrf.mxu0 }
 0x125   : > { %v3446_v27 = vpop.f32.mrf.mxu0 }
 0x127   : > { %v3450_v29 = vpop.f32.mrf.mxu0 }
 0x129   : > { %v3452_v30 = vpop.f32.mrf.mxu0 }
 0x12b   : > { %v3456_v32 = vpop.f32.mrf.mxu0 }
 0x12d   : > { %v1310_v35 = vpop.f32.mrf.mxu0 }
 0x12e   : > { %v1237_v33 = vpop.f32.mrf.mxu1 }
 0x12f   : > { %v1312_v38 = vpop.f32.mrf.mxu0 }
 0x130   : > { %v1239_v34 = vpop.f32.mrf.mxu1 }
 0x131   : > { %v1314_v41 = vpop.f32.mrf.mxu0 }
 0x132   : > { %v1241_v36 = vpop.f32.mrf.mxu1 }
 0x133   : > { %v3464_v44 = vpop.f32.mrf.mxu0 }
 0x134   : > { %v1243_v37 = vpop.f32.mrf.mxu1 }
 0x135   : > { %v3468_v46 = vpop.f32.mrf.mxu0 }
 0x136   : > { %v1247_v39 = vpop.f32.mrf.mxu1 }
 0x137   : > { %v3474_v49 = vpop.f32.mrf.mxu0 }
 0x138   : > { %v3458_v40 = vpop.f32.mrf.mxu1 }
 0x139   : > { %v3480_v54 = vpop.f32.mrf.mxu0 }
 0x13a   : > { %v3460_v42 = vpop.f32.mrf.mxu1  ;;  %3678 = vst [vmem:[#allocation6_spill] sm:$0xff] %v3480_v54 }
 0x13b   : > { %v3484_v56 = vpop.f32.mrf.mxu0 }
 0x13c   : > { %v3462_v43 = vpop.f32.mrf.mxu1  ;;  %3680 = vst [vmem:[#allocation8_spill] sm:$0xff] %v3484_v56 }
 0x13d   : > { %v3488_v58 = vpop.f32.mrf.mxu0 }
 0x13e   : > { %v3466_v45 = vpop.f32.mrf.mxu1  ;;  %3682 = vst [vmem:[#allocation10_spill] sm:$0xff] %v3488_v58 }
 0x13f   : > { %v3492_v60 = vpop.f32.mrf.mxu0 }
 0x140   : > { %v3470_v47 = vpop.f32.mrf.mxu1  ;;  %3684 = vst [vmem:[#allocation12_spill] sm:$0xff] %v3492_v60 }
 0x141   : > { %3674 = vst [vmem:[#allocation2_spill] sm:$0xff] %v3470_v47  ;;  %v3494_v1 = vpop.f32.mrf.mxu0 }
 0x142   : > { %v3472_v48 = vpop.f32.mrf.mxu1  ;;  %3685 = vst [vmem:[#allocation13_spill] sm:$0xff] %v3494_v1  ;;  %v861_v1 = vadd.f32 %v3394_v25, %v3410_v8 }
 0x143   : > { %3675 = vst [vmem:[#allocation3_spill] sm:$0xff] %v3472_v48  ;;  %v3496_v3 = vpop.f32.mrf.mxu0 }
 0x144   : > { %v3476_v52 = vpop.f32.mrf.mxu1  ;;  %3686 = vst [vmem:[#allocation14_spill] sm:$0xff] %v3496_v3  ;;  %v1238_v3 = vadd.f32 %v1237_v33, %v861_v1 }
 0x145   : > { %3676 = vst [vmem:[#allocation4_spill] sm:$0xff] %v3476_v52  ;;  %v3672_v52 = vlaneseq }
 0x146   : > { %v3478_v53 = vpop.f32.mrf.mxu1 }
 0x147   : > { %3677 = vst [vmem:[#allocation5_spill] sm:$0xff] %v3478_v53  ;;  %v3498_v53 = vpop.f32.mrf.mxu0 }
 0x148   : > { %v3482_v55 = vpop.f32.mrf.mxu1  ;;  %3687 = vst [vmem:[#allocation15_spill] sm:$0xff] %v3498_v53  ;;  %v863_v53 = vadd.f32 %v3396_v50, %v3414_v10  ;;  %v867_v50 = vadd.f32 %v3400_v62, %v3420_v13  ;;  %v1311_v10 = vadd.f32 %v1310_v35, %v1238_v3 }
 0x149   : > { %3679 = vst [vmem:[#allocation7_spill] sm:$0xff] %v3482_v55  ;;  %v3500_v48 = vpop.f32.mrf.mxu0 }
 0x14a   : > { %v3486_v57 = vpop.f32.mrf.mxu1  ;;  %3688 = vst [vmem:[#allocation16_spill] sm:$0xff] %v3500_v48  ;;  %v865_v48 = vadd.f32 %v3398_v51, %v3416_v11  ;;  %v1240_v25 = vadd.f32 %v1239_v34, %v863_v53  ;;  %v871_v11 = vadd.f32 %v3402_v5, %v3422_v14  ;;  %v1244_v34 = vadd.f32 %v1243_v37, %v867_v50 }
 0x14b   : > { %3681 = vst [vmem:[#allocation9_spill] sm:$0xff] %v3486_v57  ;;  %v3507_v60 = vpop.f32.mrf.mxu0  ;;  %v873_v37 = vadd.f32 %v3404_v63, %v3426_v16 }
 0x14c   : > { %v3490_v59 = vpop.f32.mrf.mxu1  ;;  %3690 = vst [vmem:[#allocation18_spill] sm:$0xff] %v3507_v60  ;;  %v1248_v13 = vadd.f32 %v1247_v39, %v871_v11 }
 0x14d   : > { %3683 = vst [vmem:[#allocation11_spill] sm:$0xff] %v3490_v59  ;;  %v3505_v59 = vshrl.u32 %v3672_v52, 7  ;;  %v3518_v47 = vpop.f32.mrf.mxu0  ;;  %v1864_v52 = vld [vmem:[%s3669_s3] sm:$0x3]  ;;  %v1250_v63 = vadd.f32 %v3458_v40, %v873_v37  ;;  %v887_v40 = vadd.f32 %v3430_v18, %v3444_v26  ;;  %v895_v26 = vadd.f32 %v3448_v28, %v3452_v30  ;;  %v3698_v28 = vld [vmem:[#allocation3_spill] sm:$0xff] }
 0x14e   : > { %3692 = vst [vmem:[#allocation20_spill] sm:$0xff] %v3518_v47  ;;  %v3701_v11 = vld [vmem:[#allocation5_spill] sm:$0xff] }
 0x14f   : > { %v1809_v61 = vpop.f32.mrf.mxu1  ;;  %3689 = vst [vmem:[#allocation17_spill] sm:$0xff] %v3505_v59  ;;  %v1868_v56 = vsub.s32 0, %v3505_v59  ;;  %v1872_v60 = vsub.s32 1, %v3505_v59  ;;  %v1313_v59 = vadd.f32 %v1312_v38, %v1240_v25 }
 0x151   : > { %v1811_v0 = vpop.f32.mrf.mxu1  ;;  %v3529_v51 = vrot.slane %v1864_v52, %v1868_v56  ;;  %v3533_v47 = vrot.slane %v1864_v52, %v1872_v60 }
 0x153   : > { %v1813_v2 = vpop.f32.mrf.mxu1 }
 0x155   : > { %v1815_v4 = vpop.f32.mrf.mxu1 }
 0x157   : > { %v1819_v55 = vpop.f32.mrf.mxu1 }
 0x159   : > { %v3502_v57 = vpop.f32.mrf.mxu1 }
 0x15b   : > { %v3511_v58 = vpop.f32.mrf.mxu1 }
 0x15c   : > { %3691 = vst [vmem:[#allocation19_spill] sm:$0xff] %v3511_v58  ;;  %v1242_v58 = vadd.f32 %v1241_v36, %v865_v48 }
 0x15d   : > { %v3524_v8 = vpop.f32.mrf.mxu1 }
 0x15e   : > { %3693 = vst [vmem:[#allocation21_spill] sm:$0xff] %v3524_v8  ;;  %v1315_v48 = vadd.f32 %v1314_v41, %v1242_v58  ;;  %v1317_v41 = vadd.f32 %v3464_v44, %v1244_v34  ;;  %v875_v58 = vadd.f32 %v3406_v6, %v3428_v17  ;;  %v1321_v44 = vadd.f32 %v3468_v46, %v1248_v13  ;;  %v3702_v34 = vld [vmem:[#allocation7_spill] sm:$0xff] }
 0x15f   : > { %v3535_v36 = vpop.f32.mrf.mxu1  ;;  %v883_v6 = vadd.f32 %v3418_v12, %v3438_v22  ;;  %v891_v12 = vadd.f32 %v3436_v21, %v3446_v27  ;;  %v1323_v22 = vadd.f32 %v3474_v49, %v1250_v63  ;;  %v3694_v27 = vld [vmem:[#allocation6_spill] sm:$0xff] }
 0x160   : > { %v1252_v17 = vadd.f32 %v3460_v42, %v875_v58  ;;  %v897_v42 = vadd.f32 %v3454_v31, %v3456_v32 }
 0x161   : > { %v1831_v39 = vpop.f32.mrf.mxu1 }
 0x165   : > { %v3700_v32 = vld [vmem:[#allocation21_spill] sm:$0xff] }
 0x16d   : > { %v1736_v54 = vpop.f32.mrf.mxu0 }
 0x16e   : > { %v1810_v33 = vadd.f32 %v1809_v61, %v1736_v54 }
 0x16f   : > { %v1738_v1 = vpop.f32.mrf.mxu0 }
 0x170   : > { %v1848_v53 = vadd.f32 %v1810_v33, %v1311_v10  ;;  %v1812_v8 = vadd.f32 %v1811_v0, %v1738_v1  ;;  %v3699_v10 = vld [vmem:[#allocation4_spill] sm:$0xff]  ;;  %v1268_v1 = vadd.f32 %v3701_v11, %v891_v12 }
 0x171   : > { %v1740_v62 = vpop.f32.mrf.mxu0  ;;  %v1264_v31 = vadd.f32 %v3699_v10, %v887_v40  ;;  %v3710_v12 = vld [vmem:[#allocation16_spill] sm:$0xff] }
 0x172   : > { %v3543_v5 = vadd.f32 %v3529_v51, %v1848_v53  ;;  %v1849_v14 = vadd.f32 %v1812_v8, %v1313_v59  ;;  %v1814_v35 = vadd.f32 %v1813_v2, %v1740_v62  ;;  %v877_v59 = vadd.f32 %v3408_v7, %v3432_v19  ;;  %v3697_v8 = vld [vmem:[#allocation8_spill] sm:$0xff] }
 0x173   : > { %v1742_v38 = vpop.f32.mrf.mxu0  ;;  %v881_v2 = vadd.f32 %v3412_v9, %v3434_v20  ;;  %v885_v7 = vadd.f32 %v3424_v15, %v3440_v23  ;;  %v1833_v20 = vpop.f32.mrf.mxu1  ;;  %v893_v15 = vadd.f32 %v3442_v24, %v3450_v29  ;;  %v1325_v24 = vadd.f32 %v3694_v27, %v1252_v17  ;;  %v3695_v29 = vld [vmem:[#allocation2_spill] sm:$0xff]  ;;  %v3712_v27 = vld [vmem:[#allocation20_spill] sm:$0xff] }
 0x174   : > { %1892 = vst [vmem:[%s3540_s24] sm:$0xff] %v3543_v5  ;;  %v3551_v52 = vadd.f32 %v3533_v47, %v1849_v14  ;;  %v1850_v54 = vadd.f32 %v1814_v35, %v1315_v48  ;;  %v1816_v56 = vadd.f32 %v1815_v4, %v1742_v38  ;;  %v1254_v46 = vadd.f32 %v3462_v43, %v877_v59  ;;  %v3696_v4 = vld [vmem:[#allocation19_spill] sm:$0xff]  ;;  %v3703_v14 = vld [vmem:[#allocation10_spill] sm:$0xff] }
 0x175   : > { %v1746_v16 = vpop.f32.mrf.mxu0  ;;  %v1258_v43 = vadd.f32 %v3466_v45, %v881_v2  ;;  %v1260_v49 = vadd.f32 %v3695_v29, %v883_v6  ;;  %v1262_v30 = vadd.f32 %v3698_v28, %v885_v7  ;;  %v1835_v33 = vpop.f32.mrf.mxu1  ;;  %v1270_v53 = vadd.f32 %v3702_v34, %v893_v15  ;;  %v3706_v59 = vld [vmem:[#allocation11_spill] sm:$0xff]  ;;  %v3707_v7 = vld [vmem:[#allocation13_spill] sm:$0xff] }
 0x176   : > { %1893 = vst [vmem:[%s3540_s24 + $0x8] sm:$0xff] %v3551_v52  ;;  %v3562_v60 = vadd.f32 %v3529_v51, %v1850_v54  ;;  %v1851_v61 = vadd.f32 %v1816_v56, %v1317_v41  ;;  %v1820_v0 = vadd.f32 %v1819_v55, %v1746_v16  ;;  %v1327_v50 = vadd.f32 %v3697_v8, %v1254_v46  ;;  %v3704_v41 = vld [vmem:[#allocation12_spill] sm:$0xff]  ;;  %v3705_v56 = vld [vmem:[#allocation9_spill] sm:$0xff]  ;;  %v3709_v46 = vld [vmem:[#allocation15_spill] sm:$0xff] }
 0x177   : > { %v1748_v19 = vpop.f32.mrf.mxu0  ;;  %v1331_v35 = vadd.f32 %v3703_v14, %v1258_v43  ;;  %v1333_v54 = vadd.f32 %v3704_v41, %v1260_v49  ;;  %v1272_v58 = vadd.f32 %v3705_v56, %v895_v26  ;;  %v1274_v63 = vadd.f32 %v3706_v59, %v897_v42  ;;  %v3711_v42 = vld [vmem:[#allocation18_spill] sm:$0xff] }
 0x178   : > { %1894 = vst [vmem:[%s3540_s24 + $0x10] sm:$0xff] %v3562_v60  ;;  %v3577_v55 = vadd.f32 %v3533_v47, %v1851_v61  ;;  %v1852_v9 = vadd.f32 %v1820_v0, %v1321_v44  ;;  %v1822_v18 = vadd.f32 %v3502_v57, %v1748_v19  ;;  %v1959_v61 = vmul.f32 %v3562_v60, %v3562_v60  ;;  %v3708_v19 = vld [vmem:[#allocation14_spill] sm:$0xff] }
 0x179   : > { %v1750_v23 = vpop.f32.mrf.mxu0  ;;  %v1335_v17 = vadd.f32 %v3707_v7, %v1262_v30  ;;  %v1337_v40 = vadd.f32 %v3708_v19, %v1264_v31  ;;  %v1343_v15 = vadd.f32 %v3710_v12, %v1270_v53  ;;  %v1345_v43 = vadd.f32 %v3711_v42, %v1272_v58 }
 0x17a   : > { %1895 = vst [vmem:[%s3540_s24 + $0x18] sm:$0xff] %v3577_v55  ;;  %v1880_v21 = vadd.f32 %v3529_v51, %v1852_v9  ;;  %v1853_v3 = vadd.f32 %v1822_v18, %v1323_v22  ;;  %v1824_v57 = vadd.f32 %v3696_v4, %v1750_v23  ;;  %v1341_v9 = vadd.f32 %v3709_v46, %v1268_v1 }
 0x17b   : > { %v1752_v25 = vpop.f32.mrf.mxu0  ;;  %v1957_v18 = vmul.f32 %v3543_v5, %v3543_v5  ;;  %v1908_v29 = vadd.f32 %v3562_v60, %v3543_v5  ;;  %v1958_v4 = vmul.f32 %v3551_v52, %v3551_v52  ;;  %v1921_v5 = vadd.f32 %v3577_v55, %v3551_v52 }
 0x17c   : > { %1896 = vst [vmem:[%s3540_s24 + $0x20] sm:$0xff] %v1880_v21  ;;  %v1826_v45 = vadd.f32 %v3700_v32, %v1752_v25  ;;  %v1881_v48 = vadd.f32 %v3533_v47, %v1853_v3  ;;  %v1854_v62 = vadd.f32 %v1824_v57, %v1325_v24  ;;  %v1961_v23 = vmul.f32 %v1880_v21, %v1880_v21 }
 0x17d   : > { %v1756_v13 = vpop.f32.mrf.mxu0  ;;  %v3625_v24 = vadd.f32 %v3712_v27, %v1274_v63  ;;  %v1973_v57 = vadd.f32 %v1959_v61, %v1957_v18  ;;  %v1960_v25 = vmul.f32 %v3577_v55, %v3577_v55  ;;  %v1909_v28 = vadd.f32 %v1908_v29, %v1880_v21 }
 0x17e   : > { %v1855_v37 = vadd.f32 %v1826_v45, %v1327_v50  ;;  %v1830_v38 = vadd.f32 %v3535_v36, %v1756_v13  ;;  %1897 = vst [vmem:[%s3540_s24 + $0x28] sm:$0xff] %v1881_v48  ;;  %v1882_v16 = vadd.f32 %v3529_v51, %v1854_v62  ;;  %v1839_v36 = vpop.f32.mrf.mxu1  ;;  %v1922_v21 = vadd.f32 %v1921_v5, %v1881_v48 }
 0x17f   : > { %v1758_v44 = vpop.f32.mrf.mxu0  ;;  %v1974_v60 = vadd.f32 %v1973_v57, %v1961_v23  ;;  %v1986_v13 = vadd.f32 %v1960_v25, %v1958_v4 }
 0x180   : > { %v1883_v0 = vadd.f32 %v3533_v47, %v1855_v37  ;;  %v1856_v2 = vadd.f32 %v1830_v38, %v1331_v35  ;;  %v1832_v6 = vadd.f32 %v1831_v39, %v1758_v44  ;;  %1898 = vst [vmem:[%s3540_s24 + $0x30] sm:$0xff] %v1882_v16  ;;  %v1841_v50 = vpop.f32.mrf.mxu1  ;;  %v1963_v30 = vmul.f32 %v1882_v16, %v1882_v16 }
 0x181   : > { %v1760_v22 = vpop.f32.mrf.mxu0  ;;  %v1910_v11 = vadd.f32 %v1909_v28, %v1882_v16 }
 0x182   : > { %1899 = vst [vmem:[%s3540_s24 + $0x38] sm:$0xff] %v1883_v0  ;;  %v1884_v26 = vadd.f32 %v3529_v51, %v1856_v2  ;;  %v1857_v39 = vadd.f32 %v1832_v6, %v1333_v54  ;;  %v1834_v49 = vadd.f32 %v1833_v20, %v1760_v22  ;;  %v1962_v20 = vmul.f32 %v1881_v48, %v1881_v48  ;;  %v1843_v14 = vpop.f32.mrf.mxu1 }
 0x183   : > { %v1762_v3 = vpop.f32.mrf.mxu0  ;;  %v1975_v37 = vadd.f32 %v1974_v60, %v1963_v30  ;;  %v1964_v38 = vmul.f32 %v1883_v0, %v1883_v0  ;;  %v1923_v16 = vadd.f32 %v1922_v21, %v1883_v0 }
 0x184   : > { %1900 = vst [vmem:[%s3540_s24 + $0x40] sm:$0xff] %v1884_v26  ;;  %v1885_v8 = vadd.f32 %v3533_v47, %v1857_v39  ;;  %v1858_v10 = vadd.f32 %v1834_v49, %v1335_v17  ;;  %v1836_v31 = vadd.f32 %v1835_v33, %v1762_v3  ;;  %v1965_v1 = vmul.f32 %v1884_v26, %v1884_v26 }
 0x185   : > { %v1766_v32 = vpop.f32.mrf.mxu0  ;;  %v1911_v52 = vadd.f32 %v1910_v11, %v1884_v26  ;;  %v1987_v63 = vadd.f32 %v1986_v13, %v1962_v20 }
 0x186   : > { %1901 = vst [vmem:[%s3540_s24 + $0x48] sm:$0xff] %v1885_v8  ;;  %v1840_v45 = vadd.f32 %v1839_v36, %v1766_v32  ;;  %v1886_v34 = vadd.f32 %v3529_v51, %v1858_v10  ;;  %v1859_v53 = vadd.f32 %v1836_v31, %v1337_v40  ;;  %v1976_v48 = vadd.f32 %v1975_v37, %v1965_v1  ;;  %v1845_v36 = vpop.f32.mrf.mxu1 }
 0x187   : > { %v1768_v62 = vpop.f32.mrf.mxu0  ;;  %v1966_v44 = vmul.f32 %v1885_v8, %v1885_v8  ;;  %v1988_v19 = vadd.f32 %v1987_v63, %v1964_v38  ;;  %v1924_v40 = vadd.f32 %v1923_v16, %v1885_v8  ;;  %v2795_v32 = vmov 1966171168   ;;  %v3713_v38 = vld [vmem:[#allocation17_spill] sm:$0xff] }
 0x188   : > { %v1860_v35 = vadd.f32 %v1840_v45, %v1341_v9  ;;  %v1842_v33 = vadd.f32 %v1841_v50, %v1768_v62  ;;  %1902 = vst [vmem:[%s3540_s24 + $0x50] sm:$0xff] %v1886_v34  ;;  %v1887_v55 = vadd.f32 %v3533_v47, %v1859_v53  ;;  %v1967_v54 = vmul.f32 %v1886_v34, %v1886_v34 }
 0x189   : > { %v1770_v41 = vpop.f32.mrf.mxu0  ;;  %v1912_v2 = vadd.f32 %v1911_v52, %v1886_v34  ;;  %v1989_v22 = vadd.f32 %v1988_v19, %v1966_v44  ;;  %v1938_v5 = vunpack.c.l.s4 %v2795_v32  ;;  %v3714_v63 = vlaneseq }
 0x18a   : > { %v1888_v56 = vadd.f32 %v3529_v51, %v1860_v35  ;;  %v1861_v58 = vadd.f32 %v1842_v33, %v1343_v15  ;;  %v1844_v59 = vadd.f32 %v1843_v14, %v1770_v41  ;;  %1903 = vst [vmem:[%s3540_s24 + $0x58] sm:$0xff] %v1887_v55  ;;  %v1968_v46 = vmul.f32 %v1887_v55, %v1887_v55 }
 0x18b   : > { %v1772_v61 = vpop.f32.mrf.mxu0  ;;  %v1977_v12 = vadd.f32 %v1976_v48, %v1967_v54  ;;  %v1925_v18 = vadd.f32 %v1924_v40, %v1887_v55  ;;  %v1939_v62 = vunpack.c.0.s8 %v1938_v5  ;;  %vm1954_vm0 = vcmp.lt.s32.totalorder %v3714_v63, 256 }
 0x18c   : > { %1904 = vst [vmem:[%s3540_s24 + $0x60] sm:$0xff] %v1888_v56  ;;  %v1969_v6 = vmul.f32 %v1888_v56, %v1888_v56  ;;  %v1889_v7 = vadd.f32 %v3533_v47, %v1861_v58  ;;  %v1862_v17 = vadd.f32 %v1844_v59, %v1345_v43  ;;  %v1846_v9 = vadd.f32 %v1845_v36, %v1772_v61 }
 0x18d   : > { %v1913_v15 = vadd.f32 %v1912_v2, %v1888_v56  ;;  %v1990_v43 = vadd.f32 %v1989_v22, %v1968_v46  ;;  %v1942_v52 = vsub.s32 %v1939_v62, %v3713_v38 }
 0x18e   : > { %1905 = vst [vmem:[%s3540_s24 + $0x68] sm:$0xff] %v1889_v7  ;;  %v1890_v0 = vadd.f32 %v3529_v51, %v1862_v17  ;;  %v1970_v23 = vmul.f32 %v1889_v7, %v1889_v7  ;;  %v1863_v26 = vadd.f32 %v1846_v9, %v3625_v24  ;;  %v1978_v39 = vadd.f32 %v1977_v12, %v1969_v6 }
 0x18f   : > { %v1926_v29 = vadd.f32 %v1925_v18, %v1889_v7 }
 0x190   : > { %1906 = vst [vmem:[%s3540_s24 + $0x70] sm:$0xff] %v1890_v0  ;;  %v1914_v42 = vadd.f32 %v1913_v15, %v1890_v0  ;;  %v1971_v27 = vmul.f32 %v1890_v0, %v1890_v0  ;;  %v1891_v49 = vadd.f32 %v3533_v47, %v1863_v26  ;;  %v1991_v57 = vadd.f32 %v1990_v43, %v1970_v23 }
 0x192   : > { %v1915_v3 = vrot.slane %v1914_v42, 4  ;;  %v1979_v4 = vadd.f32 %v1978_v39, %v1971_v27  ;;  %1907 = vst [vmem:[%s3540_s24 + $0x78] sm:$0xff] %v1891_v49  ;;  %v1927_v25 = vadd.f32 %v1926_v29, %v1891_v49  ;;  %v1972_v8 = vmul.f32 %v1891_v49, %v1891_v49 }
 0x194   : > { %v1916_v51 = vadd.f32 %v1915_v3, %v1914_v42  ;;  %v1980_v50 = vrot.slane %v1979_v4, 4  ;;  %v1928_v28 = vrot.slane %v1927_v25, 4  ;;  %v1992_v30 = vadd.f32 %v1991_v57, %v1972_v8 }
 0x196   : > { %v1917_v10 = vrot.slane %v1916_v51, 2  ;;  %v1981_v24 = vadd.f32 %v1980_v50, %v1979_v4  ;;  %v1929_v31 = vadd.f32 %v1928_v28, %v1927_v25  ;;  %v1993_v60 = vrot.slane %v1992_v30, 4 }
 0x198   : > { %v1918_v20 = vadd.f32 %v1917_v10, %v1916_v51  ;;  %v1982_v45 = vrot.slane %v1981_v24, 2  ;;  %v1930_v47 = vrot.slane %v1929_v31, 2  ;;  %v1994_v11 = vadd.f32 %v1993_v60, %v1992_v30 }
 0x19a   : > { %v1983_v1 = vadd.f32 %v1982_v45, %v1981_v24  ;;  %v1919_v34 = vrot.slane %v1918_v20, 1  ;;  %v1931_v53 = vadd.f32 %v1930_v47, %v1929_v31  ;;  %v1995_v13 = vrot.slane %v1994_v11, 2 }
 0x19c   : > { %v1984_v21 = vrot.slane %v1983_v1, 1  ;;  %v1932_v14 = vrot.slane %v1931_v53, 1  ;;  %v1996_v35 = vadd.f32 %v1995_v13, %v1994_v11  ;;  %v1920_v33 = vadd.f32 %v1919_v34, %v1918_v20 }
 0x19e   : > { %v1933_v37 = vadd.f32 %v1932_v14, %v1931_v53  ;;  %v1997_v55 = vrot.slane %v1996_v35, 1  ;;  %v1985_v41 = vadd.f32 %v1984_v21, %v1983_v1 }
 0x1a0   : > { %v1936_v54 = vcombine.low %v1920_v33, %v1933_v37  ;;  %v1998_v56 = vadd.f32 %v1997_v55, %v1996_v35 }
 0x1a2   : > { %v1943_v58 = vrot.slane %v1936_v54, %v1942_v52  ;;  %v2001_v59 = vcombine.low %v1985_v41, %v1998_v56 }
 0x1a4   : > { %v1950_v16 = vrot.slane %v1943_v58, %v1942_v52  ;;  %v2008_v48 = vrot.slane %v2001_v59, %v1942_v52 }
 0x1a6   : > { %1956 = vst.msk [vmem:[%s292_s28] ss:$2 sm:$0x3] %vm1954_vm0, %v1950_v16  ;;  %v2015_v44 = vrot.slane %v2008_v48, %v1942_v52 }
 0x1a8   : > { %2482 = vst.msk [vmem:[%s292_s28 + $0x1] ss:$2 sm:$0x3] %vm1954_vm0, %v2015_v44 }
 0x1a9 PF: > { %s16_s20 = sadd.s32 1, %s2792_s20   ;;  %s3715_s18 = smov %s2788_s19 }
 0x1aa   : > { %p13_p5 = scmp.ge.s32.totalorder %s16_s20, 4   ;;  %s3716_s19 = smov %s3718_s21 }
 0x1ac   :  { %15 = sbr.rel (!%p13_p5) target bundleno = 2 (0x2), region = 87 }

// kernel: discriminator_forward.14
= control target key start
LH: loop header
LB: loop body
LE: loop exit
PB: predicated region body
PF: predicated region fallthrough
CT: control target
= control target key end

     0   :  { %v48_v0 = vlaneseq  ;;  %s621_s1 = inlined_call_operand.vmem [shape: f32[1,256], index: 1, kind: input, shape index: {}]   ;;  %s622_s2 = inlined_call_operand.vmem [shape: f32[1,256], index: 2, kind: input, shape index: {}]   ;;  %s623_s0 = inlined_call_operand.vmem [shape: f32[128,256], index: 0, kind: input, shape index: {}]   ;;  %s624_s3 = inlined_call_operand.vmem [shape: bf16[128,256], index: 3, kind: output, shape index: {}]  }
   0x1   :  { %v46_v2 = vld [vmem:[%s621_s1] sm:$0x3]  ;;  %v15_v5 = vld [vmem:[%s623_s0 + $0x8] sm:$0xff]  ;;  %v16_v8 = vld [vmem:[%s623_s0 + $0x10] sm:$0xff] }
   0x2   :  { %v49_v1 = vshrl.u32 %v48_v0, 7  ;;  %v90_v3 = vld [vmem:[%s622_s2] sm:$0x3]  ;;  %v17_v9 = vld [vmem:[%s623_s0 + $0x18] sm:$0xff]  ;;  %v19_v15 = vld [vmem:[%s623_s0 + $0x28] sm:$0xff] }
   0x3   :  { %v14_v4 = vld [vmem:[%s623_s0] sm:$0xff]  ;;  %v20_v16 = vld [vmem:[%s623_s0 + $0x30] sm:$0xff]  ;;  %v21_v17 = vld [vmem:[%s623_s0 + $0x38] sm:$0xff] }
   0x4   :  { %v50_v6 = vsub.s32 0, %v49_v1  ;;  %v54_v7 = vsub.s32 1, %v49_v1  ;;  %v18_v10 = vld [vmem:[%s623_s0 + $0x20] sm:$0xff]  ;;  %v23_v45 = vld [vmem:[%s623_s0 + $0x48] sm:$0xff]  ;;  %v24_v46 = vld [vmem:[%s623_s0 + $0x50] sm:$0xff] }
   0x5   :  { %v22_v40 = vld [vmem:[%s623_s0 + $0x40] sm:$0xff]  ;;  %v25_v47 = vld [vmem:[%s623_s0 + $0x58] sm:$0xff]  ;;  %v27_v59 = vld [vmem:[%s623_s0 + $0x68] sm:$0xff] }
   0x6   :  { %v419_v11 = vrot.slane %v46_v2, %v50_v6  ;;  %v421_v12 = vrot.slane %v46_v2, %v54_v7  ;;  %v423_v13 = vrot.slane %v90_v3, %v50_v6  ;;  %v425_v14 = vrot.slane %v90_v3, %v54_v7  ;;  %v26_v58 = vld [vmem:[%s623_s0 + $0x60] sm:$0xff]  ;;  %v28_v7 = vld [vmem:[%s623_s0 + $0x70] sm:$0xff] }
   0x8   :  { %v58_v18 = vmul.f32 %v419_v11, %v14_v4  ;;  %v59_v19 = vmul.f32 %v421_v12, %v15_v5  ;;  %v60_v20 = vmul.f32 %v419_v11, %v16_v8  ;;  %v61_v21 = vmul.f32 %v421_v12, %v17_v9  ;;  %v29_v8 = vld [vmem:[%s623_s0 + $0x78] sm:$0xff] }
   0x9   :  { %v62_v22 = vmul.f32 %v419_v11, %v18_v10  ;;  %v63_v23 = vmul.f32 %v421_v12, %v19_v15  ;;  %v64_v24 = vmul.f32 %v419_v11, %v20_v16  ;;  %v65_v25 = vmul.f32 %v421_v12, %v21_v17 }
   0xa   :  { %v102_v26 = vadd.f32 %v423_v13, %v58_v18  ;;  %v103_v27 = vadd.f32 %v425_v14, %v59_v19  ;;  %v104_v28 = vadd.f32 %v423_v13, %v60_v20  ;;  %v105_v29 = vadd.f32 %v425_v14, %v61_v21 }
   0xb   :  { %v106_v30 = vadd.f32 %v423_v13, %v62_v22  ;;  %v107_v31 = vadd.f32 %v425_v14, %v63_v23  ;;  %v108_v32 = vadd.f32 %v423_v13, %v64_v24  ;;  %v109_v33 = vadd.f32 %v425_v14, %v65_v25  ;;  %v30_v22 = vld [vmem:[%s623_s0 + $0x80] sm:$0xff]  ;;  %v31_v23 = vld [vmem:[%s623_s0 + $0x88] sm:$0xff] }
   0xc   :  { %vm134_vm0 = vcmp.gt.f32.partialorder %v102_v26, 0.0  ;;  %vm135_vm1 = vcmp.gt.f32.partialorder %v103_v27, 0.0  ;;  %v166_v34 = vmul.f32 0.2, %v102_v26  ;;  %v167_v35 = vmul.f32 0.2, %v103_v27 }
   0xd   :  { %vm136_vm2 = vcmp.gt.f32.partialorder %v104_v28, 0.0  ;;  %vm137_vm3 = vcmp.gt.f32.partialorder %v105_v29, 0.0  ;;  %v168_v36 = vmul.f32 0.2, %v104_v28  ;;  %v169_v37 = vmul.f32 0.2, %v105_v29 }
   0xe   :  { %v198_v38 = vsel %vm134_vm0, %v102_v26, %v166_v34  ;;  %v199_v39 = vsel %vm135_vm1, %v103_v27, %v167_v35  ;;  %vm138_vm4 = vcmp.gt.f32.partialorder %v106_v30, 0.0  ;;  %vm139_vm5 = vcmp.gt.f32.partialorder %v107_v31, 0.0  ;;  %v32_v27 = vld [vmem:[%s623_s0 + $0x90] sm:$0xff] }
   0xf   :  { %v362_v41 = vpack.c.bf16 %v199_v39, %v198_v38  ;;  %v200_v42 = vsel %vm136_vm2, %v104_v28, %v168_v36  ;;  %v201_v43 = vsel %vm137_vm3, %v105_v29, %v169_v37  ;;  %v170_v44 = vmul.f32 0.2, %v106_v30  ;;  %v33_v28 = vld [vmem:[%s623_s0 + $0x98] sm:$0xff] }
  0x10   :  { %v363_v48 = vpack.c.bf16 %v201_v43, %v200_v42  ;;  %v171_v49 = vmul.f32 0.2, %v107_v31  ;;  %vm140_vm6 = vcmp.gt.f32.partialorder %v108_v32, 0.0  ;;  %vm141_vm7 = vcmp.gt.f32.partialorder %v109_v33, 0.0 }
  0x11   :  { %326 = vst [vmem:[%s624_s3] sm:$0xff] %v362_v41  ;;  %v202_v50 = vsel %vm138_vm4, %v106_v30, %v170_v44  ;;  %v172_v51 = vmul.f32 0.2, %v108_v32  ;;  %v173_v52 = vmul.f32 0.2, %v109_v33  ;;  %v66_v53 = vmul.f32 %v419_v11, %v22_v40  ;;  %v34_v40 = vld [vmem:[%s623_s0 + $0xa0] sm:$0xff]  ;;  %v35_v41 = vld [vmem:[%s623_s0 + $0xa8] sm:$0xff] }
  0x12   :  { %327 = vst [vmem:[%s624_s3 + $0x8] sm:$0xff] %v363_v48  ;;  %v203_v54 = vsel %vm139_vm5, %v107_v31, %v171_v49  ;;  %v67_v55 = vmul.f32 %v421_v12, %v23_v45  ;;  %v68_v56 = vmul.f32 %v419_v11, %v24_v46  ;;  %v69_v57 = vmul.f32 %v421_v12, %v25_v47 }
  0x13   :  { %v364_v60 = vpack.c.bf16 %v203_v54, %v202_v50  ;;  %v204_v61 = vsel %vm140_vm6, %v108_v32, %v172_v51  ;;  %v205_v62 = vsel %vm141_vm7, %v109_v33, %v173_v52  ;;  %v110_v63 = vadd.f32 %v423_v13, %v66_v53  ;;  %v36_v54 = vld [vmem:[%s623_s0 + $0xb0] sm:$0xff] }
  0x14   :  { %v365_v0 = vpack.c.bf16 %v205_v62, %v204_v61  ;;  %v111_v1 = vadd.f32 %v425_v14, %v67_v55  ;;  %v112_v2 = vadd.f32 %v423_v13, %v68_v56  ;;  %v113_v3 = vadd.f32 %v425_v14, %v69_v57  ;;  %v37_v55 = vld [vmem:[%s623_s0 + $0xb8] sm:$0xff] }
  0x15   :  { %328 = vst [vmem:[%s624_s3 + $0x10] sm:$0xff] %v364_v60  ;;  %vm142_vm8 = vcmp.gt.f32.partialorder %v110_v63, 0.0  ;;  %v174_v4 = vmul.f32 0.2, %v110_v63  ;;  %v70_v5 = vmul.f32 %v419_v11, %v26_v58  ;;  %v71_v6 = vmul.f32 %v421_v12, %v27_v59 }
  0x16   :  { %329 = vst [vmem:[%s624_s3 + $0x18] sm:$0xff] %v365_v0  ;;  %vm143_vm9 = vcmp.gt.f32.partialorder %v111_v1, 0.0  ;;  %v175_v9 = vmul.f32 0.2, %v111_v1  ;;  %vm144_vm10 = vcmp.gt.f32.partialorder %v112_v2, 0.0  ;;  %vm145_vm11 = vcmp.gt.f32.partialorder %v113_v3, 0.0 }
  0x17   :  { %v206_v10 = vsel %vm142_vm8, %v110_v63, %v174_v4  ;;  %v176_v15 = vmul.f32 0.2, %v112_v2  ;;  %v177_v16 = vmul.f32 0.2, %v113_v3  ;;  %v114_v17 = vadd.f32 %v423_v13, %v70_v5 }
  0x18   :  { %v207_v18 = vsel %vm143_vm9, %v111_v1, %v175_v9  ;;  %v115_v19 = vadd.f32 %v425_v14, %v71_v6  ;;  %v72_v20 = vmul.f32 %v419_v11, %v28_v7  ;;  %v73_v21 = vmul.f32 %v421_v12, %v29_v8  ;;  %v40_v7 = vld [vmem:[%s623_s0 + $0xd0] sm:$0xff]  ;;  %v41_v8 = vld [vmem:[%s623_s0 + $0xd8] sm:$0xff] }
  0x19   :  { %v366_v24 = vpack.c.bf16 %v207_v18, %v206_v10  ;;  %v208_v25 = vsel %vm144_vm10, %v112_v2, %v176_v15  ;;  %v209_v26 = vsel %vm145_vm11, %v113_v3, %v177_v16  ;;  %vm146_vm12 = vcmp.gt.f32.partialorder %v114_v17, 0.0  ;;  %v38_v2 = vld [vmem:[%s623_s0 + $0xc0] sm:$0xff]  ;;  %v39_v3 = vld [vmem:[%s623_s0 + $0xc8] sm:$0xff] }
  0x1a   :  { %v367_v29 = vpack.c.bf16 %v209_v26, %v208_v25  ;;  %vm147_vm13 = vcmp.gt.f32.partialorder %v115_v19, 0.0  ;;  %v178_v30 = vmul.f32 0.2, %v114_v17  ;;  %v179_v31 = vmul.f32 0.2, %v115_v19  ;;  %v43_v25 = vld [vmem:[%s623_s0 + $0xe8] sm:$0xff] }
  0x1b   :  { %330 = vst [vmem:[%s624_s3 + $0x20] sm:$0xff] %v366_v24  ;;  %v116_v32 = vadd.f32 %v423_v13, %v72_v20  ;;  %v117_v33 = vadd.f32 %v425_v14, %v73_v21  ;;  %v74_v34 = vmul.f32 %v419_v11, %v30_v22  ;;  %v75_v35 = vmul.f32 %v421_v12, %v31_v23  ;;  %v42_v24 = vld [vmem:[%s623_s0 + $0xe0] sm:$0xff] }
  0x1c   :  { %331 = vst [vmem:[%s624_s3 + $0x28] sm:$0xff] %v367_v29  ;;  %v210_v36 = vsel %vm146_vm12, %v114_v17, %v178_v30  ;;  %v211_v37 = vsel %vm147_vm13, %v115_v19, %v179_v31  ;;  %v76_v38 = vmul.f32 %v419_v11, %v32_v27  ;;  %v77_v39 = vmul.f32 %v421_v12, %v33_v28 }
  0x1d   :  { %v368_v42 = vpack.c.bf16 %v211_v37, %v210_v36  ;;  %vm148_vm14 = vcmp.gt.f32.partialorder %v116_v32, 0.0  ;;  %vm149_vm15 = vcmp.gt.f32.partialorder %v117_v33, 0.0  ;;  %v180_v43 = vmul.f32 0.2, %v116_v32 }
  0x1e   :  { %v181_v44 = vmul.f32 0.2, %v117_v33  ;;  %v118_v45 = vadd.f32 %v423_v13, %v74_v34  ;;  %v119_v46 = vadd.f32 %v425_v14, %v75_v35  ;;  %v120_v47 = vadd.f32 %v423_v13, %v76_v38  ;;  %v44_v38 = vld [vmem:[%s623_s0 + $0xf0] sm:$0xff] }
  0x1f   :  { %332 = vst [vmem:[%s624_s3 + $0x30] sm:$0xff] %v368_v42  ;;  %v212_v48 = vsel %vm148_vm14, %v116_v32, %v180_v43  ;;  %v121_v49 = vadd.f32 %v425_v14, %v77_v39  ;;  %v78_v50 = vmul.f32 %v419_v11, %v34_v40  ;;  %v79_v51 = vmul.f32 %v421_v12, %v35_v41  ;;  %v45_v39 = vld [vmem:[%s623_s0 + $0xf8] sm:$0xff] }
  0x20   :  { %v213_v52 = vsel %vm149_vm15, %v117_v33, %v181_v44  ;;  %vm150_vm0 = vcmp.gt.f32.partialorder %v118_v45, 0.0  ;;  %vm151_vm1 = vcmp.gt.f32.partialorder %v119_v46, 0.0  ;;  %v182_v53 = vmul.f32 0.2, %v118_v45 }
  0x21   :  { %v369_v56 = vpack.c.bf16 %v213_v52, %v212_v48  ;;  %v183_v57 = vmul.f32 0.2, %v119_v46  ;;  %vm152_vm2 = vcmp.gt.f32.partialorder %v120_v47, 0.0  ;;  %vm153_vm3 = vcmp.gt.f32.partialorder %v121_v49, 0.0 }
  0x22   :  { %v214_v58 = vsel %vm150_vm0, %v118_v45, %v182_v53  ;;  %v184_v59 = vmul.f32 0.2, %v120_v47  ;;  %v185_v60 = vmul.f32 0.2, %v121_v49  ;;  %v122_v61 = vadd.f32 %v423_v13, %v78_v50 }
  0x23   :  { %333 = vst [vmem:[%s624_s3 + $0x38] sm:$0xff] %v369_v56  ;;  %v215_v62 = vsel %vm151_vm1, %v119_v46, %v183_v57  ;;  %v123_v63 = vadd.f32 %v425_v14, %v79_v51  ;;  %v80_v0 = vmul.f32 %v419_v11, %v36_v54  ;;  %v81_v1 = vmul.f32 %v421_v12, %v37_v55 }
  0x24   :  { %v370_v4 = vpack.c.bf16 %v215_v62, %v214_v58  ;;  %v216_v5 = vsel %vm152_vm2, %v120_v47, %v184_v59  ;;  %v217_v6 = vsel %vm153_vm3, %v121_v49, %v185_v60  ;;  %vm154_vm4 = vcmp.gt.f32.partialorder %v122_v61, 0.0 }
  0x25   :  { %v371_v9 = vpack.c.bf16 %v217_v6, %v216_v5  ;;  %vm155_vm5 = vcmp.gt.f32.partialorder %v123_v63, 0.0  ;;  %v186_v10 = vmul.f32 0.2, %v122_v61  ;;  %v187_v15 = vmul.f32 0.2, %v123_v63 }
  0x26   :  { %334 = vst [vmem:[%s624_s3 + $0x40] sm:$0xff] %v370_v4  ;;  %v124_v16 = vadd.f32 %v423_v13, %v80_v0  ;;  %v125_v17 = vadd.f32 %v425_v14, %v81_v1  ;;  %v82_v18 = vmul.f32 %v419_v11, %v38_v2  ;;  %v83_v19 = vmul.f32 %v421_v12, %v39_v3 }
  0x27   :  { %335 = vst [vmem:[%s624_s3 + $0x48] sm:$0xff] %v371_v9  ;;  %v218_v20 = vsel %vm154_vm4, %v122_v61, %v186_v10  ;;  %v219_v21 = vsel %vm155_vm5, %v123_v63, %v187_v15  ;;  %v84_v22 = vmul.f32 %v419_v11, %v40_v7  ;;  %v85_v23 = vmul.f32 %v421_v12, %v41_v8 }
  0x28   :  { %v372_v26 = vpack.c.bf16 %v219_v21, %v218_v20  ;;  %vm156_vm6 = vcmp.gt.f32.partialorder %v124_v16, 0.0  ;;  %vm157_vm7 = vcmp.gt.f32.partialorder %v125_v17, 0.0  ;;  %v188_v27 = vmul.f32 0.2, %v124_v16 }
  0x29   :  { %v189_v28 = vmul.f32 0.2, %v125_v17  ;;  %v126_v29 = vadd.f32 %v423_v13, %v82_v18  ;;  %v127_v30 = vadd.f32 %v425_v14, %v83_v19  ;;  %v128_v31 = vadd.f32 %v423_v13, %v84_v22 }
  0x2a   :  { %336 = vst [vmem:[%s624_s3 + $0x50] sm:$0xff] %v372_v26  ;;  %v220_v32 = vsel %vm156_vm6, %v124_v16, %v188_v27  ;;  %v129_v33 = vadd.f32 %v425_v14, %v85_v23  ;;  %v86_v34 = vmul.f32 %v419_v11, %v42_v24  ;;  %v87_v35 = vmul.f32 %v421_v12, %v43_v25 }
  0x2b   :  { %v221_v36 = vsel %vm157_vm7, %v125_v17, %v189_v28  ;;  %vm158_vm8 = vcmp.gt.f32.partialorder %v126_v29, 0.0  ;;  %vm159_vm9 = vcmp.gt.f32.partialorder %v127_v30, 0.0  ;;  %v190_v37 = vmul.f32 0.2, %v126_v29 }
  0x2c   :  { %v373_v40 = vpack.c.bf16 %v221_v36, %v220_v32  ;;  %v191_v41 = vmul.f32 0.2, %v127_v30  ;;  %vm160_vm10 = vcmp.gt.f32.partialorder %v128_v31, 0.0  ;;  %vm161_vm11 = vcmp.gt.f32.partialorder %v129_v33, 0.0 }
  0x2d   :  { %v222_v42 = vsel %vm158_vm8, %v126_v29, %v190_v37  ;;  %v192_v43 = vmul.f32 0.2, %v128_v31  ;;  %v193_v44 = vmul.f32 0.2, %v129_v33  ;;  %v130_v45 = vadd.f32 %v423_v13, %v86_v34 }
  0x2e   :  { %337 = vst [vmem:[%s624_s3 + $0x58] sm:$0xff] %v373_v40  ;;  %v223_v46 = vsel %vm159_vm9, %v127_v30, %v191_v41  ;;  %v131_v47 = vadd.f32 %v425_v14, %v87_v35  ;;  %v88_v48 = vmul.f32 %v419_v11, %v44_v38  ;;  %v89_v49 = vmul.f32 %v421_v12, %v45_v39 }
  0x2f   :  { %v374_v50 = vpack.c.bf16 %v223_v46, %v222_v42  ;;  %v224_v51 = vsel %vm160_vm10, %v128_v31, %v192_v43  ;;  %v225_v52 = vsel %vm161_vm11, %v129_v33, %v193_v44  ;;  %vm162_vm12 = vcmp.gt.f32.partialorder %v130_v45, 0.0 }
  0x30   :  { %v375_v53 = vpack.c.bf16 %v225_v52, %v224_v51  ;;  %vm163_vm13 = vcmp.gt.f32.partialorder %v131_v47, 0.0  ;;  %v194_v54 = vmul.f32 0.2, %v130_v45  ;;  %v195_v55 = vmul.f32 0.2, %v131_v47 }
  0x31   :  { %338 = vst [vmem:[%s624_s3 + $0x60] sm:$0xff] %v374_v50  ;;  %v132_v56 = vadd.f32 %v423_v13, %v88_v48  ;;  %v133_v57 = vadd.f32 %v425_v14, %v89_v49 }
  0x32   :  { %339 = vst [vmem:[%s624_s3 + $0x68] sm:$0xff] %v375_v53  ;;  %v226_v11 = vsel %vm162_vm12, %v130_v45, %v194_v54  ;;  %v227_v12 = vsel %vm163_vm13, %v131_v47, %v195_v55 }
  0x33   :  { %v376_v58 = vpack.c.bf16 %v227_v12, %v226_v11  ;;  %vm164_vm14 = vcmp.gt.f32.partialorder %v132_v56, 0.0  ;;  %vm165_vm15 = vcmp.gt.f32.partialorder %v133_v57, 0.0  ;;  %v196_v59 = vmul.f32 0.2, %v132_v56 }
  0x34   :  { %v197_v60 = vmul.f32 0.2, %v133_v57 }
  0x35   :  { %340 = vst [vmem:[%s624_s3 + $0x70] sm:$0xff] %v376_v58  ;;  %v228_v61 = vsel %vm164_vm14, %v132_v56, %v196_v59 }
  0x36   :  { %v229_v62 = vsel %vm165_vm15, %v133_v57, %v197_v60 }
  0x37   :  { %v377_v13 = vpack.c.bf16 %v229_v62, %v228_v61 }
  0x39   :  { %341 = vst [vmem:[%s624_s3 + $0x78] sm:$0xff] %v377_v13 }

// kernel: discriminator_forward.16
= control target key start
LH: loop header
LB: loop body
LE: loop exit
PB: predicated region body
PF: predicated region fallthrough
CT: control target
= control target key end

     0   :  { %v32_v0 = vlaneseq  ;;  %s377_s1 = inlined_call_operand.vmem [shape: f32[1,512], index: 1, kind: input, shape index: {}]   ;;  %s378_s2 = inlined_call_operand.vmem [shape: f32[1,512], index: 2, kind: input, shape index: {}]   ;;  %s379_s0 = inlined_call_operand.vmem [shape: f32[32,512], index: 0, kind: input, shape index: {}]   ;;  %s380_s3 = inlined_call_operand.vmem [shape: bf16[32,512], index: 3, kind: output, shape index: {}]  }
   0x1   :  { %v30_v2 = vld [vmem:[%s377_s1] sm:$0xf]  ;;  %v15_v5 = vld [vmem:[%s379_s0 + $0x8] sm:$0xff]  ;;  %v16_v10 = vld [vmem:[%s379_s0 + $0x10] sm:$0xff] }
   0x2   :  { %v33_v1 = vshrl.u32 %v32_v0, 7  ;;  %v68_v3 = vld [vmem:[%s378_s2] sm:$0xf]  ;;  %v19_v12 = vld [vmem:[%s379_s0 + $0x28] sm:$0xff]  ;;  %v17_v17 = vld [vmem:[%s379_s0 + $0x18] sm:$0xff] }
   0x3   :  { %v14_v4 = vld [vmem:[%s379_s0] sm:$0xff]  ;;  %v20_v18 = vld [vmem:[%s379_s0 + $0x30] sm:$0xff]  ;;  %v21_v19 = vld [vmem:[%s379_s0 + $0x38] sm:$0xff] }
   0x4   :  { %v34_v6 = vsub.s32 0, %v33_v1  ;;  %v38_v7 = vsub.s32 1, %v33_v1  ;;  %v42_v8 = vsub.s32 2, %v33_v1  ;;  %v46_v9 = vsub.s32 3, %v33_v1  ;;  %v18_v11 = vld [vmem:[%s379_s0 + $0x20] sm:$0xff]  ;;  %v23_v51 = vld [vmem:[%s379_s0 + $0x48] sm:$0xff] }
   0x5   :  { %v22_v46 = vld [vmem:[%s379_s0 + $0x40] sm:$0xff]  ;;  %v24_v52 = vld [vmem:[%s379_s0 + $0x50] sm:$0xff]  ;;  %v25_v53 = vld [vmem:[%s379_s0 + $0x58] sm:$0xff] }
   0x6   :  { %v271_v13 = vrot.slane %v30_v2, %v34_v6  ;;  %v273_v14 = vrot.slane %v30_v2, %v38_v7  ;;  %v275_v15 = vrot.slane %v68_v3, %v34_v6  ;;  %v277_v16 = vrot.slane %v68_v3, %v38_v7  ;;  %v26_v0 = vld [vmem:[%s379_s0 + $0x60] sm:$0xff]  ;;  %v27_v1 = vld [vmem:[%s379_s0 + $0x68] sm:$0xff] }
   0x7   :  { %v288_v20 = vrot.slane %v30_v2, %v42_v8  ;;  %v290_v21 = vrot.slane %v30_v2, %v46_v9  ;;  %v292_v22 = vrot.slane %v68_v3, %v42_v8  ;;  %v294_v23 = vrot.slane %v68_v3, %v46_v9 }
   0x8   :  { %v52_v24 = vmul.f32 %v271_v13, %v14_v4  ;;  %v53_v25 = vmul.f32 %v273_v14, %v15_v5  ;;  %v56_v26 = vmul.f32 %v271_v13, %v18_v11  ;;  %v57_v27 = vmul.f32 %v273_v14, %v19_v12 }
   0x9   :  { %v54_v28 = vmul.f32 %v288_v20, %v16_v10  ;;  %v55_v29 = vmul.f32 %v290_v21, %v17_v17  ;;  %v58_v30 = vmul.f32 %v288_v20, %v20_v18  ;;  %v59_v31 = vmul.f32 %v290_v21, %v21_v19  ;;  %v28_v17 = vld [vmem:[%s379_s0 + $0x70] sm:$0xff]  ;;  %v29_v18 = vld [vmem:[%s379_s0 + $0x78] sm:$0xff] }
   0xa   :  { %v90_v32 = vadd.f32 %v275_v15, %v52_v24  ;;  %v91_v33 = vadd.f32 %v277_v16, %v53_v25  ;;  %v94_v34 = vadd.f32 %v275_v15, %v56_v26  ;;  %v95_v35 = vadd.f32 %v277_v16, %v57_v27 }
   0xb   :  { %v92_v36 = vadd.f32 %v292_v22, %v54_v28  ;;  %v93_v37 = vadd.f32 %v294_v23, %v55_v29  ;;  %v96_v38 = vadd.f32 %v292_v22, %v58_v30  ;;  %v97_v39 = vadd.f32 %v294_v23, %v59_v31 }
   0xc   :  { %vm106_vm0 = vcmp.gt.f32.partialorder %v90_v32, 0.0  ;;  %vm107_vm1 = vcmp.gt.f32.partialorder %v91_v33, 0.0  ;;  %v122_v40 = vmul.f32 0.2, %v90_v32  ;;  %v123_v41 = vmul.f32 0.2, %v91_v33 }
   0xd   :  { %vm108_vm2 = vcmp.gt.f32.partialorder %v92_v36, 0.0  ;;  %vm109_vm3 = vcmp.gt.f32.partialorder %v93_v37, 0.0  ;;  %v124_v42 = vmul.f32 0.2, %v92_v36  ;;  %v125_v43 = vmul.f32 0.2, %v93_v37 }
   0xe   :  { %v138_v44 = vsel %vm106_vm0, %v90_v32, %v122_v40  ;;  %v139_v45 = vsel %vm107_vm1, %v91_v33, %v123_v41  ;;  %vm110_vm4 = vcmp.gt.f32.partialorder %v94_v34, 0.0  ;;  %vm111_vm5 = vcmp.gt.f32.partialorder %v95_v35, 0.0 }
   0xf   :  { %v222_v47 = vpack.c.bf16 %v139_v45, %v138_v44  ;;  %v140_v48 = vsel %vm108_vm2, %v92_v36, %v124_v42  ;;  %v141_v49 = vsel %vm109_vm3, %v93_v37, %v125_v43  ;;  %v126_v50 = vmul.f32 0.2, %v94_v34 }
  0x10   :  { %v223_v54 = vpack.c.bf16 %v141_v49, %v140_v48  ;;  %v127_v55 = vmul.f32 0.2, %v95_v35  ;;  %vm112_vm6 = vcmp.gt.f32.partialorder %v96_v38, 0.0  ;;  %vm113_vm7 = vcmp.gt.f32.partialorder %v97_v39, 0.0 }
  0x11   :  { %202 = vst [vmem:[%s380_s3] sm:$0xff] %v222_v47  ;;  %v142_v56 = vsel %vm110_vm4, %v94_v34, %v126_v50  ;;  %v128_v57 = vmul.f32 0.2, %v96_v38  ;;  %v129_v58 = vmul.f32 0.2, %v97_v39  ;;  %v60_v59 = vmul.f32 %v271_v13, %v22_v46 }
  0x12   :  { %203 = vst [vmem:[%s380_s3 + $0x8] sm:$0xff] %v223_v54  ;;  %v143_v60 = vsel %vm111_vm5, %v95_v35, %v127_v55  ;;  %v61_v61 = vmul.f32 %v273_v14, %v23_v51  ;;  %v62_v62 = vmul.f32 %v288_v20, %v24_v52  ;;  %v63_v63 = vmul.f32 %v290_v21, %v25_v53 }
  0x13   :  { %v224_v2 = vpack.c.bf16 %v143_v60, %v142_v56  ;;  %v144_v3 = vsel %vm112_vm6, %v96_v38, %v128_v57  ;;  %v145_v4 = vsel %vm113_vm7, %v97_v39, %v129_v58  ;;  %v98_v5 = vadd.f32 %v275_v15, %v60_v59 }
  0x14   :  { %v225_v6 = vpack.c.bf16 %v145_v4, %v144_v3  ;;  %v99_v7 = vadd.f32 %v277_v16, %v61_v61  ;;  %v100_v8 = vadd.f32 %v292_v22, %v62_v62  ;;  %v101_v9 = vadd.f32 %v294_v23, %v63_v63 }
  0x15   :  { %204 = vst [vmem:[%s380_s3 + $0x10] sm:$0xff] %v224_v2  ;;  %vm114_vm8 = vcmp.gt.f32.partialorder %v98_v5, 0.0  ;;  %v130_v10 = vmul.f32 0.2, %v98_v5  ;;  %v64_v11 = vmul.f32 %v271_v13, %v26_v0  ;;  %v65_v12 = vmul.f32 %v273_v14, %v27_v1 }
  0x16   :  { %205 = vst [vmem:[%s380_s3 + $0x18] sm:$0xff] %v225_v6  ;;  %vm115_vm9 = vcmp.gt.f32.partialorder %v99_v7, 0.0  ;;  %v131_v19 = vmul.f32 0.2, %v99_v7  ;;  %vm116_vm10 = vcmp.gt.f32.partialorder %v100_v8, 0.0  ;;  %vm117_vm11 = vcmp.gt.f32.partialorder %v101_v9, 0.0 }
  0x17   :  { %v146_v24 = vsel %vm114_vm8, %v98_v5, %v130_v10  ;;  %v132_v13 = vmul.f32 0.2, %v100_v8  ;;  %v133_v25 = vmul.f32 0.2, %v101_v9  ;;  %v102_v14 = vadd.f32 %v275_v15, %v64_v11 }
  0x18   :  { %v147_v26 = vsel %vm115_vm9, %v99_v7, %v131_v19  ;;  %v103_v27 = vadd.f32 %v277_v16, %v65_v12  ;;  %v66_v28 = vmul.f32 %v288_v20, %v28_v17  ;;  %v67_v29 = vmul.f32 %v290_v21, %v29_v18 }
  0x19   :  { %v226_v30 = vpack.c.bf16 %v147_v26, %v146_v24  ;;  %v148_v31 = vsel %vm116_vm10, %v100_v8, %v132_v13  ;;  %v149_v32 = vsel %vm117_vm11, %v101_v9, %v133_v25  ;;  %vm118_vm12 = vcmp.gt.f32.partialorder %v102_v14, 0.0 }
  0x1a   :  { %v227_v33 = vpack.c.bf16 %v149_v32, %v148_v31  ;;  %vm119_vm13 = vcmp.gt.f32.partialorder %v103_v27, 0.0  ;;  %v134_v34 = vmul.f32 0.2, %v102_v14  ;;  %v135_v35 = vmul.f32 0.2, %v103_v27 }
  0x1b   :  { %206 = vst [vmem:[%s380_s3 + $0x20] sm:$0xff] %v226_v30  ;;  %v104_v15 = vadd.f32 %v292_v22, %v66_v28  ;;  %v105_v16 = vadd.f32 %v294_v23, %v67_v29 }
  0x1c   :  { %207 = vst [vmem:[%s380_s3 + $0x28] sm:$0xff] %v227_v33  ;;  %v150_v20 = vsel %vm118_vm12, %v102_v14, %v134_v34  ;;  %v151_v21 = vsel %vm119_vm13, %v103_v27, %v135_v35 }
  0x1d   :  { %v228_v36 = vpack.c.bf16 %v151_v21, %v150_v20  ;;  %vm120_vm14 = vcmp.gt.f32.partialorder %v104_v15, 0.0  ;;  %vm121_vm15 = vcmp.gt.f32.partialorder %v105_v16, 0.0  ;;  %v136_v37 = vmul.f32 0.2, %v104_v15 }
  0x1e   :  { %v137_v38 = vmul.f32 0.2, %v105_v16 }
  0x1f   :  { %208 = vst [vmem:[%s380_s3 + $0x30] sm:$0xff] %v228_v36  ;;  %v152_v39 = vsel %vm120_vm14, %v104_v15, %v136_v37 }
  0x20   :  { %v153_v40 = vsel %vm121_vm15, %v105_v16, %v137_v38 }
  0x21   :  { %v229_v22 = vpack.c.bf16 %v153_v40, %v152_v39 }
  0x23   :  { %209 = vst [vmem:[%s380_s3 + $0x38] sm:$0xff] %v229_v22 }

// kernel: discriminator_forward.15
= control target key start
LH: loop header
LB: loop body
LE: loop exit
PB: predicated region body
PF: predicated region fallthrough
CT: control target
= control target key end

     0   :  { %s7077_s18 = smov 0   ;;  %s7079_s19 = smov 0   ;;  %s9178_s0 = inlined_call_operand.vmem [shape: bf16[2,5,4,768], index: 0, kind: input, shape index: {}]   ;;  %s9179_s1 = inlined_call_operand.vmem [shape: bf16[2,5,4,768], index: 1, kind: input, shape index: {}]   ;;  %s9180_s2 = inlined_call_operand.vmem [shape: bf16[3,768,512], index: 2, kind: input, shape index: {}]   ;;  %s9181_s3 = inlined_call_operand.vmem [shape: f32[1,512], index: 3, kind: input, shape index: {}]   ;;  %s9182_s4 = inlined_call_operand.vmem [shape: f32[2,4,4,512], index: 4, kind: output, shape index: {0}]   ;;  %s9183_s5 = inlined_call_operand.vmem [shape: f32[2,1,2,512], index: 5, kind: output, shape index: {1}]  }
   0x1   :  { %s7081_s20 = smov 0  }
   0x2 LB: > { %s28_s21 = sadd.s32 1, %s7039_s19  ;;  %p5126_p0 = scmp.ge.s32.totalorder %s7043_s20, 1  ;;  %s7043_s20 = sphi %s7081_s20, %s16_s20   ;;  %s7039_s19 = sphi %s7079_s19, %s9185_s19   ;;  %s7035_s18 = sphi %s7077_s18, %s9184_s18  }
   0x3   : > { %p30_p1 = scmp.ge.s32.totalorder %s28_s21, 2  ;;  %p216_p2 = scmp.lt.s32.totalorder %s7043_s20, 3 }
   0x5   : > { %s9187_s21 = smov (%p30_p1, %s28_s21), 0  ;;  %p217_p3 = pnand %p5126_p0, %p216_p2 }
   0x6   : > { %p263_p4 = scmp.lt.s32.totalorder (!%p217_p3), %s7035_s18, 1 }
   0x7   : > { %220 = sbr.rel (%p217_p3) target bundleno = 822 (0x336), region = 36 }
   0xc   : > { %v6133_v0 = vld [vmem:[%s9180_s2 + $0x6e4] ss:$16 sps:$4 sm:$0xff]   ;;  %v6137_v2 = vld [vmem:[%s9180_s2 + $0x6e0] ss:$16 sps:$4 sm:$0xff]   ;;  %s9189_s18 = smov (!%p263_p4, %s7035_s18), 1  ;;  %v727_v40 = vlaneseq }
   0xd   : > { %v6135_v1 = vld [vmem:[%s9180_s2 + $0x8e4] ss:$16 sps:$4 sm:$0xff]   ;;  %1740 = vmatprep.subr.bf16.mxu0 %v6133_v0  ;;  %v6138_v3 = vld [vmem:[%s9180_s2 + $0x8e0] ss:$16 sps:$4 sm:$0xff]   ;;  %v7045_v38 = vmov 1983009808  }
   0xe   : > { %1783 = vmatprep.subr.bf16.mxu1 %v6135_v1  ;;  %v6139_v4 = vld [vmem:[%s9180_s2 + $0x6c4] ss:$16 sps:$4 sm:$0xff]   ;;  %1741 = vmatpush1.bf16.msra.mxu0 %v6137_v2  ;;  %v6143_v6 = vld [vmem:[%s9180_s2 + $0x6c0] ss:$16 sps:$4 sm:$0xff]   ;;  %v725_v39 = vunpack.c.l.s4 %v7045_v38  ;;  %s6106_s22 = smul.u32 60, %s9189_s18  ;;  %v7229_v46 = vshrl.u32 %v727_v40, 7 }
   0xf   : > { %1784 = vmatpush1.bf16.msra.mxu1 %v6138_v3  ;;  %v6141_v5 = vld [vmem:[%s9180_s2 + $0x8c4] ss:$16 sps:$4 sm:$0xff]   ;;  %1742 = vmatprep.subr.bf16.mxu0 %v6139_v4  ;;  %v6144_v7 = vld [vmem:[%s9180_s2 + $0x8c0] ss:$16 sps:$4 sm:$0xff]   ;;  %s6104_s30 = sshll.u32 %s9189_s18, 6  ;;  %s6105_s9 = sshll.u32 %s9189_s18, 3 }
  0x10   : > { %1785 = vmatprep.subr.bf16.mxu1 %v6141_v5  ;;  %v6145_v8 = vld [vmem:[%s9180_s2 + $0x6a4] ss:$16 sps:$4 sm:$0xff]   ;;  %v6149_v10 = vld [vmem:[%s9180_s2 + $0x6a0] ss:$16 sps:$4 sm:$0xff]   ;;  %v726_v45 = vunpack.c.0.s8 %v725_v39  ;;  %s7248_s8 = scalar_lea.vmem %s9179_s1, %s6106_s22  ;;  %v6270_v39 = vld [vmem:[%s9180_s2 + $0x64c] ss:$16 sps:$4 sm:$0xff]   ;;  %s7692_s24 = scalar_lea.vmem %s9178_s0, %s6106_s22 }
  0x11   : > { %v6147_v9 = vld [vmem:[%s9180_s2 + $0x8a4] ss:$16 sps:$4 sm:$0xff]   ;;  %v6150_v11 = vld [vmem:[%s9180_s2 + $0x8a0] ss:$16 sps:$4 sm:$0xff]   ;;  %v6234_v59 = vld [vmem:[%s7248_s8 + $0x1c] ss:$12 sps:$4 sm:$0xff]   ;;  %s9127_s22 = scalar_lea.vmem %s9182_s4, %s6104_s30  ;;  %s292_s12 = scalar_lea.vmem %s9183_s5, %s6105_s9 }
  0x12   : > { %1743 = vmatpush1.bf16.msra.mxu0 %v6143_v6  ;;  %v6151_v12 = vld [vmem:[%s9180_s2 + $0x684] ss:$16 sps:$4 sm:$0xff]   ;;  %v6155_v14 = vld [vmem:[%s9180_s2 + $0x680] ss:$16 sps:$4 sm:$0xff]   ;;  %v7257_v53 = vsub.s32 %v726_v45, %v7229_v46  ;;  %vm4892_vm0 = vcmp.lt.s32.totalorder %v727_v40, 512 }
  0x13   : > { %1786 = vmatpush1.bf16.msra.mxu1 %v6144_v7  ;;  %1744 = vmatprep.subr.bf16.mxu0 %v6145_v8  ;;  %v6153_v13 = vld [vmem:[%s9180_s2 + $0x884] ss:$16 sps:$4 sm:$0xff]   ;;  %v6156_v15 = vld [vmem:[%s9180_s2 + $0x880] ss:$16 sps:$4 sm:$0xff]  }
  0x14   : > { %1787 = vmatprep.subr.bf16.mxu1 %v6147_v9  ;;  %v6157_v16 = vld [vmem:[%s9180_s2 + $0x664] ss:$16 sps:$4 sm:$0xff]   ;;  %v6161_v18 = vld [vmem:[%s9180_s2 + $0x660] ss:$16 sps:$4 sm:$0xff]   ;;  %v751_v1 = vrot.slane %v6234_v59, %v7257_v53 }
  0x15   : > { %v6159_v17 = vld [vmem:[%s9180_s2 + $0x864] ss:$16 sps:$4 sm:$0xff]   ;;  %v6162_v19 = vld [vmem:[%s9180_s2 + $0x860] ss:$16 sps:$4 sm:$0xff]  }
  0x16   : > { %1745 = vmatpush1.bf16.msra.mxu0 %v6149_v10  ;;  %v6163_v20 = vld [vmem:[%s9180_s2 + $0x644] ss:$16 sps:$4 sm:$0xff]   ;;  %v6167_v22 = vld [vmem:[%s9180_s2 + $0x640] ss:$16 sps:$4 sm:$0xff]  }
  0x17   : > { %1788 = vmatpush1.bf16.msra.mxu1 %v6150_v11  ;;  %1746 = vmatprep.subr.bf16.mxu0 %v6151_v12  ;;  %v6165_v21 = vld [vmem:[%s9180_s2 + $0x844] ss:$16 sps:$4 sm:$0xff]   ;;  %v6168_v23 = vld [vmem:[%s9180_s2 + $0x840] ss:$16 sps:$4 sm:$0xff]  }
  0x18   : > { %1789 = vmatprep.subr.bf16.mxu1 %v6153_v13  ;;  %v6169_v24 = vld [vmem:[%s9180_s2 + $0x624] ss:$16 sps:$4 sm:$0xff]   ;;  %v6173_v26 = vld [vmem:[%s9180_s2 + $0x620] ss:$16 sps:$4 sm:$0xff]  }
  0x19   : > { %v6171_v25 = vld [vmem:[%s9180_s2 + $0x824] ss:$16 sps:$4 sm:$0xff]   ;;  %v6174_v27 = vld [vmem:[%s9180_s2 + $0x820] ss:$16 sps:$4 sm:$0xff]  }
  0x1a   : > { %1747 = vmatpush1.bf16.msra.mxu0 %v6155_v14  ;;  %v6175_v28 = vld [vmem:[%s9180_s2 + $0x604] ss:$16 sps:$4 sm:$0xff]   ;;  %v6179_v30 = vld [vmem:[%s9180_s2 + $0x600] ss:$16 sps:$4 sm:$0xff]  }
  0x1b   : > { %1790 = vmatpush1.bf16.msra.mxu1 %v6156_v15  ;;  %1748 = vmatprep.subr.bf16.mxu0 %v6157_v16  ;;  %v6177_v29 = vld [vmem:[%s9180_s2 + $0x804] ss:$16 sps:$4 sm:$0xff]   ;;  %v6180_v31 = vld [vmem:[%s9180_s2 + $0x800] ss:$16 sps:$4 sm:$0xff]  }
  0x1c   : > { %1791 = vmatprep.subr.bf16.mxu1 %v6159_v17  ;;  %v6181_v32 = vld [vmem:[%s9180_s2 + $0x7e4] ss:$16 sps:$4 sm:$0xff]   ;;  %v6185_v34 = vld [vmem:[%s9180_s2 + $0x7e0] ss:$16 sps:$4 sm:$0xff]   ;;  %v6240_v17 = vld [vmem:[%s9180_s2 + $0x6ec] ss:$16 sps:$4 sm:$0xff]  }
  0x1d   : > { %v6183_v33 = vld [vmem:[%s9180_s2 + $0x9e4] ss:$16 sps:$4 sm:$0xff]   ;;  %v6186_v35 = vld [vmem:[%s9180_s2 + $0x9e0] ss:$16 sps:$4 sm:$0xff]  }
  0x1e   : > { %1749 = vmatpush1.bf16.msra.mxu0 %v6161_v18  ;;  %v6187_v36 = vld [vmem:[%s9180_s2 + $0x7c4] ss:$16 sps:$4 sm:$0xff]   ;;  %v6191_v41 = vld [vmem:[%s9180_s2 + $0x7c0] ss:$16 sps:$4 sm:$0xff]  }
  0x1f   : > { %1792 = vmatpush1.bf16.msra.mxu1 %v6162_v19  ;;  %1750 = vmatprep.subr.bf16.mxu0 %v6163_v20  ;;  %v6189_v37 = vld [vmem:[%s9180_s2 + $0x9c4] ss:$16 sps:$4 sm:$0xff]   ;;  %v6192_v42 = vld [vmem:[%s9180_s2 + $0x9c0] ss:$16 sps:$4 sm:$0xff]  }
  0x20   : > { %1793 = vmatprep.subr.bf16.mxu1 %v6165_v21  ;;  %v6193_v43 = vld [vmem:[%s9180_s2 + $0x7a4] ss:$16 sps:$4 sm:$0xff]   ;;  %v6197_v47 = vld [vmem:[%s9180_s2 + $0x7a0] ss:$16 sps:$4 sm:$0xff]   ;;  %v6238_v21 = vld [vmem:[%s9180_s2 + $0x6e8] ss:$16 sps:$4 sm:$0xff]  }
  0x21   : > { %v6195_v44 = vld [vmem:[%s9180_s2 + $0x9a4] ss:$16 sps:$4 sm:$0xff]   ;;  %v6198_v48 = vld [vmem:[%s9180_s2 + $0x9a0] ss:$16 sps:$4 sm:$0xff]  }
  0x22   : > { %1751 = vmatpush1.bf16.msra.mxu0 %v6167_v22  ;;  %v6199_v49 = vld [vmem:[%s9180_s2 + $0x784] ss:$16 sps:$4 sm:$0xff]   ;;  %v6203_v51 = vld [vmem:[%s9180_s2 + $0x780] ss:$16 sps:$4 sm:$0xff]  }
  0x23   : > { %1794 = vmatpush1.bf16.msra.mxu1 %v6168_v23  ;;  %1752 = vmatprep.subr.bf16.mxu0 %v6169_v24  ;;  %v6201_v50 = vld [vmem:[%s9180_s2 + $0x984] ss:$16 sps:$4 sm:$0xff]   ;;  %v6204_v52 = vld [vmem:[%s9180_s2 + $0x980] ss:$16 sps:$4 sm:$0xff]   ;;  %v6246_v23 = vld [vmem:[%s9180_s2 + $0x6cc] ss:$16 sps:$4 sm:$0xff]  }
  0x24   : > { %1795 = vmatprep.subr.bf16.mxu1 %v6171_v25  ;;  %v6205_v54 = vld [vmem:[%s9180_s2 + $0x764] ss:$16 sps:$4 sm:$0xff]   ;;  %v6229_v56 = vld [vmem:[%s7248_s8] ss:$12 sps:$4 sm:$0xff]   ;;  %v6244_v25 = vld [vmem:[%s9180_s2 + $0x6c8] ss:$16 sps:$4 sm:$0xff]  }
  0x25   : > { %v6207_v55 = vld [vmem:[%s9180_s2 + $0x964] ss:$16 sps:$4 sm:$0xff]   ;;  %v730_v60 = vrot.slane %v6229_v56, %v7257_v53  ;;  %v6209_v63 = vld [vmem:[%s9180_s2 + $0x760] ss:$16 sps:$4 sm:$0xff]   ;;  %v6280_v56 = vld [vmem:[%s9180_s2 + $0x608] ss:$16 sps:$4 sm:$0xff]  }
  0x26   : > { %1753 = vmatpush1.bf16.msra.mxu0 %v6173_v26  ;;  %v6231_v57 = vld [vmem:[%s7248_s8 + $0x18] ss:$12 sps:$4 sm:$0xff]   ;;  %v6210_v0 = vld [vmem:[%s9180_s2 + $0x960] ss:$16 sps:$4 sm:$0xff]  }
  0x27   : > { %1796 = vmatpush1.bf16.msra.mxu1 %v6174_v27  ;;  %1754 = vmatprep.subr.bf16.mxu0 %v6175_v28  ;;  %v6233_v58 = vld [vmem:[%s7248_s8 + $0x4] ss:$12 sps:$4 sm:$0xff]   ;;  %v744_v61 = vrot.slane %v6231_v57, %v7257_v53  ;;  %v6252_v27 = vld [vmem:[%s9180_s2 + $0x6ac] ss:$16 sps:$4 sm:$0xff]  }
  0x28   : > { %1797 = vmatprep.subr.bf16.mxu1 %v6177_v29  ;;  %v737_v62 = vrot.slane %v6233_v58, %v7257_v53  ;;  %v6211_v2 = vld [vmem:[%s9180_s2 + $0x744] ss:$16 sps:$4 sm:$0xff]   ;;  %v6215_v6 = vld [vmem:[%s9180_s2 + $0x740] ss:$16 sps:$4 sm:$0xff]   ;;  %v6250_v29 = vld [vmem:[%s9180_s2 + $0x6a8] ss:$16 sps:$4 sm:$0xff]  }
  0x29   : > { %v753_v3 = vcombine.high %v730_v60, %v744_v61  ;;  %v6213_v4 = vld [vmem:[%s9180_s2 + $0x944] ss:$16 sps:$4 sm:$0xff]   ;;  %v6216_v7 = vld [vmem:[%s9180_s2 + $0x940] ss:$16 sps:$4 sm:$0xff]   ;;  %v7324_v18 = vcombine.low %v730_v60, %v744_v61  ;;  %v6288_v58 = vld [vmem:[%s9180_s2 + $0x7ec] ss:$16 sps:$4 sm:$0xff]  }
  0x2a   : > { %1755 = vmatpush1.bf16.msra.mxu0 %v6179_v30  ;;  %v7285_v5 = vcombine.high %v737_v62, %v751_v1  ;;  %v6217_v8 = vld [vmem:[%s9180_s2 + $0x724] ss:$16 sps:$4 sm:$0xff]   ;;  %v6221_v10 = vld [vmem:[%s9180_s2 + $0x720] ss:$16 sps:$4 sm:$0xff]   ;;  %v7326_v19 = vcombine.low %v737_v62, %v751_v1  ;;  %v6286_v61 = vld [vmem:[%s9180_s2 + $0x7e8] ss:$16 sps:$4 sm:$0xff]  }
  0x2b   : > { %1798 = vmatpush1.bf16.msra.mxu1 %v6180_v31  ;;  %1756 = vmatprep.subr.bf16.mxu0 %v6181_v32  ;;  %v6219_v9 = vld [vmem:[%s9180_s2 + $0x924] ss:$16 sps:$4 sm:$0xff]   ;;  %v6222_v11 = vld [vmem:[%s9180_s2 + $0x920] ss:$16 sps:$4 sm:$0xff]   ;;  %v6258_v31 = vld [vmem:[%s9180_s2 + $0x68c] ss:$16 sps:$4 sm:$0xff]  }
  0x2c   : > { %1799 = vmatprep.subr.bf16.mxu1 %v6183_v33  ;;  %1772 = vmatprep.mubr.bf16.mxu0 %v753_v3  ;;  %v6223_v12 = vld [vmem:[%s9180_s2 + $0x704] ss:$16 sps:$4 sm:$0xff]   ;;  %v6227_v14 = vld [vmem:[%s9180_s2 + $0x700] ss:$16 sps:$4 sm:$0xff]   ;;  %v6256_v33 = vld [vmem:[%s9180_s2 + $0x688] ss:$16 sps:$4 sm:$0xff]  }
  0x2d   : > { %1815 = vmatprep.mubr.bf16.mxu1 %v7285_v5  ;;  %v6225_v13 = vld [vmem:[%s9180_s2 + $0x904] ss:$16 sps:$4 sm:$0xff]   ;;  %v6228_v15 = vld [vmem:[%s9180_s2 + $0x900] ss:$16 sps:$4 sm:$0xff]   ;;  %v6292_v1 = vld [vmem:[%s9180_s2 + $0x7c8] ss:$16 sps:$4 sm:$0xff]  }
  0x2e   : > { %1757 = vmatpush2.bf16.msra.mxu0 %v6185_v34  ;;  %v6237_v16 = vld [vmem:[%s9180_s2 + $0xae4] ss:$16 sps:$4 sm:$0xff]   ;;  %v6235_v20 = vld [vmem:[%s9180_s2 + $0xae0] ss:$16 sps:$4 sm:$0xff]  }
  0x2f   : > { %1800 = vmatpush2.bf16.msra.mxu1 %v6186_v35  ;;  %1758 = vmatprep.subr.bf16.mxu0 %v6187_v36  ;;  %v6243_v22 = vld [vmem:[%s9180_s2 + $0xac4] ss:$16 sps:$4 sm:$0xff]   ;;  %v6241_v24 = vld [vmem:[%s9180_s2 + $0xac0] ss:$16 sps:$4 sm:$0xff]   ;;  %v6264_v35 = vld [vmem:[%s9180_s2 + $0x66c] ss:$16 sps:$4 sm:$0xff]  }
  0x30   : > { %1801 = vmatprep.subr.bf16.mxu1 %v6189_v37  ;;  %v6249_v26 = vld [vmem:[%s9180_s2 + $0xaa4] ss:$16 sps:$4 sm:$0xff]   ;;  %v6247_v28 = vld [vmem:[%s9180_s2 + $0xaa0] ss:$16 sps:$4 sm:$0xff]   ;;  %v6262_v37 = vld [vmem:[%s9180_s2 + $0x668] ss:$16 sps:$4 sm:$0xff]  }
  0x31   : > { %v6255_v30 = vld [vmem:[%s9180_s2 + $0xa84] ss:$16 sps:$4 sm:$0xff]   ;;  %v6253_v32 = vld [vmem:[%s9180_s2 + $0xa80] ss:$16 sps:$4 sm:$0xff]  }
  0x32   : > { %1759 = vmatpush2.bf16.msra.mxu0 %v6191_v41  ;;  %v6261_v34 = vld [vmem:[%s9180_s2 + $0xa64] ss:$16 sps:$4 sm:$0xff]   ;;  %v6259_v36 = vld [vmem:[%s9180_s2 + $0xa60] ss:$16 sps:$4 sm:$0xff]  }
  0x33   : > { %1802 = vmatpush2.bf16.msra.mxu1 %v6192_v42  ;;  %1760 = vmatprep.subr.bf16.mxu0 %v6193_v43  ;;  %v6267_v38 = vld [vmem:[%s9180_s2 + $0xa44] ss:$16 sps:$4 sm:$0xff]   ;;  %v6265_v41 = vld [vmem:[%s9180_s2 + $0xa40] ss:$16 sps:$4 sm:$0xff]   ;;  %v6268_v42 = vld [vmem:[%s9180_s2 + $0x648] ss:$16 sps:$4 sm:$0xff]  }
  0x34   : > { %1803 = vmatprep.subr.bf16.mxu1 %v6195_v44  ;;  %v6273_v43 = vld [vmem:[%s9180_s2 + $0xa24] ss:$16 sps:$4 sm:$0xff]   ;;  %v6276_v44 = vld [vmem:[%s9180_s2 + $0x62c] ss:$16 sps:$4 sm:$0xff]   ;;  %v6271_v45 = vld [vmem:[%s9180_s2 + $0xa20] ss:$16 sps:$4 sm:$0xff]  }
  0x35   : > { %v6285_v57 = vld [vmem:[%s9180_s2 + $0xbe4] ss:$16 sps:$4 sm:$0xff]   ;;  %v6283_v60 = vld [vmem:[%s9180_s2 + $0xbe0] ss:$16 sps:$4 sm:$0xff]  }
  0x36   : > { %1761 = vmatpush2.bf16.msra.mxu0 %v6197_v47  ;;  %v6274_v47 = vld [vmem:[%s9180_s2 + $0x628] ss:$16 sps:$4 sm:$0xff]   ;;  %v6291_v62 = vld [vmem:[%s9180_s2 + $0xbc4] ss:$16 sps:$4 sm:$0xff]  }
  0x37   : > { %1804 = vmatpush2.bf16.msra.mxu1 %v6198_v48  ;;  %1762 = vmatprep.subr.bf16.mxu0 %v6199_v49  ;;  %v6279_v48 = vld [vmem:[%s9180_s2 + $0xa04] ss:$16 sps:$4 sm:$0xff]   ;;  %v6282_v49 = vld [vmem:[%s9180_s2 + $0x60c] ss:$16 sps:$4 sm:$0xff]  }
  0x38   : > { %1805 = vmatprep.subr.bf16.mxu1 %v6201_v50  ;;  %v6331_v50 = vld [vmem:[%s7248_s8 + $0x8] ss:$12 sps:$4 sm:$0xff]  }
  0x3a   : > { %1763 = vmatpush2.bf16.msra.mxu0 %v6203_v51  ;;  %v6332_v51 = vld [vmem:[%s7248_s8 + $0x20] ss:$12 sps:$4 sm:$0xff]  }
  0x3b   : > { %1806 = vmatpush2.bf16.msra.mxu1 %v6204_v52  ;;  %1764 = vmatprep.subr.bf16.mxu0 %v6205_v54  ;;  %v7417_v52 = vrot.slane %v6331_v50, %v7257_v53  ;;  %v7420_v54 = vrot.slane %v6332_v51, %v7257_v53  ;;  %v6365_v50 = vld [vmem:[%s9180_s2 + $0x84c] ss:$16 sps:$4 sm:$0xff]  }
  0x3c   : > { %1807 = vmatprep.subr.bf16.mxu1 %v6207_v55  ;;  %v6277_v55 = vld [vmem:[%s9180_s2 + $0xa00] ss:$16 sps:$4 sm:$0xff]   ;;  %v6368_v51 = vld [vmem:[%s9180_s2 + $0xa4c] ss:$16 sps:$4 sm:$0xff]  }
  0x3d   : > { %v7436_v59 = vcombine.high %v7417_v52, %v7420_v54 }
  0x3e   : > { %1765 = vmatpush2.bf16.msra.mxu0 %v6209_v63  ;;  %v6294_v63 = vld [vmem:[%s9180_s2 + $0x7cc] ss:$16 sps:$4 sm:$0xff]  }
  0x3f   : > { %1808 = vmatpush2.bf16.msra.mxu1 %v6210_v0  ;;  %1766 = vmatprep.subr.bf16.mxu0 %v6211_v2  ;;  %v6289_v0 = vld [vmem:[%s9180_s2 + $0xbc0] ss:$16 sps:$4 sm:$0xff]   ;;  %v6297_v2 = vld [vmem:[%s9180_s2 + $0xba4] ss:$16 sps:$4 sm:$0xff]  }
  0x40   : > { %1809 = vmatprep.subr.bf16.mxu1 %v6213_v4  ;;  %v6295_v4 = vld [vmem:[%s9180_s2 + $0xba0] ss:$16 sps:$4 sm:$0xff]  }
  0x42   : > { %1767 = vmatpush2.bf16.msra.mxu0 %v6215_v6  ;;  %v6298_v6 = vld [vmem:[%s9180_s2 + $0x7a8] ss:$16 sps:$4 sm:$0xff]  }
  0x43   : > { %1810 = vmatpush2.bf16.msra.mxu1 %v6216_v7  ;;  %1768 = vmatprep.subr.bf16.mxu0 %v6217_v8  ;;  %v6303_v7 = vld [vmem:[%s9180_s2 + $0xb84] ss:$16 sps:$4 sm:$0xff]   ;;  %v6306_v8 = vld [vmem:[%s9180_s2 + $0x78c] ss:$16 sps:$4 sm:$0xff]  }
  0x44   : > { %1811 = vmatprep.subr.bf16.mxu1 %v6219_v9  ;;  %v6301_v9 = vld [vmem:[%s9180_s2 + $0xb80] ss:$16 sps:$4 sm:$0xff]  }
  0x46   : > { %1769 = vmatpush2.bf16.msra.mxu0 %v6221_v10  ;;  %v6304_v10 = vld [vmem:[%s9180_s2 + $0x788] ss:$16 sps:$4 sm:$0xff]  }
  0x47   : > { %1812 = vmatpush2.bf16.msra.mxu1 %v6222_v11  ;;  %1770 = vmatprep.subr.bf16.mxu0 %v6223_v12  ;;  %v6309_v11 = vld [vmem:[%s9180_s2 + $0xb64] ss:$16 sps:$4 sm:$0xff]   ;;  %v6312_v12 = vld [vmem:[%s9180_s2 + $0x76c] ss:$16 sps:$4 sm:$0xff]  }
  0x48   : > { %1813 = vmatprep.subr.bf16.mxu1 %v6225_v13  ;;  %v6307_v13 = vld [vmem:[%s9180_s2 + $0xb60] ss:$16 sps:$4 sm:$0xff]  }
  0x4a   : > { %1771 = vmatpush2.bf16.msra.mxu0 %v6227_v14  ;;  %v6310_v14 = vld [vmem:[%s9180_s2 + $0x768] ss:$16 sps:$4 sm:$0xff]  }
  0x4b   : > { %1814 = vmatpush2.bf16.msra.mxu1 %v6228_v15  ;;  %1826 = vmatprep.subr.bf16.mxu0 %v6237_v16  ;;  %v6315_v15 = vld [vmem:[%s9180_s2 + $0xb44] ss:$16 sps:$4 sm:$0xff]   ;;  %v6318_v16 = vld [vmem:[%s9180_s2 + $0x74c] ss:$16 sps:$4 sm:$0xff]  }
  0x4c   : > { %1869 = vmatprep.subr.bf16.mxu1 %v6240_v17  ;;  %v6313_v17 = vld [vmem:[%s9180_s2 + $0xb40] ss:$16 sps:$4 sm:$0xff]  }
  0x4d   : > { %1773 = vmatmul.mubr.bf16.vlgmr.msra.gmra.mxu0 %v7324_v18 }
  0x4e   : > { %1816 = vmatmul.mubr.bf16.vlgmr.msra.gmra.mxu1 %v7326_v19  ;;  %1827 = vmatpush1.bf16.msra.mxu0 %v6235_v20  ;;  %v6316_v20 = vld [vmem:[%s9180_s2 + $0x748] ss:$16 sps:$4 sm:$0xff]  }
  0x4f   : > { %1870 = vmatpush1.bf16.msra.mxu1 %v6238_v21  ;;  %1828 = vmatprep.subr.bf16.mxu0 %v6243_v22  ;;  %v6321_v21 = vld [vmem:[%s9180_s2 + $0xb24] ss:$16 sps:$4 sm:$0xff]   ;;  %v6324_v22 = vld [vmem:[%s9180_s2 + $0x72c] ss:$16 sps:$4 sm:$0xff]  }
  0x50   : > { %1871 = vmatprep.subr.bf16.mxu1 %v6246_v23  ;;  %1901 = vmatprep.mubr.bf16.mxu1 %v753_v3  ;;  %v6300_v3 = vld [vmem:[%s9180_s2 + $0x7ac] ss:$16 sps:$4 sm:$0xff]   ;;  %v6319_v23 = vld [vmem:[%s9180_s2 + $0xb20] ss:$16 sps:$4 sm:$0xff]  }
  0x51   : > { %1858 = vmatprep.mubr.bf16.mxu0 %v7436_v59 }
  0x52   : > { %1829 = vmatpush1.bf16.msra.mxu0 %v6241_v24  ;;  %v6322_v24 = vld [vmem:[%s9180_s2 + $0x728] ss:$16 sps:$4 sm:$0xff]  }
  0x53   : > { %1872 = vmatpush1.bf16.msra.mxu1 %v6244_v25  ;;  %1830 = vmatprep.subr.bf16.mxu0 %v6249_v26  ;;  %v6327_v25 = vld [vmem:[%s9180_s2 + $0xb04] ss:$16 sps:$4 sm:$0xff]   ;;  %v6330_v26 = vld [vmem:[%s9180_s2 + $0x70c] ss:$16 sps:$4 sm:$0xff]  }
  0x54   : > { %1873 = vmatprep.subr.bf16.mxu1 %v6252_v27  ;;  %v6325_v27 = vld [vmem:[%s9180_s2 + $0xb00] ss:$16 sps:$4 sm:$0xff]  }
  0x56   : > { %1831 = vmatpush1.bf16.msra.mxu0 %v6247_v28  ;;  %v6328_v28 = vld [vmem:[%s9180_s2 + $0x708] ss:$16 sps:$4 sm:$0xff]  }
  0x57   : > { %1874 = vmatpush1.bf16.msra.mxu1 %v6250_v29  ;;  %1832 = vmatprep.subr.bf16.mxu0 %v6255_v30  ;;  %v6335_v29 = vld [vmem:[%s9180_s2 + $0x8ec] ss:$16 sps:$4 sm:$0xff]  }
  0x58   : > { %1875 = vmatprep.subr.bf16.mxu1 %v6258_v31  ;;  %v6338_v30 = vld [vmem:[%s9180_s2 + $0xaec] ss:$16 sps:$4 sm:$0xff]   ;;  %v7537_v31 = vcombine.low %v7417_v52, %v7420_v54  ;;  %v6363_v52 = vld [vmem:[%s9180_s2 + $0x848] ss:$16 sps:$4 sm:$0xff]  }
  0x59   : > { %v6366_v54 = vld [vmem:[%s9180_s2 + $0xa48] ss:$16 sps:$4 sm:$0xff]  }
  0x5a   : > { %1833 = vmatpush1.bf16.msra.mxu0 %v6253_v32  ;;  %v6333_v32 = vld [vmem:[%s9180_s2 + $0x8e8] ss:$16 sps:$4 sm:$0xff]  }
  0x5b   : > { %1876 = vmatpush1.bf16.msra.mxu1 %v6256_v33  ;;  %1834 = vmatprep.subr.bf16.mxu0 %v6261_v34  ;;  %v6336_v33 = vld [vmem:[%s9180_s2 + $0xae8] ss:$16 sps:$4 sm:$0xff]   ;;  %v6341_v34 = vld [vmem:[%s9180_s2 + $0x8cc] ss:$16 sps:$4 sm:$0xff]  }
  0x5c   : > { %1877 = vmatprep.subr.bf16.mxu1 %v6264_v35  ;;  %v6344_v35 = vld [vmem:[%s9180_s2 + $0xacc] ss:$16 sps:$4 sm:$0xff]  }
  0x5e   : > { %1835 = vmatpush1.bf16.msra.mxu0 %v6259_v36  ;;  %v6339_v36 = vld [vmem:[%s9180_s2 + $0x8c8] ss:$16 sps:$4 sm:$0xff]  }
  0x5f   : > { %1878 = vmatpush1.bf16.msra.mxu1 %v6262_v37  ;;  %1836 = vmatprep.subr.bf16.mxu0 %v6267_v38  ;;  %v6342_v37 = vld [vmem:[%s9180_s2 + $0xac8] ss:$16 sps:$4 sm:$0xff]   ;;  %v6347_v38 = vld [vmem:[%s9180_s2 + $0x8ac] ss:$16 sps:$4 sm:$0xff]  }
  0x60   : > { %1879 = vmatprep.subr.bf16.mxu1 %v6270_v39  ;;  %v6345_v39 = vld [vmem:[%s9180_s2 + $0x8a8] ss:$16 sps:$4 sm:$0xff]  }
  0x62   : > { %1837 = vmatpush1.bf16.msra.mxu0 %v6265_v41  ;;  %v6348_v41 = vld [vmem:[%s9180_s2 + $0xaa8] ss:$16 sps:$4 sm:$0xff]  }
  0x63   : > { %1880 = vmatpush1.bf16.msra.mxu1 %v6268_v42  ;;  %1838 = vmatprep.subr.bf16.mxu0 %v6273_v43  ;;  %v6353_v42 = vld [vmem:[%s9180_s2 + $0x88c] ss:$16 sps:$4 sm:$0xff]   ;;  %v6351_v43 = vld [vmem:[%s9180_s2 + $0x888] ss:$16 sps:$4 sm:$0xff]  }
  0x64   : > { %1881 = vmatprep.subr.bf16.mxu1 %v6276_v44  ;;  %v6354_v44 = vld [vmem:[%s9180_s2 + $0xa88] ss:$16 sps:$4 sm:$0xff]  }
  0x66   : > { %1839 = vmatpush1.bf16.msra.mxu0 %v6271_v45  ;;  %v6359_v45 = vld [vmem:[%s9180_s2 + $0x86c] ss:$16 sps:$4 sm:$0xff]  }
  0x67   : > { %1882 = vmatpush1.bf16.msra.mxu1 %v6274_v47  ;;  %1840 = vmatprep.subr.bf16.mxu0 %v6279_v48  ;;  %v6362_v47 = vld [vmem:[%s9180_s2 + $0xa6c] ss:$16 sps:$4 sm:$0xff]   ;;  %v6357_v48 = vld [vmem:[%s9180_s2 + $0x868] ss:$16 sps:$4 sm:$0xff]  }
  0x68   : > { %1883 = vmatprep.subr.bf16.mxu1 %v6282_v49  ;;  %v6360_v49 = vld [vmem:[%s9180_s2 + $0xa68] ss:$16 sps:$4 sm:$0xff]  }
  0x6a   : > { %1841 = vmatpush1.bf16.msra.mxu0 %v6277_v55  ;;  %v6371_v55 = vld [vmem:[%s9180_s2 + $0x82c] ss:$16 sps:$4 sm:$0xff]  }
  0x6b   : > { %1884 = vmatpush1.bf16.msra.mxu1 %v6280_v56  ;;  %1842 = vmatprep.subr.bf16.mxu0 %v6285_v57  ;;  %v6374_v56 = vld [vmem:[%s9180_s2 + $0xa2c] ss:$16 sps:$4 sm:$0xff]   ;;  %v6369_v57 = vld [vmem:[%s9180_s2 + $0x828] ss:$16 sps:$4 sm:$0xff]  }
  0x6c   : > { %1885 = vmatprep.subr.bf16.mxu1 %v6288_v58  ;;  %v6372_v58 = vld [vmem:[%s9180_s2 + $0xa28] ss:$16 sps:$4 sm:$0xff]  }
  0x6e   : > { %1843 = vmatpush2.bf16.msra.mxu0 %v6283_v60  ;;  %v6380_v60 = vld [vmem:[%s9180_s2 + $0xa0c] ss:$16 sps:$4 sm:$0xff]  }
  0x6f   : > { %1886 = vmatpush2.bf16.msra.mxu1 %v6286_v61  ;;  %1844 = vmatprep.subr.bf16.mxu0 %v6291_v62  ;;  %v6375_v61 = vld [vmem:[%s9180_s2 + $0x808] ss:$16 sps:$4 sm:$0xff]  }
  0x70   : > { %1887 = vmatprep.subr.bf16.mxu1 %v6294_v63  ;;  %v6378_v62 = vld [vmem:[%s9180_s2 + $0xa08] ss:$16 sps:$4 sm:$0xff]   ;;  %v6383_v63 = vld [vmem:[%s9180_s2 + $0x9ec] ss:$16 sps:$4 sm:$0xff]  }
  0x72   : > { %1845 = vmatpush2.bf16.msra.mxu0 %v6289_v0  ;;  %v6386_v0 = vld [vmem:[%s9180_s2 + $0xbec] ss:$16 sps:$4 sm:$0xff]  }
  0x73   : > { %1888 = vmatpush2.bf16.msra.mxu1 %v6292_v1  ;;  %1846 = vmatprep.subr.bf16.mxu0 %v6297_v2  ;;  %v6381_v1 = vld [vmem:[%s9180_s2 + $0x9e8] ss:$16 sps:$4 sm:$0xff]  }
  0x74   : > { %1889 = vmatprep.subr.bf16.mxu1 %v6300_v3  ;;  %v6384_v2 = vld [vmem:[%s9180_s2 + $0xbe8] ss:$16 sps:$4 sm:$0xff]   ;;  %v6389_v3 = vld [vmem:[%s9180_s2 + $0x9cc] ss:$16 sps:$4 sm:$0xff]  }
  0x76   : > { %1847 = vmatpush2.bf16.msra.mxu0 %v6295_v4  ;;  %v6392_v4 = vld [vmem:[%s9180_s2 + $0xbcc] ss:$16 sps:$4 sm:$0xff]  }
  0x77   : > { %1890 = vmatpush2.bf16.msra.mxu1 %v6298_v6  ;;  %1848 = vmatprep.subr.bf16.mxu0 %v6303_v7  ;;  %v6387_v6 = vld [vmem:[%s9180_s2 + $0x9c8] ss:$16 sps:$4 sm:$0xff]  }
  0x78   : > { %1891 = vmatprep.subr.bf16.mxu1 %v6306_v8  ;;  %v6390_v7 = vld [vmem:[%s9180_s2 + $0xbc8] ss:$16 sps:$4 sm:$0xff]   ;;  %v6395_v8 = vld [vmem:[%s9180_s2 + $0x9ac] ss:$16 sps:$4 sm:$0xff]  }
  0x7a   : > { %1849 = vmatpush2.bf16.msra.mxu0 %v6301_v9  ;;  %v6398_v9 = vld [vmem:[%s9180_s2 + $0xbac] ss:$16 sps:$4 sm:$0xff]  }
  0x7b   : > { %1892 = vmatpush2.bf16.msra.mxu1 %v6304_v10  ;;  %1850 = vmatprep.subr.bf16.mxu0 %v6309_v11  ;;  %v6393_v10 = vld [vmem:[%s9180_s2 + $0x9a8] ss:$16 sps:$4 sm:$0xff]  }
  0x7c   : > { %1893 = vmatprep.subr.bf16.mxu1 %v6312_v12  ;;  %v6396_v11 = vld [vmem:[%s9180_s2 + $0xba8] ss:$16 sps:$4 sm:$0xff]   ;;  %v6401_v12 = vld [vmem:[%s9180_s2 + $0x98c] ss:$16 sps:$4 sm:$0xff]  }
  0x7e   : > { %1851 = vmatpush2.bf16.msra.mxu0 %v6307_v13  ;;  %v6404_v13 = vld [vmem:[%s9180_s2 + $0xb8c] ss:$16 sps:$4 sm:$0xff]  }
  0x7f   : > { %1894 = vmatpush2.bf16.msra.mxu1 %v6310_v14  ;;  %1852 = vmatprep.subr.bf16.mxu0 %v6315_v15  ;;  %v6399_v14 = vld [vmem:[%s9180_s2 + $0x988] ss:$16 sps:$4 sm:$0xff]  }
  0x80   : > { %1895 = vmatprep.subr.bf16.mxu1 %v6318_v16  ;;  %v6402_v15 = vld [vmem:[%s9180_s2 + $0xb88] ss:$16 sps:$4 sm:$0xff]   ;;  %v6407_v16 = vld [vmem:[%s9180_s2 + $0x96c] ss:$16 sps:$4 sm:$0xff]  }
  0x82   : > { %1853 = vmatpush2.bf16.msra.mxu0 %v6313_v17  ;;  %v6410_v17 = vld [vmem:[%s9180_s2 + $0xb6c] ss:$16 sps:$4 sm:$0xff]  }
  0x83   : > { %1896 = vmatpush2.bf16.msra.mxu1 %v6316_v20  ;;  %1854 = vmatprep.subr.bf16.mxu0 %v6321_v21  ;;  %v6405_v20 = vld [vmem:[%s9180_s2 + $0x968] ss:$16 sps:$4 sm:$0xff]  }
  0x84   : > { %1897 = vmatprep.subr.bf16.mxu1 %v6324_v22  ;;  %v6408_v21 = vld [vmem:[%s9180_s2 + $0xb68] ss:$16 sps:$4 sm:$0xff]   ;;  %v6413_v22 = vld [vmem:[%s9180_s2 + $0x94c] ss:$16 sps:$4 sm:$0xff]  }
  0x86   : > { %1855 = vmatpush2.bf16.msra.mxu0 %v6319_v23  ;;  %v6416_v23 = vld [vmem:[%s9180_s2 + $0xb4c] ss:$16 sps:$4 sm:$0xff]  }
  0x87   : > { %1898 = vmatpush2.bf16.msra.mxu1 %v6322_v24  ;;  %1856 = vmatprep.subr.bf16.mxu0 %v6327_v25  ;;  %v6411_v24 = vld [vmem:[%s9180_s2 + $0x948] ss:$16 sps:$4 sm:$0xff]  }
  0x88   : > { %1899 = vmatprep.subr.bf16.mxu1 %v6330_v26  ;;  %v6414_v25 = vld [vmem:[%s9180_s2 + $0xb48] ss:$16 sps:$4 sm:$0xff]   ;;  %v6419_v26 = vld [vmem:[%s9180_s2 + $0x92c] ss:$16 sps:$4 sm:$0xff]  }
  0x8a   : > { %1857 = vmatpush2.bf16.msra.mxu0 %v6325_v27  ;;  %v6422_v27 = vld [vmem:[%s9180_s2 + $0xb2c] ss:$16 sps:$4 sm:$0xff]  }
  0x8b   : > { %1900 = vmatpush2.bf16.msra.mxu1 %v6328_v28  ;;  %1912 = vmatprep.subr.bf16.mxu0 %v6335_v29  ;;  %v6417_v28 = vld [vmem:[%s9180_s2 + $0x928] ss:$16 sps:$4 sm:$0xff]  }
  0x8c   : > { %1955 = vmatprep.subr.bf16.mxu1 %v6338_v30  ;;  %v6420_v29 = vld [vmem:[%s9180_s2 + $0xb28] ss:$16 sps:$4 sm:$0xff]   ;;  %v6425_v30 = vld [vmem:[%s9180_s2 + $0x90c] ss:$16 sps:$4 sm:$0xff]  }
  0x8d   : > { %1859 = vmatmul.mubr.bf16.vlgmr.msra.gmra.mxu0 %v7537_v31 }
  0x8e   : > { %1902 = vmatmul.mubr.bf16.vlgmr.msra.gmra.mxu1 %v7324_v18  ;;  %1913 = vmatpush1.bf16.msra.mxu0 %v6333_v32  ;;  %v6350_v18 = vld [vmem:[%s9180_s2 + $0xaac] ss:$16 sps:$4 sm:$0xff]  }
  0x8f   : > { %1956 = vmatpush1.bf16.msra.mxu1 %v6336_v33  ;;  %1914 = vmatprep.subr.bf16.mxu0 %v6341_v34  ;;  %v6428_v32 = vld [vmem:[%s9180_s2 + $0xb0c] ss:$16 sps:$4 sm:$0xff]   ;;  %v6527_v34 = vld [vmem:[%s7692_s24 + $0x18] ss:$12 sps:$4 sm:$0xff]  }
  0x90   : > { %1957 = vmatprep.subr.bf16.mxu1 %v6344_v35  ;;  %1944 = vmatprep.mubr.bf16.mxu0 %v7285_v5  ;;  %v6356_v5 = vld [vmem:[%s9180_s2 + $0xa8c] ss:$16 sps:$4 sm:$0xff]   ;;  %v6529_v35 = vld [vmem:[%s7692_s24 + $0x4] ss:$12 sps:$4 sm:$0xff]  }
  0x91   : > { %1987 = vmatprep.mubr.bf16.mxu1 %v7436_v59  ;;  %v6377_v59 = vld [vmem:[%s9180_s2 + $0x80c] ss:$16 sps:$4 sm:$0xff]  }
  0x92   : > { %1915 = vmatpush1.bf16.msra.mxu0 %v6339_v36  ;;  %v6525_v33 = vld [vmem:[%s7692_s24] ss:$12 sps:$4 sm:$0xff]   ;;  %v6530_v36 = vld [vmem:[%s7692_s24 + $0x1c] ss:$12 sps:$4 sm:$0xff]  }
  0x93   : > { %1958 = vmatpush1.bf16.msra.mxu1 %v6342_v37  ;;  %1916 = vmatprep.subr.bf16.mxu0 %v6347_v38  ;;  %v6423_v37 = vld [vmem:[%s9180_s2 + $0x908] ss:$16 sps:$4 sm:$0xff]  }
  0x94   : > { %1959 = vmatprep.subr.bf16.mxu1 %v6350_v18  ;;  %v6426_v38 = vld [vmem:[%s9180_s2 + $0xb08] ss:$16 sps:$4 sm:$0xff]   ;;  %v6431_v18 = vld [vmem:[%s9180_s2 + $0xe4] ss:$16 sps:$4 sm:$0xff]  }
  0x96   : > { %1917 = vmatpush1.bf16.msra.mxu0 %v6345_v39  ;;  %v6434_v39 = vld [vmem:[%s9180_s2 + $0x2e4] ss:$16 sps:$4 sm:$0xff]  }
  0x97   : > { %1960 = vmatpush1.bf16.msra.mxu1 %v6348_v41  ;;  %1918 = vmatprep.subr.bf16.mxu0 %v6353_v42  ;;  %v7747_v41 = vrot.slane %v6525_v33, %v7257_v53  ;;  %v7750_v42 = vrot.slane %v6527_v34, %v7257_v53  ;;  %v6506_v33 = vld [vmem:[%s9180_s2 + $0x364] ss:$16 sps:$4 sm:$0xff]   ;;  %v6501_v34 = vld [vmem:[%s9180_s2 + $0x160] ss:$16 sps:$4 sm:$0xff]  }
  0x98   : > { %1961 = vmatprep.subr.bf16.mxu1 %v6356_v5  ;;  %v7753_v5 = vrot.slane %v6529_v35, %v7257_v53  ;;  %v6504_v35 = vld [vmem:[%s9180_s2 + $0x360] ss:$16 sps:$4 sm:$0xff]  }
  0x9a   : > { %1919 = vmatpush1.bf16.msra.mxu0 %v6351_v43  ;;  %v7756_v43 = vrot.slane %v6530_v36, %v7257_v53  ;;  %v6509_v36 = vld [vmem:[%s9180_s2 + $0x144] ss:$16 sps:$4 sm:$0xff]  }
  0x9b   : > { %1962 = vmatpush1.bf16.msra.mxu1 %v6354_v44  ;;  %1920 = vmatprep.subr.bf16.mxu0 %v6359_v45  ;;  %v6429_v44 = vld [vmem:[%s9180_s2 + $0xe0] ss:$16 sps:$4 sm:$0xff]  }
  0x9c   : > { %1963 = vmatprep.subr.bf16.mxu1 %v6362_v47  ;;  %v6432_v45 = vld [vmem:[%s9180_s2 + $0x2e0] ss:$16 sps:$4 sm:$0xff]   ;;  %v6437_v47 = vld [vmem:[%s9180_s2 + $0xc4] ss:$16 sps:$4 sm:$0xff]  }
  0x9e   : > { %1921 = vmatpush1.bf16.msra.mxu0 %v6357_v48  ;;  %v6440_v48 = vld [vmem:[%s9180_s2 + $0x2c4] ss:$16 sps:$4 sm:$0xff]  }
  0x9f   : > { %1964 = vmatpush1.bf16.msra.mxu1 %v6360_v49  ;;  %1922 = vmatprep.subr.bf16.mxu0 %v6365_v50  ;;  %v7772_v49 = vcombine.high %v7747_v41, %v7750_v42  ;;  %v7776_v50 = vcombine.high %v7753_v5, %v7756_v43 }
  0xa0   : > { %1965 = vmatprep.subr.bf16.mxu1 %v6368_v51  ;;  %v6435_v51 = vld [vmem:[%s9180_s2 + $0xc0] ss:$16 sps:$4 sm:$0xff]  }
  0xa2   : > { %1923 = vmatpush1.bf16.msra.mxu0 %v6363_v52  ;;  %v6438_v52 = vld [vmem:[%s9180_s2 + $0x2c0] ss:$16 sps:$4 sm:$0xff]  }
  0xa3   : > { %1966 = vmatpush1.bf16.msra.mxu1 %v6366_v54  ;;  %1924 = vmatprep.subr.bf16.mxu0 %v6371_v55  ;;  %v6443_v54 = vld [vmem:[%s9180_s2 + $0xa4] ss:$16 sps:$4 sm:$0xff]   ;;  %v6444_v55 = vld [vmem:[%s9180_s2 + $0x2a0] ss:$16 sps:$4 sm:$0xff]  }
  0xa4   : > { %1967 = vmatprep.subr.bf16.mxu1 %v6374_v56  ;;  %v6449_v56 = vld [vmem:[%s9180_s2 + $0x84] ss:$16 sps:$4 sm:$0xff]  }
  0xa6   : > { %1925 = vmatpush1.bf16.msra.mxu0 %v6369_v57  ;;  %v6452_v57 = vld [vmem:[%s9180_s2 + $0x284] ss:$16 sps:$4 sm:$0xff]  }
  0xa7   : > { %1968 = vmatpush1.bf16.msra.mxu1 %v6372_v58  ;;  %1926 = vmatprep.subr.bf16.mxu0 %v6377_v59  ;;  %v6447_v58 = vld [vmem:[%s9180_s2 + $0x80] ss:$16 sps:$4 sm:$0xff]  }
  0xa8   : > { %1969 = vmatprep.subr.bf16.mxu1 %v6380_v60  ;;  %v6450_v59 = vld [vmem:[%s9180_s2 + $0x280] ss:$16 sps:$4 sm:$0xff]   ;;  %v6455_v60 = vld [vmem:[%s9180_s2 + $0x64] ss:$16 sps:$4 sm:$0xff]  }
  0xaa   : > { %1927 = vmatpush1.bf16.msra.mxu0 %v6375_v61  ;;  %v6458_v61 = vld [vmem:[%s9180_s2 + $0x264] ss:$16 sps:$4 sm:$0xff]  }
  0xab   : > { %1970 = vmatpush1.bf16.msra.mxu1 %v6378_v62  ;;  %1928 = vmatprep.subr.bf16.mxu0 %v6383_v63  ;;  %v6453_v62 = vld [vmem:[%s9180_s2 + $0x60] ss:$16 sps:$4 sm:$0xff]  }
  0xac   : > { %1971 = vmatprep.subr.bf16.mxu1 %v6386_v0  ;;  %v6456_v63 = vld [vmem:[%s9180_s2 + $0x260] ss:$16 sps:$4 sm:$0xff]   ;;  %v6461_v0 = vld [vmem:[%s9180_s2 + $0x44] ss:$16 sps:$4 sm:$0xff]  }
  0xae   : > { %1929 = vmatpush2.bf16.msra.mxu0 %v6381_v1  ;;  %v6464_v1 = vld [vmem:[%s9180_s2 + $0x244] ss:$16 sps:$4 sm:$0xff]  }
  0xaf   : > { %1972 = vmatpush2.bf16.msra.mxu1 %v6384_v2  ;;  %1930 = vmatprep.subr.bf16.mxu0 %v6389_v3  ;;  %v6459_v2 = vld [vmem:[%s9180_s2 + $0x40] ss:$16 sps:$4 sm:$0xff]  }
  0xb0   : > { %1973 = vmatprep.subr.bf16.mxu1 %v6392_v4  ;;  %v6462_v3 = vld [vmem:[%s9180_s2 + $0x240] ss:$16 sps:$4 sm:$0xff]   ;;  %v6467_v4 = vld [vmem:[%s9180_s2 + $0x24] ss:$16 sps:$4 sm:$0xff]  }
  0xb2   : > { %1931 = vmatpush2.bf16.msra.mxu0 %v6387_v6  ;;  %v6470_v6 = vld [vmem:[%s9180_s2 + $0x224] ss:$16 sps:$4 sm:$0xff]  }
  0xb3   : > { %1974 = vmatpush2.bf16.msra.mxu1 %v6390_v7  ;;  %1932 = vmatprep.subr.bf16.mxu0 %v6395_v8  ;;  %v6465_v7 = vld [vmem:[%s9180_s2 + $0x20] ss:$16 sps:$4 sm:$0xff]  }
  0xb4   : > { %1975 = vmatprep.subr.bf16.mxu1 %v6398_v9  ;;  %v6468_v8 = vld [vmem:[%s9180_s2 + $0x220] ss:$16 sps:$4 sm:$0xff]   ;;  %v6473_v9 = vld [vmem:[%s9180_s2 + $0x4] ss:$16 sps:$4 sm:$0xff]  }
  0xb6   : > { %1933 = vmatpush2.bf16.msra.mxu0 %v6393_v10  ;;  %v6476_v10 = vld [vmem:[%s9180_s2 + $0x204] ss:$16 sps:$4 sm:$0xff]  }
  0xb7   : > { %1976 = vmatpush2.bf16.msra.mxu1 %v6396_v11  ;;  %1934 = vmatprep.subr.bf16.mxu0 %v6401_v12  ;;  %v6471_v11 = vld [vmem:[%s9180_s2] ss:$16 sps:$4 sm:$0xff]  }
  0xb8   : > { %1977 = vmatprep.subr.bf16.mxu1 %v6404_v13  ;;  %v6474_v12 = vld [vmem:[%s9180_s2 + $0x200] ss:$16 sps:$4 sm:$0xff]   ;;  %v6479_v13 = vld [vmem:[%s9180_s2 + $0x1e4] ss:$16 sps:$4 sm:$0xff]  }
  0xba   : > { %1935 = vmatpush2.bf16.msra.mxu0 %v6399_v14  ;;  %v6482_v14 = vld [vmem:[%s9180_s2 + $0x3e4] ss:$16 sps:$4 sm:$0xff]  }
  0xbb   : > { %1978 = vmatpush2.bf16.msra.mxu1 %v6402_v15  ;;  %1936 = vmatprep.subr.bf16.mxu0 %v6407_v16  ;;  %v6477_v15 = vld [vmem:[%s9180_s2 + $0x1e0] ss:$16 sps:$4 sm:$0xff]  }
  0xbc   : > { %1979 = vmatprep.subr.bf16.mxu1 %v6410_v17  ;;  %v6480_v16 = vld [vmem:[%s9180_s2 + $0x3e0] ss:$16 sps:$4 sm:$0xff]   ;;  %v6485_v17 = vld [vmem:[%s9180_s2 + $0x1c4] ss:$16 sps:$4 sm:$0xff]  }
  0xbe   : > { %1937 = vmatpush2.bf16.msra.mxu0 %v6405_v20  ;;  %v6488_v20 = vld [vmem:[%s9180_s2 + $0x3c4] ss:$16 sps:$4 sm:$0xff]  }
  0xbf   : > { %1980 = vmatpush2.bf16.msra.mxu1 %v6408_v21  ;;  %1938 = vmatprep.subr.bf16.mxu0 %v6413_v22  ;;  %v6483_v21 = vld [vmem:[%s9180_s2 + $0x1c0] ss:$16 sps:$4 sm:$0xff]  }
  0xc0   : > { %1981 = vmatprep.subr.bf16.mxu1 %v6416_v23  ;;  %v6486_v22 = vld [vmem:[%s9180_s2 + $0x3c0] ss:$16 sps:$4 sm:$0xff]   ;;  %v6491_v23 = vld [vmem:[%s9180_s2 + $0x1a4] ss:$16 sps:$4 sm:$0xff]  }
  0xc2   : > { %1939 = vmatpush2.bf16.msra.mxu0 %v6411_v24  ;;  %v6494_v24 = vld [vmem:[%s9180_s2 + $0x3a4] ss:$16 sps:$4 sm:$0xff]  }
  0xc3   : > { %1982 = vmatpush2.bf16.msra.mxu1 %v6414_v25  ;;  %1940 = vmatprep.subr.bf16.mxu0 %v6419_v26  ;;  %v6489_v25 = vld [vmem:[%s9180_s2 + $0x1a0] ss:$16 sps:$4 sm:$0xff]  }
  0xc4   : > { %1983 = vmatprep.subr.bf16.mxu1 %v6422_v27  ;;  %v6492_v26 = vld [vmem:[%s9180_s2 + $0x3a0] ss:$16 sps:$4 sm:$0xff]   ;;  %v6497_v27 = vld [vmem:[%s9180_s2 + $0x184] ss:$16 sps:$4 sm:$0xff]  }
  0xc6   : > { %1941 = vmatpush2.bf16.msra.mxu0 %v6417_v28  ;;  %v6500_v28 = vld [vmem:[%s9180_s2 + $0x384] ss:$16 sps:$4 sm:$0xff]  }
  0xc7   : > { %1984 = vmatpush2.bf16.msra.mxu1 %v6420_v29  ;;  %1942 = vmatprep.subr.bf16.mxu0 %v6425_v30  ;;  %v6495_v29 = vld [vmem:[%s9180_s2 + $0x180] ss:$16 sps:$4 sm:$0xff]  }
  0xc8   : > { %1985 = vmatprep.subr.bf16.mxu1 %v6428_v32  ;;  %v6498_v30 = vld [vmem:[%s9180_s2 + $0x380] ss:$16 sps:$4 sm:$0xff]   ;;  %v6503_v32 = vld [vmem:[%s9180_s2 + $0x164] ss:$16 sps:$4 sm:$0xff]  }
  0xca   : > { %1943 = vmatpush2.bf16.msra.mxu0 %v6423_v37  ;;  %v6512_v37 = vld [vmem:[%s9180_s2 + $0x344] ss:$16 sps:$4 sm:$0xff]  }
  0xcb   : > { %1986 = vmatpush2.bf16.msra.mxu1 %v6426_v38  ;;  %3026 = vmatprep.subr.bf16.mxu0 %v6431_v18  ;;  %v6507_v38 = vld [vmem:[%s9180_s2 + $0x140] ss:$16 sps:$4 sm:$0xff]  }
  0xcc   : > { %3069 = vmatprep.subr.bf16.mxu1 %v6434_v39  ;;  %v6510_v18 = vld [vmem:[%s9180_s2 + $0x340] ss:$16 sps:$4 sm:$0xff]   ;;  %v6515_v39 = vld [vmem:[%s9180_s2 + $0x124] ss:$16 sps:$4 sm:$0xff]  }
  0xcd   : > { %1945 = vmatmul.mubr.bf16.vlgmr.msra.gmra.mxu0 %v7326_v19  ;;  %v6446_v19 = vld [vmem:[%s9180_s2 + $0x2a4] ss:$16 sps:$4 sm:$0xff]  }
  0xce   : > { %1988 = vmatmul.mubr.bf16.vlgmr.msra.gmra.mxu1 %v7537_v31  ;;  %3027 = vmatpush1.bf16.msra.mxu0 %v6429_v44  ;;  %v6441_v31 = vld [vmem:[%s9180_s2 + $0xa0] ss:$16 sps:$4 sm:$0xff]   ;;  %v6518_v44 = vld [vmem:[%s9180_s2 + $0x324] ss:$16 sps:$4 sm:$0xff]  }
  0xcf   : > { %3070 = vmatpush1.bf16.msra.mxu1 %v6432_v45  ;;  %3028 = vmatprep.subr.bf16.mxu0 %v6437_v47  ;;  %v6513_v45 = vld [vmem:[%s9180_s2 + $0x120] ss:$16 sps:$4 sm:$0xff]  }
  0xd0   : > { %3071 = vmatprep.subr.bf16.mxu1 %v6440_v48  ;;  %3058 = vmatprep.mubr.bf16.mxu0 %v7772_v49  ;;  %v6516_v47 = vld [vmem:[%s9180_s2 + $0x320] ss:$16 sps:$4 sm:$0xff]   ;;  %v6521_v48 = vld [vmem:[%s9180_s2 + $0x104] ss:$16 sps:$4 sm:$0xff]  }
  0xd1   : > { %3101 = vmatprep.mubr.bf16.mxu1 %v7776_v50 }
  0xd2   : > { %3029 = vmatpush1.bf16.msra.mxu0 %v6435_v51  ;;  %v6524_v51 = vld [vmem:[%s9180_s2 + $0x304] ss:$16 sps:$4 sm:$0xff]  }
  0xd3   : > { %3072 = vmatpush1.bf16.msra.mxu1 %v6438_v52  ;;  %3030 = vmatprep.subr.bf16.mxu0 %v6443_v54  ;;  %v6627_v52 = vld [vmem:[%s7692_s24 + $0x8] ss:$12 sps:$4 sm:$0xff]   ;;  %v6628_v54 = vld [vmem:[%s7692_s24 + $0x20] ss:$12 sps:$4 sm:$0xff]  }
  0xd4   : > { %3073 = vmatprep.subr.bf16.mxu1 %v6446_v19  ;;  %v6519_v19 = vld [vmem:[%s9180_s2 + $0x100] ss:$16 sps:$4 sm:$0xff]  }
  0xd6   : > { %3031 = vmatpush1.bf16.msra.mxu0 %v6441_v31  ;;  %v6522_v31 = vld [vmem:[%s9180_s2 + $0x300] ss:$16 sps:$4 sm:$0xff]  }
  0xd7   : > { %3074 = vmatpush1.bf16.msra.mxu1 %v6444_v55  ;;  %3032 = vmatprep.subr.bf16.mxu0 %v6449_v56  ;;  %v6533_v55 = vld [vmem:[%s9180_s2 + $0x4e4] ss:$16 sps:$4 sm:$0xff]   ;;  %v6536_v56 = vld [vmem:[%s9180_s2 + $0xec] ss:$16 sps:$4 sm:$0xff]  }
  0xd8   : > { %3075 = vmatprep.subr.bf16.mxu1 %v6452_v57  ;;  %v7965_v57 = vrot.slane %v6627_v52, %v7257_v53  ;;  %v6606_v52 = vld [vmem:[%s9180_s2 + $0x168] ss:$16 sps:$4 sm:$0xff]  }
  0xda   : > { %3033 = vmatpush1.bf16.msra.mxu0 %v6447_v58  ;;  %v7968_v58 = vrot.slane %v6628_v54, %v7257_v53  ;;  %v6611_v54 = vld [vmem:[%s9180_s2 + $0x544] ss:$16 sps:$4 sm:$0xff]  }
  0xdb   : > { %3076 = vmatpush1.bf16.msra.mxu1 %v6450_v59  ;;  %3034 = vmatprep.subr.bf16.mxu0 %v6455_v60  ;;  %v7972_v59 = vcombine.low %v7747_v41, %v7750_v42  ;;  %v7976_v60 = vcombine.low %v7753_v5, %v7756_v43  ;;  %v6542_v41 = vld [vmem:[%s9180_s2 + $0xcc] ss:$16 sps:$4 sm:$0xff]   ;;  %v6537_v5 = vld [vmem:[%s9180_s2 + $0x4c0] ss:$16 sps:$4 sm:$0xff]   ;;  %v6540_v43 = vld [vmem:[%s9180_s2 + $0xc8] ss:$16 sps:$4 sm:$0xff]  }
  0xdc   : > { %3077 = vmatprep.subr.bf16.mxu1 %v6458_v61  ;;  %v6531_v61 = vld [vmem:[%s9180_s2 + $0x4e0] ss:$16 sps:$4 sm:$0xff]   ;;  %v7992_v42 = vcombine.high %v7965_v57, %v7968_v58 }
  0xde   : > { %3035 = vmatpush1.bf16.msra.mxu0 %v6453_v62  ;;  %v6534_v62 = vld [vmem:[%s9180_s2 + $0xe8] ss:$16 sps:$4 sm:$0xff]  }
  0xdf   : > { %3078 = vmatpush1.bf16.msra.mxu1 %v6456_v63  ;;  %3036 = vmatprep.subr.bf16.mxu0 %v6461_v0  ;;  %v6539_v63 = vld [vmem:[%s9180_s2 + $0x4c4] ss:$16 sps:$4 sm:$0xff]  }
  0xe0   : > { %3079 = vmatprep.subr.bf16.mxu1 %v6464_v1  ;;  %v6545_v0 = vld [vmem:[%s9180_s2 + $0x4a4] ss:$16 sps:$4 sm:$0xff]   ;;  %v6548_v1 = vld [vmem:[%s9180_s2 + $0xac] ss:$16 sps:$4 sm:$0xff]  }
  0xe2   : > { %3037 = vmatpush1.bf16.msra.mxu0 %v6459_v2  ;;  %v6543_v2 = vld [vmem:[%s9180_s2 + $0x4a0] ss:$16 sps:$4 sm:$0xff]  }
  0xe3   : > { %3080 = vmatpush1.bf16.msra.mxu1 %v6462_v3  ;;  %3038 = vmatprep.subr.bf16.mxu0 %v6467_v4  ;;  %v6546_v3 = vld [vmem:[%s9180_s2 + $0xa8] ss:$16 sps:$4 sm:$0xff]   ;;  %v6551_v4 = vld [vmem:[%s9180_s2 + $0x484] ss:$16 sps:$4 sm:$0xff]  }
  0xe4   : > { %3081 = vmatprep.subr.bf16.mxu1 %v6470_v6  ;;  %v6549_v6 = vld [vmem:[%s9180_s2 + $0x480] ss:$16 sps:$4 sm:$0xff]  }
  0xe6   : > { %3039 = vmatpush1.bf16.msra.mxu0 %v6465_v7  ;;  %v6552_v7 = vld [vmem:[%s9180_s2 + $0x88] ss:$16 sps:$4 sm:$0xff]  }
  0xe7   : > { %3082 = vmatpush1.bf16.msra.mxu1 %v6468_v8  ;;  %3040 = vmatprep.subr.bf16.mxu0 %v6473_v9  ;;  %v6557_v8 = vld [vmem:[%s9180_s2 + $0x464] ss:$16 sps:$4 sm:$0xff]   ;;  %v6560_v9 = vld [vmem:[%s9180_s2 + $0x6c] ss:$16 sps:$4 sm:$0xff]  }
  0xe8   : > { %3083 = vmatprep.subr.bf16.mxu1 %v6476_v10  ;;  %v6555_v10 = vld [vmem:[%s9180_s2 + $0x460] ss:$16 sps:$4 sm:$0xff]  }
  0xea   : > { %3041 = vmatpush1.bf16.msra.mxu0 %v6471_v11  ;;  %v6558_v11 = vld [vmem:[%s9180_s2 + $0x68] ss:$16 sps:$4 sm:$0xff]  }
  0xeb   : > { %3084 = vmatpush1.bf16.msra.mxu1 %v6474_v12  ;;  %3042 = vmatprep.subr.bf16.mxu0 %v6479_v13  ;;  %v6563_v12 = vld [vmem:[%s9180_s2 + $0x444] ss:$16 sps:$4 sm:$0xff]   ;;  %v6566_v13 = vld [vmem:[%s9180_s2 + $0x4c] ss:$16 sps:$4 sm:$0xff]  }
  0xec   : > { %3085 = vmatprep.subr.bf16.mxu1 %v6482_v14  ;;  %v6561_v14 = vld [vmem:[%s9180_s2 + $0x440] ss:$16 sps:$4 sm:$0xff]  }
  0xee   : > { %3043 = vmatpush2.bf16.msra.mxu0 %v6477_v15  ;;  %v6564_v15 = vld [vmem:[%s9180_s2 + $0x48] ss:$16 sps:$4 sm:$0xff]  }
  0xef   : > { %3086 = vmatpush2.bf16.msra.mxu1 %v6480_v16  ;;  %3044 = vmatprep.subr.bf16.mxu0 %v6485_v17  ;;  %v6569_v16 = vld [vmem:[%s9180_s2 + $0x424] ss:$16 sps:$4 sm:$0xff]   ;;  %v6572_v17 = vld [vmem:[%s9180_s2 + $0x2c] ss:$16 sps:$4 sm:$0xff]  }
  0xf0   : > { %3087 = vmatprep.subr.bf16.mxu1 %v6488_v20  ;;  %v6567_v20 = vld [vmem:[%s9180_s2 + $0x420] ss:$16 sps:$4 sm:$0xff]  }
  0xf2   : > { %3045 = vmatpush2.bf16.msra.mxu0 %v6483_v21  ;;  %v6570_v21 = vld [vmem:[%s9180_s2 + $0x28] ss:$16 sps:$4 sm:$0xff]  }
  0xf3   : > { %3088 = vmatpush2.bf16.msra.mxu1 %v6486_v22  ;;  %3046 = vmatprep.subr.bf16.mxu0 %v6491_v23  ;;  %v6575_v22 = vld [vmem:[%s9180_s2 + $0x404] ss:$16 sps:$4 sm:$0xff]   ;;  %v6578_v23 = vld [vmem:[%s9180_s2 + $0xc] ss:$16 sps:$4 sm:$0xff]  }
  0xf4   : > { %3089 = vmatprep.subr.bf16.mxu1 %v6494_v24  ;;  %v6573_v24 = vld [vmem:[%s9180_s2 + $0x400] ss:$16 sps:$4 sm:$0xff]  }
  0xf6   : > { %3047 = vmatpush2.bf16.msra.mxu0 %v6489_v25  ;;  %v6576_v25 = vld [vmem:[%s9180_s2 + $0x8] ss:$16 sps:$4 sm:$0xff]  }
  0xf7   : > { %3090 = vmatpush2.bf16.msra.mxu1 %v6492_v26  ;;  %3048 = vmatprep.subr.bf16.mxu0 %v6497_v27  ;;  %v6581_v26 = vld [vmem:[%s9180_s2 + $0x5e4] ss:$16 sps:$4 sm:$0xff]   ;;  %v6584_v27 = vld [vmem:[%s9180_s2 + $0x1ec] ss:$16 sps:$4 sm:$0xff]  }
  0xf8   : > { %3091 = vmatprep.subr.bf16.mxu1 %v6500_v28  ;;  %v6579_v28 = vld [vmem:[%s9180_s2 + $0x5e0] ss:$16 sps:$4 sm:$0xff]  }
  0xfa   : > { %3049 = vmatpush2.bf16.msra.mxu0 %v6495_v29  ;;  %v6582_v29 = vld [vmem:[%s9180_s2 + $0x1e8] ss:$16 sps:$4 sm:$0xff]  }
  0xfb   : > { %3092 = vmatpush2.bf16.msra.mxu1 %v6498_v30  ;;  %3050 = vmatprep.subr.bf16.mxu0 %v6503_v32  ;;  %v6587_v30 = vld [vmem:[%s9180_s2 + $0x5c4] ss:$16 sps:$4 sm:$0xff]   ;;  %v6590_v32 = vld [vmem:[%s9180_s2 + $0x1cc] ss:$16 sps:$4 sm:$0xff]  }
  0xfc   : > { %3093 = vmatprep.subr.bf16.mxu1 %v6506_v33  ;;  %v6585_v33 = vld [vmem:[%s9180_s2 + $0x5c0] ss:$16 sps:$4 sm:$0xff]  }
  0xfe   : > { %3051 = vmatpush2.bf16.msra.mxu0 %v6501_v34  ;;  %v6588_v34 = vld [vmem:[%s9180_s2 + $0x1c8] ss:$16 sps:$4 sm:$0xff]  }
  0xff   : > { %3094 = vmatpush2.bf16.msra.mxu1 %v6504_v35  ;;  %3052 = vmatprep.subr.bf16.mxu0 %v6509_v36  ;;  %v6593_v35 = vld [vmem:[%s9180_s2 + $0x5a4] ss:$16 sps:$4 sm:$0xff]   ;;  %v6596_v36 = vld [vmem:[%s9180_s2 + $0x1ac] ss:$16 sps:$4 sm:$0xff]  }
 0x100   : > { %3095 = vmatprep.subr.bf16.mxu1 %v6512_v37  ;;  %v6591_v37 = vld [vmem:[%s9180_s2 + $0x5a0] ss:$16 sps:$4 sm:$0xff]  }
 0x102   : > { %3053 = vmatpush2.bf16.msra.mxu0 %v6507_v38  ;;  %v6594_v38 = vld [vmem:[%s9180_s2 + $0x1a8] ss:$16 sps:$4 sm:$0xff]  }
 0x103   : > { %3096 = vmatpush2.bf16.msra.mxu1 %v6510_v18  ;;  %3054 = vmatprep.subr.bf16.mxu0 %v6515_v39  ;;  %v6599_v18 = vld [vmem:[%s9180_s2 + $0x584] ss:$16 sps:$4 sm:$0xff]   ;;  %v6602_v39 = vld [vmem:[%s9180_s2 + $0x18c] ss:$16 sps:$4 sm:$0xff]  }
 0x104   : > { %3097 = vmatprep.subr.bf16.mxu1 %v6518_v44  ;;  %v6597_v44 = vld [vmem:[%s9180_s2 + $0x580] ss:$16 sps:$4 sm:$0xff]  }
 0x106   : > { %3055 = vmatpush2.bf16.msra.mxu0 %v6513_v45  ;;  %v6600_v45 = vld [vmem:[%s9180_s2 + $0x188] ss:$16 sps:$4 sm:$0xff]  }
 0x107   : > { %3098 = vmatpush2.bf16.msra.mxu1 %v6516_v47  ;;  %3056 = vmatprep.subr.bf16.mxu0 %v6521_v48  ;;  %v6605_v47 = vld [vmem:[%s9180_s2 + $0x564] ss:$16 sps:$4 sm:$0xff]   ;;  %v6608_v48 = vld [vmem:[%s9180_s2 + $0x16c] ss:$16 sps:$4 sm:$0xff]  }
 0x108   : > { %3099 = vmatprep.subr.bf16.mxu1 %v6524_v51  ;;  %v6603_v51 = vld [vmem:[%s9180_s2 + $0x560] ss:$16 sps:$4 sm:$0xff]  }
 0x10a   : > { %3057 = vmatpush2.bf16.msra.mxu0 %v6519_v19  ;;  %v6614_v19 = vld [vmem:[%s9180_s2 + $0x14c] ss:$16 sps:$4 sm:$0xff]  }
 0x10b   : > { %3100 = vmatpush2.bf16.msra.mxu1 %v6522_v31  ;;  %3112 = vmatprep.subr.bf16.mxu0 %v6533_v55  ;;  %v6609_v31 = vld [vmem:[%s9180_s2 + $0x540] ss:$16 sps:$4 sm:$0xff]   ;;  %v6612_v55 = vld [vmem:[%s9180_s2 + $0x148] ss:$16 sps:$4 sm:$0xff]  }
 0x10c   : > { %3155 = vmatprep.subr.bf16.mxu1 %v6536_v56  ;;  %v6617_v56 = vld [vmem:[%s9180_s2 + $0x524] ss:$16 sps:$4 sm:$0xff]  }
 0x10d   : > { %3059 = vmatmul.mubr.bf16.vlgmr.msra.gmra.mxu0 %v7972_v59 }
 0x10e   : > { %3102 = vmatmul.mubr.bf16.vlgmr.msra.gmra.mxu1 %v7976_v60  ;;  %3113 = vmatpush1.bf16.msra.mxu0 %v6531_v61  ;;  %v6620_v61 = vld [vmem:[%s9180_s2 + $0x12c] ss:$16 sps:$4 sm:$0xff]  }
 0x10f   : > { %3156 = vmatpush1.bf16.msra.mxu1 %v6534_v62  ;;  %3114 = vmatprep.subr.bf16.mxu0 %v6539_v63  ;;  %v6615_v62 = vld [vmem:[%s9180_s2 + $0x520] ss:$16 sps:$4 sm:$0xff]   ;;  %v6618_v63 = vld [vmem:[%s9180_s2 + $0x128] ss:$16 sps:$4 sm:$0xff]  }
 0x110   : > { %3157 = vmatprep.subr.bf16.mxu1 %v6542_v41  ;;  %3144 = vmatprep.mubr.bf16.mxu0 %v7992_v42  ;;  %v6623_v41 = vld [vmem:[%s9180_s2 + $0x504] ss:$16 sps:$4 sm:$0xff]  }
 0x111   : > { %3187 = vmatprep.mubr.bf16.mxu1 %v7772_v49  ;;  %v6554_v49 = vld [vmem:[%s9180_s2 + $0x8c] ss:$16 sps:$4 sm:$0xff]  }
 0x112   : > { %3115 = vmatpush1.bf16.msra.mxu0 %v6537_v5  ;;  %v6626_v5 = vld [vmem:[%s9180_s2 + $0x10c] ss:$16 sps:$4 sm:$0xff]  }
 0x113   : > { %3158 = vmatpush1.bf16.msra.mxu1 %v6540_v43  ;;  %3116 = vmatprep.subr.bf16.mxu0 %v6545_v0  ;;  %v6621_v43 = vld [vmem:[%s9180_s2 + $0x500] ss:$16 sps:$4 sm:$0xff]   ;;  %v6624_v0 = vld [vmem:[%s9180_s2 + $0x108] ss:$16 sps:$4 sm:$0xff]  }
 0x114   : > { %3159 = vmatprep.subr.bf16.mxu1 %v6548_v1  ;;  %v6631_v1 = vld [vmem:[%s9180_s2 + $0x2ec] ss:$16 sps:$4 sm:$0xff]  }
 0x116   : > { %3117 = vmatpush1.bf16.msra.mxu0 %v6543_v2  ;;  %v6634_v2 = vld [vmem:[%s9180_s2 + $0x4ec] ss:$16 sps:$4 sm:$0xff]  }
 0x117   : > { %3160 = vmatpush1.bf16.msra.mxu1 %v6546_v3  ;;  %3118 = vmatprep.subr.bf16.mxu0 %v6551_v4  ;;  %v6629_v3 = vld [vmem:[%s9180_s2 + $0x2e8] ss:$16 sps:$4 sm:$0xff]  }
 0x118   : > { %3161 = vmatprep.subr.bf16.mxu1 %v6554_v49  ;;  %v6632_v4 = vld [vmem:[%s9180_s2 + $0x4e8] ss:$16 sps:$4 sm:$0xff]   ;;  %v8186_v49 = vcombine.low %v7965_v57, %v7968_v58  ;;  %v6643_v58 = vld [vmem:[%s9180_s2 + $0x2ac] ss:$16 sps:$4 sm:$0xff]  }
 0x119   : > { %v6638_v57 = vld [vmem:[%s9180_s2 + $0x4c8] ss:$16 sps:$4 sm:$0xff]  }
 0x11a   : > { %3119 = vmatpush1.bf16.msra.mxu0 %v6549_v6  ;;  %v6637_v6 = vld [vmem:[%s9180_s2 + $0x2cc] ss:$16 sps:$4 sm:$0xff]  }
 0x11b   : > { %3162 = vmatpush1.bf16.msra.mxu1 %v6552_v7  ;;  %3120 = vmatprep.subr.bf16.mxu0 %v6557_v8  ;;  %v6640_v7 = vld [vmem:[%s9180_s2 + $0x4cc] ss:$16 sps:$4 sm:$0xff]   ;;  %v6635_v8 = vld [vmem:[%s9180_s2 + $0x2c8] ss:$16 sps:$4 sm:$0xff]  }
 0x11c   : > { %3163 = vmatprep.subr.bf16.mxu1 %v6560_v9  ;;  %v6646_v9 = vld [vmem:[%s9180_s2 + $0x4ac] ss:$16 sps:$4 sm:$0xff]  }
 0x11e   : > { %3121 = vmatpush1.bf16.msra.mxu0 %v6555_v10  ;;  %v6641_v10 = vld [vmem:[%s9180_s2 + $0x2a8] ss:$16 sps:$4 sm:$0xff]  }
 0x11f   : > { %3164 = vmatpush1.bf16.msra.mxu1 %v6558_v11  ;;  %3122 = vmatprep.subr.bf16.mxu0 %v6563_v12  ;;  %v6649_v11 = vld [vmem:[%s9180_s2 + $0x28c] ss:$16 sps:$4 sm:$0xff]  }
 0x120   : > { %3165 = vmatprep.subr.bf16.mxu1 %v6566_v13  ;;  %v6652_v12 = vld [vmem:[%s9180_s2 + $0x48c] ss:$16 sps:$4 sm:$0xff]  }
 0x121   : > { %v6655_v13 = vld [vmem:[%s9180_s2 + $0x26c] ss:$16 sps:$4 sm:$0xff]  }
 0x122   : > { %3123 = vmatpush1.bf16.msra.mxu0 %v6561_v14  ;;  %v6658_v14 = vld [vmem:[%s9180_s2 + $0x46c] ss:$16 sps:$4 sm:$0xff]  }
 0x123   : > { %3166 = vmatpush1.bf16.msra.mxu1 %v6564_v15  ;;  %3124 = vmatprep.subr.bf16.mxu0 %v6569_v16  ;;  %v6653_v15 = vld [vmem:[%s9180_s2 + $0x268] ss:$16 sps:$4 sm:$0xff]  }
 0x124   : > { %3167 = vmatprep.subr.bf16.mxu1 %v6572_v17  ;;  %v6656_v16 = vld [vmem:[%s9180_s2 + $0x468] ss:$16 sps:$4 sm:$0xff]   ;;  %v6661_v17 = vld [vmem:[%s9180_s2 + $0x24c] ss:$16 sps:$4 sm:$0xff]  }
 0x126   : > { %3125 = vmatpush1.bf16.msra.mxu0 %v6567_v20  ;;  %v6664_v20 = vld [vmem:[%s9180_s2 + $0x44c] ss:$16 sps:$4 sm:$0xff]  }
 0x127   : > { %3168 = vmatpush1.bf16.msra.mxu1 %v6570_v21  ;;  %3126 = vmatprep.subr.bf16.mxu0 %v6575_v22  ;;  %v6659_v21 = vld [vmem:[%s9180_s2 + $0x248] ss:$16 sps:$4 sm:$0xff]  }
 0x128   : > { %3169 = vmatprep.subr.bf16.mxu1 %v6578_v23  ;;  %v6662_v22 = vld [vmem:[%s9180_s2 + $0x448] ss:$16 sps:$4 sm:$0xff]   ;;  %v6667_v23 = vld [vmem:[%s9180_s2 + $0x22c] ss:$16 sps:$4 sm:$0xff]  }
 0x12a   : > { %3127 = vmatpush1.bf16.msra.mxu0 %v6573_v24  ;;  %v6670_v24 = vld [vmem:[%s9180_s2 + $0x42c] ss:$16 sps:$4 sm:$0xff]  }
 0x12b   : > { %3170 = vmatpush1.bf16.msra.mxu1 %v6576_v25  ;;  %3128 = vmatprep.subr.bf16.mxu0 %v6581_v26  ;;  %v6665_v25 = vld [vmem:[%s9180_s2 + $0x228] ss:$16 sps:$4 sm:$0xff]  }
 0x12c   : > { %3171 = vmatprep.subr.bf16.mxu1 %v6584_v27  ;;  %v6668_v26 = vld [vmem:[%s9180_s2 + $0x428] ss:$16 sps:$4 sm:$0xff]   ;;  %v6673_v27 = vld [vmem:[%s9180_s2 + $0x20c] ss:$16 sps:$4 sm:$0xff]  }
 0x12e   : > { %3129 = vmatpush2.bf16.msra.mxu0 %v6579_v28  ;;  %v6676_v28 = vld [vmem:[%s9180_s2 + $0x40c] ss:$16 sps:$4 sm:$0xff]  }
 0x12f   : > { %3172 = vmatpush2.bf16.msra.mxu1 %v6582_v29  ;;  %3130 = vmatprep.subr.bf16.mxu0 %v6587_v30  ;;  %v6671_v29 = vld [vmem:[%s9180_s2 + $0x208] ss:$16 sps:$4 sm:$0xff]  }
 0x130   : > { %3173 = vmatprep.subr.bf16.mxu1 %v6590_v32  ;;  %v6674_v30 = vld [vmem:[%s9180_s2 + $0x408] ss:$16 sps:$4 sm:$0xff]   ;;  %v6679_v32 = vld [vmem:[%s9180_s2 + $0x3ec] ss:$16 sps:$4 sm:$0xff]  }
 0x132   : > { %3131 = vmatpush2.bf16.msra.mxu0 %v6585_v33  ;;  %v6682_v33 = vld [vmem:[%s9180_s2 + $0x5ec] ss:$16 sps:$4 sm:$0xff]  }
 0x133   : > { %3174 = vmatpush2.bf16.msra.mxu1 %v6588_v34  ;;  %3132 = vmatprep.subr.bf16.mxu0 %v6593_v35  ;;  %v6677_v34 = vld [vmem:[%s9180_s2 + $0x3e8] ss:$16 sps:$4 sm:$0xff]  }
 0x134   : > { %3175 = vmatprep.subr.bf16.mxu1 %v6596_v36  ;;  %v6680_v35 = vld [vmem:[%s9180_s2 + $0x5e8] ss:$16 sps:$4 sm:$0xff]   ;;  %v6685_v36 = vld [vmem:[%s9180_s2 + $0x3cc] ss:$16 sps:$4 sm:$0xff]  }
 0x136   : > { %3133 = vmatpush2.bf16.msra.mxu0 %v6591_v37  ;;  %v6688_v37 = vld [vmem:[%s9180_s2 + $0x5cc] ss:$16 sps:$4 sm:$0xff]  }
 0x137   : > { %3176 = vmatpush2.bf16.msra.mxu1 %v6594_v38  ;;  %3134 = vmatprep.subr.bf16.mxu0 %v6599_v18  ;;  %v6683_v38 = vld [vmem:[%s9180_s2 + $0x3c8] ss:$16 sps:$4 sm:$0xff]  }
 0x138   : > { %3177 = vmatprep.subr.bf16.mxu1 %v6602_v39  ;;  %v6686_v18 = vld [vmem:[%s9180_s2 + $0x5c8] ss:$16 sps:$4 sm:$0xff]   ;;  %v6691_v39 = vld [vmem:[%s9180_s2 + $0x3ac] ss:$16 sps:$4 sm:$0xff]  }
 0x13a   : > { %3135 = vmatpush2.bf16.msra.mxu0 %v6597_v44  ;;  %v6694_v44 = vld [vmem:[%s9180_s2 + $0x5ac] ss:$16 sps:$4 sm:$0xff]  }
 0x13b   : > { %3178 = vmatpush2.bf16.msra.mxu1 %v6600_v45  ;;  %3136 = vmatprep.subr.bf16.mxu0 %v6605_v47  ;;  %v8306_v45 = vpop.f32.mrf.mxu0  ;;  %v8308_v47 = vpop.f32.mrf.mxu1 }
 0x13c   : > { %3179 = vmatprep.subr.bf16.mxu1 %v6608_v48  ;;  %v6689_v48 = vld [vmem:[%s9180_s2 + $0x3a8] ss:$16 sps:$4 sm:$0xff]  }
 0x13e   : > { %3137 = vmatpush2.bf16.msra.mxu0 %v6603_v51  ;;  %v6692_v51 = vld [vmem:[%s9180_s2 + $0x5a8] ss:$16 sps:$4 sm:$0xff]  }
 0x13f   : > { %3180 = vmatpush2.bf16.msra.mxu1 %v6606_v52  ;;  %3138 = vmatprep.subr.bf16.mxu0 %v6611_v54  ;;  %v6697_v52 = vld [vmem:[%s9180_s2 + $0x38c] ss:$16 sps:$4 sm:$0xff]  }
 0x140   : > { %3181 = vmatprep.subr.bf16.mxu1 %v6614_v19  ;;  %v6700_v54 = vld [vmem:[%s9180_s2 + $0x58c] ss:$16 sps:$4 sm:$0xff]   ;;  %v8322_v19 = vpop.f32.mrf.mxu0 }
 0x142   : > { %3139 = vmatpush2.bf16.msra.mxu0 %v6609_v31  ;;  %v8324_v31 = vpop.f32.mrf.mxu1 }
 0x143   : > { %3182 = vmatpush2.bf16.msra.mxu1 %v6612_v55  ;;  %3140 = vmatprep.subr.bf16.mxu0 %v6617_v56  ;;  %v6695_v55 = vld [vmem:[%s9180_s2 + $0x388] ss:$16 sps:$4 sm:$0xff]  }
 0x144   : > { %3183 = vmatprep.subr.bf16.mxu1 %v6620_v61  ;;  %v6698_v56 = vld [vmem:[%s9180_s2 + $0x588] ss:$16 sps:$4 sm:$0xff]   ;;  %v6703_v61 = vld [vmem:[%s9180_s2 + $0x36c] ss:$16 sps:$4 sm:$0xff]  }
 0x146   : > { %3141 = vmatpush2.bf16.msra.mxu0 %v6615_v62  ;;  %v6706_v62 = vld [vmem:[%s9180_s2 + $0x56c] ss:$16 sps:$4 sm:$0xff]  }
 0x147   : > { %3184 = vmatpush2.bf16.msra.mxu1 %v6618_v63  ;;  %3142 = vmatprep.subr.bf16.mxu0 %v6623_v41  ;;  %v8338_v63 = vpop.f32.mrf.mxu0  ;;  %v8340_v41 = vpop.f32.mrf.mxu1 }
 0x148   : > { %3185 = vmatprep.subr.bf16.mxu1 %v6626_v5  ;;  %v6701_v5 = vld [vmem:[%s9180_s2 + $0x368] ss:$16 sps:$4 sm:$0xff]  }
 0x14a   : > { %3143 = vmatpush2.bf16.msra.mxu0 %v6621_v43  ;;  %v6704_v43 = vld [vmem:[%s9180_s2 + $0x568] ss:$16 sps:$4 sm:$0xff]  }
 0x14b   : > { %3186 = vmatpush2.bf16.msra.mxu1 %v6624_v0  ;;  %3198 = vmatprep.subr.bf16.mxu0 %v6631_v1  ;;  %v6709_v0 = vld [vmem:[%s9180_s2 + $0x34c] ss:$16 sps:$4 sm:$0xff]  }
 0x14c   : > { %3241 = vmatprep.subr.bf16.mxu1 %v6634_v2  ;;  %v6712_v1 = vld [vmem:[%s9180_s2 + $0x54c] ss:$16 sps:$4 sm:$0xff]   ;;  %v8354_v2 = vpop.f32.mrf.mxu0 }
 0x14d   : > { %3145 = vmatmul.mubr.bf16.vlgmr.msra.gmra.mxu0 %v8186_v49 }
 0x14e   : > { %3188 = vmatmul.mubr.bf16.vlgmr.msra.gmra.mxu1 %v7972_v59  ;;  %3199 = vmatpush1.bf16.msra.mxu0 %v6629_v3  ;;  %v6644_v59 = vld [vmem:[%s9180_s2 + $0x4a8] ss:$16 sps:$4 sm:$0xff]   ;;  %v8356_v3 = vpop.f32.mrf.mxu1 }
 0x14f   : > { %3242 = vmatpush1.bf16.msra.mxu1 %v6632_v4  ;;  %3200 = vmatprep.subr.bf16.mxu0 %v6637_v6  ;;  %v6707_v4 = vld [vmem:[%s9180_s2 + $0x348] ss:$16 sps:$4 sm:$0xff]  }
 0x150   : > { %3243 = vmatprep.subr.bf16.mxu1 %v6640_v7  ;;  %3230 = vmatprep.mubr.bf16.mxu0 %v7776_v50  ;;  %v6647_v50 = vld [vmem:[%s9180_s2 + $0x288] ss:$16 sps:$4 sm:$0xff]   ;;  %v8364_v7 = vpop.f32.mrf.mxu0 }
 0x151   : > { %3273 = vmatprep.mubr.bf16.mxu1 %v7992_v42  ;;  %v6650_v42 = vld [vmem:[%s9180_s2 + $0x488] ss:$16 sps:$4 sm:$0xff]  }
 0x152   : > { %3201 = vmatpush1.bf16.msra.mxu0 %v6635_v8  ;;  %v6710_v6 = vld [vmem:[%s9180_s2 + $0x548] ss:$16 sps:$4 sm:$0xff]   ;;  %v1903_v8 = vpop.f32.mrf.mxu1 }
 0x153   : > { %3244 = vmatpush1.bf16.msra.mxu1 %v6638_v57  ;;  %3202 = vmatprep.subr.bf16.mxu0 %v6643_v58  ;;  %v6715_v57 = vld [vmem:[%s9180_s2 + $0x32c] ss:$16 sps:$4 sm:$0xff]  }
 0x154   : > { %3245 = vmatprep.subr.bf16.mxu1 %v6646_v9  ;;  %v6718_v58 = vld [vmem:[%s9180_s2 + $0x52c] ss:$16 sps:$4 sm:$0xff]   ;;  %v6713_v9 = vld [vmem:[%s9180_s2 + $0x328] ss:$16 sps:$4 sm:$0xff]  }
 0x156   : > { %3203 = vmatpush1.bf16.msra.mxu0 %v6641_v10  ;;  %v6716_v10 = vld [vmem:[%s9180_s2 + $0x528] ss:$16 sps:$4 sm:$0xff]  }
 0x157   : > { %3246 = vmatpush1.bf16.msra.mxu1 %v6644_v59  ;;  %3204 = vmatprep.subr.bf16.mxu0 %v6649_v11  ;;  %v8378_v59 = vpop.f32.mrf.mxu0  ;;  %v1905_v11 = vpop.f32.mrf.mxu1 }
 0x158   : > { %3247 = vmatprep.subr.bf16.mxu1 %v6652_v12  ;;  %v6721_v12 = vld [vmem:[%s9180_s2 + $0x30c] ss:$16 sps:$4 sm:$0xff]  }
 0x15a   : > { %3205 = vmatpush1.bf16.msra.mxu0 %v6647_v50  ;;  %v6724_v50 = vld [vmem:[%s9180_s2 + $0x50c] ss:$16 sps:$4 sm:$0xff]  }
 0x15b   : > { %3248 = vmatpush1.bf16.msra.mxu1 %v6650_v42  ;;  %3206 = vmatprep.subr.bf16.mxu0 %v6655_v13  ;;  %v6821_v42 = vld [vmem:[%s7692_s24 + $0xc] ss:$12 sps:$4 sm:$0xff]   ;;  %v6823_v13 = vld [vmem:[%s7692_s24 + $0x24] ss:$12 sps:$4 sm:$0xff]  }
 0x15c   : > { %3249 = vmatprep.subr.bf16.mxu1 %v6658_v14  ;;  %v6825_v14 = vld [vmem:[%s7692_s24 + $0x10] ss:$12 sps:$4 sm:$0xff]  }
 0x15e   : > { %3207 = vmatpush1.bf16.msra.mxu0 %v6653_v15  ;;  %v6826_v15 = vld [vmem:[%s7692_s24 + $0x28] ss:$12 sps:$4 sm:$0xff]  }
 0x15f   : > { %3250 = vmatpush1.bf16.msra.mxu1 %v6656_v16  ;;  %3208 = vmatprep.subr.bf16.mxu0 %v6661_v17  ;;  %v6719_v16 = vld [vmem:[%s9180_s2 + $0x308] ss:$16 sps:$4 sm:$0xff]  }
 0x160   : > { %3251 = vmatprep.subr.bf16.mxu1 %v6664_v20  ;;  %v6722_v17 = vld [vmem:[%s9180_s2 + $0x508] ss:$16 sps:$4 sm:$0xff]   ;;  %v8396_v20 = vpop.f32.mrf.mxu0 }
 0x162   : > { %3209 = vmatpush1.bf16.msra.mxu0 %v6659_v21  ;;  %v1907_v21 = vpop.f32.mrf.mxu1 }
 0x163   : > { %3252 = vmatpush1.bf16.msra.mxu1 %v6662_v22  ;;  %3210 = vmatprep.subr.bf16.mxu0 %v6667_v23  ;;  %v6727_v22 = vld [vmem:[%s9180_s2 + $0xce4] ss:$16 sps:$4 sm:$0xff]  }
 0x164   : > { %3253 = vmatprep.subr.bf16.mxu1 %v6670_v24  ;;  %v6730_v23 = vld [vmem:[%s9180_s2 + $0xee4] ss:$16 sps:$4 sm:$0xff]   ;;  %v8405_v24 = vrot.slane %v6821_v42, %v7257_v53  ;;  %v6752_v42 = vld [vmem:[%s9180_s2 + $0xe60] ss:$16 sps:$4 sm:$0xff]  }
 0x166   : > { %3211 = vmatpush1.bf16.msra.mxu0 %v6665_v25  ;;  %v8408_v25 = vrot.slane %v6823_v13, %v7257_v53  ;;  %v6757_v13 = vld [vmem:[%s9180_s2 + $0xc44] ss:$16 sps:$4 sm:$0xff]  }
 0x167   : > { %3254 = vmatpush1.bf16.msra.mxu1 %v6668_v26  ;;  %3212 = vmatprep.subr.bf16.mxu0 %v6673_v27  ;;  %v8411_v26 = vrot.slane %v6825_v14, %v7257_v53  ;;  %v8414_v27 = vrot.slane %v6826_v15, %v7257_v53  ;;  %v6760_v14 = vld [vmem:[%s9180_s2 + $0xe44] ss:$16 sps:$4 sm:$0xff]   ;;  %v6755_v15 = vld [vmem:[%s9180_s2 + $0xc40] ss:$16 sps:$4 sm:$0xff]  }
 0x168   : > { %3255 = vmatprep.subr.bf16.mxu1 %v6676_v28  ;;  %v6725_v28 = vld [vmem:[%s9180_s2 + $0xce0] ss:$16 sps:$4 sm:$0xff]  }
 0x16a   : > { %3213 = vmatpush1.bf16.msra.mxu0 %v6671_v29  ;;  %v6728_v29 = vld [vmem:[%s9180_s2 + $0xee0] ss:$16 sps:$4 sm:$0xff]  }
 0x16b   : > { %3256 = vmatpush1.bf16.msra.mxu1 %v6674_v30  ;;  %3214 = vmatprep.subr.bf16.mxu0 %v6679_v32  ;;  %v8422_v30 = vpop.f32.mrf.mxu0  ;;  %v1909_v32 = vpop.f32.mrf.mxu1 }
 0x16c   : > { %3257 = vmatprep.subr.bf16.mxu1 %v6682_v33  ;;  %v6733_v33 = vld [vmem:[%s9180_s2 + $0xcc4] ss:$16 sps:$4 sm:$0xff]  }
 0x16e   : > { %3215 = vmatpush2.bf16.msra.mxu0 %v6677_v34  ;;  %v6736_v34 = vld [vmem:[%s9180_s2 + $0xec4] ss:$16 sps:$4 sm:$0xff]  }
 0x16f   : > { %3258 = vmatpush2.bf16.msra.mxu1 %v6680_v35  ;;  %3216 = vmatprep.subr.bf16.mxu0 %v6685_v36  ;;  %v8432_v35 = vcombine.high %v8405_v24, %v8408_v25  ;;  %v8436_v36 = vcombine.high %v8411_v26, %v8414_v27 }
 0x170   : > { %3259 = vmatprep.subr.bf16.mxu1 %v6688_v37 }
 0x172   : > { %3217 = vmatpush2.bf16.msra.mxu0 %v6683_v38 }
 0x173   : > { %3260 = vmatpush2.bf16.msra.mxu1 %v6686_v18  ;;  %3218 = vmatprep.subr.bf16.mxu0 %v6691_v39  ;;  %v6731_v39 = vld [vmem:[%s9180_s2 + $0xcc0] ss:$16 sps:$4 sm:$0xff]  }
 0x174   : > { %3261 = vmatprep.subr.bf16.mxu1 %v6694_v44  ;;  %v6734_v44 = vld [vmem:[%s9180_s2 + $0xec0] ss:$16 sps:$4 sm:$0xff]  }
 0x176   : > { %3219 = vmatpush2.bf16.msra.mxu0 %v6689_v48 }
 0x177   : > { %3262 = vmatpush2.bf16.msra.mxu1 %v6692_v51  ;;  %3220 = vmatprep.subr.bf16.mxu0 %v6697_v52 }
 0x178   : > { %3263 = vmatprep.subr.bf16.mxu1 %v6700_v54 }
 0x17a   : > { %3221 = vmatpush2.bf16.msra.mxu0 %v6695_v55 }
 0x17b   : > { %3264 = vmatpush2.bf16.msra.mxu1 %v6698_v56  ;;  %3222 = vmatprep.subr.bf16.mxu0 %v6703_v61 }
 0x17c   : > { %3265 = vmatprep.subr.bf16.mxu1 %v6706_v62 }
 0x17e   : > { %3223 = vmatpush2.bf16.msra.mxu0 %v6701_v5  ;;  %v6737_v5 = vld [vmem:[%s9180_s2 + $0xca0] ss:$16 sps:$4 sm:$0xff]  }
 0x17f   : > { %3266 = vmatpush2.bf16.msra.mxu1 %v6704_v43  ;;  %3224 = vmatprep.subr.bf16.mxu0 %v6709_v0  ;;  %v6740_v43 = vld [vmem:[%s9180_s2 + $0xea0] ss:$16 sps:$4 sm:$0xff]  }
 0x180   : > { %3267 = vmatprep.subr.bf16.mxu1 %v6712_v1  ;;  %v6745_v1 = vld [vmem:[%s9180_s2 + $0xc84] ss:$16 sps:$4 sm:$0xff]  }
 0x182   : > { %3225 = vmatpush2.bf16.msra.mxu0 %v6707_v4  ;;  %v6748_v4 = vld [vmem:[%s9180_s2 + $0xe84] ss:$16 sps:$4 sm:$0xff]  }
 0x183   : > { %3268 = vmatpush2.bf16.msra.mxu1 %v6710_v6  ;;  %3226 = vmatprep.subr.bf16.mxu0 %v6715_v57 }
 0x184   : > { %3269 = vmatprep.subr.bf16.mxu1 %v6718_v58 }
 0x186   : > { %3227 = vmatpush2.bf16.msra.mxu0 %v6713_v9  ;;  %v6743_v9 = vld [vmem:[%s9180_s2 + $0xc80] ss:$16 sps:$4 sm:$0xff]  }
 0x187   : > { %3270 = vmatpush2.bf16.msra.mxu1 %v6716_v10  ;;  %3228 = vmatprep.subr.bf16.mxu0 %v6721_v12  ;;  %v6746_v10 = vld [vmem:[%s9180_s2 + $0xe80] ss:$16 sps:$4 sm:$0xff]   ;;  %v6754_v12 = vld [vmem:[%s9180_s2 + $0xe64] ss:$16 sps:$4 sm:$0xff]  }
 0x188   : > { %3271 = vmatprep.subr.bf16.mxu1 %v6724_v50  ;;  %v6749_v50 = vld [vmem:[%s9180_s2 + $0xc60] ss:$16 sps:$4 sm:$0xff]  }
 0x18a   : > { %3229 = vmatpush2.bf16.msra.mxu0 %v6719_v16  ;;  %v6758_v16 = vld [vmem:[%s9180_s2 + $0xe40] ss:$16 sps:$4 sm:$0xff]  }
 0x18b   : > { %3272 = vmatpush2.bf16.msra.mxu1 %v6722_v17  ;;  %4505 = vmatprep.subr.bf16.mxu0 %v6727_v22  ;;  %v6763_v17 = vld [vmem:[%s9180_s2 + $0xc24] ss:$16 sps:$4 sm:$0xff]   ;;  %v6761_v22 = vld [vmem:[%s9180_s2 + $0xc20] ss:$16 sps:$4 sm:$0xff]  }
 0x18c   : > { %4548 = vmatprep.subr.bf16.mxu1 %v6730_v23  ;;  %v6764_v23 = vld [vmem:[%s9180_s2 + $0xe20] ss:$16 sps:$4 sm:$0xff]  }
 0x18d   : > { %v1946_v37 = vpop.f32.mrf.mxu0  ;;  %3231 = vmatmul.mubr.bf16.vlgmr.msra.gmra.mxu0 %v7976_v60  ;;  %v6739_v60 = vld [vmem:[%s9180_s2 + $0xca4] ss:$16 sps:$4 sm:$0xff]  }
 0x18e   : > { %v1989_v38 = vpop.f32.mrf.mxu1  ;;  %3274 = vmatmul.mubr.bf16.vlgmr.msra.gmra.mxu1 %v8186_v49  ;;  %v1947_v18 = vadd.f32 %v1946_v37, %v1903_v8  ;;  %4506 = vmatpush1.bf16.msra.mxu0 %v6725_v28  ;;  %v6742_v49 = vld [vmem:[%s9180_s2 + $0xea4] ss:$16 sps:$4 sm:$0xff]  }
 0x18f   : > { %4549 = vmatpush1.bf16.msra.mxu1 %v6728_v29  ;;  %v1948_v48 = vpop.f32.mrf.mxu0  ;;  %4507 = vmatprep.subr.bf16.mxu0 %v6733_v33  ;;  %v6769_v28 = vld [vmem:[%s9180_s2 + $0xc04] ss:$16 sps:$4 sm:$0xff]   ;;  %v6770_v33 = vld [vmem:[%s9180_s2 + $0xe00] ss:$16 sps:$4 sm:$0xff]  }
 0x190   : > { %v1991_v51 = vpop.f32.mrf.mxu1  ;;  %4550 = vmatprep.subr.bf16.mxu1 %v6736_v34  ;;  %v8452_v52 = vadd.f32 %v1989_v38, %v1947_v18  ;;  %v1949_v54 = vadd.f32 %v1948_v48, %v1905_v11  ;;  %4537 = vmatprep.mubr.bf16.mxu0 %v8432_v35  ;;  %v6751_v11 = vld [vmem:[%s9180_s2 + $0xc64] ss:$16 sps:$4 sm:$0xff]   ;;  %v6773_v38 = vld [vmem:[%s9180_s2 + $0xde0] ss:$16 sps:$4 sm:$0xff]  }
 0x191   : > { %4580 = vmatprep.mubr.bf16.mxu1 %v8436_v36  ;;  %v1950_v55 = vpop.f32.mrf.mxu0  ;;  %v6772_v29 = vld [vmem:[%s9180_s2 + $0xe04] ss:$16 sps:$4 sm:$0xff]   ;;  %v6776_v18 = vld [vmem:[%s9180_s2 + $0xfe0] ss:$16 sps:$4 sm:$0xff]  }
 0x192   : > { %v1993_v56 = vpop.f32.mrf.mxu1  ;;  %v8456_v61 = vadd.f32 %v1991_v51, %v1949_v54  ;;  %v1951_v62 = vadd.f32 %v1950_v55, %v1907_v21  ;;  %4508 = vmatpush1.bf16.msra.mxu0 %v6731_v39  ;;  %v6766_v21 = vld [vmem:[%s9180_s2 + $0xe24] ss:$16 sps:$4 sm:$0xff]   ;;  %v6779_v48 = vld [vmem:[%s9180_s2 + $0xdc0] ss:$16 sps:$4 sm:$0xff]  }
 0x193   : > { %4551 = vmatpush1.bf16.msra.mxu1 %v6734_v44  ;;  %v1952_v0 = vpop.f32.mrf.mxu0  ;;  %4509 = vmatprep.subr.bf16.mxu0 %v6739_v60  ;;  %v6775_v34 = vld [vmem:[%s9180_s2 + $0xde4] ss:$16 sps:$4 sm:$0xff]   ;;  %v6782_v51 = vld [vmem:[%s9180_s2 + $0xfc0] ss:$16 sps:$4 sm:$0xff]  }
 0x194   : > { %4552 = vmatprep.subr.bf16.mxu1 %v6742_v49  ;;  %v8470_v6 = vadd.f32 %v1993_v56, %v1951_v62  ;;  %v1953_v8 = vadd.f32 %v1952_v0, %v1909_v32  ;;  %v1995_v57 = vpop.f32.mrf.mxu1  ;;  %v6767_v32 = vld [vmem:[%s9180_s2 + $0xc00] ss:$16 sps:$4 sm:$0xff]   ;;  %v6778_v37 = vld [vmem:[%s9180_s2 + $0xfe4] ss:$16 sps:$4 sm:$0xff]  }
 0x195   : > { %v6781_v39 = vld [vmem:[%s9180_s2 + $0xdc4] ss:$16 sps:$4 sm:$0xff]   ;;  %v6785_v54 = vld [vmem:[%s9180_s2 + $0xda0] ss:$16 sps:$4 sm:$0xff]  }
 0x196   : > { %v8472_v58 = vadd.f32 %v1995_v57, %v1953_v8  ;;  %4510 = vmatpush1.bf16.msra.mxu0 %v6737_v5  ;;  %v6784_v44 = vld [vmem:[%s9180_s2 + $0xfc4] ss:$16 sps:$4 sm:$0xff]   ;;  %v6788_v55 = vld [vmem:[%s9180_s2 + $0xfa0] ss:$16 sps:$4 sm:$0xff]  }
 0x197   : > { %4553 = vmatpush1.bf16.msra.mxu1 %v6740_v43  ;;  %4511 = vmatprep.subr.bf16.mxu0 %v6745_v1  ;;  %v6787_v60 = vld [vmem:[%s9180_s2 + $0xda4] ss:$16 sps:$4 sm:$0xff]   ;;  %v6791_v5 = vld [vmem:[%s9180_s2 + $0xd80] ss:$16 sps:$4 sm:$0xff]  }
 0x198   : > { %4554 = vmatprep.subr.bf16.mxu1 %v6748_v4  ;;  %v6790_v49 = vld [vmem:[%s9180_s2 + $0xfa4] ss:$16 sps:$4 sm:$0xff]   ;;  %v6794_v43 = vld [vmem:[%s9180_s2 + $0xf80] ss:$16 sps:$4 sm:$0xff]  }
 0x199   : > { %v6793_v56 = vld [vmem:[%s9180_s2 + $0xd84] ss:$16 sps:$4 sm:$0xff]   ;;  %v6797_v4 = vld [vmem:[%s9180_s2 + $0xd60] ss:$16 sps:$4 sm:$0xff]  }
 0x19a   : > { %4512 = vmatpush1.bf16.msra.mxu0 %v6743_v9  ;;  %v6796_v62 = vld [vmem:[%s9180_s2 + $0xf84] ss:$16 sps:$4 sm:$0xff]   ;;  %v6800_v8 = vld [vmem:[%s9180_s2 + $0xf60] ss:$16 sps:$4 sm:$0xff]  }
 0x19b   : > { %4555 = vmatpush1.bf16.msra.mxu1 %v6746_v10  ;;  %4513 = vmatprep.subr.bf16.mxu0 %v6751_v11  ;;  %v6799_v0 = vld [vmem:[%s9180_s2 + $0xd64] ss:$16 sps:$4 sm:$0xff]   ;;  %v6803_v10 = vld [vmem:[%s9180_s2 + $0xd40] ss:$16 sps:$4 sm:$0xff]  }
 0x19c   : > { %4556 = vmatprep.subr.bf16.mxu1 %v6754_v12  ;;  %v6802_v1 = vld [vmem:[%s9180_s2 + $0xf64] ss:$16 sps:$4 sm:$0xff]   ;;  %v6806_v11 = vld [vmem:[%s9180_s2 + $0xf40] ss:$16 sps:$4 sm:$0xff]  }
 0x19d   : > { %v6805_v57 = vld [vmem:[%s9180_s2 + $0xd44] ss:$16 sps:$4 sm:$0xff]  }
 0x19e   : > { %4514 = vmatpush1.bf16.msra.mxu0 %v6749_v50  ;;  %v6808_v9 = vld [vmem:[%s9180_s2 + $0xf44] ss:$16 sps:$4 sm:$0xff]  }
 0x19f   : > { %4557 = vmatpush1.bf16.msra.mxu1 %v6752_v42  ;;  %4515 = vmatprep.subr.bf16.mxu0 %v6757_v13  ;;  %v6811_v12 = vld [vmem:[%s9180_s2 + $0xd24] ss:$16 sps:$4 sm:$0xff]   ;;  %v6809_v42 = vld [vmem:[%s9180_s2 + $0xd20] ss:$16 sps:$4 sm:$0xff]  }
 0x1a0   : > { %4558 = vmatprep.subr.bf16.mxu1 %v6760_v14  ;;  %v6814_v50 = vld [vmem:[%s9180_s2 + $0xf24] ss:$16 sps:$4 sm:$0xff]   ;;  %v6812_v13 = vld [vmem:[%s9180_s2 + $0xf20] ss:$16 sps:$4 sm:$0xff]  }
 0x1a1   : > { %v6817_v14 = vld [vmem:[%s9180_s2 + $0xd04] ss:$16 sps:$4 sm:$0xff]  }
 0x1a2   : > { %4516 = vmatpush1.bf16.msra.mxu0 %v6755_v15  ;;  %v6820_v15 = vld [vmem:[%s9180_s2 + $0xf04] ss:$16 sps:$4 sm:$0xff]  }
 0x1a3   : > { %4559 = vmatpush1.bf16.msra.mxu1 %v6758_v16  ;;  %4517 = vmatprep.subr.bf16.mxu0 %v6763_v17  ;;  %v6923_v16 = vld [vmem:[%s7692_s24 + $0x14] ss:$12 sps:$4 sm:$0xff]   ;;  %v6924_v17 = vld [vmem:[%s7692_s24 + $0x2c] ss:$12 sps:$4 sm:$0xff]  }
 0x1a4   : > { %4560 = vmatprep.subr.bf16.mxu1 %v6766_v21  ;;  %v6815_v21 = vld [vmem:[%s9180_s2 + $0xd00] ss:$16 sps:$4 sm:$0xff]  }
 0x1a6   : > { %4518 = vmatpush1.bf16.msra.mxu0 %v6761_v22  ;;  %v6818_v22 = vld [vmem:[%s9180_s2 + $0xf00] ss:$16 sps:$4 sm:$0xff]  }
 0x1a7   : > { %4561 = vmatpush1.bf16.msra.mxu1 %v6764_v23  ;;  %4519 = vmatprep.subr.bf16.mxu0 %v6769_v28  ;;  %v6829_v23 = vld [vmem:[%s9180_s2 + $0x10e4] ss:$16 sps:$4 sm:$0xff]   ;;  %v6832_v28 = vld [vmem:[%s9180_s2 + $0xcec] ss:$16 sps:$4 sm:$0xff]  }
 0x1a8   : > { %4562 = vmatprep.subr.bf16.mxu1 %v6772_v29  ;;  %v8633_v29 = vrot.slane %v6923_v16, %v7257_v53  ;;  %v6883_v16 = vld [vmem:[%s9180_s2 + $0x11c4] ss:$16 sps:$4 sm:$0xff]  }
 0x1aa   : > { %4520 = vmatpush1.bf16.msra.mxu0 %v6767_v32  ;;  %v8636_v32 = vrot.slane %v6924_v17, %v7257_v53  ;;  %v6835_v53 = vld [vmem:[%s9180_s2 + $0x10c4] ss:$16 sps:$4 sm:$0xff]   ;;  %v6886_v17 = vld [vmem:[%s9180_s2 + $0xdcc] ss:$16 sps:$4 sm:$0xff]  }
 0x1ab   : > { %4563 = vmatpush1.bf16.msra.mxu1 %v6770_v33  ;;  %4521 = vmatprep.subr.bf16.mxu0 %v6775_v34  ;;  %v8640_v33 = vcombine.low %v8405_v24, %v8408_v25  ;;  %v8644_v34 = vcombine.low %v8411_v26, %v8414_v27  ;;  %v6838_v24 = vld [vmem:[%s9180_s2 + $0xccc] ss:$16 sps:$4 sm:$0xff]   ;;  %v6833_v26 = vld [vmem:[%s9180_s2 + $0x10c0] ss:$16 sps:$4 sm:$0xff]   ;;  %v6836_v27 = vld [vmem:[%s9180_s2 + $0xcc8] ss:$16 sps:$4 sm:$0xff]  }
 0x1ac   : > { %4564 = vmatprep.subr.bf16.mxu1 %v6778_v37  ;;  %v6827_v37 = vld [vmem:[%s9180_s2 + $0x10e0] ss:$16 sps:$4 sm:$0xff]   ;;  %v8660_v25 = vcombine.high %v8633_v29, %v8636_v32 }
 0x1ae   : > { %4522 = vmatpush2.bf16.msra.mxu0 %v6773_v38  ;;  %v6830_v38 = vld [vmem:[%s9180_s2 + $0xce8] ss:$16 sps:$4 sm:$0xff]  }
 0x1af   : > { %4565 = vmatpush2.bf16.msra.mxu1 %v6776_v18  ;;  %4523 = vmatprep.subr.bf16.mxu0 %v6781_v39  ;;  %v6841_v18 = vld [vmem:[%s9180_s2 + $0x10a4] ss:$16 sps:$4 sm:$0xff]   ;;  %v6844_v39 = vld [vmem:[%s9180_s2 + $0xcac] ss:$16 sps:$4 sm:$0xff]  }
 0x1b0   : > { %4566 = vmatprep.subr.bf16.mxu1 %v6784_v44  ;;  %v6839_v44 = vld [vmem:[%s9180_s2 + $0x10a0] ss:$16 sps:$4 sm:$0xff]  }
 0x1b2   : > { %4524 = vmatpush2.bf16.msra.mxu0 %v6779_v48  ;;  %v6842_v48 = vld [vmem:[%s9180_s2 + $0xca8] ss:$16 sps:$4 sm:$0xff]  }
 0x1b3   : > { %4567 = vmatpush2.bf16.msra.mxu1 %v6782_v51  ;;  %4525 = vmatprep.subr.bf16.mxu0 %v6787_v60  ;;  %v6847_v51 = vld [vmem:[%s9180_s2 + $0x1084] ss:$16 sps:$4 sm:$0xff]   ;;  %v6845_v60 = vld [vmem:[%s9180_s2 + $0x1080] ss:$16 sps:$4 sm:$0xff]  }
 0x1b4   : > { %4568 = vmatprep.subr.bf16.mxu1 %v6790_v49  ;;  %v6848_v49 = vld [vmem:[%s9180_s2 + $0xc88] ss:$16 sps:$4 sm:$0xff]  }
 0x1b6   : > { %4526 = vmatpush2.bf16.msra.mxu0 %v6785_v54  ;;  %v6853_v54 = vld [vmem:[%s9180_s2 + $0x1064] ss:$16 sps:$4 sm:$0xff]  }
 0x1b7   : > { %4569 = vmatpush2.bf16.msra.mxu1 %v6788_v55  ;;  %4527 = vmatprep.subr.bf16.mxu0 %v6793_v56  ;;  %v6856_v55 = vld [vmem:[%s9180_s2 + $0xc6c] ss:$16 sps:$4 sm:$0xff]   ;;  %v6851_v56 = vld [vmem:[%s9180_s2 + $0x1060] ss:$16 sps:$4 sm:$0xff]  }
 0x1b8   : > { %4570 = vmatprep.subr.bf16.mxu1 %v6796_v62  ;;  %v6854_v62 = vld [vmem:[%s9180_s2 + $0xc68] ss:$16 sps:$4 sm:$0xff]  }
 0x1ba   : > { %4528 = vmatpush2.bf16.msra.mxu0 %v6791_v5  ;;  %v6859_v5 = vld [vmem:[%s9180_s2 + $0x1044] ss:$16 sps:$4 sm:$0xff]  }
 0x1bb   : > { %4571 = vmatpush2.bf16.msra.mxu1 %v6794_v43  ;;  %4529 = vmatprep.subr.bf16.mxu0 %v6799_v0  ;;  %v6862_v43 = vld [vmem:[%s9180_s2 + $0xc4c] ss:$16 sps:$4 sm:$0xff]   ;;  %v6857_v0 = vld [vmem:[%s9180_s2 + $0x1040] ss:$16 sps:$4 sm:$0xff]  }
 0x1bc   : > { %4572 = vmatprep.subr.bf16.mxu1 %v6802_v1  ;;  %v6860_v1 = vld [vmem:[%s9180_s2 + $0xc48] ss:$16 sps:$4 sm:$0xff]  }
 0x1be   : > { %4530 = vmatpush2.bf16.msra.mxu0 %v6797_v4  ;;  %v6865_v4 = vld [vmem:[%s9180_s2 + $0x1024] ss:$16 sps:$4 sm:$0xff]  }
 0x1bf   : > { %4573 = vmatpush2.bf16.msra.mxu1 %v6800_v8  ;;  %4531 = vmatprep.subr.bf16.mxu0 %v6805_v57  ;;  %v6868_v8 = vld [vmem:[%s9180_s2 + $0xc2c] ss:$16 sps:$4 sm:$0xff]   ;;  %v6863_v57 = vld [vmem:[%s9180_s2 + $0x1020] ss:$16 sps:$4 sm:$0xff]  }
 0x1c0   : > { %4574 = vmatprep.subr.bf16.mxu1 %v6808_v9  ;;  %v6866_v9 = vld [vmem:[%s9180_s2 + $0xc28] ss:$16 sps:$4 sm:$0xff]  }
 0x1c2   : > { %4532 = vmatpush2.bf16.msra.mxu0 %v6803_v10  ;;  %v6871_v10 = vld [vmem:[%s9180_s2 + $0x1004] ss:$16 sps:$4 sm:$0xff]  }
 0x1c3   : > { %4575 = vmatpush2.bf16.msra.mxu1 %v6806_v11  ;;  %4533 = vmatprep.subr.bf16.mxu0 %v6811_v12  ;;  %v6874_v11 = vld [vmem:[%s9180_s2 + $0xc0c] ss:$16 sps:$4 sm:$0xff]   ;;  %v6869_v12 = vld [vmem:[%s9180_s2 + $0x1000] ss:$16 sps:$4 sm:$0xff]  }
 0x1c4   : > { %4576 = vmatprep.subr.bf16.mxu1 %v6814_v50  ;;  %v6872_v50 = vld [vmem:[%s9180_s2 + $0xc08] ss:$16 sps:$4 sm:$0xff]  }
 0x1c6   : > { %4534 = vmatpush2.bf16.msra.mxu0 %v6809_v42  ;;  %v6877_v42 = vld [vmem:[%s9180_s2 + $0x11e4] ss:$16 sps:$4 sm:$0xff]  }
 0x1c7   : > { %4577 = vmatpush2.bf16.msra.mxu1 %v6812_v13  ;;  %4535 = vmatprep.subr.bf16.mxu0 %v6817_v14  ;;  %v6880_v13 = vld [vmem:[%s9180_s2 + $0xdec] ss:$16 sps:$4 sm:$0xff]   ;;  %v6875_v14 = vld [vmem:[%s9180_s2 + $0x11e0] ss:$16 sps:$4 sm:$0xff]  }
 0x1c8   : > { %4578 = vmatprep.subr.bf16.mxu1 %v6820_v15  ;;  %v6878_v15 = vld [vmem:[%s9180_s2 + $0xde8] ss:$16 sps:$4 sm:$0xff]  }
 0x1ca   : > { %4536 = vmatpush2.bf16.msra.mxu0 %v6815_v21  ;;  %v6881_v21 = vld [vmem:[%s9180_s2 + $0x11c0] ss:$16 sps:$4 sm:$0xff]  }
 0x1cb   : > { %4579 = vmatpush2.bf16.msra.mxu1 %v6818_v22  ;;  %4591 = vmatprep.subr.bf16.mxu0 %v6829_v23  ;;  %v6884_v22 = vld [vmem:[%s9180_s2 + $0xdc8] ss:$16 sps:$4 sm:$0xff]   ;;  %v6889_v23 = vld [vmem:[%s9180_s2 + $0x11a4] ss:$16 sps:$4 sm:$0xff]  }
 0x1cc   : > { %4634 = vmatprep.subr.bf16.mxu1 %v6832_v28  ;;  %v6892_v28 = vld [vmem:[%s9180_s2 + $0xdac] ss:$16 sps:$4 sm:$0xff]  }
 0x1cd   : > { %4538 = vmatmul.mubr.bf16.vlgmr.msra.gmra.mxu0 %v8640_v33 }
 0x1ce   : > { %4581 = vmatmul.mubr.bf16.vlgmr.msra.gmra.mxu1 %v8644_v34  ;;  %4592 = vmatpush1.bf16.msra.mxu0 %v6827_v37  ;;  %v6887_v37 = vld [vmem:[%s9180_s2 + $0x11a0] ss:$16 sps:$4 sm:$0xff]  }
 0x1cf   : > { %4635 = vmatpush1.bf16.msra.mxu1 %v6830_v38  ;;  %4593 = vmatprep.subr.bf16.mxu0 %v6835_v53  ;;  %v6890_v38 = vld [vmem:[%s9180_s2 + $0xda8] ss:$16 sps:$4 sm:$0xff]   ;;  %v6895_v53 = vld [vmem:[%s9180_s2 + $0x1184] ss:$16 sps:$4 sm:$0xff]  }
 0x1d0   : > { %4636 = vmatprep.subr.bf16.mxu1 %v6838_v24  ;;  %4623 = vmatprep.mubr.bf16.mxu0 %v8660_v25  ;;  %v6898_v24 = vld [vmem:[%s9180_s2 + $0xd8c] ss:$16 sps:$4 sm:$0xff]  }
 0x1d1   : > { %4666 = vmatprep.mubr.bf16.mxu1 %v8432_v35  ;;  %v6850_v35 = vld [vmem:[%s9180_s2 + $0xc8c] ss:$16 sps:$4 sm:$0xff]  }
 0x1d2   : > { %4594 = vmatpush1.bf16.msra.mxu0 %v6833_v26  ;;  %v6893_v26 = vld [vmem:[%s9180_s2 + $0x1180] ss:$16 sps:$4 sm:$0xff]  }
 0x1d3   : > { %4637 = vmatpush1.bf16.msra.mxu1 %v6836_v27  ;;  %4595 = vmatprep.subr.bf16.mxu0 %v6841_v18  ;;  %v6896_v27 = vld [vmem:[%s9180_s2 + $0xd88] ss:$16 sps:$4 sm:$0xff]   ;;  %v6901_v18 = vld [vmem:[%s9180_s2 + $0x1164] ss:$16 sps:$4 sm:$0xff]  }
 0x1d4   : > { %4638 = vmatprep.subr.bf16.mxu1 %v6844_v39  ;;  %v6904_v39 = vld [vmem:[%s9180_s2 + $0xd6c] ss:$16 sps:$4 sm:$0xff]  }
 0x1d6   : > { %4596 = vmatpush1.bf16.msra.mxu0 %v6839_v44  ;;  %v6899_v44 = vld [vmem:[%s9180_s2 + $0x1160] ss:$16 sps:$4 sm:$0xff]  }
 0x1d7   : > { %4639 = vmatpush1.bf16.msra.mxu1 %v6842_v48  ;;  %4597 = vmatprep.subr.bf16.mxu0 %v6847_v51  ;;  %v6902_v48 = vld [vmem:[%s9180_s2 + $0xd68] ss:$16 sps:$4 sm:$0xff]   ;;  %v6907_v51 = vld [vmem:[%s9180_s2 + $0x1144] ss:$16 sps:$4 sm:$0xff]  }
 0x1d8   : > { %4640 = vmatprep.subr.bf16.mxu1 %v6850_v35  ;;  %v6910_v35 = vld [vmem:[%s9180_s2 + $0xd4c] ss:$16 sps:$4 sm:$0xff]  }
 0x1da   : > { %4598 = vmatpush1.bf16.msra.mxu0 %v6845_v60  ;;  %v6905_v60 = vld [vmem:[%s9180_s2 + $0x1140] ss:$16 sps:$4 sm:$0xff]  }
 0x1db   : > { %4641 = vmatpush1.bf16.msra.mxu1 %v6848_v49  ;;  %4599 = vmatprep.subr.bf16.mxu0 %v6853_v54  ;;  %v6908_v49 = vld [vmem:[%s9180_s2 + $0xd48] ss:$16 sps:$4 sm:$0xff]   ;;  %v8816_v54 = vpop.f32.mrf.mxu1 }
 0x1dc   : > { %4642 = vmatprep.subr.bf16.mxu1 %v6856_v55  ;;  %v6913_v55 = vld [vmem:[%s9180_s2 + $0x1124] ss:$16 sps:$4 sm:$0xff]  }
 0x1de   : > { %4600 = vmatpush1.bf16.msra.mxu0 %v6851_v56  ;;  %v6916_v56 = vld [vmem:[%s9180_s2 + $0xd2c] ss:$16 sps:$4 sm:$0xff]  }
 0x1df   : > { %4643 = vmatpush1.bf16.msra.mxu1 %v6854_v62  ;;  %4601 = vmatprep.subr.bf16.mxu0 %v6859_v5  ;;  %v6911_v62 = vld [vmem:[%s9180_s2 + $0x1120] ss:$16 sps:$4 sm:$0xff]   ;;  %v6914_v5 = vld [vmem:[%s9180_s2 + $0xd28] ss:$16 sps:$4 sm:$0xff]  }
 0x1e0   : > { %4644 = vmatprep.subr.bf16.mxu1 %v6862_v43  ;;  %v8830_v43 = vpop.f32.mrf.mxu1 }
 0x1e2   : > { %4602 = vmatpush1.bf16.msra.mxu0 %v6857_v0  ;;  %v6919_v0 = vld [vmem:[%s9180_s2 + $0x1104] ss:$16 sps:$4 sm:$0xff]  }
 0x1e3   : > { %4645 = vmatpush1.bf16.msra.mxu1 %v6860_v1  ;;  %4603 = vmatprep.subr.bf16.mxu0 %v6865_v4  ;;  %v6922_v1 = vld [vmem:[%s9180_s2 + $0xd0c] ss:$16 sps:$4 sm:$0xff]   ;;  %v6917_v4 = vld [vmem:[%s9180_s2 + $0x1100] ss:$16 sps:$4 sm:$0xff]  }
 0x1e4   : > { %4646 = vmatprep.subr.bf16.mxu1 %v6868_v8  ;;  %v6920_v8 = vld [vmem:[%s9180_s2 + $0xd08] ss:$16 sps:$4 sm:$0xff]  }
 0x1e6   : > { %4604 = vmatpush1.bf16.msra.mxu0 %v6863_v57  ;;  %v8844_v57 = vpop.f32.mrf.mxu1 }
 0x1e7   : > { %4647 = vmatpush1.bf16.msra.mxu1 %v6866_v9  ;;  %4605 = vmatprep.subr.bf16.mxu0 %v6871_v10  ;;  %v6927_v9 = vld [vmem:[%s9180_s2 + $0xeec] ss:$16 sps:$4 sm:$0xff]  }
 0x1e8   : > { %4648 = vmatprep.subr.bf16.mxu1 %v6874_v11  ;;  %v6930_v10 = vld [vmem:[%s9180_s2 + $0x10ec] ss:$16 sps:$4 sm:$0xff]   ;;  %v8854_v11 = vcombine.low %v8633_v29, %v8636_v32 }
 0x1e9   : > { %v6936_v29 = vld [vmem:[%s9180_s2 + $0x10cc] ss:$16 sps:$4 sm:$0xff]  }
 0x1ea   : > { %4606 = vmatpush1.bf16.msra.mxu0 %v6869_v12  ;;  %v6925_v12 = vld [vmem:[%s9180_s2 + $0xee8] ss:$16 sps:$4 sm:$0xff]  }
 0x1eb   : > { %4649 = vmatpush1.bf16.msra.mxu1 %v6872_v50  ;;  %4607 = vmatprep.subr.bf16.mxu0 %v6877_v42  ;;  %v6928_v50 = vld [vmem:[%s9180_s2 + $0x10e8] ss:$16 sps:$4 sm:$0xff]   ;;  %v8862_v42 = vpop.f32.mrf.mxu1 }
 0x1ec   : > { %4650 = vmatprep.subr.bf16.mxu1 %v6880_v13  ;;  %v6933_v13 = vld [vmem:[%s9180_s2 + $0xecc] ss:$16 sps:$4 sm:$0xff]  }
 0x1ee   : > { %4608 = vmatpush2.bf16.msra.mxu0 %v6875_v14 }
 0x1ef   : > { %4651 = vmatpush2.bf16.msra.mxu1 %v6878_v15  ;;  %4609 = vmatprep.subr.bf16.mxu0 %v6883_v16  ;;  %v6931_v15 = vld [vmem:[%s9180_s2 + $0xec8] ss:$16 sps:$4 sm:$0xff]  }
 0x1f0   : > { %4652 = vmatprep.subr.bf16.mxu1 %v6886_v17  ;;  %v6934_v16 = vld [vmem:[%s9180_s2 + $0x10c8] ss:$16 sps:$4 sm:$0xff]  }
 0x1f2   : > { %4610 = vmatpush2.bf16.msra.mxu0 %v6881_v21 }
 0x1f3   : > { %4653 = vmatpush2.bf16.msra.mxu1 %v6884_v22  ;;  %4611 = vmatprep.subr.bf16.mxu0 %v6889_v23 }
 0x1f4   : > { %4654 = vmatprep.subr.bf16.mxu1 %v6892_v28  ;;  %v6937_v28 = vld [vmem:[%s9180_s2 + $0xea8] ss:$16 sps:$4 sm:$0xff]  }
 0x1f6   : > { %4612 = vmatpush2.bf16.msra.mxu0 %v6887_v37  ;;  %v6940_v37 = vld [vmem:[%s9180_s2 + $0x10a8] ss:$16 sps:$4 sm:$0xff]  }
 0x1f7   : > { %4655 = vmatpush2.bf16.msra.mxu1 %v6890_v38  ;;  %4613 = vmatprep.subr.bf16.mxu0 %v6895_v53  ;;  %v6943_v38 = vld [vmem:[%s9180_s2 + $0xe88] ss:$16 sps:$4 sm:$0xff]  }
 0x1f8   : > { %4656 = vmatprep.subr.bf16.mxu1 %v6898_v24  ;;  %v6946_v53 = vld [vmem:[%s9180_s2 + $0x1088] ss:$16 sps:$4 sm:$0xff]   ;;  %v6951_v24 = vld [vmem:[%s9180_s2 + $0xe6c] ss:$16 sps:$4 sm:$0xff]  }
 0x1fa   : > { %4614 = vmatpush2.bf16.msra.mxu0 %v6893_v26  ;;  %v6949_v26 = vld [vmem:[%s9180_s2 + $0xe68] ss:$16 sps:$4 sm:$0xff]  }
 0x1fb   : > { %4657 = vmatpush2.bf16.msra.mxu1 %v6896_v27  ;;  %4615 = vmatprep.subr.bf16.mxu0 %v6901_v18  ;;  %v6952_v27 = vld [vmem:[%s9180_s2 + $0x1068] ss:$16 sps:$4 sm:$0xff]   ;;  %v6957_v18 = vld [vmem:[%s9180_s2 + $0xe4c] ss:$16 sps:$4 sm:$0xff]  }
 0x1fc   : > { %4658 = vmatprep.subr.bf16.mxu1 %v6904_v39  ;;  %v6960_v39 = vld [vmem:[%s9180_s2 + $0x104c] ss:$16 sps:$4 sm:$0xff]  }
 0x1fe   : > { %4616 = vmatpush2.bf16.msra.mxu0 %v6899_v44  ;;  %v6955_v44 = vld [vmem:[%s9180_s2 + $0xe48] ss:$16 sps:$4 sm:$0xff]  }
 0x1ff   : > { %4659 = vmatpush2.bf16.msra.mxu1 %v6902_v48  ;;  %4617 = vmatprep.subr.bf16.mxu0 %v6907_v51  ;;  %v6958_v48 = vld [vmem:[%s9180_s2 + $0x1048] ss:$16 sps:$4 sm:$0xff]   ;;  %v6963_v51 = vld [vmem:[%s9180_s2 + $0xe2c] ss:$16 sps:$4 sm:$0xff]  }
 0x200   : > { %4660 = vmatprep.subr.bf16.mxu1 %v6910_v35  ;;  %v6966_v35 = vld [vmem:[%s9180_s2 + $0x102c] ss:$16 sps:$4 sm:$0xff]  }
 0x202   : > { %4618 = vmatpush2.bf16.msra.mxu0 %v6905_v60  ;;  %v6961_v60 = vld [vmem:[%s9180_s2 + $0xe28] ss:$16 sps:$4 sm:$0xff]  }
 0x203   : > { %4661 = vmatpush2.bf16.msra.mxu1 %v6908_v49  ;;  %4619 = vmatprep.subr.bf16.mxu0 %v6913_v55  ;;  %v6964_v49 = vld [vmem:[%s9180_s2 + $0x1028] ss:$16 sps:$4 sm:$0xff]   ;;  %v6969_v55 = vld [vmem:[%s9180_s2 + $0xe0c] ss:$16 sps:$4 sm:$0xff]  }
 0x204   : > { %4662 = vmatprep.subr.bf16.mxu1 %v6916_v56  ;;  %v6972_v56 = vld [vmem:[%s9180_s2 + $0x100c] ss:$16 sps:$4 sm:$0xff]  }
 0x206   : > { %4620 = vmatpush2.bf16.msra.mxu0 %v6911_v62  ;;  %v6967_v62 = vld [vmem:[%s9180_s2 + $0xe08] ss:$16 sps:$4 sm:$0xff]  }
 0x207   : > { %4663 = vmatpush2.bf16.msra.mxu1 %v6914_v5  ;;  %4621 = vmatprep.subr.bf16.mxu0 %v6919_v0  ;;  %v6970_v5 = vld [vmem:[%s9180_s2 + $0x1008] ss:$16 sps:$4 sm:$0xff]   ;;  %v6975_v0 = vld [vmem:[%s9180_s2 + $0xfec] ss:$16 sps:$4 sm:$0xff]  }
 0x208   : > { %4664 = vmatprep.subr.bf16.mxu1 %v6922_v1  ;;  %v6978_v1 = vld [vmem:[%s9180_s2 + $0x11ec] ss:$16 sps:$4 sm:$0xff]  }
 0x20a   : > { %4622 = vmatpush2.bf16.msra.mxu0 %v6917_v4  ;;  %v6973_v4 = vld [vmem:[%s9180_s2 + $0xfe8] ss:$16 sps:$4 sm:$0xff]  }
 0x20b   : > { %4665 = vmatpush2.bf16.msra.mxu1 %v6920_v8  ;;  %4677 = vmatprep.subr.bf16.mxu0 %v6927_v9  ;;  %v6976_v8 = vld [vmem:[%s9180_s2 + $0x11e8] ss:$16 sps:$4 sm:$0xff]   ;;  %v6981_v9 = vld [vmem:[%s9180_s2 + $0xfcc] ss:$16 sps:$4 sm:$0xff]  }
 0x20c   : > { %4720 = vmatprep.subr.bf16.mxu1 %v6930_v10  ;;  %v6984_v10 = vld [vmem:[%s9180_s2 + $0x11cc] ss:$16 sps:$4 sm:$0xff]  }
 0x20d   : > { %4624 = vmatmul.mubr.bf16.vlgmr.msra.gmra.mxu0 %v8854_v11 }
 0x20e   : > { %v3189_v32 = vpop.f32.mrf.mxu1  ;;  %4667 = vmatmul.mubr.bf16.vlgmr.msra.gmra.mxu1 %v8640_v33  ;;  %4678 = vmatpush1.bf16.msra.mxu0 %v6925_v12  ;;  %v6939_v33 = vld [vmem:[%s9180_s2 + $0xeac] ss:$16 sps:$4 sm:$0xff]   ;;  %v6979_v12 = vld [vmem:[%s9180_s2 + $0xfc8] ss:$16 sps:$4 sm:$0xff]  }
 0x20f   : > { %v8873_v14 = vadd.f32 %v3189_v32, %v8452_v52  ;;  %4721 = vmatpush1.bf16.msra.mxu1 %v6928_v50  ;;  %4679 = vmatprep.subr.bf16.mxu0 %v6933_v13  ;;  %v6942_v52 = vld [vmem:[%s9180_s2 + $0x10ac] ss:$16 sps:$4 sm:$0xff]   ;;  %v6982_v50 = vld [vmem:[%s9180_s2 + $0x11c8] ss:$16 sps:$4 sm:$0xff]   ;;  %v8994_v32 = vpop.f32.mrf.mxu0 }
 0x210   : > { %v3191_v17 = vpop.f32.mrf.mxu1  ;;  %4722 = vmatprep.subr.bf16.mxu1 %v6936_v29  ;;  %4709 = vmatprep.mubr.bf16.mxu0 %v8436_v36  ;;  %v6945_v36 = vld [vmem:[%s9180_s2 + $0xe8c] ss:$16 sps:$4 sm:$0xff]  }
 0x211   : > { %v8888_v21 = vadd.f32 %v3191_v17, %v8456_v61  ;;  %4752 = vmatprep.mubr.bf16.mxu1 %v8660_v25  ;;  %v6987_v13 = vld [vmem:[%s9180_s2 + $0xfac] ss:$16 sps:$4 sm:$0xff]  }
 0x212   : > { %v3193_v22 = vpop.f32.mrf.mxu1  ;;  %4680 = vmatpush1.bf16.msra.mxu0 %v6931_v15  ;;  %v6990_v29 = vld [vmem:[%s9180_s2 + $0x11ac] ss:$16 sps:$4 sm:$0xff]   ;;  %v6985_v15 = vld [vmem:[%s9180_s2 + $0xfa8] ss:$16 sps:$4 sm:$0xff]  }
 0x213   : > { %v8893_v23 = vadd.f32 %v3193_v22, %v8470_v6  ;;  %4723 = vmatpush1.bf16.msra.mxu1 %v6934_v16  ;;  %4681 = vmatprep.subr.bf16.mxu0 %v6939_v33  ;;  %v6948_v6 = vld [vmem:[%s9180_s2 + $0x108c] ss:$16 sps:$4 sm:$0xff]   ;;  %v6988_v16 = vld [vmem:[%s9180_s2 + $0x11a8] ss:$16 sps:$4 sm:$0xff]  }
 0x214   : > { %v3195_v61 = vpop.f32.mrf.mxu1  ;;  %4724 = vmatprep.subr.bf16.mxu1 %v6942_v52  ;;  %v6993_v17 = vld [vmem:[%s9180_s2 + $0xf8c] ss:$16 sps:$4 sm:$0xff]   ;;  %v9008_v52 = vpop.f32.mrf.mxu0  ;;  %v6991_v22 = vld [vmem:[%s9180_s2 + $0xf88] ss:$16 sps:$4 sm:$0xff]  }
 0x215   : > { %v8908_v25 = vadd.f32 %v3195_v61, %v8472_v58  ;;  %v6954_v58 = vld [vmem:[%s9180_s2 + $0x106c] ss:$16 sps:$4 sm:$0xff]  }
 0x216   : > { %4682 = vmatpush1.bf16.msra.mxu0 %v6937_v28  ;;  %v6996_v33 = vld [vmem:[%s9180_s2 + $0x118c] ss:$16 sps:$4 sm:$0xff]   ;;  %v6994_v28 = vld [vmem:[%s9180_s2 + $0x1188] ss:$16 sps:$4 sm:$0xff]  }
 0x217   : > { %4725 = vmatpush1.bf16.msra.mxu1 %v6940_v37  ;;  %4683 = vmatprep.subr.bf16.mxu0 %v6945_v36  ;;  %v6999_v37 = vld [vmem:[%s9180_s2 + $0xf6c] ss:$16 sps:$4 sm:$0xff]   ;;  %v9022_v36 = vpop.f32.mrf.mxu0 }
 0x218   : > { %4726 = vmatprep.subr.bf16.mxu1 %v6948_v6  ;;  %v7002_v61 = vld [vmem:[%s9180_s2 + $0x116c] ss:$16 sps:$4 sm:$0xff]   ;;  %v6997_v6 = vld [vmem:[%s9180_s2 + $0xf68] ss:$16 sps:$4 sm:$0xff]  }
 0x21a   : > { %4684 = vmatpush1.bf16.msra.mxu0 %v6943_v38  ;;  %v7000_v38 = vld [vmem:[%s9180_s2 + $0x1168] ss:$16 sps:$4 sm:$0xff]  }
 0x21b   : > { %4727 = vmatpush1.bf16.msra.mxu1 %v6946_v53  ;;  %4685 = vmatprep.subr.bf16.mxu0 %v6951_v24  ;;  %v7005_v53 = vld [vmem:[%s9180_s2 + $0xf4c] ss:$16 sps:$4 sm:$0xff]  }
 0x21c   : > { %4728 = vmatprep.subr.bf16.mxu1 %v6954_v58  ;;  %v7008_v24 = vld [vmem:[%s9180_s2 + $0x114c] ss:$16 sps:$4 sm:$0xff]   ;;  %v9036_v58 = vpop.f32.mrf.mxu0 }
 0x21e   : > { %4686 = vmatpush1.bf16.msra.mxu0 %v6949_v26  ;;  %v7003_v26 = vld [vmem:[%s9180_s2 + $0xf48] ss:$16 sps:$4 sm:$0xff]  }
 0x21f   : > { %4729 = vmatpush1.bf16.msra.mxu1 %v6952_v27  ;;  %4687 = vmatprep.subr.bf16.mxu0 %v6957_v18  ;;  %v7006_v27 = vld [vmem:[%s9180_s2 + $0x1148] ss:$16 sps:$4 sm:$0xff]   ;;  %v9044_v18 = vpop.f32.mrf.mxu0 }
 0x220   : > { %4730 = vmatprep.subr.bf16.mxu1 %v6960_v39  ;;  %v7011_v39 = vld [vmem:[%s9180_s2 + $0xf2c] ss:$16 sps:$4 sm:$0xff]  }
 0x222   : > { %4688 = vmatpush1.bf16.msra.mxu0 %v6955_v44  ;;  %v7014_v44 = vld [vmem:[%s9180_s2 + $0x112c] ss:$16 sps:$4 sm:$0xff]  }
 0x223   : > { %4731 = vmatpush1.bf16.msra.mxu1 %v6958_v48  ;;  %4689 = vmatprep.subr.bf16.mxu0 %v6963_v51  ;;  %v7009_v48 = vld [vmem:[%s9180_s2 + $0xf28] ss:$16 sps:$4 sm:$0xff]  }
 0x224   : > { %4732 = vmatprep.subr.bf16.mxu1 %v6966_v35  ;;  %v7012_v51 = vld [vmem:[%s9180_s2 + $0x1128] ss:$16 sps:$4 sm:$0xff]   ;;  %v9058_v35 = vpop.f32.mrf.mxu0 }
 0x226   : > { %4690 = vmatpush1.bf16.msra.mxu0 %v6961_v60  ;;  %v7017_v60 = vld [vmem:[%s9180_s2 + $0xf0c] ss:$16 sps:$4 sm:$0xff]  }
 0x227   : > { %4733 = vmatpush1.bf16.msra.mxu1 %v6964_v49  ;;  %4691 = vmatprep.subr.bf16.mxu0 %v6969_v55  ;;  %v7020_v49 = vld [vmem:[%s9180_s2 + $0x110c] ss:$16 sps:$4 sm:$0xff]   ;;  %v7015_v55 = vld [vmem:[%s9180_s2 + $0xf08] ss:$16 sps:$4 sm:$0xff]  }
 0x228   : > { %4734 = vmatprep.subr.bf16.mxu1 %v6972_v56  ;;  %v7018_v56 = vld [vmem:[%s9180_s2 + $0x1108] ss:$16 sps:$4 sm:$0xff]  }
 0x22a   : > { %4692 = vmatpush1.bf16.msra.mxu0 %v6967_v62  ;;  %v9072_v62 = vpop.f32.mrf.mxu0 }
 0x22b   : > { %4735 = vmatpush1.bf16.msra.mxu1 %v6970_v5  ;;  %4693 = vmatprep.subr.bf16.mxu0 %v6975_v0 }
 0x22c   : > { %4736 = vmatprep.subr.bf16.mxu1 %v6978_v1  ;;  %v9074_v5 = vpop.f32.mrf.mxu0 }
 0x22e   : > { %4694 = vmatpush2.bf16.msra.mxu0 %v6973_v4 }
 0x22f   : > { %4737 = vmatpush2.bf16.msra.mxu1 %v6976_v8  ;;  %4695 = vmatprep.subr.bf16.mxu0 %v6981_v9 }
 0x230   : > { %4738 = vmatprep.subr.bf16.mxu1 %v6984_v10 }
 0x232   : > { %4696 = vmatpush2.bf16.msra.mxu0 %v6979_v12 }
 0x233   : > { %4739 = vmatpush2.bf16.msra.mxu1 %v6982_v50  ;;  %4697 = vmatprep.subr.bf16.mxu0 %v6987_v13 }
 0x234   : > { %4740 = vmatprep.subr.bf16.mxu1 %v6990_v29 }
 0x236   : > { %4698 = vmatpush2.bf16.msra.mxu0 %v6985_v15 }
 0x237   : > { %4741 = vmatpush2.bf16.msra.mxu1 %v6988_v16  ;;  %4699 = vmatprep.subr.bf16.mxu0 %v6993_v17 }
 0x238   : > { %4742 = vmatprep.subr.bf16.mxu1 %v6996_v33 }
 0x23a   : > { %4700 = vmatpush2.bf16.msra.mxu0 %v6991_v22 }
 0x23b   : > { %4743 = vmatpush2.bf16.msra.mxu1 %v6994_v28  ;;  %4701 = vmatprep.subr.bf16.mxu0 %v6999_v37  ;;  %v1820_v37 = vadd.f32 %v8324_v31, %v8322_v19 }
 0x23c   : > { %4744 = vmatprep.subr.bf16.mxu1 %v7002_v61 }
 0x23e   : > { %4702 = vmatpush2.bf16.msra.mxu0 %v6997_v6  ;;  %v1863_v6 = vadd.f32 %v8378_v59, %v1820_v37  ;;  %v9109_v59 = vld [vmem:[%s9181_s3] sm:$0xf] }
 0x23f   : > { %4745 = vmatpush2.bf16.msra.mxu1 %v7000_v38  ;;  %4703 = vmatprep.subr.bf16.mxu0 %v7005_v53 }
 0x240   : > { %4746 = vmatprep.subr.bf16.mxu1 %v7008_v24 }
 0x242   : > { %4704 = vmatpush2.bf16.msra.mxu0 %v7003_v26  ;;  %v3063_v26 = vadd.f32 %v9008_v52, %v1863_v6 }
 0x243   : > { %4747 = vmatpush2.bf16.msra.mxu1 %v7006_v27  ;;  %4705 = vmatprep.subr.bf16.mxu0 %v7011_v39 }
 0x244   : > { %4748 = vmatprep.subr.bf16.mxu1 %v7014_v44 }
 0x246   : > { %4706 = vmatpush2.bf16.msra.mxu0 %v7009_v48 }
 0x247   : > { %4749 = vmatpush2.bf16.msra.mxu1 %v7012_v51  ;;  %4707 = vmatprep.subr.bf16.mxu0 %v7017_v60 }
 0x248   : > { %4750 = vmatprep.subr.bf16.mxu1 %v7020_v49 }
 0x24a   : > { %4708 = vmatpush2.bf16.msra.mxu0 %v7015_v55 }
 0x24b   : > { %4751 = vmatpush2.bf16.msra.mxu1 %v7018_v56 }
 0x24d   : > { %v3232_v0 = vpop.f32.mrf.mxu0  ;;  %4710 = vmatmul.mubr.bf16.vlgmr.msra.gmra.mxu0 %v8644_v34 }
 0x24e   : > { %v3275_v1 = vpop.f32.mrf.mxu1  ;;  %4753 = vmatmul.mubr.bf16.vlgmr.msra.gmra.mxu1 %v8854_v11  ;;  %v3233_v4 = vadd.f32 %v3232_v0, %v8873_v14 }
 0x24f   : > { %v3234_v8 = vpop.f32.mrf.mxu0 }
 0x250   : > { %v3277_v9 = vpop.f32.mrf.mxu1  ;;  %v9079_v10 = vadd.f32 %v3275_v1, %v3233_v4  ;;  %v3235_v12 = vadd.f32 %v3234_v8, %v8888_v21  ;;  %v1818_v21 = vadd.f32 %v8308_v47, %v8306_v45  ;;  %v1824_v45 = vadd.f32 %v8356_v3, %v8354_v2 }
 0x251   : > { %v3236_v50 = vpop.f32.mrf.mxu0  ;;  %v3106_v2 = vadd.f32 %v8830_v43, %v3063_v26 }
 0x252   : > { %v3279_v13 = vpop.f32.mrf.mxu1  ;;  %v9082_v29 = vadd.f32 %v3277_v9, %v3235_v12  ;;  %v3237_v15 = vadd.f32 %v3236_v50, %v8893_v23  ;;  %v1861_v61 = vadd.f32 %v8364_v7, %v1818_v21  ;;  %v1822_v23 = vadd.f32 %v8340_v41, %v8338_v63 }
 0x253   : > { %v3238_v16 = vpop.f32.mrf.mxu0  ;;  %v4775_v7 = vsub.s32 0, %v7229_v46  ;;  %v3149_v44 = vadd.f32 %v9058_v35, %v3106_v2 }
 0x254   : > { %v9085_v17 = vadd.f32 %v3279_v13, %v3237_v15  ;;  %v3239_v34 = vadd.f32 %v3238_v16, %v8908_v25  ;;  %v3281_v11 = vpop.f32.mrf.mxu1  ;;  %v3061_v53 = vadd.f32 %v8994_v32, %v1861_v61  ;;  %v1865_v24 = vadd.f32 %v8396_v20, %v1822_v23 }
 0x255   : > { %v4779_v20 = vsub.s32 1, %v7229_v46  ;;  %v1867_v32 = vadd.f32 %v8422_v30, %v1824_v45  ;;  %v4776_v51 = vrot.slane %v9109_v59, %v4775_v7 }
 0x256   : > { %v9088_v33 = vadd.f32 %v3281_v11, %v3239_v34  ;;  %v3065_v47 = vadd.f32 %v9022_v36, %v1865_v24  ;;  %v3104_v63 = vadd.f32 %v8816_v54, %v3061_v53 }
 0x257   : > { %v3067_v39 = vadd.f32 %v9036_v58, %v1867_v32  ;;  %v4780_v43 = vrot.slane %v9109_v59, %v4779_v20 }
 0x258   : > { %v3147_v52 = vadd.f32 %v9044_v18, %v3104_v63  ;;  %v3108_v54 = vadd.f32 %v8844_v57, %v3065_v47 }
 0x259   : > { %v3110_v58 = vadd.f32 %v8862_v42, %v3067_v39 }
 0x25a   : > { %v3151_v18 = vadd.f32 %v9072_v62, %v3108_v54 }
 0x25b   : > { %v3153_v50 = vadd.f32 %v9074_v5, %v3110_v58 }
 0x28d   : > { %v4539_v14 = vpop.f32.mrf.mxu0 }
 0x28e   : > { %v4582_v22 = vpop.f32.mrf.mxu1 }
 0x28f   : > { %v4541_v28 = vpop.f32.mrf.mxu0  ;;  %v4583_v41 = vadd.f32 %v4582_v22, %v4539_v14 }
 0x290   : > { %v4584_v25 = vpop.f32.mrf.mxu1 }
 0x291   : > { %v4543_v38 = vpop.f32.mrf.mxu0  ;;  %v4585_v36 = vadd.f32 %v4584_v25, %v4541_v28 }
 0x292   : > { %v4586_v19 = vpop.f32.mrf.mxu1 }
 0x293   : > { %v4545_v31 = vpop.f32.mrf.mxu0  ;;  %v4587_v49 = vadd.f32 %v4586_v19, %v4543_v38 }
 0x294   : > { %v4588_v48 = vpop.f32.mrf.mxu1 }
 0x295   : > { %v4589_v0 = vadd.f32 %v4588_v48, %v4545_v31 }
 0x2cd   : > { %v4625_v3 = vpop.f32.mrf.mxu0 }
 0x2ce   : > { %v4626_v27 = vadd.f32 %v4625_v3, %v4583_v41 }
 0x2cf   : > { %v4627_v60 = vpop.f32.mrf.mxu0 }
 0x2d0   : > { %v4763_v30 = vadd.f32 %v4626_v27, %v3147_v52  ;;  %v4628_v55 = vadd.f32 %v4627_v60, %v4585_v36 }
 0x2d1   : > { %v4629_v56 = vpop.f32.mrf.mxu0 }
 0x2d2   : > { %v4764_v1 = vadd.f32 %v4628_v55, %v3149_v44  ;;  %v4630_v57 = vadd.f32 %v4629_v56, %v4587_v49  ;;  %v4793_v35 = vadd.f32 %v4776_v51, %v4763_v30  ;;  %v4668_v49 = vpop.f32.mrf.mxu1 }
 0x2d3   : > { %v4631_v4 = vpop.f32.mrf.mxu0 }
 0x2d4   : > { %v4794_v8 = vadd.f32 %v4780_v43, %v4764_v1  ;;  %v4767_v9 = vadd.f32 %v4630_v57, %v3151_v18  ;;  %v4632_v12 = vadd.f32 %v4631_v4, %v4589_v0  ;;  %v4895_v42 = vmul.f32 %v4793_v35, %v4793_v35  ;;  %v4670_v30 = vpop.f32.mrf.mxu1 }
 0x2d5   : > { %v4783_v0 = vsub.s32 2, %v7229_v46  ;;  %v4787_v57 = vsub.s32 3, %v7229_v46 }
 0x2d6   : > { %v4809_v62 = vcombine.low %v4793_v35, %v4794_v8  ;;  %v4810_v13 = vcombine.high %v4793_v35, %v4794_v8  ;;  %v4797_v15 = vadd.f32 %v4776_v51, %v4767_v9  ;;  %v4768_v16 = vadd.f32 %v4632_v12, %v3153_v50  ;;  %v4672_v55 = vpop.f32.mrf.mxu1 }
 0x2d7   : > { %v4896_v5 = vmul.f32 %v4794_v8, %v4794_v8  ;;  %v4784_v9 = vrot.slane %v9109_v59, %v4783_v0 }
 0x2d8   : > { %4825 = vst [vmem:[%s9127_s22] sm:$0xff] %v4809_v62  ;;  %4827 = vst [vmem:[%s9127_s22 + $0x10] sm:$0xff] %v4810_v13  ;;  %v4833_v34 = vadd.f32 %v4797_v15, %v4793_v35  ;;  %v4899_v11 = vmul.f32 %v4797_v15, %v4797_v15  ;;  %v4798_v14 = vadd.f32 %v4780_v43, %v4768_v16  ;;  %v4674_v43 = vpop.f32.mrf.mxu1 }
 0x2da   : > { %v4834_v22 = vrot.slane %v4833_v34, 4  ;;  %v4903_v28 = vadd.f32 %v4899_v11, %v4895_v42  ;;  %v4813_v21 = vcombine.low %v4797_v15, %v4798_v14  ;;  %v4814_v37 = vcombine.high %v4797_v15, %v4798_v14 }
 0x2db   : > { %v4840_v61 = vadd.f32 %v4798_v14, %v4794_v8  ;;  %v4900_v23 = vmul.f32 %v4798_v14, %v4798_v14  ;;  %v4788_v15 = vrot.slane %v9109_v59, %v4787_v57 }
 0x2dc   : > { %v4835_v6 = vadd.f32 %v4834_v22, %v4833_v34  ;;  %v4904_v25 = vrot.slane %v4903_v28, 4  ;;  %4829 = vst [vmem:[%s9127_s22 + $0x20] sm:$0xff] %v4813_v21  ;;  %4831 = vst [vmem:[%s9127_s22 + $0x30] sm:$0xff] %v4814_v37 }
 0x2dd   : > { %v4841_v38 = vrot.slane %v4840_v61, 4  ;;  %v4910_v53 = vadd.f32 %v4900_v23, %v4896_v5 }
 0x2de   : > { %v4836_v24 = vrot.slane %v4835_v6, 2  ;;  %v4905_v26 = vadd.f32 %v4904_v25, %v4903_v28 }
 0x2df   : > { %v4842_v45 = vadd.f32 %v4841_v38, %v4840_v61  ;;  %v4911_v47 = vrot.slane %v4910_v53, 4 }
 0x2e0   : > { %v4837_v19 = vadd.f32 %v4836_v24, %v4835_v6  ;;  %v4906_v31 = vrot.slane %v4905_v26, 2 }
 0x2e1   : > { %v4843_v7 = vrot.slane %v4842_v45, 2  ;;  %v4912_v63 = vadd.f32 %v4911_v47, %v4910_v53 }
 0x2e2   : > { %v4907_v41 = vadd.f32 %v4906_v31, %v4905_v26  ;;  %v4838_v20 = vrot.slane %v4837_v19, 1 }
 0x2e3   : > { %v4844_v32 = vadd.f32 %v4843_v7, %v4842_v45  ;;  %v4913_v2 = vrot.slane %v4912_v63, 2 }
 0x2e4   : > { %v4908_v3 = vrot.slane %v4907_v41, 1  ;;  %v9133_v27 = vadd.f32 %v4838_v20, %v4837_v19 }
 0x2e5   : > { %v4845_v52 = vrot.slane %v4844_v32, 1  ;;  %v4914_v36 = vadd.f32 %v4913_v2, %v4912_v63 }
 0x2e6   : > { %v9137_v44 = vadd.f32 %v4908_v3, %v4907_v41 }
 0x2e7   : > { %v9135_v54 = vadd.f32 %v4845_v52, %v4844_v32  ;;  %v4915_v39 = vrot.slane %v4914_v36, 1  ;;  %v7046_v32 = vmov 1966171168  }
 0x2e8   : > { %v4868_v2 = vunpack.c.l.s4 %v7046_v32 }
 0x2e9   : > { %v4865_v48 = vcombine.low %v9133_v27, %v9135_v54  ;;  %v9141_v51 = vadd.f32 %v4915_v39, %v4914_v36 }
 0x2eb   : > { %v4935_v60 = vcombine.low %v9137_v44, %v9141_v51 }
 0x30d   : > { %v4711_v56 = vpop.f32.mrf.mxu0 }
 0x30e   : > { %v4754_v18 = vpop.f32.mrf.mxu1  ;;  %v4712_v1 = vadd.f32 %v4711_v56, %v4668_v49 }
 0x30f   : > { %v4713_v58 = vpop.f32.mrf.mxu0 }
 0x310   : > { %v4756_v4 = vpop.f32.mrf.mxu1  ;;  %v4755_v35 = vadd.f32 %v4754_v18, %v4712_v1  ;;  %v4714_v8 = vadd.f32 %v4713_v58, %v4670_v30 }
 0x311   : > { %v4715_v12 = vpop.f32.mrf.mxu0 }
 0x312   : > { %v4758_v50 = vpop.f32.mrf.mxu1  ;;  %v4765_v62 = vadd.f32 %v4755_v35, %v9079_v10  ;;  %v4757_v13 = vadd.f32 %v4756_v4, %v4714_v8  ;;  %v4716_v16 = vadd.f32 %v4715_v12, %v4672_v55 }
 0x313   : > { %v4717_v42 = vpop.f32.mrf.mxu0 }
 0x314   : > { %v4766_v34 = vadd.f32 %v4757_v13, %v9082_v29  ;;  %v4759_v11 = vadd.f32 %v4758_v50, %v4716_v16  ;;  %v4718_v14 = vadd.f32 %v4717_v42, %v4674_v43  ;;  %v4760_v5 = vpop.f32.mrf.mxu1  ;;  %v4795_v22 = vadd.f32 %v4784_v9, %v4765_v62 }
 0x315   : > { %v4869_v43 = vunpack.c.0.s8 %v4868_v2 }
 0x316   : > { %v4796_v28 = vadd.f32 %v4788_v15, %v4766_v34  ;;  %v4769_v21 = vadd.f32 %v4759_v11, %v9085_v17  ;;  %v4761_v37 = vadd.f32 %v4760_v5, %v4718_v14  ;;  %v4897_v59 = vmul.f32 %v4795_v22, %v4795_v22 }
 0x317   : > { %v4872_v4 = vsub.s32 %v4869_v43, %v7229_v46 }
 0x318   : > { %v4811_v61 = vcombine.low %v4795_v22, %v4796_v28  ;;  %v4812_v23 = vcombine.high %v4795_v22, %v4796_v28  ;;  %v4799_v10 = vadd.f32 %v4784_v9, %v4769_v21  ;;  %v4770_v6 = vadd.f32 %v4761_v37, %v9088_v33 }
 0x319   : > { %v4898_v53 = vmul.f32 %v4796_v28, %v4796_v28  ;;  %v4873_v13 = vrot.slane %v4865_v48, %v4872_v4  ;;  %v4943_v42 = vrot.slane %v4935_v60, %v4872_v4 }
 0x31a   : > { %4826 = vst [vmem:[%s9127_s22 + $0x8] sm:$0xff] %v4811_v61  ;;  %4828 = vst [vmem:[%s9127_s22 + $0x18] sm:$0xff] %v4812_v23  ;;  %v4847_v25 = vadd.f32 %v4799_v10, %v4795_v22  ;;  %v4901_v29 = vmul.f32 %v4799_v10, %v4799_v10  ;;  %v4800_v38 = vadd.f32 %v4788_v15, %v4770_v6 }
 0x31c   : > { %v4848_v24 = vrot.slane %v4847_v25, 4  ;;  %v4917_v26 = vadd.f32 %v4901_v29, %v4897_v59  ;;  %v4815_v45 = vcombine.low %v4799_v10, %v4800_v38  ;;  %v4816_v47 = vcombine.high %v4799_v10, %v4800_v38 }
 0x31d   : > { %v4854_v17 = vadd.f32 %v4800_v38, %v4796_v28  ;;  %v4902_v19 = vmul.f32 %v4800_v38, %v4800_v38 }
 0x31e   : > { %v4849_v31 = vadd.f32 %v4848_v24, %v4847_v25  ;;  %v4918_v7 = vrot.slane %v4917_v26, 4  ;;  %4830 = vst [vmem:[%s9127_s22 + $0x28] sm:$0xff] %v4815_v45  ;;  %4832 = vst [vmem:[%s9127_s22 + $0x38] sm:$0xff] %v4816_v47 }
 0x31f   : > { %v4855_v33 = vrot.slane %v4854_v17, 4  ;;  %v4924_v63 = vadd.f32 %v4902_v19, %v4898_v53 }
 0x320   : > { %v4850_v41 = vrot.slane %v4849_v31, 2  ;;  %v4919_v20 = vadd.f32 %v4918_v7, %v4917_v26 }
 0x321   : > { %v4856_v3 = vadd.f32 %v4855_v33, %v4854_v17  ;;  %v4925_v52 = vrot.slane %v4924_v63, 4 }
 0x322   : > { %v4851_v36 = vadd.f32 %v4850_v41, %v4849_v31  ;;  %v4920_v39 = vrot.slane %v4919_v20, 2 }
 0x323   : > { %v4857_v49 = vrot.slane %v4856_v3, 2  ;;  %v4926_v30 = vadd.f32 %v4925_v52, %v4924_v63 }
 0x324   : > { %v4921_v55 = vadd.f32 %v4920_v39, %v4919_v20  ;;  %v4852_v56 = vrot.slane %v4851_v36, 1 }
 0x325   : > { %v4858_v18 = vadd.f32 %v4857_v49, %v4856_v3  ;;  %v4927_v0 = vrot.slane %v4926_v30, 2 }
 0x326   : > { %v4922_v1 = vrot.slane %v4921_v55, 1  ;;  %v4853_v35 = vadd.f32 %v4852_v56, %v4851_v36 }
 0x327   : > { %v4859_v57 = vrot.slane %v4858_v18, 1  ;;  %v4928_v58 = vadd.f32 %v4927_v0, %v4926_v30 }
 0x328   : > { %v4923_v12 = vadd.f32 %v4922_v1, %v4921_v55 }
 0x329   : > { %v4860_v8 = vadd.f32 %v4859_v57, %v4858_v18  ;;  %v4929_v9 = vrot.slane %v4928_v58, 1 }
 0x32b   : > { %v4866_v50 = vcombine.low %v4853_v35, %v4860_v8  ;;  %v4930_v62 = vadd.f32 %v4929_v9, %v4928_v58 }
 0x32d   : > { %v4880_v15 = vrot.slane %v4866_v50, %v4872_v4  ;;  %v4936_v16 = vcombine.low %v4923_v12, %v4930_v62 }
 0x32f   : > { %v4881_v34 = vcombine.low %v4873_v13, %v4880_v15  ;;  %v4950_v11 = vrot.slane %v4936_v16, %v4872_v4 }
 0x331   : > { %v4888_v46 = vrot.slane %v4881_v34, %v4872_v4  ;;  %v4951_v14 = vcombine.low %v4943_v42, %v4950_v11 }
 0x333   : > { %4894 = vst.msk [vmem:[%s292_s12] ss:$2 sm:$0xf] %vm4892_vm0, %v4888_v46  ;;  %v4958_v27 = vrot.slane %v4951_v14, %v4872_v4 }
 0x335   : > { %6101 = vst.msk [vmem:[%s292_s12 + $0x1] ss:$2 sm:$0xf] %vm4892_vm0, %v4958_v27 }
 0x336 PF: > { %s16_s20 = sadd.s32 1, %s7043_s20   ;;  %s9184_s18 = smov %s7039_s19 }
 0x337   : > { %p13_p5 = scmp.ge.s32.totalorder %s16_s20, 4   ;;  %s9185_s19 = smov %s9187_s21 }
 0x339   :  { %15 = sbr.rel (!%p13_p5) target bundleno = 2 (0x2), region = 87 }

// kernel: discriminator_forward.17
= control target key start
LH: loop header
LB: loop body
LE: loop exit
PB: predicated region body
PF: predicated region fallthrough
CT: control target
= control target key end

     0   :  { %v7623_v22 = vmov 1966171168   ;;  %v1066_v24 = vlaneseq  ;;  %s9324_s1 = inlined_call_operand.vmem [shape: bf16[8192,128], index: 1, kind: input, shape index: {}]   ;;  %s9325_s0 = inlined_call_operand.vmem [shape: bf16[2,8192], index: 0, kind: input, shape index: {}]   ;;  %s9326_s2 = inlined_call_operand.vmem [shape: f32[1,128], index: 2, kind: input, shape index: {}]   ;;  %s9327_s3 = inlined_call_operand.vmem [shape: f32[2,128], index: 3, kind: output, shape index: {}]  }
   0x1   :  { %v7099_v0 = vld [vmem:[%s9324_s1 + $0x78] sm:$0xff]   ;;  %v7103_v4 = vld [vmem:[%s9324_s1 + $0x70] sm:$0xff]   ;;  %v7107_v8 = vld [vmem:[%s9324_s1 + $0x68] sm:$0xff]   ;;  %v1064_v23 = vunpack.c.l.s4 %v7623_v22 }
   0x2   :  { %v7100_v1 = vld [vmem:[%s9324_s1 + $0xf8] sm:$0xff]   ;;  %6394 = vmatprep.subr.bf16.mxu0 %v7099_v0  ;;  %v7104_v5 = vld [vmem:[%s9324_s1 + $0xf0] sm:$0xff]   ;;  %v7108_v9 = vld [vmem:[%s9324_s1 + $0xe8] sm:$0xff]   ;;  %v1067_v30 = vshrl.u32 %v1066_v24, 7 }
   0x3   :  { %v7101_v2 = vld [vmem:[%s9324_s1 + $0x38] sm:$0xff]   ;;  %6416 = vmatprep.subr.bf16.mxu1 %v7100_v1  ;;  %v7105_v6 = vld [vmem:[%s9324_s1 + $0x30] sm:$0xff]   ;;  %v7109_v10 = vld [vmem:[%s9324_s1 + $0x28] sm:$0xff]   ;;  %v1065_v29 = vunpack.c.0.s8 %v1064_v23 }
   0x4   :  { %v7102_v3 = vld [vmem:[%s9324_s1 + $0xb8] sm:$0xff]   ;;  %6395 = vmatpush3.bf16.msra.mxu0 %v7101_v2  ;;  %v7106_v7 = vld [vmem:[%s9324_s1 + $0xb0] sm:$0xff]   ;;  %v7110_v11 = vld [vmem:[%s9324_s1 + $0xa8] sm:$0xff]  }
   0x5   :  { %6417 = vmatpush3.bf16.msra.mxu1 %v7102_v3  ;;  %6396 = vmatprep.subr.bf16.mxu0 %v7103_v4  ;;  %v7111_v12 = vld [vmem:[%s9324_s1 + $0x60] sm:$0xff]   ;;  %v7115_v16 = vld [vmem:[%s9324_s1 + $0x58] sm:$0xff]   ;;  %v7119_v20 = vld [vmem:[%s9324_s1 + $0x50] sm:$0xff]   ;;  %v7734_v35 = vsub.s32 %v1065_v29, %v1067_v30 }
   0x6   :  { %6418 = vmatprep.subr.bf16.mxu1 %v7104_v5  ;;  %v7112_v13 = vld [vmem:[%s9324_s1 + $0xe0] sm:$0xff]   ;;  %v7116_v17 = vld [vmem:[%s9324_s1 + $0xd8] sm:$0xff]   ;;  %v7120_v21 = vld [vmem:[%s9324_s1 + $0xd0] sm:$0xff]  }
   0x7   :  { %v7113_v14 = vld [vmem:[%s9324_s1 + $0x20] sm:$0xff]   ;;  %v7117_v18 = vld [vmem:[%s9324_s1 + $0x18] sm:$0xff]   ;;  %v7121_v25 = vld [vmem:[%s9324_s1 + $0x10] sm:$0xff]  }
   0x8   :  { %6397 = vmatpush3.bf16.msra.mxu0 %v7105_v6  ;;  %v7114_v15 = vld [vmem:[%s9324_s1 + $0xa0] sm:$0xff]   ;;  %v7118_v19 = vld [vmem:[%s9324_s1 + $0x98] sm:$0xff]   ;;  %v7122_v26 = vld [vmem:[%s9324_s1 + $0x90] sm:$0xff]  }
   0x9   :  { %6419 = vmatpush3.bf16.msra.mxu1 %v7106_v7  ;;  %6398 = vmatprep.subr.bf16.mxu0 %v7107_v8  ;;  %v7123_v27 = vld [vmem:[%s9324_s1 + $0x48] sm:$0xff]   ;;  %v7127_v33 = vld [vmem:[%s9324_s1 + $0x40] sm:$0xff]   ;;  %v7132_v41 = vld [vmem:[%s9324_s1 + $0x178] sm:$0xff]  }
   0xa   :  { %6420 = vmatprep.subr.bf16.mxu1 %v7108_v9  ;;  %v7124_v28 = vld [vmem:[%s9324_s1 + $0xc8] sm:$0xff]   ;;  %v7128_v34 = vld [vmem:[%s9324_s1 + $0xc0] sm:$0xff]   ;;  %v7133_v42 = vld [vmem:[%s9324_s1 + $0x1f8] sm:$0xff]  }
   0xb   :  { %v7125_v31 = vld [vmem:[%s9324_s1 + $0x8] sm:$0xff]   ;;  %v7129_v36 = vld [vmem:[%s9324_s1] sm:$0xff]   ;;  %v7134_v46 = vld [vmem:[%s9324_s1 + $0x138] sm:$0xff]  }
   0xc   :  { %6399 = vmatpush3.bf16.msra.mxu0 %v7109_v10  ;;  %v7126_v32 = vld [vmem:[%s9324_s1 + $0x88] sm:$0xff]   ;;  %v7130_v37 = vld [vmem:[%s9324_s1 + $0x80] sm:$0xff]   ;;  %v7135_v48 = vld [vmem:[%s9324_s1 + $0x1b8] sm:$0xff]  }
   0xd   :  { %6421 = vmatpush3.bf16.msra.mxu1 %v7110_v11  ;;  %6400 = vmatprep.subr.bf16.mxu0 %v7111_v12  ;;  %v15_v38 = vld [vmem:[%s9325_s0] sm:$0xff]  ;;  %v7136_v51 = vld [vmem:[%s9324_s1 + $0x170] sm:$0xff]   ;;  %v7140_v58 = vld [vmem:[%s9324_s1 + $0x168] sm:$0xff]  }
   0xe   :  { %6422 = vmatprep.subr.bf16.mxu1 %v7112_v13  ;;  %v1062_v39 = vcombine.high %v15_v38, %v15_v38  ;;  %v1069_v40 = vrot.slane %v15_v38, %v7734_v35  ;;  %v7137_v53 = vld [vmem:[%s9324_s1 + $0x1f0] sm:$0xff]   ;;  %v7141_v59 = vld [vmem:[%s9324_s1 + $0x1e8] sm:$0xff]   ;;  %v7144_v62 = vld [vmem:[%s9324_s1 + $0x160] sm:$0xff]  }
   0xf   :  { %v7138_v55 = vld [vmem:[%s9324_s1 + $0x130] sm:$0xff]   ;;  %v7142_v60 = vld [vmem:[%s9324_s1 + $0x128] sm:$0xff]   ;;  %v7145_v63 = vld [vmem:[%s9324_s1 + $0x1e0] sm:$0xff]  }
  0x10   :  { %6401 = vmatpush3.bf16.msra.mxu0 %v7113_v14  ;;  %v1077_v43 = vcombine.high %v1069_v40, %v1069_v40  ;;  %v1085_v44 = vrot.slane %v1069_v40, %v7734_v35  ;;  %v7754_v45 = vrot.slane %v1062_v39, %v7734_v35  ;;  %v7139_v56 = vld [vmem:[%s9324_s1 + $0x1b0] sm:$0xff]   ;;  %v7143_v61 = vld [vmem:[%s9324_s1 + $0x1a8] sm:$0xff]   ;;  %v7146_v0 = vld [vmem:[%s9324_s1 + $0x120] sm:$0xff]  }
  0x11   :  { %6423 = vmatpush3.bf16.msra.mxu1 %v7114_v15  ;;  %6402 = vmatprep.subr.bf16.mxu0 %v7115_v16  ;;  %v7147_v1 = vld [vmem:[%s9324_s1 + $0x1a0] sm:$0xff]   ;;  %v7148_v2 = vld [vmem:[%s9324_s1 + $0x158] sm:$0xff]   ;;  %v7152_v6 = vld [vmem:[%s9324_s1 + $0x150] sm:$0xff]  }
  0x12   :  { %6424 = vmatprep.subr.bf16.mxu1 %v7116_v17  ;;  %v1099_v47 = vrot.slane %v1077_v43, %v7734_v35  ;;  %v1078_v49 = vcombine.high %v7754_v45, %v7754_v45  ;;  %v1107_v50 = vcombine.high %v1085_v44, %v1085_v44  ;;  %v7149_v3 = vld [vmem:[%s9324_s1 + $0x1d8] sm:$0xff]   ;;  %v7153_v7 = vld [vmem:[%s9324_s1 + $0x1d0] sm:$0xff]   ;;  %v7156_v10 = vld [vmem:[%s9324_s1 + $0x148] sm:$0xff]  }
  0x13   :  { %v7150_v4 = vld [vmem:[%s9324_s1 + $0x118] sm:$0xff]   ;;  %v7154_v8 = vld [vmem:[%s9324_s1 + $0x110] sm:$0xff]   ;;  %v7157_v11 = vld [vmem:[%s9324_s1 + $0x1c8] sm:$0xff]  }
  0x14   :  { %6403 = vmatpush3.bf16.msra.mxu0 %v7117_v18  ;;  %4622 = vmatprep.mubr.bf16.mxu0 %v1099_v47  ;;  %v1109_v52 = vcombine.high %v1099_v47, %v1099_v47  ;;  %v1106_v54 = vrot.slane %v1078_v49, %v7734_v35  ;;  %v7151_v5 = vld [vmem:[%s9324_s1 + $0x198] sm:$0xff]   ;;  %v7155_v9 = vld [vmem:[%s9324_s1 + $0x190] sm:$0xff]   ;;  %v7158_v12 = vld [vmem:[%s9324_s1 + $0x108] sm:$0xff]   ;;  %v1092_v18 = vrot.slane %v7754_v45, %v7734_v35 }
  0x15   :  { %6425 = vmatpush3.bf16.msra.mxu1 %v7118_v19  ;;  %6404 = vmatprep.subr.bf16.mxu0 %v7119_v20  ;;  %v7159_v13 = vld [vmem:[%s9324_s1 + $0x188] sm:$0xff]   ;;  %v7160_v14 = vld [vmem:[%s9324_s1 + $0x140] sm:$0xff]   ;;  %v7164_v19 = vld [vmem:[%s9324_s1 + $0x278] sm:$0xff]  }
  0x16   :  { %6426 = vmatprep.subr.bf16.mxu1 %v7120_v21  ;;  %4662 = vmatprep.mubr.bf16.mxu1 %v1109_v52  ;;  %v1110_v57 = vcombine.high %v1106_v54, %v1106_v54  ;;  %v7161_v15 = vld [vmem:[%s9324_s1 + $0x1c0] sm:$0xff]   ;;  %v7165_v20 = vld [vmem:[%s9324_s1 + $0x2f8] sm:$0xff]   ;;  %v1108_v23 = vcombine.high %v1092_v18, %v1092_v18  ;;  %v7168_v24 = vld [vmem:[%s9324_s1 + $0x270] sm:$0xff]  }
  0x17   :  { %v7162_v16 = vld [vmem:[%s9324_s1 + $0x100] sm:$0xff]   ;;  %v7166_v21 = vld [vmem:[%s9324_s1 + $0x238] sm:$0xff]   ;;  %v7173_v29 = vld [vmem:[%s9324_s1 + $0x2e8] sm:$0xff]  }
  0x18   :  { %6405 = vmatpush3.bf16.msra.mxu0 %v7121_v25  ;;  %v7163_v17 = vld [vmem:[%s9324_s1 + $0x180] sm:$0xff]   ;;  %v7167_v22 = vld [vmem:[%s9324_s1 + $0x2b8] sm:$0xff]   ;;  %v7169_v25 = vld [vmem:[%s9324_s1 + $0x2f0] sm:$0xff]  }
  0x19   :  { %6427 = vmatpush3.bf16.msra.mxu1 %v7122_v26  ;;  %6406 = vmatprep.subr.bf16.mxu0 %v7123_v27  ;;  %v7170_v26 = vld [vmem:[%s9324_s1 + $0x230] sm:$0xff]   ;;  %v7174_v30 = vld [vmem:[%s9324_s1 + $0x228] sm:$0xff]   ;;  %v7181_v38 = vld [vmem:[%s9324_s1 + $0x2d8] sm:$0xff]  }
  0x1a   :  { %6428 = vmatprep.subr.bf16.mxu1 %v7124_v28  ;;  %v7171_v27 = vld [vmem:[%s9324_s1 + $0x2b0] sm:$0xff]   ;;  %v7172_v28 = vld [vmem:[%s9324_s1 + $0x268] sm:$0xff]   ;;  %v7182_v39 = vld [vmem:[%s9324_s1 + $0x218] sm:$0xff]  }
  0x1b   :  { %v7183_v40 = vld [vmem:[%s9324_s1 + $0x298] sm:$0xff]   ;;  %v7186_v43 = vld [vmem:[%s9324_s1 + $0x210] sm:$0xff]   ;;  %v7188_v45 = vld [vmem:[%s9324_s1 + $0x248] sm:$0xff]  }
  0x1c   :  { %6407 = vmatpush3.bf16.msra.mxu0 %v7125_v31  ;;  %v7175_v31 = vld [vmem:[%s9324_s1 + $0x2a8] sm:$0xff]   ;;  %v7192_v49 = vld [vmem:[%s9324_s1 + $0x240] sm:$0xff]  }
  0x1d   :  { %6429 = vmatpush3.bf16.msra.mxu1 %v7126_v32  ;;  %6408 = vmatprep.subr.bf16.mxu0 %v7127_v33  ;;  %v7176_v32 = vld [vmem:[%s9324_s1 + $0x260] sm:$0xff]   ;;  %v7190_v47 = vld [vmem:[%s9324_s1 + $0x208] sm:$0xff]  }
  0x1e   :  { %6430 = vmatprep.subr.bf16.mxu1 %v7128_v34  ;;  %v7177_v33 = vld [vmem:[%s9324_s1 + $0x2e0] sm:$0xff]   ;;  %v16_v52 = vld [vmem:[%s9325_s0 + $0x8] sm:$0xff] }
  0x1f   :  { %v7178_v34 = vld [vmem:[%s9324_s1 + $0x220] sm:$0xff]  }
  0x20   :  { %6409 = vmatpush3.bf16.msra.mxu0 %v7129_v36  ;;  %v7179_v36 = vld [vmem:[%s9324_s1 + $0x2a0] sm:$0xff]  }
  0x21   :  { %6431 = vmatpush3.bf16.msra.mxu1 %v7130_v37  ;;  %6438 = vmatprep.subr.bf16.mxu0 %v7132_v41  ;;  %v7180_v37 = vld [vmem:[%s9324_s1 + $0x258] sm:$0xff]   ;;  %v7184_v41 = vld [vmem:[%s9324_s1 + $0x250] sm:$0xff]  }
  0x22   :  { %6460 = vmatprep.subr.bf16.mxu1 %v7133_v42  ;;  %v7185_v42 = vld [vmem:[%s9324_s1 + $0x2d0] sm:$0xff]  }
  0x23   :  { %4623 = vmatmul.mubr.bf16.vlgmr.msra.gmra.mxu0 %v1085_v44  ;;  %v7187_v44 = vld [vmem:[%s9324_s1 + $0x290] sm:$0xff]  }
  0x24   :  { %6439 = vmatpush3.bf16.msra.mxu0 %v7134_v46  ;;  %4663 = vmatmul.mubr.bf16.vlgmr.msra.gmra.mxu1 %v1107_v50  ;;  %v7189_v46 = vld [vmem:[%s9324_s1 + $0x2c8] sm:$0xff]   ;;  %v7193_v50 = vld [vmem:[%s9324_s1 + $0x2c0] sm:$0xff]  }
  0x25   :  { %6440 = vmatprep.subr.bf16.mxu0 %v7136_v51  ;;  %6461 = vmatpush3.bf16.msra.mxu1 %v7135_v48  ;;  %v7191_v48 = vld [vmem:[%s9324_s1 + $0x288] sm:$0xff]   ;;  %v7194_v51 = vld [vmem:[%s9324_s1 + $0x200] sm:$0xff]  }
  0x26   :  { %4702 = vmatprep.mubr.bf16.mxu0 %v1106_v54  ;;  %6462 = vmatprep.subr.bf16.mxu1 %v7137_v53  ;;  %v7195_v53 = vld [vmem:[%s9324_s1 + $0x280] sm:$0xff]   ;;  %v1118_v54 = vrot.slane %v16_v52, %v7734_v35 }
  0x27   :  { %4742 = vmatprep.mubr.bf16.mxu1 %v1110_v57 }
  0x28   :  { %6441 = vmatpush3.bf16.msra.mxu0 %v7138_v55  ;;  %v1111_v55 = vcombine.high %v16_v52, %v16_v52  ;;  %v1126_v57 = vcombine.high %v1118_v54, %v1118_v54  ;;  %v7245_v52 = vld [vmem:[%s9324_s1 + $0x458] sm:$0xff]  }
  0x29   :  { %6442 = vmatprep.subr.bf16.mxu0 %v7140_v58  ;;  %6463 = vmatpush3.bf16.msra.mxu1 %v7139_v56  ;;  %v7196_v56 = vld [vmem:[%s9324_s1 + $0x378] sm:$0xff]   ;;  %v1134_v58 = vrot.slane %v1118_v54, %v7734_v35 }
  0x2a   :  { %6464 = vmatprep.subr.bf16.mxu1 %v7141_v59  ;;  %v7197_v59 = vld [vmem:[%s9324_s1 + $0x3f8] sm:$0xff]  }
  0x2b   :  { %v7247_v54 = vld [vmem:[%s9324_s1 + $0x418] sm:$0xff]  }
  0x2c   :  { %6443 = vmatpush3.bf16.msra.mxu0 %v7142_v60  ;;  %v7960_v60 = vrot.slane %v1111_v55, %v7734_v35  ;;  %v7248_v55 = vld [vmem:[%s9324_s1 + $0x498] sm:$0xff]  }
  0x2d   :  { %6444 = vmatprep.subr.bf16.mxu0 %v7144_v62  ;;  %6465 = vmatpush3.bf16.msra.mxu1 %v7143_v61  ;;  %v7198_v61 = vld [vmem:[%s9324_s1 + $0x338] sm:$0xff]   ;;  %v1148_v62 = vrot.slane %v1126_v57, %v7734_v35  ;;  %v7250_v57 = vld [vmem:[%s9324_s1 + $0x4d0] sm:$0xff]  }
  0x2e   :  { %6466 = vmatprep.subr.bf16.mxu1 %v7145_v63  ;;  %v7199_v63 = vld [vmem:[%s9324_s1 + $0x3b8] sm:$0xff]  }
  0x30   :  { %6445 = vmatpush3.bf16.msra.mxu0 %v7146_v0  ;;  %v1127_v0 = vcombine.high %v7960_v60, %v7960_v60 }
  0x31   :  { %6446 = vmatprep.subr.bf16.mxu0 %v7148_v2  ;;  %6467 = vmatpush3.bf16.msra.mxu1 %v7147_v1  ;;  %v1156_v1 = vcombine.high %v1134_v58, %v1134_v58  ;;  %v7200_v2 = vld [vmem:[%s9324_s1 + $0x370] sm:$0xff]  }
  0x32   :  { %6468 = vmatprep.subr.bf16.mxu1 %v7149_v3  ;;  %v1158_v3 = vcombine.high %v1148_v62, %v1148_v62 }
  0x34   :  { %6447 = vmatpush3.bf16.msra.mxu0 %v7150_v4  ;;  %v7201_v4 = vld [vmem:[%s9324_s1 + $0x3f0] sm:$0xff]  }
  0x35   :  { %6448 = vmatprep.subr.bf16.mxu0 %v7152_v6  ;;  %6469 = vmatpush3.bf16.msra.mxu1 %v7151_v5  ;;  %v1155_v5 = vrot.slane %v1127_v0, %v7734_v35  ;;  %v7202_v6 = vld [vmem:[%s9324_s1 + $0x330] sm:$0xff]   ;;  %v7257_v0 = vld [vmem:[%s9324_s1 + $0x440] sm:$0xff]  }
  0x36   :  { %6470 = vmatprep.subr.bf16.mxu1 %v7153_v7  ;;  %v7203_v7 = vld [vmem:[%s9324_s1 + $0x3b0] sm:$0xff]  }
  0x38   :  { %6449 = vmatpush3.bf16.msra.mxu0 %v7154_v8  ;;  %v1159_v8 = vcombine.high %v1155_v5, %v1155_v5 }
  0x39   :  { %6450 = vmatprep.subr.bf16.mxu0 %v7156_v10  ;;  %6471 = vmatpush3.bf16.msra.mxu1 %v7155_v9  ;;  %v7204_v9 = vld [vmem:[%s9324_s1 + $0x368] sm:$0xff]  }
  0x3a   :  { %6472 = vmatprep.subr.bf16.mxu1 %v7157_v11  ;;  %v7205_v10 = vld [vmem:[%s9324_s1 + $0x3e8] sm:$0xff]  }
  0x3b   :  { %v7206_v11 = vld [vmem:[%s9324_s1 + $0x328] sm:$0xff]  }
  0x3c   :  { %6451 = vmatpush3.bf16.msra.mxu0 %v7158_v12  ;;  %v7207_v12 = vld [vmem:[%s9324_s1 + $0x3a8] sm:$0xff]  }
  0x3d   :  { %6452 = vmatprep.subr.bf16.mxu0 %v7160_v14  ;;  %6473 = vmatpush3.bf16.msra.mxu1 %v7159_v13  ;;  %v7208_v13 = vld [vmem:[%s9324_s1 + $0x360] sm:$0xff]  }
  0x3e   :  { %6474 = vmatprep.subr.bf16.mxu1 %v7161_v15  ;;  %v7209_v14 = vld [vmem:[%s9324_s1 + $0x3e0] sm:$0xff]  }
  0x3f   :  { %v7210_v15 = vld [vmem:[%s9324_s1 + $0x320] sm:$0xff]  }
  0x40   :  { %6453 = vmatpush3.bf16.msra.mxu0 %v7162_v16  ;;  %v7211_v16 = vld [vmem:[%s9324_s1 + $0x3a0] sm:$0xff]  }
  0x41   :  { %6482 = vmatprep.subr.bf16.mxu0 %v7164_v19  ;;  %6475 = vmatpush3.bf16.msra.mxu1 %v7163_v17  ;;  %v7212_v17 = vld [vmem:[%s9324_s1 + $0x358] sm:$0xff]  }
  0x42   :  { %6504 = vmatprep.subr.bf16.mxu1 %v7165_v20  ;;  %v7214_v19 = vld [vmem:[%s9324_s1 + $0x318] sm:$0xff]  }
  0x43   :  { %4703 = vmatmul.mubr.bf16.vlgmr.msra.gmra.mxu0 %v1092_v18  ;;  %v7213_v18 = vld [vmem:[%s9324_s1 + $0x3d8] sm:$0xff]  }
  0x44   :  { %6483 = vmatpush3.bf16.msra.mxu0 %v7166_v21  ;;  %4743 = vmatmul.mubr.bf16.vlgmr.msra.gmra.mxu1 %v1108_v23  ;;  %v7215_v20 = vld [vmem:[%s9324_s1 + $0x398] sm:$0xff]   ;;  %v7216_v21 = vld [vmem:[%s9324_s1 + $0x350] sm:$0xff]  }
  0x45   :  { %6484 = vmatprep.subr.bf16.mxu0 %v7168_v24  ;;  %6505 = vmatpush3.bf16.msra.mxu1 %v7167_v22  ;;  %v7217_v22 = vld [vmem:[%s9324_s1 + $0x3d0] sm:$0xff]  }
  0x46   :  { %6506 = vmatprep.subr.bf16.mxu1 %v7169_v25  ;;  %4782 = vmatprep.mubr.bf16.mxu0 %v1148_v62  ;;  %v7218_v23 = vld [vmem:[%s9324_s1 + $0x310] sm:$0xff]   ;;  %v7220_v25 = vld [vmem:[%s9324_s1 + $0x348] sm:$0xff]  }
  0x47   :  { %4822 = vmatprep.mubr.bf16.mxu1 %v1158_v3  ;;  %v7219_v24 = vld [vmem:[%s9324_s1 + $0x390] sm:$0xff]   ;;  %v7255_v62 = vld [vmem:[%s9324_s1 + $0x408] sm:$0xff]  }
  0x48   :  { %6485 = vmatpush3.bf16.msra.mxu0 %v7170_v26  ;;  %v7221_v26 = vld [vmem:[%s9324_s1 + $0x3c8] sm:$0xff]   ;;  %v17_v3 = vld [vmem:[%s9325_s0 + $0x10] sm:$0xff] }
  0x49   :  { %6486 = vmatprep.subr.bf16.mxu0 %v7172_v28  ;;  %6507 = vmatpush3.bf16.msra.mxu1 %v7171_v27  ;;  %v7222_v27 = vld [vmem:[%s9324_s1 + $0x308] sm:$0xff]  }
  0x4a   :  { %6508 = vmatprep.subr.bf16.mxu1 %v7173_v29  ;;  %v7223_v28 = vld [vmem:[%s9324_s1 + $0x388] sm:$0xff]   ;;  %v7224_v29 = vld [vmem:[%s9324_s1 + $0x340] sm:$0xff]  }
  0x4c   :  { %6487 = vmatpush3.bf16.msra.mxu0 %v7174_v30  ;;  %v7225_v30 = vld [vmem:[%s9324_s1 + $0x3c0] sm:$0xff]  }
  0x4d   :  { %6488 = vmatprep.subr.bf16.mxu0 %v7176_v32  ;;  %6509 = vmatpush3.bf16.msra.mxu1 %v7175_v31  ;;  %v7226_v31 = vld [vmem:[%s9324_s1 + $0x300] sm:$0xff]  }
  0x4e   :  { %6510 = vmatprep.subr.bf16.mxu1 %v7177_v33  ;;  %v7227_v32 = vld [vmem:[%s9324_s1 + $0x380] sm:$0xff]   ;;  %v1141_v33 = vrot.slane %v7960_v60, %v7734_v35  ;;  %v7253_v60 = vld [vmem:[%s9324_s1 + $0x448] sm:$0xff]  }
  0x50   :  { %6489 = vmatpush3.bf16.msra.mxu0 %v7178_v34  ;;  %v7229_v34 = vld [vmem:[%s9324_s1 + $0x478] sm:$0xff]  }
  0x51   :  { %6490 = vmatprep.subr.bf16.mxu0 %v7180_v37  ;;  %6511 = vmatpush3.bf16.msra.mxu1 %v7179_v36  ;;  %v7230_v36 = vld [vmem:[%s9324_s1 + $0x4f8] sm:$0xff]  }
  0x52   :  { %6512 = vmatprep.subr.bf16.mxu1 %v7181_v38  ;;  %v7231_v37 = vld [vmem:[%s9324_s1 + $0x438] sm:$0xff]  }
  0x53   :  { %v7232_v38 = vld [vmem:[%s9324_s1 + $0x4b8] sm:$0xff]  }
  0x54   :  { %6491 = vmatpush3.bf16.msra.mxu0 %v7182_v39  ;;  %v1157_v39 = vcombine.high %v1141_v33, %v1141_v33 }
  0x55   :  { %6492 = vmatprep.subr.bf16.mxu0 %v7184_v41  ;;  %6513 = vmatpush3.bf16.msra.mxu1 %v7183_v40  ;;  %v7233_v40 = vld [vmem:[%s9324_s1 + $0x470] sm:$0xff]  }
  0x56   :  { %6514 = vmatprep.subr.bf16.mxu1 %v7185_v42  ;;  %v7234_v41 = vld [vmem:[%s9324_s1 + $0x4f0] sm:$0xff]  }
  0x57   :  { %v7235_v42 = vld [vmem:[%s9324_s1 + $0x430] sm:$0xff]  }
  0x58   :  { %6493 = vmatpush3.bf16.msra.mxu0 %v7186_v43  ;;  %v7236_v43 = vld [vmem:[%s9324_s1 + $0x4b0] sm:$0xff]  }
  0x59   :  { %6494 = vmatprep.subr.bf16.mxu0 %v7188_v45  ;;  %6515 = vmatpush3.bf16.msra.mxu1 %v7187_v44  ;;  %v7237_v44 = vld [vmem:[%s9324_s1 + $0x468] sm:$0xff]  }
  0x5a   :  { %6516 = vmatprep.subr.bf16.mxu1 %v7189_v46  ;;  %v7238_v45 = vld [vmem:[%s9324_s1 + $0x4e8] sm:$0xff]  }
  0x5b   :  { %v7239_v46 = vld [vmem:[%s9324_s1 + $0x428] sm:$0xff]  }
  0x5c   :  { %6495 = vmatpush3.bf16.msra.mxu0 %v7190_v47  ;;  %v7240_v47 = vld [vmem:[%s9324_s1 + $0x4a8] sm:$0xff]  }
  0x5d   :  { %6496 = vmatprep.subr.bf16.mxu0 %v7192_v49  ;;  %6517 = vmatpush3.bf16.msra.mxu1 %v7191_v48  ;;  %v7241_v48 = vld [vmem:[%s9324_s1 + $0x460] sm:$0xff]  }
  0x5e   :  { %6518 = vmatprep.subr.bf16.mxu1 %v7193_v50  ;;  %v7242_v49 = vld [vmem:[%s9324_s1 + $0x4e0] sm:$0xff]  }
  0x5f   :  { %v7243_v50 = vld [vmem:[%s9324_s1 + $0x420] sm:$0xff]  }
  0x60   :  { %6497 = vmatpush3.bf16.msra.mxu0 %v7194_v51  ;;  %v7244_v51 = vld [vmem:[%s9324_s1 + $0x4a0] sm:$0xff]  }
  0x61   :  { %6526 = vmatprep.subr.bf16.mxu0 %v7196_v56  ;;  %6519 = vmatpush3.bf16.msra.mxu1 %v7195_v53  ;;  %v7246_v53 = vld [vmem:[%s9324_s1 + $0x4d8] sm:$0xff]   ;;  %v7249_v56 = vld [vmem:[%s9324_s1 + $0x450] sm:$0xff]  }
  0x62   :  { %6548 = vmatprep.subr.bf16.mxu1 %v7197_v59  ;;  %v7252_v59 = vld [vmem:[%s9324_s1 + $0x490] sm:$0xff]  }
  0x63   :  { %4783 = vmatmul.mubr.bf16.vlgmr.msra.gmra.mxu0 %v1134_v58  ;;  %v7251_v58 = vld [vmem:[%s9324_s1 + $0x410] sm:$0xff]  }
  0x64   :  { %6527 = vmatpush3.bf16.msra.mxu0 %v7198_v61  ;;  %4823 = vmatmul.mubr.bf16.vlgmr.msra.gmra.mxu1 %v1156_v1  ;;  %v7254_v61 = vld [vmem:[%s9324_s1 + $0x4c8] sm:$0xff]   ;;  %v7258_v1 = vld [vmem:[%s9324_s1 + $0x4c0] sm:$0xff]  }
  0x65   :  { %6528 = vmatprep.subr.bf16.mxu0 %v7200_v2  ;;  %6549 = vmatpush3.bf16.msra.mxu1 %v7199_v63  ;;  %v7256_v63 = vld [vmem:[%s9324_s1 + $0x488] sm:$0xff]   ;;  %v7259_v2 = vld [vmem:[%s9324_s1 + $0x400] sm:$0xff]  }
  0x66   :  { %4862 = vmatprep.mubr.bf16.mxu0 %v1155_v5  ;;  %6550 = vmatprep.subr.bf16.mxu1 %v7201_v4  ;;  %v7260_v4 = vld [vmem:[%s9324_s1 + $0x480] sm:$0xff]   ;;  %v1167_v5 = vrot.slane %v17_v3, %v7734_v35 }
  0x67   :  { %4902 = vmatprep.mubr.bf16.mxu1 %v1159_v8 }
  0x68   :  { %6529 = vmatpush3.bf16.msra.mxu0 %v7202_v6  ;;  %v1160_v6 = vcombine.high %v17_v3, %v17_v3  ;;  %v1175_v8 = vcombine.high %v1167_v5, %v1167_v5  ;;  %v7310_v3 = vld [vmem:[%s9324_s1 + $0x658] sm:$0xff]  }
  0x69   :  { %6530 = vmatprep.subr.bf16.mxu0 %v7204_v9  ;;  %6551 = vmatpush3.bf16.msra.mxu1 %v7203_v7  ;;  %v7261_v7 = vld [vmem:[%s9324_s1 + $0x578] sm:$0xff]   ;;  %v1183_v9 = vrot.slane %v1167_v5, %v7734_v35 }
  0x6a   :  { %6552 = vmatprep.subr.bf16.mxu1 %v7205_v10  ;;  %v7262_v10 = vld [vmem:[%s9324_s1 + $0x5f8] sm:$0xff]  }
  0x6b   :  { %v7312_v5 = vld [vmem:[%s9324_s1 + $0x618] sm:$0xff]  }
  0x6c   :  { %6531 = vmatpush3.bf16.msra.mxu0 %v7206_v11  ;;  %v8166_v11 = vrot.slane %v1160_v6, %v7734_v35  ;;  %v7313_v6 = vld [vmem:[%s9324_s1 + $0x698] sm:$0xff]  }
  0x6d   :  { %6532 = vmatprep.subr.bf16.mxu0 %v7208_v13  ;;  %6553 = vmatpush3.bf16.msra.mxu1 %v7207_v12  ;;  %v7263_v12 = vld [vmem:[%s9324_s1 + $0x538] sm:$0xff]   ;;  %v1197_v13 = vrot.slane %v1175_v8, %v7734_v35  ;;  %v7315_v8 = vld [vmem:[%s9324_s1 + $0x6d0] sm:$0xff]  }
  0x6e   :  { %6554 = vmatprep.subr.bf16.mxu1 %v7209_v14  ;;  %v7264_v14 = vld [vmem:[%s9324_s1 + $0x5b8] sm:$0xff]  }
  0x70   :  { %6533 = vmatpush3.bf16.msra.mxu0 %v7210_v15  ;;  %v1176_v15 = vcombine.high %v8166_v11, %v8166_v11 }
  0x71   :  { %6534 = vmatprep.subr.bf16.mxu0 %v7212_v17  ;;  %6555 = vmatpush3.bf16.msra.mxu1 %v7211_v16  ;;  %v1205_v16 = vcombine.high %v1183_v9, %v1183_v9  ;;  %v7265_v17 = vld [vmem:[%s9324_s1 + $0x570] sm:$0xff]  }
  0x72   :  { %6556 = vmatprep.subr.bf16.mxu1 %v7213_v18  ;;  %v1207_v18 = vcombine.high %v1197_v13, %v1197_v13 }
  0x74   :  { %6535 = vmatpush3.bf16.msra.mxu0 %v7214_v19  ;;  %v7266_v19 = vld [vmem:[%s9324_s1 + $0x5f0] sm:$0xff]  }
  0x75   :  { %6536 = vmatprep.subr.bf16.mxu0 %v7216_v21  ;;  %6557 = vmatpush3.bf16.msra.mxu1 %v7215_v20  ;;  %v1204_v20 = vrot.slane %v1176_v15, %v7734_v35  ;;  %v7267_v21 = vld [vmem:[%s9324_s1 + $0x530] sm:$0xff]   ;;  %v7322_v15 = vld [vmem:[%s9324_s1 + $0x640] sm:$0xff]  }
  0x76   :  { %6558 = vmatprep.subr.bf16.mxu1 %v7217_v22  ;;  %v7268_v22 = vld [vmem:[%s9324_s1 + $0x5b0] sm:$0xff]  }
  0x78   :  { %6537 = vmatpush3.bf16.msra.mxu0 %v7218_v23  ;;  %v1208_v23 = vcombine.high %v1204_v20, %v1204_v20 }
  0x79   :  { %6538 = vmatprep.subr.bf16.mxu0 %v7220_v25  ;;  %6559 = vmatpush3.bf16.msra.mxu1 %v7219_v24  ;;  %v7269_v24 = vld [vmem:[%s9324_s1 + $0x568] sm:$0xff]  }
  0x7a   :  { %6560 = vmatprep.subr.bf16.mxu1 %v7221_v26  ;;  %v7270_v25 = vld [vmem:[%s9324_s1 + $0x5e8] sm:$0xff]  }
  0x7b   :  { %v7271_v26 = vld [vmem:[%s9324_s1 + $0x528] sm:$0xff]  }
  0x7c   :  { %6539 = vmatpush3.bf16.msra.mxu0 %v7222_v27  ;;  %v7272_v27 = vld [vmem:[%s9324_s1 + $0x5a8] sm:$0xff]  }
  0x7d   :  { %6540 = vmatprep.subr.bf16.mxu0 %v7224_v29  ;;  %6561 = vmatpush3.bf16.msra.mxu1 %v7223_v28  ;;  %v7273_v28 = vld [vmem:[%s9324_s1 + $0x560] sm:$0xff]  }
  0x7e   :  { %6562 = vmatprep.subr.bf16.mxu1 %v7225_v30  ;;  %v7274_v29 = vld [vmem:[%s9324_s1 + $0x5e0] sm:$0xff]  }
  0x7f   :  { %v7275_v30 = vld [vmem:[%s9324_s1 + $0x520] sm:$0xff]  }
  0x80   :  { %6541 = vmatpush3.bf16.msra.mxu0 %v7226_v31  ;;  %v7276_v31 = vld [vmem:[%s9324_s1 + $0x5a0] sm:$0xff]  }
  0x81   :  { %6570 = vmatprep.subr.bf16.mxu0 %v7229_v34  ;;  %6563 = vmatpush3.bf16.msra.mxu1 %v7227_v32  ;;  %v7277_v32 = vld [vmem:[%s9324_s1 + $0x558] sm:$0xff]  }
  0x82   :  { %6592 = vmatprep.subr.bf16.mxu1 %v7230_v36  ;;  %v7279_v34 = vld [vmem:[%s9324_s1 + $0x518] sm:$0xff]  }
  0x83   :  { %4863 = vmatmul.mubr.bf16.vlgmr.msra.gmra.mxu0 %v1141_v33  ;;  %v7278_v33 = vld [vmem:[%s9324_s1 + $0x5d8] sm:$0xff]  }
  0x84   :  { %6571 = vmatpush3.bf16.msra.mxu0 %v7231_v37  ;;  %4903 = vmatmul.mubr.bf16.vlgmr.msra.gmra.mxu1 %v1157_v39  ;;  %v7280_v36 = vld [vmem:[%s9324_s1 + $0x598] sm:$0xff]   ;;  %v7281_v37 = vld [vmem:[%s9324_s1 + $0x550] sm:$0xff]  }
  0x85   :  { %6572 = vmatprep.subr.bf16.mxu0 %v7233_v40  ;;  %6593 = vmatpush3.bf16.msra.mxu1 %v7232_v38  ;;  %v7282_v38 = vld [vmem:[%s9324_s1 + $0x5d0] sm:$0xff]  }
  0x86   :  { %6594 = vmatprep.subr.bf16.mxu1 %v7234_v41  ;;  %4942 = vmatprep.mubr.bf16.mxu0 %v1197_v13  ;;  %v7283_v39 = vld [vmem:[%s9324_s1 + $0x510] sm:$0xff]   ;;  %v7285_v41 = vld [vmem:[%s9324_s1 + $0x548] sm:$0xff]  }
  0x87   :  { %4982 = vmatprep.mubr.bf16.mxu1 %v1207_v18  ;;  %v7284_v40 = vld [vmem:[%s9324_s1 + $0x590] sm:$0xff]   ;;  %v7320_v13 = vld [vmem:[%s9324_s1 + $0x608] sm:$0xff]   ;;  %v18_v18 = vld [vmem:[%s9325_s0 + $0x18] sm:$0xff] }
  0x88   :  { %6573 = vmatpush3.bf16.msra.mxu0 %v7235_v42  ;;  %v7286_v42 = vld [vmem:[%s9324_s1 + $0x5c8] sm:$0xff]  }
  0x89   :  { %6574 = vmatprep.subr.bf16.mxu0 %v7237_v44  ;;  %6595 = vmatpush3.bf16.msra.mxu1 %v7236_v43  ;;  %v7287_v43 = vld [vmem:[%s9324_s1 + $0x508] sm:$0xff]  }
  0x8a   :  { %6596 = vmatprep.subr.bf16.mxu1 %v7238_v45  ;;  %v7288_v44 = vld [vmem:[%s9324_s1 + $0x588] sm:$0xff]   ;;  %v7289_v45 = vld [vmem:[%s9324_s1 + $0x540] sm:$0xff]  }
  0x8c   :  { %6575 = vmatpush3.bf16.msra.mxu0 %v7239_v46  ;;  %v7290_v46 = vld [vmem:[%s9324_s1 + $0x5c0] sm:$0xff]  }
  0x8d   :  { %6576 = vmatprep.subr.bf16.mxu0 %v7241_v48  ;;  %6597 = vmatpush3.bf16.msra.mxu1 %v7240_v47  ;;  %v7291_v47 = vld [vmem:[%s9324_s1 + $0x500] sm:$0xff]  }
  0x8e   :  { %6598 = vmatprep.subr.bf16.mxu1 %v7242_v49  ;;  %v7292_v48 = vld [vmem:[%s9324_s1 + $0x580] sm:$0xff]   ;;  %v1190_v49 = vrot.slane %v8166_v11, %v7734_v35  ;;  %v7318_v11 = vld [vmem:[%s9324_s1 + $0x648] sm:$0xff]  }
  0x90   :  { %6577 = vmatpush3.bf16.msra.mxu0 %v7243_v50  ;;  %v7294_v50 = vld [vmem:[%s9324_s1 + $0x678] sm:$0xff]  }
  0x91   :  { %6578 = vmatprep.subr.bf16.mxu0 %v7245_v52  ;;  %6599 = vmatpush3.bf16.msra.mxu1 %v7244_v51  ;;  %v7295_v51 = vld [vmem:[%s9324_s1 + $0x6f8] sm:$0xff]  }
  0x92   :  { %6600 = vmatprep.subr.bf16.mxu1 %v7246_v53  ;;  %v7296_v52 = vld [vmem:[%s9324_s1 + $0x638] sm:$0xff]  }
  0x93   :  { %v7297_v53 = vld [vmem:[%s9324_s1 + $0x6b8] sm:$0xff]  }
  0x94   :  { %6579 = vmatpush3.bf16.msra.mxu0 %v7247_v54  ;;  %v1206_v54 = vcombine.high %v1190_v49, %v1190_v49 }
  0x95   :  { %6580 = vmatprep.subr.bf16.mxu0 %v7249_v56  ;;  %6601 = vmatpush3.bf16.msra.mxu1 %v7248_v55  ;;  %v7298_v55 = vld [vmem:[%s9324_s1 + $0x670] sm:$0xff]  }
  0x96   :  { %6602 = vmatprep.subr.bf16.mxu1 %v7250_v57  ;;  %v7299_v56 = vld [vmem:[%s9324_s1 + $0x6f0] sm:$0xff]  }
  0x97   :  { %v7300_v57 = vld [vmem:[%s9324_s1 + $0x630] sm:$0xff]  }
  0x98   :  { %6581 = vmatpush3.bf16.msra.mxu0 %v7251_v58  ;;  %v7301_v58 = vld [vmem:[%s9324_s1 + $0x6b0] sm:$0xff]  }
  0x99   :  { %6582 = vmatprep.subr.bf16.mxu0 %v7253_v60  ;;  %6603 = vmatpush3.bf16.msra.mxu1 %v7252_v59  ;;  %v7302_v59 = vld [vmem:[%s9324_s1 + $0x668] sm:$0xff]  }
  0x9a   :  { %6604 = vmatprep.subr.bf16.mxu1 %v7254_v61  ;;  %v7303_v60 = vld [vmem:[%s9324_s1 + $0x6e8] sm:$0xff]  }
  0x9b   :  { %v7304_v61 = vld [vmem:[%s9324_s1 + $0x628] sm:$0xff]  }
  0x9c   :  { %6583 = vmatpush3.bf16.msra.mxu0 %v7255_v62  ;;  %v7305_v62 = vld [vmem:[%s9324_s1 + $0x6a8] sm:$0xff]  }
  0x9d   :  { %6584 = vmatprep.subr.bf16.mxu0 %v7257_v0  ;;  %6605 = vmatpush3.bf16.msra.mxu1 %v7256_v63  ;;  %v7306_v63 = vld [vmem:[%s9324_s1 + $0x660] sm:$0xff]  }
  0x9e   :  { %6606 = vmatprep.subr.bf16.mxu1 %v7258_v1  ;;  %v7307_v0 = vld [vmem:[%s9324_s1 + $0x6e0] sm:$0xff]  }
  0x9f   :  { %v7308_v1 = vld [vmem:[%s9324_s1 + $0x620] sm:$0xff]  }
  0xa0   :  { %6585 = vmatpush3.bf16.msra.mxu0 %v7259_v2  ;;  %v7309_v2 = vld [vmem:[%s9324_s1 + $0x6a0] sm:$0xff]  }
  0xa1   :  { %6614 = vmatprep.subr.bf16.mxu0 %v7261_v7  ;;  %6607 = vmatpush3.bf16.msra.mxu1 %v7260_v4  ;;  %v7311_v4 = vld [vmem:[%s9324_s1 + $0x6d8] sm:$0xff]   ;;  %v7314_v7 = vld [vmem:[%s9324_s1 + $0x650] sm:$0xff]  }
  0xa2   :  { %6636 = vmatprep.subr.bf16.mxu1 %v7262_v10  ;;  %v7317_v10 = vld [vmem:[%s9324_s1 + $0x690] sm:$0xff]  }
  0xa3   :  { %4943 = vmatmul.mubr.bf16.vlgmr.msra.gmra.mxu0 %v1183_v9  ;;  %v7316_v9 = vld [vmem:[%s9324_s1 + $0x610] sm:$0xff]  }
  0xa4   :  { %6615 = vmatpush3.bf16.msra.mxu0 %v7263_v12  ;;  %4983 = vmatmul.mubr.bf16.vlgmr.msra.gmra.mxu1 %v1205_v16  ;;  %v7319_v12 = vld [vmem:[%s9324_s1 + $0x6c8] sm:$0xff]   ;;  %v7323_v16 = vld [vmem:[%s9324_s1 + $0x6c0] sm:$0xff]  }
  0xa5   :  { %6616 = vmatprep.subr.bf16.mxu0 %v7265_v17  ;;  %6637 = vmatpush3.bf16.msra.mxu1 %v7264_v14  ;;  %v7321_v14 = vld [vmem:[%s9324_s1 + $0x688] sm:$0xff]   ;;  %v7324_v17 = vld [vmem:[%s9324_s1 + $0x600] sm:$0xff]  }
  0xa6   :  { %5022 = vmatprep.mubr.bf16.mxu0 %v1204_v20  ;;  %6638 = vmatprep.subr.bf16.mxu1 %v7266_v19  ;;  %v1216_v19 = vrot.slane %v18_v18, %v7734_v35  ;;  %v7326_v20 = vld [vmem:[%s9324_s1 + $0x778] sm:$0xff]  }
  0xa7   :  { %5062 = vmatprep.mubr.bf16.mxu1 %v1208_v23 }
  0xa8   :  { %6617 = vmatpush3.bf16.msra.mxu0 %v7267_v21  ;;  %v1209_v21 = vcombine.high %v18_v18, %v18_v18  ;;  %v1224_v23 = vcombine.high %v1216_v19, %v1216_v19 }
  0xa9   :  { %6618 = vmatprep.subr.bf16.mxu0 %v7269_v24  ;;  %6639 = vmatpush3.bf16.msra.mxu1 %v7268_v22  ;;  %v7325_v22 = vld [vmem:[%s9324_s1 + $0x680] sm:$0xff]   ;;  %v1232_v24 = vrot.slane %v1216_v19, %v7734_v35  ;;  %v7363_v19 = vld [vmem:[%s9324_s1 + $0x870] sm:$0xff]  }
  0xaa   :  { %6640 = vmatprep.subr.bf16.mxu1 %v7270_v25  ;;  %v7327_v25 = vld [vmem:[%s9324_s1 + $0x7f8] sm:$0xff]  }
  0xac   :  { %6619 = vmatpush3.bf16.msra.mxu0 %v7271_v26  ;;  %v8372_v26 = vrot.slane %v1209_v21, %v7734_v35  ;;  %v7364_v21 = vld [vmem:[%s9324_s1 + $0x8f0] sm:$0xff]  }
  0xad   :  { %6620 = vmatprep.subr.bf16.mxu0 %v7273_v28  ;;  %6641 = vmatpush3.bf16.msra.mxu1 %v7272_v27  ;;  %v7328_v27 = vld [vmem:[%s9324_s1 + $0x738] sm:$0xff]   ;;  %v1246_v28 = vrot.slane %v1224_v23, %v7734_v35 }
  0xae   :  { %6642 = vmatprep.subr.bf16.mxu1 %v7274_v29  ;;  %v7329_v29 = vld [vmem:[%s9324_s1 + $0x7b8] sm:$0xff]  }
  0xb0   :  { %6621 = vmatpush3.bf16.msra.mxu0 %v7275_v30  ;;  %v1225_v30 = vcombine.high %v8372_v26, %v8372_v26 }
  0xb1   :  { %6622 = vmatprep.subr.bf16.mxu0 %v7277_v32  ;;  %6643 = vmatpush3.bf16.msra.mxu1 %v7276_v31  ;;  %v1254_v31 = vcombine.high %v1232_v24, %v1232_v24  ;;  %v7330_v32 = vld [vmem:[%s9324_s1 + $0x770] sm:$0xff]  }
  0xb2   :  { %6644 = vmatprep.subr.bf16.mxu1 %v7278_v33  ;;  %v1256_v33 = vcombine.high %v1246_v28, %v1246_v28 }
  0xb4   :  { %6623 = vmatpush3.bf16.msra.mxu0 %v7279_v34 }
  0xb5   :  { %6624 = vmatprep.subr.bf16.mxu0 %v7281_v37  ;;  %6645 = vmatpush3.bf16.msra.mxu1 %v7280_v36  ;;  %v5881_v36 = vld [vmem:[%s9326_s2] ss:$0 sm:$0xff]  ;;  %v7331_v37 = vld [vmem:[%s9324_s1 + $0x7f0] sm:$0xff]  }
  0xb6   :  { %6646 = vmatprep.subr.bf16.mxu1 %v7282_v38  ;;  %v1253_v38 = vrot.slane %v1225_v30, %v7734_v35  ;;  %v7368_v30 = vld [vmem:[%s9324_s1 + $0x8e8] sm:$0xff]  }
  0xb8   :  { %6625 = vmatpush3.bf16.msra.mxu0 %v7283_v39  ;;  %v7332_v39 = vld [vmem:[%s9324_s1 + $0x730] sm:$0xff]  }
  0xb9   :  { %6626 = vmatprep.subr.bf16.mxu0 %v7285_v41  ;;  %6647 = vmatpush3.bf16.msra.mxu1 %v7284_v40 }
  0xba   :  { %6648 = vmatprep.subr.bf16.mxu1 %v7286_v42  ;;  %v7333_v42 = vld [vmem:[%s9324_s1 + $0x7b0] sm:$0xff]  }
  0xbc   :  { %6627 = vmatpush3.bf16.msra.mxu0 %v7287_v43  ;;  %v1257_v43 = vcombine.high %v1253_v38, %v1253_v38 }
  0xbd   :  { %6628 = vmatprep.subr.bf16.mxu0 %v7289_v45  ;;  %6649 = vmatpush3.bf16.msra.mxu1 %v7288_v44  ;;  %v7334_v45 = vld [vmem:[%s9324_s1 + $0x768] sm:$0xff]  }
  0xbe   :  { %6650 = vmatprep.subr.bf16.mxu1 %v7290_v46 }
  0xc0   :  { %6629 = vmatpush3.bf16.msra.mxu0 %v7291_v47 }
  0xc1   :  { %6658 = vmatprep.subr.bf16.mxu0 %v7294_v50  ;;  %6651 = vmatpush3.bf16.msra.mxu1 %v7292_v48  ;;  %v7335_v48 = vld [vmem:[%s9324_s1 + $0x7e8] sm:$0xff]  }
  0xc2   :  { %6680 = vmatprep.subr.bf16.mxu1 %v7295_v51  ;;  %v7336_v51 = vld [vmem:[%s9324_s1 + $0x728] sm:$0xff]  }
  0xc3   :  { %5023 = vmatmul.mubr.bf16.vlgmr.msra.gmra.mxu0 %v1190_v49 }
  0xc4   :  { %6659 = vmatpush3.bf16.msra.mxu0 %v7296_v52  ;;  %5063 = vmatmul.mubr.bf16.vlgmr.msra.gmra.mxu1 %v1206_v54  ;;  %v7337_v54 = vld [vmem:[%s9324_s1 + $0x7a8] sm:$0xff]  }
  0xc5   :  { %6660 = vmatprep.subr.bf16.mxu0 %v7298_v55  ;;  %6681 = vmatpush3.bf16.msra.mxu1 %v7297_v53 }
  0xc6   :  { %6682 = vmatprep.subr.bf16.mxu1 %v7299_v56  ;;  %5102 = vmatprep.mubr.bf16.mxu0 %v1246_v28  ;;  %v7338_v56 = vld [vmem:[%s9324_s1 + $0x760] sm:$0xff]  }
  0xc7   :  { %5142 = vmatprep.mubr.bf16.mxu1 %v1256_v33  ;;  %v7369_v33 = vld [vmem:[%s9324_s1 + $0x828] sm:$0xff]  }
  0xc8   :  { %6661 = vmatpush3.bf16.msra.mxu0 %v7300_v57 }
  0xc9   :  { %6662 = vmatprep.subr.bf16.mxu0 %v7302_v59  ;;  %6683 = vmatpush3.bf16.msra.mxu1 %v7301_v58  ;;  %v7339_v58 = vld [vmem:[%s9324_s1 + $0x7e0] sm:$0xff]  }
  0xca   :  { %6684 = vmatprep.subr.bf16.mxu1 %v7303_v60  ;;  %v7340_v59 = vld [vmem:[%s9324_s1 + $0x720] sm:$0xff]  }
  0xcb   :  { %v7341_v60 = vld [vmem:[%s9324_s1 + $0x7a0] sm:$0xff]  }
  0xcc   :  { %6663 = vmatpush3.bf16.msra.mxu0 %v7304_v61  ;;  %v7342_v61 = vld [vmem:[%s9324_s1 + $0x758] sm:$0xff]  }
  0xcd   :  { %6664 = vmatprep.subr.bf16.mxu0 %v7306_v63  ;;  %6685 = vmatpush3.bf16.msra.mxu1 %v7305_v62  ;;  %v7343_v62 = vld [vmem:[%s9324_s1 + $0x7d8] sm:$0xff]  }
  0xce   :  { %6686 = vmatprep.subr.bf16.mxu1 %v7307_v0  ;;  %v7344_v63 = vld [vmem:[%s9324_s1 + $0x718] sm:$0xff]  }
  0xcf   :  { %v7345_v0 = vld [vmem:[%s9324_s1 + $0x798] sm:$0xff]  }
  0xd0   :  { %6665 = vmatpush3.bf16.msra.mxu0 %v7308_v1  ;;  %v7346_v1 = vld [vmem:[%s9324_s1 + $0x750] sm:$0xff]  }
  0xd1   :  { %6666 = vmatprep.subr.bf16.mxu0 %v7310_v3  ;;  %6687 = vmatpush3.bf16.msra.mxu1 %v7309_v2  ;;  %v7347_v2 = vld [vmem:[%s9324_s1 + $0x7d0] sm:$0xff]  }
  0xd2   :  { %6688 = vmatprep.subr.bf16.mxu1 %v7311_v4  ;;  %v7348_v3 = vld [vmem:[%s9324_s1 + $0x710] sm:$0xff]  }
  0xd3   :  { %v7349_v4 = vld [vmem:[%s9324_s1 + $0x790] sm:$0xff]  }
  0xd4   :  { %6667 = vmatpush3.bf16.msra.mxu0 %v7312_v5  ;;  %v7350_v5 = vld [vmem:[%s9324_s1 + $0x748] sm:$0xff]  }
  0xd5   :  { %6668 = vmatprep.subr.bf16.mxu0 %v7314_v7  ;;  %6689 = vmatpush3.bf16.msra.mxu1 %v7313_v6  ;;  %v7351_v6 = vld [vmem:[%s9324_s1 + $0x7c8] sm:$0xff]  }
  0xd6   :  { %6690 = vmatprep.subr.bf16.mxu1 %v7315_v8  ;;  %v7352_v7 = vld [vmem:[%s9324_s1 + $0x708] sm:$0xff]  }
  0xd7   :  { %v7353_v8 = vld [vmem:[%s9324_s1 + $0x788] sm:$0xff]  }
  0xd8   :  { %6669 = vmatpush3.bf16.msra.mxu0 %v7316_v9  ;;  %v7354_v9 = vld [vmem:[%s9324_s1 + $0x740] sm:$0xff]  }
  0xd9   :  { %6670 = vmatprep.subr.bf16.mxu0 %v7318_v11  ;;  %6691 = vmatpush3.bf16.msra.mxu1 %v7317_v10  ;;  %v7355_v10 = vld [vmem:[%s9324_s1 + $0x7c0] sm:$0xff]  }
  0xda   :  { %6692 = vmatprep.subr.bf16.mxu1 %v7319_v12  ;;  %v7356_v11 = vld [vmem:[%s9324_s1 + $0x700] sm:$0xff]  }
  0xdb   :  { %v7357_v12 = vld [vmem:[%s9324_s1 + $0x780] sm:$0xff]  }
  0xdc   :  { %6671 = vmatpush3.bf16.msra.mxu0 %v7320_v13  ;;  %v1239_v13 = vrot.slane %v8372_v26, %v7734_v35 }
  0xdd   :  { %6672 = vmatprep.subr.bf16.mxu0 %v7322_v15  ;;  %6693 = vmatpush3.bf16.msra.mxu1 %v7321_v14  ;;  %v7359_v14 = vld [vmem:[%s9324_s1 + $0x878] sm:$0xff]  }
  0xde   :  { %6694 = vmatprep.subr.bf16.mxu1 %v7323_v16  ;;  %v7360_v15 = vld [vmem:[%s9324_s1 + $0x8f8] sm:$0xff]   ;;  %v1255_v18 = vcombine.high %v1239_v13, %v1239_v13 }
  0xdf   :  { %v7361_v16 = vld [vmem:[%s9324_s1 + $0x838] sm:$0xff]  }
  0xe0   :  { %6673 = vmatpush3.bf16.msra.mxu0 %v7324_v17  ;;  %v7362_v17 = vld [vmem:[%s9324_s1 + $0x8b8] sm:$0xff]  }
  0xe1   :  { %6702 = vmatprep.subr.bf16.mxu0 %v7326_v20  ;;  %6695 = vmatpush3.bf16.msra.mxu1 %v7325_v22  ;;  %v7365_v22 = vld [vmem:[%s9324_s1 + $0x830] sm:$0xff]  }
  0xe2   :  { %6724 = vmatprep.subr.bf16.mxu1 %v7327_v25  ;;  %v7366_v25 = vld [vmem:[%s9324_s1 + $0x8b0] sm:$0xff]  }
  0xe3   :  { %v6410_v34 = vpop.f32.mrf.mxu0  ;;  %5103 = vmatmul.mubr.bf16.vlgmr.msra.gmra.mxu0 %v1232_v24 }
  0xe4   :  { %v6432_v40 = vpop.f32.mrf.mxu1  ;;  %6703 = vmatpush3.bf16.msra.mxu0 %v7328_v27  ;;  %5143 = vmatmul.mubr.bf16.vlgmr.msra.gmra.mxu1 %v1254_v31  ;;  %v7367_v27 = vld [vmem:[%s9324_s1 + $0x868] sm:$0xff]  }
  0xe5   :  { %v6411_v41 = vpop.f32.mrf.mxu0  ;;  %6704 = vmatprep.subr.bf16.mxu0 %v7330_v32  ;;  %6725 = vmatpush3.bf16.msra.mxu1 %v7329_v29 }
  0xe6   :  { %v6412_v44 = vadd.f32 %v6411_v41, %v6410_v34  ;;  %v6433_v46 = vpop.f32.mrf.mxu1  ;;  %5182 = vmatprep.mubr.bf16.mxu0 %v1253_v38  ;;  %6726 = vmatprep.subr.bf16.mxu1 %v7331_v37  ;;  %v7370_v37 = vld [vmem:[%s9324_s1 + $0x8a8] sm:$0xff]   ;;  %v7372_v41 = vld [vmem:[%s9324_s1 + $0x8e0] sm:$0xff]  }
  0xe7   :  { %v6413_v47 = vpop.f32.mrf.mxu0  ;;  %v6434_v50 = vadd.f32 %v6433_v46, %v6432_v40  ;;  %5222 = vmatprep.mubr.bf16.mxu1 %v1257_v43  ;;  %v7374_v43 = vld [vmem:[%s9324_s1 + $0x8a0] sm:$0xff]   ;;  %v7377_v46 = vld [vmem:[%s9324_s1 + $0x818] sm:$0xff]  }
  0xe8   :  { %v4625_v49 = vadd.f32 %v6412_v44, %v5881_v36  ;;  %v6435_v52 = vpop.f32.mrf.mxu1  ;;  %6705 = vmatpush3.bf16.msra.mxu0 %v7332_v39  ;;  %v7371_v39 = vld [vmem:[%s9324_s1 + $0x860] sm:$0xff]   ;;  %v7375_v44 = vld [vmem:[%s9324_s1 + $0x858] sm:$0xff]  }
  0xe9   :  { %v6414_v53 = vpop.f32.mrf.mxu0  ;;  %6706 = vmatprep.subr.bf16.mxu0 %v7334_v45  ;;  %6727 = vmatpush3.bf16.msra.mxu1 %v7333_v42  ;;  %v7373_v42 = vld [vmem:[%s9324_s1 + $0x820] sm:$0xff]   ;;  %v7376_v45 = vld [vmem:[%s9324_s1 + $0x8d8] sm:$0xff]   ;;  %v7383_v52 = vld [vmem:[%s9324_s1 + $0x848] sm:$0xff]  }
  0xea   :  { %v8411_v55 = vadd.f32 %v6434_v50, %v4625_v49  ;;  %v6436_v57 = vpop.f32.mrf.mxu1  ;;  %6728 = vmatprep.subr.bf16.mxu1 %v7335_v48  ;;  %v7378_v47 = vld [vmem:[%s9324_s1 + $0x898] sm:$0xff]   ;;  %v7379_v48 = vld [vmem:[%s9324_s1 + $0x850] sm:$0xff]   ;;  %v7384_v53 = vld [vmem:[%s9324_s1 + $0x8c8] sm:$0xff]  }
  0xeb   :  { %v7380_v49 = vld [vmem:[%s9324_s1 + $0x8d0] sm:$0xff]   ;;  %v7388_v57 = vld [vmem:[%s9324_s1 + $0x8c0] sm:$0xff]  }
  0xec   :  { %6707 = vmatpush3.bf16.msra.mxu0 %v7336_v51  ;;  %v7381_v50 = vld [vmem:[%s9324_s1 + $0x810] sm:$0xff]  }
  0xed   :  { %6708 = vmatprep.subr.bf16.mxu0 %v7338_v56  ;;  %6729 = vmatpush3.bf16.msra.mxu1 %v7337_v54  ;;  %v7382_v51 = vld [vmem:[%s9324_s1 + $0x890] sm:$0xff]   ;;  %v7385_v54 = vld [vmem:[%s9324_s1 + $0x808] sm:$0xff]   ;;  %v7387_v56 = vld [vmem:[%s9324_s1 + $0x840] sm:$0xff]  }
  0xee   :  { %6730 = vmatprep.subr.bf16.mxu1 %v7339_v58  ;;  %v7389_v58 = vld [vmem:[%s9324_s1 + $0x800] sm:$0xff]  }
  0xf0   :  { %6709 = vmatpush3.bf16.msra.mxu0 %v7340_v59  ;;  %v19_v59 = vld [vmem:[%s9325_s0 + $0x20] sm:$0xff] }
  0xf1   :  { %6710 = vmatprep.subr.bf16.mxu0 %v7342_v61  ;;  %6731 = vmatpush3.bf16.msra.mxu1 %v7341_v60  ;;  %v7390_v60 = vld [vmem:[%s9324_s1 + $0x880] sm:$0xff]   ;;  %v1265_v61 = vrot.slane %v19_v59, %v7734_v35 }
  0xf2   :  { %6732 = vmatprep.subr.bf16.mxu1 %v7343_v62  ;;  %v1258_v62 = vcombine.high %v19_v59, %v19_v59  ;;  %v7428_v59 = vld [vmem:[%s9324_s1 + $0xa70] sm:$0xff]  }
  0xf4   :  { %6711 = vmatpush3.bf16.msra.mxu0 %v7344_v63  ;;  %v7391_v63 = vld [vmem:[%s9324_s1 + $0x978] sm:$0xff]  }
  0xf5   :  { %6712 = vmatprep.subr.bf16.mxu0 %v7346_v1  ;;  %6733 = vmatpush3.bf16.msra.mxu1 %v7345_v0  ;;  %v1273_v0 = vcombine.high %v1265_v61, %v1265_v61  ;;  %v1281_v1 = vrot.slane %v1265_v61, %v7734_v35  ;;  %v7429_v61 = vld [vmem:[%s9324_s1 + $0xaf0] sm:$0xff]  }
  0xf6   :  { %6734 = vmatprep.subr.bf16.mxu1 %v7347_v2  ;;  %v7392_v2 = vld [vmem:[%s9324_s1 + $0x9f8] sm:$0xff]  }
  0xf8   :  { %6713 = vmatpush3.bf16.msra.mxu0 %v7348_v3  ;;  %v8586_v3 = vrot.slane %v1258_v62, %v7734_v35  ;;  %v7430_v62 = vld [vmem:[%s9324_s1 + $0xa30] sm:$0xff]  }
  0xf9   :  { %6714 = vmatprep.subr.bf16.mxu0 %v7350_v5  ;;  %6735 = vmatpush3.bf16.msra.mxu1 %v7349_v4  ;;  %v7393_v4 = vld [vmem:[%s9324_s1 + $0x938] sm:$0xff]   ;;  %v1295_v5 = vrot.slane %v1273_v0, %v7734_v35 }
  0xfa   :  { %6736 = vmatprep.subr.bf16.mxu1 %v7351_v6  ;;  %v7394_v6 = vld [vmem:[%s9324_s1 + $0x9b8] sm:$0xff]  }
  0xfc   :  { %6715 = vmatpush3.bf16.msra.mxu0 %v7352_v7  ;;  %v1274_v7 = vcombine.high %v8586_v3, %v8586_v3 }
  0xfd   :  { %6716 = vmatprep.subr.bf16.mxu0 %v7354_v9  ;;  %6737 = vmatpush3.bf16.msra.mxu1 %v7353_v8  ;;  %v1303_v8 = vcombine.high %v1281_v1, %v1281_v1  ;;  %v7395_v9 = vld [vmem:[%s9324_s1 + $0x970] sm:$0xff]  }
  0xfe   :  { %6738 = vmatprep.subr.bf16.mxu1 %v7355_v10  ;;  %v1305_v10 = vcombine.high %v1295_v5, %v1295_v5 }
 0x100   :  { %6717 = vmatpush3.bf16.msra.mxu0 %v7356_v11 }
 0x101   :  { %6746 = vmatprep.subr.bf16.mxu0 %v7359_v14  ;;  %6739 = vmatpush3.bf16.msra.mxu1 %v7357_v12  ;;  %v7396_v12 = vld [vmem:[%s9324_s1 + $0x9f0] sm:$0xff]  }
 0x102   :  { %6768 = vmatprep.subr.bf16.mxu1 %v7360_v15  ;;  %v7397_v14 = vld [vmem:[%s9324_s1 + $0x930] sm:$0xff]  }
 0x103   :  { %v6454_v20 = vpop.f32.mrf.mxu0  ;;  %5183 = vmatmul.mubr.bf16.vlgmr.msra.gmra.mxu0 %v1239_v13  ;;  %v1302_v13 = vrot.slane %v1274_v7, %v7734_v35 }
 0x104   :  { %v6476_v23 = vpop.f32.mrf.mxu1  ;;  %6747 = vmatpush3.bf16.msra.mxu0 %v7361_v16  ;;  %5223 = vmatmul.mubr.bf16.vlgmr.msra.gmra.mxu1 %v1255_v18 }
 0x105   :  { %v6455_v24 = vpop.f32.mrf.mxu0  ;;  %6748 = vmatprep.subr.bf16.mxu0 %v7363_v19  ;;  %6769 = vmatpush3.bf16.msra.mxu1 %v7362_v17  ;;  %v7398_v17 = vld [vmem:[%s9324_s1 + $0x9b0] sm:$0xff]   ;;  %v1306_v18 = vcombine.high %v1302_v13, %v1302_v13 }
 0x106   :  { %v6456_v26 = vadd.f32 %v6455_v24, %v6454_v20  ;;  %v6477_v28 = vpop.f32.mrf.mxu1  ;;  %6770 = vmatprep.subr.bf16.mxu1 %v7364_v21  ;;  %5262 = vmatprep.mubr.bf16.mxu0 %v1295_v5  ;;  %v7399_v20 = vld [vmem:[%s9324_s1 + $0x968] sm:$0xff]  }
 0x107   :  { %v6457_v29 = vpop.f32.mrf.mxu0  ;;  %v6478_v32 = vadd.f32 %v6477_v28, %v6476_v23  ;;  %5302 = vmatprep.mubr.bf16.mxu1 %v1305_v10  ;;  %v7400_v23 = vld [vmem:[%s9324_s1 + $0x9e8] sm:$0xff]  }
 0x108   :  { %v4705_v31 = vadd.f32 %v6456_v26, %v8411_v55  ;;  %v6479_v34 = vpop.f32.mrf.mxu1  ;;  %6749 = vmatpush3.bf16.msra.mxu0 %v7365_v22  ;;  %v7386_v55 = vld [vmem:[%s9324_s1 + $0x888] sm:$0xff]  }
 0x109   :  { %v6458_v36 = vpop.f32.mrf.mxu0  ;;  %6750 = vmatprep.subr.bf16.mxu0 %v7367_v27  ;;  %6771 = vmatpush3.bf16.msra.mxu1 %v7366_v25  ;;  %v7401_v26 = vld [vmem:[%s9324_s1 + $0x928] sm:$0xff]   ;;  %v7405_v34 = vld [vmem:[%s9324_s1 + $0x920] sm:$0xff]  }
 0x10a   :  { %v8512_v38 = vadd.f32 %v6478_v32, %v4705_v31  ;;  %v6480_v40 = vpop.f32.mrf.mxu1  ;;  %6772 = vmatprep.subr.bf16.mxu1 %v7368_v30  ;;  %v7402_v29 = vld [vmem:[%s9324_s1 + $0x9a8] sm:$0xff]   ;;  %v7403_v31 = vld [vmem:[%s9324_s1 + $0x960] sm:$0xff]  }
 0x10b   :  { %v7406_v36 = vld [vmem:[%s9324_s1 + $0x9a0] sm:$0xff]   ;;  %v7410_v40 = vld [vmem:[%s9324_s1 + $0x998] sm:$0xff]  }
 0x10c   :  { %6751 = vmatpush3.bf16.msra.mxu0 %v7369_v33  ;;  %v7404_v33 = vld [vmem:[%s9324_s1 + $0x9e0] sm:$0xff]  }
 0x10d   :  { %6752 = vmatprep.subr.bf16.mxu0 %v7371_v39  ;;  %6773 = vmatpush3.bf16.msra.mxu1 %v7370_v37  ;;  %v7407_v37 = vld [vmem:[%s9324_s1 + $0x958] sm:$0xff]  }
 0x10e   :  { %6774 = vmatprep.subr.bf16.mxu1 %v7372_v41  ;;  %v7409_v39 = vld [vmem:[%s9324_s1 + $0x918] sm:$0xff]   ;;  %v7411_v41 = vld [vmem:[%s9324_s1 + $0x950] sm:$0xff]  }
 0x110   :  { %6753 = vmatpush3.bf16.msra.mxu0 %v7373_v42  ;;  %v7412_v42 = vld [vmem:[%s9324_s1 + $0x9d0] sm:$0xff]  }
 0x111   :  { %6754 = vmatprep.subr.bf16.mxu0 %v7375_v44  ;;  %6775 = vmatpush3.bf16.msra.mxu1 %v7374_v43  ;;  %v7413_v43 = vld [vmem:[%s9324_s1 + $0x910] sm:$0xff]  }
 0x112   :  { %6776 = vmatprep.subr.bf16.mxu1 %v7376_v45  ;;  %v7414_v44 = vld [vmem:[%s9324_s1 + $0x990] sm:$0xff]   ;;  %v7415_v45 = vld [vmem:[%s9324_s1 + $0x948] sm:$0xff]  }
 0x114   :  { %6755 = vmatpush3.bf16.msra.mxu0 %v7377_v46  ;;  %v7416_v46 = vld [vmem:[%s9324_s1 + $0x9c8] sm:$0xff]  }
 0x115   :  { %6756 = vmatprep.subr.bf16.mxu0 %v7379_v48  ;;  %6777 = vmatpush3.bf16.msra.mxu1 %v7378_v47  ;;  %v7417_v47 = vld [vmem:[%s9324_s1 + $0x908] sm:$0xff]  }
 0x116   :  { %6778 = vmatprep.subr.bf16.mxu1 %v7380_v49  ;;  %v7418_v48 = vld [vmem:[%s9324_s1 + $0x988] sm:$0xff]   ;;  %v7419_v49 = vld [vmem:[%s9324_s1 + $0x940] sm:$0xff]  }
 0x118   :  { %6757 = vmatpush3.bf16.msra.mxu0 %v7381_v50  ;;  %v7420_v50 = vld [vmem:[%s9324_s1 + $0x9c0] sm:$0xff]  }
 0x119   :  { %6758 = vmatprep.subr.bf16.mxu0 %v7383_v52  ;;  %6779 = vmatpush3.bf16.msra.mxu1 %v7382_v51  ;;  %v7421_v51 = vld [vmem:[%s9324_s1 + $0x900] sm:$0xff]  }
 0x11a   :  { %6780 = vmatprep.subr.bf16.mxu1 %v7384_v53  ;;  %v7422_v52 = vld [vmem:[%s9324_s1 + $0x980] sm:$0xff]   ;;  %v1288_v53 = vrot.slane %v8586_v3, %v7734_v35  ;;  %v7432_v3 = vld [vmem:[%s9324_s1 + $0xa68] sm:$0xff]  }
 0x11c   :  { %6759 = vmatpush3.bf16.msra.mxu0 %v7385_v54  ;;  %v7424_v54 = vld [vmem:[%s9324_s1 + $0xa78] sm:$0xff]  }
 0x11d   :  { %6760 = vmatprep.subr.bf16.mxu0 %v7387_v56  ;;  %6781 = vmatpush3.bf16.msra.mxu1 %v7386_v55  ;;  %v7425_v55 = vld [vmem:[%s9324_s1 + $0xaf8] sm:$0xff]  }
 0x11e   :  { %6782 = vmatprep.subr.bf16.mxu1 %v7388_v57  ;;  %v7426_v56 = vld [vmem:[%s9324_s1 + $0xa38] sm:$0xff]  }
 0x11f   :  { %v7427_v57 = vld [vmem:[%s9324_s1 + $0xab8] sm:$0xff]  }
 0x120   :  { %6761 = vmatpush3.bf16.msra.mxu0 %v7389_v58  ;;  %v1304_v58 = vcombine.high %v1288_v53, %v1288_v53 }
 0x121   :  { %6790 = vmatprep.subr.bf16.mxu0 %v7391_v63  ;;  %6783 = vmatpush3.bf16.msra.mxu1 %v7390_v60 }
 0x122   :  { %6812 = vmatprep.subr.bf16.mxu1 %v7392_v2 }
 0x123   :  { %v6498_v11 = vpop.f32.mrf.mxu0  ;;  %5263 = vmatmul.mubr.bf16.vlgmr.msra.gmra.mxu0 %v1281_v1  ;;  %v7431_v1 = vld [vmem:[%s9324_s1 + $0xab0] sm:$0xff]  }
 0x124   :  { %v6520_v15 = vpop.f32.mrf.mxu1  ;;  %6791 = vmatpush3.bf16.msra.mxu0 %v7393_v4  ;;  %5303 = vmatmul.mubr.bf16.vlgmr.msra.gmra.mxu1 %v1303_v8 }
 0x125   :  { %v6499_v16 = vpop.f32.mrf.mxu0  ;;  %6792 = vmatprep.subr.bf16.mxu0 %v7395_v9  ;;  %6813 = vmatpush3.bf16.msra.mxu1 %v7394_v6  ;;  %v7433_v6 = vld [vmem:[%s9324_s1 + $0xae8] sm:$0xff]  }
 0x126   :  { %v6500_v19 = vadd.f32 %v6499_v16, %v6498_v11  ;;  %v6521_v21 = vpop.f32.mrf.mxu1  ;;  %5342 = vmatprep.mubr.bf16.mxu0 %v1302_v13  ;;  %6814 = vmatprep.subr.bf16.mxu1 %v7396_v12  ;;  %v7434_v9 = vld [vmem:[%s9324_s1 + $0xa28] sm:$0xff]   ;;  %v7437_v16 = vld [vmem:[%s9324_s1 + $0xae0] sm:$0xff]  }
 0x127   :  { %v6501_v22 = vpop.f32.mrf.mxu0  ;;  %v6522_v25 = vadd.f32 %v6521_v21, %v6520_v15  ;;  %5382 = vmatprep.mubr.bf16.mxu1 %v1306_v18  ;;  %v7435_v12 = vld [vmem:[%s9324_s1 + $0xaa8] sm:$0xff]   ;;  %v7439_v18 = vld [vmem:[%s9324_s1 + $0xaa0] sm:$0xff]   ;;  %v7442_v21 = vld [vmem:[%s9324_s1 + $0xa18] sm:$0xff]  }
 0x128   :  { %v4785_v24 = vadd.f32 %v6500_v19, %v8512_v38  ;;  %v6523_v27 = vpop.f32.mrf.mxu1  ;;  %6793 = vmatpush3.bf16.msra.mxu0 %v7397_v14  ;;  %v7408_v38 = vld [vmem:[%s9324_s1 + $0x9d8] sm:$0xff]   ;;  %v7436_v14 = vld [vmem:[%s9324_s1 + $0xa60] sm:$0xff]  }
 0x129   :  { %v6502_v28 = vpop.f32.mrf.mxu0  ;;  %6794 = vmatprep.subr.bf16.mxu0 %v7399_v20  ;;  %6815 = vmatpush3.bf16.msra.mxu1 %v7398_v17  ;;  %v7438_v17 = vld [vmem:[%s9324_s1 + $0xa20] sm:$0xff]   ;;  %v7440_v19 = vld [vmem:[%s9324_s1 + $0xa58] sm:$0xff]   ;;  %v7448_v27 = vld [vmem:[%s9324_s1 + $0xa48] sm:$0xff]  }
 0x12a   :  { %v8623_v30 = vadd.f32 %v6522_v25, %v4785_v24  ;;  %v6524_v32 = vpop.f32.mrf.mxu1  ;;  %6816 = vmatprep.subr.bf16.mxu1 %v7400_v23  ;;  %v7441_v20 = vld [vmem:[%s9324_s1 + $0xad8] sm:$0xff]   ;;  %v7444_v23 = vld [vmem:[%s9324_s1 + $0xa50] sm:$0xff]   ;;  %v7449_v28 = vld [vmem:[%s9324_s1 + $0xac8] sm:$0xff]  }
 0x12b   :  { %v7443_v22 = vld [vmem:[%s9324_s1 + $0xa98] sm:$0xff]   ;;  %v7445_v24 = vld [vmem:[%s9324_s1 + $0xad0] sm:$0xff]   ;;  %v7453_v32 = vld [vmem:[%s9324_s1 + $0xac0] sm:$0xff]  }
 0x12c   :  { %6795 = vmatpush3.bf16.msra.mxu0 %v7401_v26  ;;  %v7446_v25 = vld [vmem:[%s9324_s1 + $0xa10] sm:$0xff]  }
 0x12d   :  { %6796 = vmatprep.subr.bf16.mxu0 %v7403_v31  ;;  %6817 = vmatpush3.bf16.msra.mxu1 %v7402_v29  ;;  %v7447_v26 = vld [vmem:[%s9324_s1 + $0xa90] sm:$0xff]   ;;  %v7450_v29 = vld [vmem:[%s9324_s1 + $0xa08] sm:$0xff]   ;;  %v7452_v31 = vld [vmem:[%s9324_s1 + $0xa40] sm:$0xff]  }
 0x12e   :  { %6818 = vmatprep.subr.bf16.mxu1 %v7404_v33  ;;  %v7454_v33 = vld [vmem:[%s9324_s1 + $0xa00] sm:$0xff]  }
 0x130   :  { %6797 = vmatpush3.bf16.msra.mxu0 %v7405_v34  ;;  %v20_v34 = vld [vmem:[%s9325_s0 + $0x28] sm:$0xff] }
 0x131   :  { %6798 = vmatprep.subr.bf16.mxu0 %v7407_v37  ;;  %6819 = vmatpush3.bf16.msra.mxu1 %v7406_v36  ;;  %v1314_v36 = vrot.slane %v20_v34, %v7734_v35  ;;  %v7456_v37 = vld [vmem:[%s9324_s1 + $0xb78] sm:$0xff]  }
 0x132   :  { %6820 = vmatprep.subr.bf16.mxu1 %v7408_v38  ;;  %v1307_v38 = vcombine.high %v20_v34, %v20_v34  ;;  %v7493_v34 = vld [vmem:[%s9324_s1 + $0xc70] sm:$0xff]  }
 0x134   :  { %6799 = vmatpush3.bf16.msra.mxu0 %v7409_v39  ;;  %v7455_v39 = vld [vmem:[%s9324_s1 + $0xa80] sm:$0xff]  }
 0x135   :  { %6800 = vmatprep.subr.bf16.mxu0 %v7411_v41  ;;  %6821 = vmatpush3.bf16.msra.mxu1 %v7410_v40  ;;  %v1322_v40 = vcombine.high %v1314_v36, %v1314_v36  ;;  %v1330_v41 = vrot.slane %v1314_v36, %v7734_v35  ;;  %v7492_v36 = vld [vmem:[%s9324_s1 + $0xcb8] sm:$0xff]  }
 0x136   :  { %6822 = vmatprep.subr.bf16.mxu1 %v7412_v42  ;;  %v7457_v42 = vld [vmem:[%s9324_s1 + $0xbf8] sm:$0xff]  }
 0x138   :  { %6801 = vmatpush3.bf16.msra.mxu0 %v7413_v43  ;;  %v8798_v43 = vrot.slane %v1307_v38, %v7734_v35 }
 0x139   :  { %6802 = vmatprep.subr.bf16.mxu0 %v7415_v45  ;;  %6823 = vmatpush3.bf16.msra.mxu1 %v7414_v44  ;;  %v1344_v44 = vrot.slane %v1322_v40, %v7734_v35  ;;  %v7458_v45 = vld [vmem:[%s9324_s1 + $0xb38] sm:$0xff]  }
 0x13a   :  { %6824 = vmatprep.subr.bf16.mxu1 %v7416_v46  ;;  %v1323_v46 = vcombine.high %v8798_v43, %v8798_v43 }
 0x13c   :  { %6803 = vmatpush3.bf16.msra.mxu0 %v7417_v47 }
 0x13d   :  { %6804 = vmatprep.subr.bf16.mxu0 %v7419_v49  ;;  %6825 = vmatpush3.bf16.msra.mxu1 %v7418_v48  ;;  %v1352_v48 = vcombine.high %v1330_v41, %v1330_v41  ;;  %v7460_v49 = vld [vmem:[%s9324_s1 + $0xb70] sm:$0xff]  }
 0x13e   :  { %6826 = vmatprep.subr.bf16.mxu1 %v7420_v50  ;;  %v1354_v50 = vcombine.high %v1344_v44, %v1344_v44 }
 0x140   :  { %6805 = vmatpush3.bf16.msra.mxu0 %v7421_v51  ;;  %v7459_v51 = vld [vmem:[%s9324_s1 + $0xbb8] sm:$0xff]  }
 0x141   :  { %6834 = vmatprep.subr.bf16.mxu0 %v7424_v54  ;;  %6827 = vmatpush3.bf16.msra.mxu1 %v7422_v52  ;;  %v1351_v52 = vrot.slane %v1323_v46, %v7734_v35 }
 0x142   :  { %6856 = vmatprep.subr.bf16.mxu1 %v7425_v55  ;;  %v7461_v55 = vld [vmem:[%s9324_s1 + $0xbf0] sm:$0xff]  }
 0x143   :  { %v6542_v60 = vpop.f32.mrf.mxu0  ;;  %5343 = vmatmul.mubr.bf16.vlgmr.msra.gmra.mxu0 %v1288_v53 }
 0x144   :  { %v6564_v63 = vpop.f32.mrf.mxu1  ;;  %6835 = vmatpush3.bf16.msra.mxu0 %v7426_v56  ;;  %5383 = vmatmul.mubr.bf16.vlgmr.msra.gmra.mxu1 %v1304_v58  ;;  %v1355_v58 = vcombine.high %v1351_v52, %v1351_v52 }
 0x145   :  { %v6543_v0 = vpop.f32.mrf.mxu0  ;;  %6836 = vmatprep.subr.bf16.mxu0 %v7428_v59  ;;  %6857 = vmatpush3.bf16.msra.mxu1 %v7427_v57  ;;  %v7462_v57 = vld [vmem:[%s9324_s1 + $0xb30] sm:$0xff]  }
 0x146   :  { %v6544_v2 = vadd.f32 %v6543_v0, %v6542_v60  ;;  %v6565_v4 = vpop.f32.mrf.mxu1  ;;  %6858 = vmatprep.subr.bf16.mxu1 %v7429_v61  ;;  %5422 = vmatprep.mubr.bf16.mxu0 %v1344_v44  ;;  %v7464_v61 = vld [vmem:[%s9324_s1 + $0xb68] sm:$0xff]   ;;  %v7463_v0 = vld [vmem:[%s9324_s1 + $0xbb0] sm:$0xff]  }
 0x147   :  { %v6545_v5 = vpop.f32.mrf.mxu0  ;;  %v6566_v8 = vadd.f32 %v6565_v4, %v6564_v63  ;;  %5462 = vmatprep.mubr.bf16.mxu1 %v1354_v50  ;;  %v7497_v44 = vld [vmem:[%s9324_s1 + $0xc68] sm:$0xff]  }
 0x148   :  { %v4865_v7 = vadd.f32 %v6544_v2, %v8623_v30  ;;  %v6567_v10 = vpop.f32.mrf.mxu1  ;;  %6837 = vmatpush3.bf16.msra.mxu0 %v7430_v62  ;;  %v7451_v30 = vld [vmem:[%s9324_s1 + $0xa88] sm:$0xff]  }
 0x149   :  { %v6546_v11 = vpop.f32.mrf.mxu0  ;;  %6838 = vmatprep.subr.bf16.mxu0 %v7432_v3  ;;  %6859 = vmatpush3.bf16.msra.mxu1 %v7431_v1  ;;  %v7465_v3 = vld [vmem:[%s9324_s1 + $0xbe8] sm:$0xff]   ;;  %v7470_v10 = vld [vmem:[%s9324_s1 + $0xb20] sm:$0xff]  }
 0x14a   :  { %v8724_v13 = vadd.f32 %v6566_v8, %v4865_v7  ;;  %v6568_v15 = vpop.f32.mrf.mxu1  ;;  %6860 = vmatprep.subr.bf16.mxu1 %v7433_v6  ;;  %v7466_v5 = vld [vmem:[%s9324_s1 + $0xb28] sm:$0xff]   ;;  %v7468_v7 = vld [vmem:[%s9324_s1 + $0xb60] sm:$0xff]   ;;  %v7472_v11 = vld [vmem:[%s9324_s1 + $0xb58] sm:$0xff]  }
 0x14b   :  { %v7467_v8 = vld [vmem:[%s9324_s1 + $0xba8] sm:$0xff]   ;;  %v7476_v15 = vld [vmem:[%s9324_s1 + $0xb50] sm:$0xff]  }
 0x14c   :  { %6839 = vmatpush3.bf16.msra.mxu0 %v7434_v9  ;;  %v7469_v9 = vld [vmem:[%s9324_s1 + $0xbe0] sm:$0xff]   ;;  %v7498_v50 = vld [vmem:[%s9324_s1 + $0xce8] sm:$0xff]  }
 0x14d   :  { %6840 = vmatprep.subr.bf16.mxu0 %v7436_v14  ;;  %6861 = vmatpush3.bf16.msra.mxu1 %v7435_v12  ;;  %v7471_v12 = vld [vmem:[%s9324_s1 + $0xba0] sm:$0xff]   ;;  %v7474_v14 = vld [vmem:[%s9324_s1 + $0xb18] sm:$0xff]  }
 0x14e   :  { %6862 = vmatprep.subr.bf16.mxu1 %v7437_v16  ;;  %v7475_v16 = vld [vmem:[%s9324_s1 + $0xb98] sm:$0xff]  }
 0x150   :  { %6841 = vmatpush3.bf16.msra.mxu0 %v7438_v17  ;;  %v7477_v17 = vld [vmem:[%s9324_s1 + $0xbd0] sm:$0xff]  }
 0x151   :  { %6842 = vmatprep.subr.bf16.mxu0 %v7440_v19  ;;  %6863 = vmatpush3.bf16.msra.mxu1 %v7439_v18  ;;  %v7478_v18 = vld [vmem:[%s9324_s1 + $0xb10] sm:$0xff]   ;;  %v7480_v19 = vld [vmem:[%s9324_s1 + $0xb48] sm:$0xff]  }
 0x152   :  { %6864 = vmatprep.subr.bf16.mxu1 %v7441_v20  ;;  %v7479_v20 = vld [vmem:[%s9324_s1 + $0xb90] sm:$0xff]  }
 0x154   :  { %6843 = vmatpush3.bf16.msra.mxu0 %v7442_v21  ;;  %v7481_v21 = vld [vmem:[%s9324_s1 + $0xbc8] sm:$0xff]  }
 0x155   :  { %6844 = vmatprep.subr.bf16.mxu0 %v7444_v23  ;;  %6865 = vmatpush3.bf16.msra.mxu1 %v7443_v22  ;;  %v7482_v22 = vld [vmem:[%s9324_s1 + $0xb08] sm:$0xff]   ;;  %v7484_v23 = vld [vmem:[%s9324_s1 + $0xb40] sm:$0xff]  }
 0x156   :  { %6866 = vmatprep.subr.bf16.mxu1 %v7445_v24  ;;  %v7483_v24 = vld [vmem:[%s9324_s1 + $0xb88] sm:$0xff]  }
 0x158   :  { %6845 = vmatpush3.bf16.msra.mxu0 %v7446_v25  ;;  %v7485_v25 = vld [vmem:[%s9324_s1 + $0xbc0] sm:$0xff]  }
 0x159   :  { %6846 = vmatprep.subr.bf16.mxu0 %v7448_v27  ;;  %6867 = vmatpush3.bf16.msra.mxu1 %v7447_v26  ;;  %v7486_v26 = vld [vmem:[%s9324_s1 + $0xb00] sm:$0xff]   ;;  %v1337_v27 = vrot.slane %v8798_v43, %v7734_v35 }
 0x15a   :  { %6868 = vmatprep.subr.bf16.mxu1 %v7449_v28  ;;  %v7489_v28 = vld [vmem:[%s9324_s1 + $0xc78] sm:$0xff]  }
 0x15c   :  { %6847 = vmatpush3.bf16.msra.mxu0 %v7450_v29  ;;  %v7487_v29 = vld [vmem:[%s9324_s1 + $0xb80] sm:$0xff]  }
 0x15d   :  { %6848 = vmatprep.subr.bf16.mxu0 %v7452_v31  ;;  %6869 = vmatpush3.bf16.msra.mxu1 %v7451_v30  ;;  %v7490_v30 = vld [vmem:[%s9324_s1 + $0xcf8] sm:$0xff]  }
 0x15e   :  { %6870 = vmatprep.subr.bf16.mxu1 %v7453_v32  ;;  %v7491_v31 = vld [vmem:[%s9324_s1 + $0xc38] sm:$0xff]  }
 0x160   :  { %6849 = vmatpush3.bf16.msra.mxu0 %v7454_v33  ;;  %v1353_v33 = vcombine.high %v1337_v27, %v1337_v27 }
 0x161   :  { %6878 = vmatprep.subr.bf16.mxu0 %v7456_v37  ;;  %6871 = vmatpush3.bf16.msra.mxu1 %v7455_v39  ;;  %v7494_v39 = vld [vmem:[%s9324_s1 + $0xcf0] sm:$0xff]  }
 0x162   :  { %6900 = vmatprep.subr.bf16.mxu1 %v7457_v42 }
 0x163   :  { %v6586_v47 = vpop.f32.mrf.mxu0  ;;  %5423 = vmatmul.mubr.bf16.vlgmr.msra.gmra.mxu0 %v1330_v41  ;;  %v7495_v41 = vld [vmem:[%s9324_s1 + $0xc30] sm:$0xff]  }
 0x164   :  { %v6608_v53 = vpop.f32.mrf.mxu1  ;;  %6879 = vmatpush3.bf16.msra.mxu0 %v7458_v45  ;;  %5463 = vmatmul.mubr.bf16.vlgmr.msra.gmra.mxu1 %v1352_v48 }
 0x165   :  { %v6587_v54 = vpop.f32.mrf.mxu0  ;;  %6880 = vmatprep.subr.bf16.mxu0 %v7460_v49  ;;  %6901 = vmatpush3.bf16.msra.mxu1 %v7459_v51 }
 0x166   :  { %v6588_v56 = vadd.f32 %v6587_v54, %v6586_v47  ;;  %v6609_v59 = vpop.f32.mrf.mxu1  ;;  %5502 = vmatprep.mubr.bf16.mxu0 %v1351_v52  ;;  %6902 = vmatprep.subr.bf16.mxu1 %v7461_v55  ;;  %v7496_v47 = vld [vmem:[%s9324_s1 + $0xcb0] sm:$0xff]   ;;  %v7499_v52 = vld [vmem:[%s9324_s1 + $0xc28] sm:$0xff]   ;;  %v7501_v54 = vld [vmem:[%s9324_s1 + $0xc60] sm:$0xff]  }
 0x167   :  { %v6589_v60 = vpop.f32.mrf.mxu0  ;;  %v6610_v63 = vadd.f32 %v6609_v59, %v6608_v53  ;;  %5542 = vmatprep.mubr.bf16.mxu1 %v1355_v58  ;;  %v7500_v55 = vld [vmem:[%s9324_s1 + $0xca8] sm:$0xff]   ;;  %v7505_v58 = vld [vmem:[%s9324_s1 + $0xc58] sm:$0xff]   ;;  %v7504_v59 = vld [vmem:[%s9324_s1 + $0xca0] sm:$0xff]  }
 0x168   :  { %v4945_v62 = vadd.f32 %v6588_v56, %v8724_v13  ;;  %v6611_v1 = vpop.f32.mrf.mxu1  ;;  %6881 = vmatpush3.bf16.msra.mxu0 %v7462_v57  ;;  %v7473_v13 = vld [vmem:[%s9324_s1 + $0xbd8] sm:$0xff]   ;;  %v7502_v56 = vld [vmem:[%s9324_s1 + $0xce0] sm:$0xff]  }
 0x169   :  { %v6590_v2 = vpop.f32.mrf.mxu0  ;;  %6882 = vmatprep.subr.bf16.mxu0 %v7464_v61  ;;  %6903 = vmatpush3.bf16.msra.mxu1 %v7463_v0  ;;  %v7503_v57 = vld [vmem:[%s9324_s1 + $0xc20] sm:$0xff]   ;;  %v7506_v60 = vld [vmem:[%s9324_s1 + $0xcd8] sm:$0xff]   ;;  %v7510_v0 = vld [vmem:[%s9324_s1 + $0xcd0] sm:$0xff]  }
 0x16a   :  { %v8829_v4 = vadd.f32 %v6610_v63, %v4945_v62  ;;  %v6612_v6 = vpop.f32.mrf.mxu1  ;;  %6904 = vmatprep.subr.bf16.mxu1 %v7465_v3  ;;  %v7507_v61 = vld [vmem:[%s9324_s1 + $0xc18] sm:$0xff]   ;;  %v7509_v62 = vld [vmem:[%s9324_s1 + $0xc50] sm:$0xff]   ;;  %v7513_v2 = vld [vmem:[%s9324_s1 + $0xc48] sm:$0xff]  }
 0x16b   :  { %v7508_v63 = vld [vmem:[%s9324_s1 + $0xc98] sm:$0xff]   ;;  %v7511_v1 = vld [vmem:[%s9324_s1 + $0xc10] sm:$0xff]   ;;  %v7517_v6 = vld [vmem:[%s9324_s1 + $0xc40] sm:$0xff]  }
 0x16c   :  { %6883 = vmatpush3.bf16.msra.mxu0 %v7466_v5  ;;  %v7512_v3 = vld [vmem:[%s9324_s1 + $0xc90] sm:$0xff]   ;;  %v7515_v5 = vld [vmem:[%s9324_s1 + $0xc08] sm:$0xff]  }
 0x16d   :  { %6884 = vmatprep.subr.bf16.mxu0 %v7468_v7  ;;  %6905 = vmatpush3.bf16.msra.mxu1 %v7467_v8  ;;  %v7516_v7 = vld [vmem:[%s9324_s1 + $0xc88] sm:$0xff]   ;;  %v7518_v8 = vld [vmem:[%s9324_s1 + $0xcc0] sm:$0xff]  }
 0x16e   :  { %6906 = vmatprep.subr.bf16.mxu1 %v7469_v9  ;;  %v21_v9 = vld [vmem:[%s9325_s0 + $0x30] sm:$0xff] }
 0x170   :  { %6885 = vmatpush3.bf16.msra.mxu0 %v7470_v10  ;;  %v7519_v10 = vld [vmem:[%s9324_s1 + $0xc00] sm:$0xff]  }
 0x171   :  { %6886 = vmatprep.subr.bf16.mxu0 %v7472_v11  ;;  %6907 = vmatpush3.bf16.msra.mxu1 %v7471_v12  ;;  %v1363_v11 = vrot.slane %v21_v9, %v7734_v35  ;;  %v1356_v12 = vcombine.high %v21_v9, %v21_v9  ;;  %v7558_v9 = vld [vmem:[%s9324_s1 + $0xe70] sm:$0xff]  }
 0x172   :  { %6908 = vmatprep.subr.bf16.mxu1 %v7473_v13  ;;  %v7521_v13 = vld [vmem:[%s9324_s1 + $0xd78] sm:$0xff]  }
 0x174   :  { %6887 = vmatpush3.bf16.msra.mxu0 %v7474_v14  ;;  %v7520_v14 = vld [vmem:[%s9324_s1 + $0xc80] sm:$0xff]  }
 0x175   :  { %6888 = vmatprep.subr.bf16.mxu0 %v7476_v15  ;;  %6909 = vmatpush3.bf16.msra.mxu1 %v7475_v16  ;;  %v1371_v15 = vcombine.high %v1363_v11, %v1363_v11  ;;  %v1379_v16 = vrot.slane %v1363_v11, %v7734_v35  ;;  %v7557_v11 = vld [vmem:[%s9324_s1 + $0xeb8] sm:$0xff]  }
 0x176   :  { %6910 = vmatprep.subr.bf16.mxu1 %v7477_v17  ;;  %v9007_v17 = vrot.slane %v1356_v12, %v7734_v35  ;;  %v7559_v12 = vld [vmem:[%s9324_s1 + $0xef0] sm:$0xff]  }
 0x178   :  { %6889 = vmatpush3.bf16.msra.mxu0 %v7478_v18  ;;  %v7522_v18 = vld [vmem:[%s9324_s1 + $0xdf8] sm:$0xff]  }
 0x179   :  { %6890 = vmatprep.subr.bf16.mxu0 %v7480_v19  ;;  %6911 = vmatpush3.bf16.msra.mxu1 %v7479_v20  ;;  %v1393_v19 = vrot.slane %v1371_v15, %v7734_v35  ;;  %v7523_v20 = vld [vmem:[%s9324_s1 + $0xd38] sm:$0xff]   ;;  %v7560_v15 = vld [vmem:[%s9324_s1 + $0xe30] sm:$0xff]  }
 0x17a   :  { %6912 = vmatprep.subr.bf16.mxu1 %v7481_v21  ;;  %v1372_v21 = vcombine.high %v9007_v17, %v9007_v17 }
 0x17c   :  { %6891 = vmatpush3.bf16.msra.mxu0 %v7482_v22  ;;  %v1401_v22 = vcombine.high %v1379_v16, %v1379_v16 }
 0x17d   :  { %6892 = vmatprep.subr.bf16.mxu0 %v7484_v23  ;;  %6913 = vmatpush3.bf16.msra.mxu1 %v7483_v24  ;;  %v7525_v23 = vld [vmem:[%s9324_s1 + $0xd70] sm:$0xff]   ;;  %v1403_v24 = vcombine.high %v1393_v19, %v1393_v19 }
 0x17e   :  { %6914 = vmatprep.subr.bf16.mxu1 %v7485_v25 }
 0x180   :  { %6893 = vmatpush3.bf16.msra.mxu0 %v7486_v26  ;;  %v7524_v26 = vld [vmem:[%s9324_s1 + $0xdb8] sm:$0xff]  }
 0x181   :  { %6922 = vmatprep.subr.bf16.mxu0 %v7489_v28  ;;  %6915 = vmatpush3.bf16.msra.mxu1 %v7487_v29  ;;  %v7526_v28 = vld [vmem:[%s9324_s1 + $0xdf0] sm:$0xff]  }
 0x182   :  { %6944 = vmatprep.subr.bf16.mxu1 %v7490_v30 }
 0x183   :  { %v6630_v32 = vpop.f32.mrf.mxu0  ;;  %5503 = vmatmul.mubr.bf16.vlgmr.msra.gmra.mxu0 %v1337_v27  ;;  %v1400_v27 = vrot.slane %v1372_v21, %v7734_v35 }
 0x184   :  { %v6652_v37 = vpop.f32.mrf.mxu1  ;;  %6923 = vmatpush3.bf16.msra.mxu0 %v7491_v31  ;;  %5543 = vmatmul.mubr.bf16.vlgmr.msra.gmra.mxu1 %v1353_v33  ;;  %v7527_v31 = vld [vmem:[%s9324_s1 + $0xd30] sm:$0xff]  }
 0x185   :  { %v6631_v38 = vpop.f32.mrf.mxu0  ;;  %6924 = vmatprep.subr.bf16.mxu0 %v7493_v34  ;;  %6945 = vmatpush3.bf16.msra.mxu1 %v7492_v36  ;;  %v7529_v34 = vld [vmem:[%s9324_s1 + $0xd68] sm:$0xff]  }
 0x186   :  { %v6632_v40 = vadd.f32 %v6631_v38, %v6630_v32  ;;  %v6653_v42 = vpop.f32.mrf.mxu1  ;;  %6946 = vmatprep.subr.bf16.mxu1 %v7494_v39  ;;  %5582 = vmatprep.mubr.bf16.mxu0 %v1393_v19  ;;  %v1404_v32 = vcombine.high %v1400_v27, %v1400_v27  ;;  %v7528_v38 = vld [vmem:[%s9324_s1 + $0xdb0] sm:$0xff]  }
 0x187   :  { %v6633_v43 = vpop.f32.mrf.mxu0  ;;  %v6654_v46 = vadd.f32 %v6653_v42, %v6652_v37  ;;  %5622 = vmatprep.mubr.bf16.mxu1 %v1403_v24 }
 0x188   :  { %v5025_v45 = vadd.f32 %v6632_v40, %v8829_v4  ;;  %v6655_v48 = vpop.f32.mrf.mxu1  ;;  %6925 = vmatpush3.bf16.msra.mxu0 %v7495_v41  ;;  %v7514_v4 = vld [vmem:[%s9324_s1 + $0xcc8] sm:$0xff]  }
 0x189   :  { %v6634_v49 = vpop.f32.mrf.mxu0  ;;  %6926 = vmatprep.subr.bf16.mxu0 %v7497_v44  ;;  %6947 = vmatpush3.bf16.msra.mxu1 %v7496_v47  ;;  %v7530_v41 = vld [vmem:[%s9324_s1 + $0xde8] sm:$0xff]  }
 0x18a   :  { %v8930_v51 = vadd.f32 %v6654_v46, %v5025_v45  ;;  %v6656_v53 = vpop.f32.mrf.mxu1  ;;  %6948 = vmatprep.subr.bf16.mxu1 %v7498_v50  ;;  %v7531_v44 = vld [vmem:[%s9324_s1 + $0xd28] sm:$0xff]   ;;  %v7533_v46 = vld [vmem:[%s9324_s1 + $0xd60] sm:$0xff]  }
 0x18b   :  { %v7532_v48 = vld [vmem:[%s9324_s1 + $0xda8] sm:$0xff]   ;;  %v7534_v49 = vld [vmem:[%s9324_s1 + $0xde0] sm:$0xff]   ;;  %v7538_v53 = vld [vmem:[%s9324_s1 + $0xdd8] sm:$0xff]  }
 0x18c   :  { %6927 = vmatpush3.bf16.msra.mxu0 %v7499_v52  ;;  %v7535_v50 = vld [vmem:[%s9324_s1 + $0xd20] sm:$0xff]  }
 0x18d   :  { %6928 = vmatprep.subr.bf16.mxu0 %v7501_v54  ;;  %6949 = vmatpush3.bf16.msra.mxu1 %v7500_v55  ;;  %v7536_v52 = vld [vmem:[%s9324_s1 + $0xda0] sm:$0xff]   ;;  %v7539_v54 = vld [vmem:[%s9324_s1 + $0xd18] sm:$0xff]   ;;  %v7541_v55 = vld [vmem:[%s9324_s1 + $0xd50] sm:$0xff]  }
 0x18e   :  { %6950 = vmatprep.subr.bf16.mxu1 %v7502_v56  ;;  %v7540_v56 = vld [vmem:[%s9324_s1 + $0xd98] sm:$0xff]  }
 0x190   :  { %6929 = vmatpush3.bf16.msra.mxu0 %v7503_v57  ;;  %v7542_v57 = vld [vmem:[%s9324_s1 + $0xdd0] sm:$0xff]  }
 0x191   :  { %6930 = vmatprep.subr.bf16.mxu0 %v7505_v58  ;;  %6951 = vmatpush3.bf16.msra.mxu1 %v7504_v59  ;;  %v7543_v58 = vld [vmem:[%s9324_s1 + $0xd10] sm:$0xff]   ;;  %v7545_v59 = vld [vmem:[%s9324_s1 + $0xd48] sm:$0xff]  }
 0x192   :  { %6952 = vmatprep.subr.bf16.mxu1 %v7506_v60  ;;  %v7544_v60 = vld [vmem:[%s9324_s1 + $0xd90] sm:$0xff]  }
 0x194   :  { %6931 = vmatpush3.bf16.msra.mxu0 %v7507_v61  ;;  %v7546_v61 = vld [vmem:[%s9324_s1 + $0xdc8] sm:$0xff]  }
 0x195   :  { %6932 = vmatprep.subr.bf16.mxu0 %v7509_v62  ;;  %6953 = vmatpush3.bf16.msra.mxu1 %v7508_v63  ;;  %v7547_v62 = vld [vmem:[%s9324_s1 + $0xd08] sm:$0xff]   ;;  %v7549_v63 = vld [vmem:[%s9324_s1 + $0xd40] sm:$0xff]  }
 0x196   :  { %6954 = vmatprep.subr.bf16.mxu1 %v7510_v0  ;;  %v7548_v0 = vld [vmem:[%s9324_s1 + $0xd88] sm:$0xff]  }
 0x198   :  { %6933 = vmatpush3.bf16.msra.mxu0 %v7511_v1  ;;  %v7550_v1 = vld [vmem:[%s9324_s1 + $0xdc0] sm:$0xff]  }
 0x199   :  { %6934 = vmatprep.subr.bf16.mxu0 %v7513_v2  ;;  %6955 = vmatpush3.bf16.msra.mxu1 %v7512_v3  ;;  %v7551_v2 = vld [vmem:[%s9324_s1 + $0xd00] sm:$0xff]   ;;  %v1386_v3 = vrot.slane %v9007_v17, %v7734_v35  ;;  %v7562_v17 = vld [vmem:[%s9324_s1 + $0xe68] sm:$0xff]  }
 0x19a   :  { %6956 = vmatprep.subr.bf16.mxu1 %v7514_v4  ;;  %v7554_v4 = vld [vmem:[%s9324_s1 + $0xe78] sm:$0xff]  }
 0x19c   :  { %6935 = vmatpush3.bf16.msra.mxu0 %v7515_v5  ;;  %v7552_v5 = vld [vmem:[%s9324_s1 + $0xd80] sm:$0xff]  }
 0x19d   :  { %6936 = vmatprep.subr.bf16.mxu0 %v7517_v6  ;;  %6957 = vmatpush3.bf16.msra.mxu1 %v7516_v7  ;;  %v7555_v6 = vld [vmem:[%s9324_s1 + $0xef8] sm:$0xff]  }
 0x19e   :  { %6958 = vmatprep.subr.bf16.mxu1 %v7518_v8  ;;  %v7556_v7 = vld [vmem:[%s9324_s1 + $0xe38] sm:$0xff]   ;;  %v1402_v8 = vcombine.high %v1386_v3, %v1386_v3 }
 0x1a0   :  { %6937 = vmatpush3.bf16.msra.mxu0 %v7519_v10 }
 0x1a1   :  { %6966 = vmatprep.subr.bf16.mxu0 %v7521_v13  ;;  %6959 = vmatpush3.bf16.msra.mxu1 %v7520_v14 }
 0x1a2   :  { %6988 = vmatprep.subr.bf16.mxu1 %v7522_v18 }
 0x1a3   :  { %v6674_v25 = vpop.f32.mrf.mxu0  ;;  %5583 = vmatmul.mubr.bf16.vlgmr.msra.gmra.mxu0 %v1379_v16 }
 0x1a4   :  { %v6696_v29 = vpop.f32.mrf.mxu1  ;;  %6967 = vmatpush3.bf16.msra.mxu0 %v7523_v20  ;;  %5623 = vmatmul.mubr.bf16.vlgmr.msra.gmra.mxu1 %v1401_v22  ;;  %v7561_v20 = vld [vmem:[%s9324_s1 + $0xeb0] sm:$0xff]  }
 0x1a5   :  { %v6675_v30 = vpop.f32.mrf.mxu0  ;;  %6968 = vmatprep.subr.bf16.mxu0 %v7525_v23  ;;  %6989 = vmatpush3.bf16.msra.mxu1 %v7524_v26  ;;  %v7563_v23 = vld [vmem:[%s9324_s1 + $0xee8] sm:$0xff]  }
 0x1a6   :  { %v6676_v33 = vadd.f32 %v6675_v30, %v6674_v25  ;;  %v6697_v36 = vpop.f32.mrf.mxu1  ;;  %5662 = vmatprep.mubr.bf16.mxu0 %v1400_v27  ;;  %6990 = vmatprep.subr.bf16.mxu1 %v7526_v28  ;;  %v7564_v26 = vld [vmem:[%s9324_s1 + $0xe28] sm:$0xff]   ;;  %v7566_v28 = vld [vmem:[%s9324_s1 + $0xe60] sm:$0xff]  }
 0x1a7   :  { %v6677_v37 = vpop.f32.mrf.mxu0  ;;  %v6698_v40 = vadd.f32 %v6697_v36, %v6696_v29  ;;  %5702 = vmatprep.mubr.bf16.mxu1 %v1404_v32  ;;  %v7565_v30 = vld [vmem:[%s9324_s1 + $0xea8] sm:$0xff]   ;;  %v7568_v32 = vld [vmem:[%s9324_s1 + $0xe20] sm:$0xff]   ;;  %v7571_v36 = vld [vmem:[%s9324_s1 + $0xed8] sm:$0xff]  }
 0x1a8   :  { %v5105_v39 = vadd.f32 %v6676_v33, %v8930_v51  ;;  %v6699_v42 = vpop.f32.mrf.mxu1  ;;  %6969 = vmatpush3.bf16.msra.mxu0 %v7527_v31  ;;  %v7537_v51 = vld [vmem:[%s9324_s1 + $0xd58] sm:$0xff]   ;;  %v7567_v31 = vld [vmem:[%s9324_s1 + $0xee0] sm:$0xff]  }
 0x1a9   :  { %v6678_v43 = vpop.f32.mrf.mxu0  ;;  %6970 = vmatprep.subr.bf16.mxu0 %v7529_v34  ;;  %6991 = vmatpush3.bf16.msra.mxu1 %v7528_v38  ;;  %v7570_v33 = vld [vmem:[%s9324_s1 + $0xe58] sm:$0xff]   ;;  %v7569_v34 = vld [vmem:[%s9324_s1 + $0xea0] sm:$0xff]   ;;  %v7574_v38 = vld [vmem:[%s9324_s1 + $0xe50] sm:$0xff]  }
 0x1aa   :  { %v9044_v45 = vadd.f32 %v6698_v40, %v5105_v39  ;;  %v6700_v47 = vpop.f32.mrf.mxu1  ;;  %6992 = vmatprep.subr.bf16.mxu1 %v7530_v41  ;;  %v7572_v37 = vld [vmem:[%s9324_s1 + $0xe18] sm:$0xff]   ;;  %v7575_v40 = vld [vmem:[%s9324_s1 + $0xed0] sm:$0xff]   ;;  %v7578_v42 = vld [vmem:[%s9324_s1 + $0xe48] sm:$0xff]  }
 0x1ab   :  { %v7573_v39 = vld [vmem:[%s9324_s1 + $0xe98] sm:$0xff]   ;;  %v7576_v41 = vld [vmem:[%s9324_s1 + $0xe10] sm:$0xff]   ;;  %v7581_v47 = vld [vmem:[%s9324_s1 + $0xe88] sm:$0xff]  }
 0x1ac   :  { %6971 = vmatpush3.bf16.msra.mxu0 %v7531_v44  ;;  %v7577_v43 = vld [vmem:[%s9324_s1 + $0xe90] sm:$0xff]   ;;  %v7579_v44 = vld [vmem:[%s9324_s1 + $0xec8] sm:$0xff]  }
 0x1ad   :  { %6972 = vmatprep.subr.bf16.mxu0 %v7533_v46  ;;  %6993 = vmatpush3.bf16.msra.mxu1 %v7532_v48  ;;  %v7582_v46 = vld [vmem:[%s9324_s1 + $0xe40] sm:$0xff]  }
 0x1ae   :  { %6994 = vmatprep.subr.bf16.mxu1 %v7534_v49  ;;  %v7583_v48 = vld [vmem:[%s9324_s1 + $0xec0] sm:$0xff]   ;;  %v22_v49 = vld [vmem:[%s9325_s0 + $0x38] sm:$0xff] }
 0x1b0   :  { %6973 = vmatpush3.bf16.msra.mxu0 %v7535_v50  ;;  %v7584_v50 = vld [vmem:[%s9324_s1 + $0xe00] sm:$0xff]  }
 0x1b1   :  { %6974 = vmatprep.subr.bf16.mxu0 %v7537_v51  ;;  %6995 = vmatpush3.bf16.msra.mxu1 %v7536_v52  ;;  %v1412_v51 = vrot.slane %v22_v49, %v7734_v35  ;;  %v1405_v52 = vcombine.high %v22_v49, %v22_v49 }
 0x1b2   :  { %6996 = vmatprep.subr.bf16.mxu1 %v7538_v53  ;;  %v7586_v53 = vld [vmem:[%s9324_s1 + $0xf78] sm:$0xff]  }
 0x1b4   :  { %6975 = vmatpush3.bf16.msra.mxu0 %v7539_v54  ;;  %v7585_v54 = vld [vmem:[%s9324_s1 + $0xe80] sm:$0xff]  }
 0x1b5   :  { %6976 = vmatprep.subr.bf16.mxu0 %v7541_v55  ;;  %6997 = vmatpush3.bf16.msra.mxu1 %v7540_v56  ;;  %v1420_v55 = vcombine.high %v1412_v51, %v1412_v51  ;;  %v1428_v56 = vrot.slane %v1412_v51, %v7734_v35 }
 0x1b6   :  { %6998 = vmatprep.subr.bf16.mxu1 %v7542_v57  ;;  %v9219_v57 = vrot.slane %v1405_v52, %v7734_v35 }
 0x1b8   :  { %6977 = vmatpush3.bf16.msra.mxu0 %v7543_v58  ;;  %v7587_v58 = vld [vmem:[%s9324_s1 + $0xff8] sm:$0xff]  }
 0x1b9   :  { %6978 = vmatprep.subr.bf16.mxu0 %v7545_v59  ;;  %6999 = vmatpush3.bf16.msra.mxu1 %v7544_v60  ;;  %v1442_v59 = vrot.slane %v1420_v55, %v7734_v35  ;;  %v7588_v60 = vld [vmem:[%s9324_s1 + $0xf38] sm:$0xff]  }
 0x1ba   :  { %7000 = vmatprep.subr.bf16.mxu1 %v7546_v61  ;;  %v1421_v61 = vcombine.high %v9219_v57, %v9219_v57 }
 0x1bc   :  { %6979 = vmatpush3.bf16.msra.mxu0 %v7547_v62  ;;  %v1450_v62 = vcombine.high %v1428_v56, %v1428_v56 }
 0x1bd   :  { %6980 = vmatprep.subr.bf16.mxu0 %v7549_v63  ;;  %7001 = vmatpush3.bf16.msra.mxu1 %v7548_v0  ;;  %v7590_v63 = vld [vmem:[%s9324_s1 + $0xf70] sm:$0xff]   ;;  %v1452_v0 = vcombine.high %v1442_v59, %v1442_v59 }
 0x1be   :  { %7002 = vmatprep.subr.bf16.mxu1 %v7550_v1 }
 0x1c0   :  { %6981 = vmatpush3.bf16.msra.mxu0 %v7551_v2  ;;  %v7589_v2 = vld [vmem:[%s9324_s1 + $0xfb8] sm:$0xff]  }
 0x1c1   :  { %7010 = vmatprep.subr.bf16.mxu0 %v7554_v4  ;;  %7003 = vmatpush3.bf16.msra.mxu1 %v7552_v5  ;;  %v7591_v4 = vld [vmem:[%s9324_s1 + $0xff0] sm:$0xff]  }
 0x1c2   :  { %7032 = vmatprep.subr.bf16.mxu1 %v7555_v6 }
 0x1c3   :  { %v6718_v10 = vpop.f32.mrf.mxu0  ;;  %5663 = vmatmul.mubr.bf16.vlgmr.msra.gmra.mxu0 %v1386_v3  ;;  %v1449_v3 = vrot.slane %v1421_v61, %v7734_v35 }
 0x1c4   :  { %v6740_v13 = vpop.f32.mrf.mxu1  ;;  %7011 = vmatpush3.bf16.msra.mxu0 %v7556_v7  ;;  %5703 = vmatmul.mubr.bf16.vlgmr.msra.gmra.mxu1 %v1402_v8  ;;  %v7592_v7 = vld [vmem:[%s9324_s1 + $0xf30] sm:$0xff]  }
 0x1c5   :  { %v6719_v14 = vpop.f32.mrf.mxu0  ;;  %7012 = vmatprep.subr.bf16.mxu0 %v7558_v9  ;;  %7033 = vmatpush3.bf16.msra.mxu1 %v7557_v11  ;;  %v1453_v8 = vcombine.high %v1449_v3, %v1449_v3 }
 0x1c6   :  { %v6720_v16 = vadd.f32 %v6719_v14, %v6718_v10  ;;  %v6741_v18 = vpop.f32.mrf.mxu1  ;;  %7034 = vmatprep.subr.bf16.mxu1 %v7559_v12  ;;  %5742 = vmatprep.mubr.bf16.mxu0 %v1442_v59  ;;  %v7594_v10 = vld [vmem:[%s9324_s1 + $0xf68] sm:$0xff]  }
 0x1c7   :  { %v6721_v19 = vpop.f32.mrf.mxu0  ;;  %v6742_v22 = vadd.f32 %v6741_v18, %v6740_v13  ;;  %5782 = vmatprep.mubr.bf16.mxu1 %v1452_v0  ;;  %v7593_v13 = vld [vmem:[%s9324_s1 + $0xfb0] sm:$0xff]  }
 0x1c8   :  { %v5185_v21 = vadd.f32 %v6720_v16, %v9044_v45  ;;  %v6743_v24 = vpop.f32.mrf.mxu1  ;;  %7013 = vmatpush3.bf16.msra.mxu0 %v7560_v15  ;;  %v7580_v45 = vld [vmem:[%s9324_s1 + $0xe08] sm:$0xff]  }
 0x1c9   :  { %v6722_v25 = vpop.f32.mrf.mxu0  ;;  %7014 = vmatprep.subr.bf16.mxu0 %v7562_v17  ;;  %7035 = vmatpush3.bf16.msra.mxu1 %v7561_v20  ;;  %v7595_v16 = vld [vmem:[%s9324_s1 + $0xfe8] sm:$0xff]   ;;  %v7599_v24 = vld [vmem:[%s9324_s1 + $0xfe0] sm:$0xff]  }
 0x1ca   :  { %v9145_v27 = vadd.f32 %v6742_v22, %v5185_v21  ;;  %v6744_v29 = vpop.f32.mrf.mxu1  ;;  %7036 = vmatprep.subr.bf16.mxu1 %v7563_v23  ;;  %v7596_v19 = vld [vmem:[%s9324_s1 + $0xf28] sm:$0xff]   ;;  %v7598_v21 = vld [vmem:[%s9324_s1 + $0xf60] sm:$0xff]  }
 0x1cb   :  { %v7597_v23 = vld [vmem:[%s9324_s1 + $0xfa8] sm:$0xff]   ;;  %v7600_v25 = vld [vmem:[%s9324_s1 + $0xf20] sm:$0xff]   ;;  %v7604_v29 = vld [vmem:[%s9324_s1 + $0xf18] sm:$0xff]  }
 0x1cc   :  { %7015 = vmatpush3.bf16.msra.mxu0 %v7564_v26  ;;  %v7602_v26 = vld [vmem:[%s9324_s1 + $0xf58] sm:$0xff]  }
 0x1cd   :  { %7016 = vmatprep.subr.bf16.mxu0 %v7566_v28  ;;  %7037 = vmatpush3.bf16.msra.mxu1 %v7565_v30  ;;  %v7603_v28 = vld [vmem:[%s9324_s1 + $0xfd8] sm:$0xff]   ;;  %v7606_v30 = vld [vmem:[%s9324_s1 + $0xf50] sm:$0xff]  }
 0x1ce   :  { %7038 = vmatprep.subr.bf16.mxu1 %v7567_v31  ;;  %v7605_v31 = vld [vmem:[%s9324_s1 + $0xf98] sm:$0xff]  }
 0x1d0   :  { %7017 = vmatpush3.bf16.msra.mxu0 %v7568_v32  ;;  %v7607_v32 = vld [vmem:[%s9324_s1 + $0xfd0] sm:$0xff]  }
 0x1d1   :  { %7018 = vmatprep.subr.bf16.mxu0 %v7570_v33  ;;  %7039 = vmatpush3.bf16.msra.mxu1 %v7569_v34  ;;  %v7608_v33 = vld [vmem:[%s9324_s1 + $0xf10] sm:$0xff]   ;;  %v7610_v34 = vld [vmem:[%s9324_s1 + $0xf48] sm:$0xff]  }
 0x1d2   :  { %7040 = vmatprep.subr.bf16.mxu1 %v7571_v36  ;;  %v7609_v36 = vld [vmem:[%s9324_s1 + $0xf90] sm:$0xff]  }
 0x1d4   :  { %7019 = vmatpush3.bf16.msra.mxu0 %v7572_v37  ;;  %v7611_v37 = vld [vmem:[%s9324_s1 + $0xfc8] sm:$0xff]  }
 0x1d5   :  { %7020 = vmatprep.subr.bf16.mxu0 %v7574_v38  ;;  %7041 = vmatpush3.bf16.msra.mxu1 %v7573_v39  ;;  %v7612_v38 = vld [vmem:[%s9324_s1 + $0xf08] sm:$0xff]   ;;  %v7614_v39 = vld [vmem:[%s9324_s1 + $0xf40] sm:$0xff]  }
 0x1d6   :  { %7042 = vmatprep.subr.bf16.mxu1 %v7575_v40  ;;  %v7613_v40 = vld [vmem:[%s9324_s1 + $0xf88] sm:$0xff]  }
 0x1d8   :  { %7021 = vmatpush3.bf16.msra.mxu0 %v7576_v41  ;;  %v7615_v41 = vld [vmem:[%s9324_s1 + $0xfc0] sm:$0xff]  }
 0x1d9   :  { %7022 = vmatprep.subr.bf16.mxu0 %v7578_v42  ;;  %7043 = vmatpush3.bf16.msra.mxu1 %v7577_v43  ;;  %v7616_v42 = vld [vmem:[%s9324_s1 + $0xf00] sm:$0xff]   ;;  %v1435_v43 = vrot.slane %v9219_v57, %v7734_v35 }
 0x1da   :  { %7044 = vmatprep.subr.bf16.mxu1 %v7579_v44  ;;  %v7617_v44 = vld [vmem:[%s9324_s1 + $0xf80] sm:$0xff]  }
 0x1dc   :  { %7023 = vmatpush3.bf16.msra.mxu0 %v7580_v45  ;;  %v1451_v45 = vcombine.high %v1435_v43, %v1435_v43 }
 0x1dd   :  { %7024 = vmatprep.subr.bf16.mxu0 %v7582_v46  ;;  %7045 = vmatpush3.bf16.msra.mxu1 %v7581_v47 }
 0x1de   :  { %7046 = vmatprep.subr.bf16.mxu1 %v7583_v48 }
 0x1e0   :  { %7025 = vmatpush3.bf16.msra.mxu0 %v7584_v50 }
 0x1e1   :  { %7054 = vmatprep.subr.bf16.mxu0 %v7586_v53  ;;  %7047 = vmatpush3.bf16.msra.mxu1 %v7585_v54 }
 0x1e2   :  { %7076 = vmatprep.subr.bf16.mxu1 %v7587_v58 }
 0x1e3   :  { %v6762_v1 = vpop.f32.mrf.mxu0  ;;  %5743 = vmatmul.mubr.bf16.vlgmr.msra.gmra.mxu0 %v1428_v56 }
 0x1e4   :  { %v6784_v5 = vpop.f32.mrf.mxu1  ;;  %7055 = vmatpush3.bf16.msra.mxu0 %v7588_v60  ;;  %5783 = vmatmul.mubr.bf16.vlgmr.msra.gmra.mxu1 %v1450_v62 }
 0x1e5   :  { %v6763_v6 = vpop.f32.mrf.mxu0  ;;  %7056 = vmatprep.subr.bf16.mxu0 %v7590_v63  ;;  %7077 = vmatpush3.bf16.msra.mxu1 %v7589_v2 }
 0x1e6   :  { %v6764_v9 = vadd.f32 %v6763_v6, %v6762_v1  ;;  %v6785_v11 = vpop.f32.mrf.mxu1  ;;  %5822 = vmatprep.mubr.bf16.mxu0 %v1449_v3  ;;  %7078 = vmatprep.subr.bf16.mxu1 %v7591_v4 }
 0x1e7   :  { %v6765_v12 = vpop.f32.mrf.mxu0  ;;  %v6786_v15 = vadd.f32 %v6785_v11, %v6784_v5  ;;  %5862 = vmatprep.mubr.bf16.mxu1 %v1453_v8 }
 0x1e8   :  { %v5265_v14 = vadd.f32 %v6764_v9, %v9145_v27  ;;  %v6787_v17 = vpop.f32.mrf.mxu1  ;;  %7057 = vmatpush3.bf16.msra.mxu0 %v7592_v7  ;;  %v7601_v27 = vld [vmem:[%s9324_s1 + $0xfa0] sm:$0xff]  }
 0x1e9   :  { %v6766_v18 = vpop.f32.mrf.mxu0  ;;  %7058 = vmatprep.subr.bf16.mxu0 %v7594_v10  ;;  %7079 = vmatpush3.bf16.msra.mxu1 %v7593_v13 }
 0x1ea   :  { %v5305_v20 = vadd.f32 %v6786_v15, %v5265_v14  ;;  %v6788_v22 = vpop.f32.mrf.mxu1  ;;  %7080 = vmatprep.subr.bf16.mxu1 %v7595_v16 }
 0x1ec   :  { %7059 = vmatpush3.bf16.msra.mxu0 %v7596_v19 }
 0x1ed   :  { %7060 = vmatprep.subr.bf16.mxu0 %v7598_v21  ;;  %7081 = vmatpush3.bf16.msra.mxu1 %v7597_v23 }
 0x1ee   :  { %7082 = vmatprep.subr.bf16.mxu1 %v7599_v24 }
 0x1f0   :  { %7061 = vmatpush3.bf16.msra.mxu0 %v7600_v25 }
 0x1f1   :  { %7062 = vmatprep.subr.bf16.mxu0 %v7602_v26  ;;  %7083 = vmatpush3.bf16.msra.mxu1 %v7601_v27 }
 0x1f2   :  { %7084 = vmatprep.subr.bf16.mxu1 %v7603_v28 }
 0x1f4   :  { %7063 = vmatpush3.bf16.msra.mxu0 %v7604_v29 }
 0x1f5   :  { %7064 = vmatprep.subr.bf16.mxu0 %v7606_v30  ;;  %7085 = vmatpush3.bf16.msra.mxu1 %v7605_v31 }
 0x1f6   :  { %7086 = vmatprep.subr.bf16.mxu1 %v7607_v32 }
 0x1f8   :  { %7065 = vmatpush3.bf16.msra.mxu0 %v7608_v33 }
 0x1f9   :  { %7066 = vmatprep.subr.bf16.mxu0 %v7610_v34  ;;  %7087 = vmatpush3.bf16.msra.mxu1 %v7609_v36 }
 0x1fa   :  { %7088 = vmatprep.subr.bf16.mxu1 %v7611_v37 }
 0x1fc   :  { %7067 = vmatpush3.bf16.msra.mxu0 %v7612_v38 }
 0x1fd   :  { %7068 = vmatprep.subr.bf16.mxu0 %v7614_v39  ;;  %7089 = vmatpush3.bf16.msra.mxu1 %v7613_v40 }
 0x1fe   :  { %7090 = vmatprep.subr.bf16.mxu1 %v7615_v41 }
 0x200   :  { %7069 = vmatpush3.bf16.msra.mxu0 %v7616_v42 }
 0x201   :  { %7091 = vmatpush3.bf16.msra.mxu1 %v7617_v44 }
 0x203   :  { %v6806_v46 = vpop.f32.mrf.mxu0  ;;  %5823 = vmatmul.mubr.bf16.vlgmr.msra.gmra.mxu0 %v1435_v43 }
 0x204   :  { %v6828_v47 = vpop.f32.mrf.mxu1  ;;  %5863 = vmatmul.mubr.bf16.vlgmr.msra.gmra.mxu1 %v1451_v45 }
 0x205   :  { %v6807_v48 = vpop.f32.mrf.mxu0 }
 0x206   :  { %v6808_v49 = vadd.f32 %v6807_v48, %v6806_v46  ;;  %v6829_v50 = vpop.f32.mrf.mxu1 }
 0x207   :  { %v6809_v51 = vpop.f32.mrf.mxu0  ;;  %v6830_v53 = vadd.f32 %v6829_v50, %v6828_v47 }
 0x208   :  { %v5345_v52 = vadd.f32 %v6808_v49, %v5305_v20  ;;  %v6831_v35 = vpop.f32.mrf.mxu1 }
 0x209   :  { %v6810_v54 = vpop.f32.mrf.mxu0 }
 0x20a   :  { %v5385_v55 = vadd.f32 %v6830_v53, %v5345_v52  ;;  %v6832_v56 = vpop.f32.mrf.mxu1 }
 0x223   :  { %v6850_v57 = vpop.f32.mrf.mxu0 }
 0x224   :  { %v6872_v58 = vpop.f32.mrf.mxu1 }
 0x225   :  { %v6851_v59 = vpop.f32.mrf.mxu0 }
 0x226   :  { %v6852_v60 = vadd.f32 %v6851_v59, %v6850_v57  ;;  %v6873_v61 = vpop.f32.mrf.mxu1 }
 0x227   :  { %v6853_v62 = vpop.f32.mrf.mxu0  ;;  %v6874_v0 = vadd.f32 %v6873_v61, %v6872_v58 }
 0x228   :  { %v5425_v63 = vadd.f32 %v6852_v60, %v5385_v55  ;;  %v6875_v1 = vpop.f32.mrf.mxu1 }
 0x229   :  { %v6854_v2 = vpop.f32.mrf.mxu0 }
 0x22a   :  { %v5465_v3 = vadd.f32 %v6874_v0, %v5425_v63  ;;  %v6876_v4 = vpop.f32.mrf.mxu1 }
 0x243   :  { %v6894_v5 = vpop.f32.mrf.mxu0 }
 0x244   :  { %v6916_v6 = vpop.f32.mrf.mxu1 }
 0x245   :  { %v6895_v7 = vpop.f32.mrf.mxu0 }
 0x246   :  { %v6896_v8 = vadd.f32 %v6895_v7, %v6894_v5  ;;  %v6917_v9 = vpop.f32.mrf.mxu1 }
 0x247   :  { %v6897_v10 = vpop.f32.mrf.mxu0  ;;  %v6918_v12 = vadd.f32 %v6917_v9, %v6916_v6 }
 0x248   :  { %v5505_v11 = vadd.f32 %v6896_v8, %v5465_v3  ;;  %v6919_v13 = vpop.f32.mrf.mxu1 }
 0x249   :  { %v6898_v14 = vpop.f32.mrf.mxu0 }
 0x24a   :  { %v5545_v15 = vadd.f32 %v6918_v12, %v5505_v11  ;;  %v6920_v16 = vpop.f32.mrf.mxu1 }
 0x263   :  { %v6938_v17 = vpop.f32.mrf.mxu0 }
 0x264   :  { %v6960_v18 = vpop.f32.mrf.mxu1 }
 0x265   :  { %v6939_v19 = vpop.f32.mrf.mxu0 }
 0x266   :  { %v6940_v20 = vadd.f32 %v6939_v19, %v6938_v17  ;;  %v6961_v21 = vpop.f32.mrf.mxu1 }
 0x267   :  { %v6941_v22 = vpop.f32.mrf.mxu0  ;;  %v6962_v24 = vadd.f32 %v6961_v21, %v6960_v18 }
 0x268   :  { %v5585_v23 = vadd.f32 %v6940_v20, %v5545_v15  ;;  %v6963_v25 = vpop.f32.mrf.mxu1 }
 0x269   :  { %v6942_v26 = vpop.f32.mrf.mxu0 }
 0x26a   :  { %v5625_v27 = vadd.f32 %v6962_v24, %v5585_v23  ;;  %v6964_v28 = vpop.f32.mrf.mxu1 }
 0x283   :  { %v6982_v29 = vpop.f32.mrf.mxu0 }
 0x284   :  { %v7004_v30 = vpop.f32.mrf.mxu1 }
 0x285   :  { %v6983_v31 = vpop.f32.mrf.mxu0 }
 0x286   :  { %v7005_v32 = vpop.f32.mrf.mxu1  ;;  %v6984_v46 = vadd.f32 %v6983_v31, %v6982_v29 }
 0x287   :  { %v6985_v33 = vpop.f32.mrf.mxu0  ;;  %v7006_v48 = vadd.f32 %v7005_v32, %v7004_v30 }
 0x288   :  { %v7007_v34 = vpop.f32.mrf.mxu1  ;;  %v5665_v47 = vadd.f32 %v6984_v46, %v5625_v27 }
 0x289   :  { %v6986_v36 = vpop.f32.mrf.mxu0 }
 0x28a   :  { %v7008_v37 = vpop.f32.mrf.mxu1  ;;  %v5705_v50 = vadd.f32 %v7006_v48, %v5665_v47 }
 0x2a3   :  { %v7026_v38 = vpop.f32.mrf.mxu0 }
 0x2a4   :  { %v7048_v39 = vpop.f32.mrf.mxu1 }
 0x2a5   :  { %v7027_v40 = vpop.f32.mrf.mxu0 }
 0x2a6   :  { %v7049_v41 = vpop.f32.mrf.mxu1  ;;  %v7028_v49 = vadd.f32 %v7027_v40, %v7026_v38 }
 0x2a7   :  { %v7029_v42 = vpop.f32.mrf.mxu0  ;;  %v7050_v52 = vadd.f32 %v7049_v41, %v7048_v39 }
 0x2a8   :  { %v7051_v43 = vpop.f32.mrf.mxu1  ;;  %v5745_v51 = vadd.f32 %v7028_v49, %v5705_v50 }
 0x2a9   :  { %v7030_v44 = vpop.f32.mrf.mxu0 }
 0x2aa   :  { %v7052_v45 = vpop.f32.mrf.mxu1  ;;  %v5785_v55 = vadd.f32 %v7050_v52, %v5745_v51 }
 0x2c3   :  { %v7070_v53 = vpop.f32.mrf.mxu0 }
 0x2c4   :  { %v7092_v35 = vpop.f32.mrf.mxu1 }
 0x2c5   :  { %v7071_v54 = vpop.f32.mrf.mxu0 }
 0x2c6   :  { %v7072_v56 = vadd.f32 %v7071_v54, %v7070_v53  ;;  %v7093_v57 = vpop.f32.mrf.mxu1 }
 0x2c7   :  { %v7073_v58 = vpop.f32.mrf.mxu0  ;;  %v7094_v60 = vadd.f32 %v7093_v57, %v7092_v35 }
 0x2c8   :  { %v5825_v59 = vadd.f32 %v7072_v56, %v5785_v55  ;;  %v7095_v61 = vpop.f32.mrf.mxu1 }
 0x2c9   :  { %v7074_v62 = vpop.f32.mrf.mxu0 }
 0x2ca   :  { %v5865_v63 = vadd.f32 %v7094_v60, %v5825_v59  ;;  %v7096_v0 = vpop.f32.mrf.mxu1 }
 0x2cc   :  { %v5870_v1 = vsub.f32 0.0, %v5865_v63 }
 0x2ce   :  { %v5871_v2 = vmul.f32 1.442695, %v5870_v1 }
 0x2d0   :  { %7619 = vpow2.f32 %v5871_v2 }
 0x2dd   :  { %v7620_v3 = vpop.eup %7619 }
 0x2de   :  { %v5873_v4 = vadd.f32 1.0, %v7620_v3 }
 0x2e0   :  { %7621 = vrcp.f32 %v5873_v4 }
 0x2ed   :  { %v7622_v5 = vpop.eup %7621 }
 0x2ee   :  { %5876 = vst [vmem:[%s9327_s3] sm:$0x3] %v7622_v5 }

</bundles_post_ra>
